<compile_context>
chip_gen: v7x
topology: tpu7x:2x2x1
jax: 0.10.0
libtpu: 0.0.40
codegen_flags: <defaults>
</compile_context>

<pallas_src>
import math
from functools import partial

import jax
import jax.numpy as jnp
from jax import lax
from jax.experimental import pallas as pl
from jax.experimental.pallas import tpu as pltpu

LN_EPS = 1e-5


# ------------------------------ fused kernel ---------------------------------
def _make_kernel(H, W, C):
    WC = W * C                       # lane width of one conv-group plane (512)
    PADW = WC + 2 * C                # plane + one zero pixel-block on each side

    def kernel(x_ref, avg_ref, g_ref, bt_ref, mlp_w_ref, mlp_b_ref,
               wce_ref, wco_ref, cb_ref, o_ref, ps_ref):
        # ---- LayerNorm over each pixel's C channels (lane-dense layout).
        # Group-of-C statistics are computed with a block-diagonal averaging
        # matmul so everything stays lane-dense (no (N, C) <-> (H, W*C) relayout).
        x = x_ref[0]                                              # (H, W*C) f32
        mean = jnp.dot(x, avg_ref[...], preferred_element_type=jnp.float32)
        xc = x - mean
        var = jnp.dot(xc * xc, avg_ref[...], preferred_element_type=jnp.float32)
        u = xc * lax.rsqrt(var + LN_EPS) * g_ref[...] + bt_ref[...]

        # ---- fc1 / fc2 fused into a single block-diagonal matmul that directly
        # emits the (even | odd) conv-group planes, with the "+u" residuals
        # folded into the weights as identity one-hots.
        # (PyTorch swaps flattened rows 0 and B*N-1 of the input around fc2; fc2
        #  is row-wise, so swap . fc2 . swap == fc2 exactly.)
        eo = (jnp.dot(u, mlp_w_ref[...], preferred_element_type=jnp.float32)
              + mlp_b_ref[...])                                   # (H, 2*W*C)

        # ---- second LayerNorm: per sample over all 2C*H*W elements (eo is a
        # channel permutation + relayout of `cat`, so the stats are identical).
        m2 = jnp.mean(eo)
        v2 = jnp.mean((eo - m2) ** 2)
        eo = (eo - m2) * lax.rsqrt(v2 + LN_EPS)

        # ---- zero-padded stencil scratch, lanes: [0_C | even | 0_2C | odd | 0_C]
        # Only the thin borders are memset; the planes are stored lane-dense.
        ps_ref[0:1, :] = jnp.zeros((1, 2 * PADW), jnp.float32)
        ps_ref[H + 1:H + 2, :] = jnp.zeros((1, 2 * PADW), jnp.float32)
        ps_ref[1:H + 1, 0:C] = jnp.zeros((H, C), jnp.float32)
        ps_ref[1:H + 1, C + WC:3 * C + WC] = jnp.zeros((H, 2 * C), jnp.float32)
        ps_ref[1:H + 1, 3 * C + 2 * WC:4 * C + 2 * WC] = jnp.zeros((H, C), jnp.float32)
        ps_ref[1:H + 1, C:C + WC] = eo[:, :WC]                    # even plane
        ps_ref[1:H + 1, 3 * C + WC:3 * C + 2 * WC] = eo[:, WC:]   # odd plane

        # ---- grouped 3x3 conv: 9 shift-and-FMA taps per plane.  The zero
        # borders of the scratch provide the 'SAME' padding, so no masks/rolls.
        acc = jnp.zeros((H, WC), jnp.float32)
        for kh in range(3):                                       # dh = kh - 1
            for kw in range(3):                                   # dw = kw - 1
                k = kh * 3 + kw
                e_tap = ps_ref[kh:kh + H, kw * C:kw * C + WC]
                o_tap = ps_ref[kh:kh + H, PADW + kw * C:PADW + kw * C + WC]
                acc = acc + e_tap * wce_ref[k:k + 1, :] + o_tap * wco_ref[k:k + 1, :]

        # conv bias + residual u, then x = x + drop_path(x) (identity) -> 2x
        o_ref[0] = 2.0 * (acc + cb_ref[...] + u)

    return kernel


# ------------------- host-side (weight-sized) pre-interleaving ----------------
def _derived_params(params, H, W):
    """Builds the lane-dense / pre-interleaved constant operands.

    Channel mapping: cat = [a | y2] has 2C channels; grouped conv (groups = C)
    gives output channel g the input channels (2g, 2g+1):
        channel 2g   = a[2g]     (g <  C/2)   or  y2[2g - C]     (g >= C/2)
        channel 2g+1 = a[2g + 1] (g <  C/2)   or  y2[2g + 1 - C] (g >= C/2)
    so the "even" plane column g is fc1 row 2g (resp. fc2 row 2g - C), and the
    matching "+u" residual is that same channel index (added as a one-hot).
    In a real model these would be precomputed once from the checkpoint.
    """
    gamma, beta, w1, b1, w2, b2, conv_w, conv_b = params
    C = gamma.shape[0]
    WC = W * C
    eye_w = jnp.eye(W, dtype=jnp.float32)

    # LayerNorm(C) helpers in lane-dense layout.
    avg = jnp.kron(eye_w, jnp.full((C, C), 1.0 / C, jnp.float32))      # (WC, WC)
    gamma_t = jnp.tile(gamma.astype(jnp.float32), W)[None, :]          # (1, WC)
    beta_t = jnp.tile(beta.astype(jnp.float32), W)[None, :]

    # Pre-interleaved fc1/fc2 weights (+ residual fold), per pixel ...
    w_even = jnp.concatenate([w1[0::2, :], w2[0::2, :]], axis=0).T     # (C, C)
    w_odd = jnp.concatenate([w1[1::2, :], w2[1::2, :]], axis=0).T
    b_even = jnp.concatenate([b1[0::2], b2[0::2]])
    b_odd = jnp.concatenate([b1[1::2], b2[1::2]])
    r_even = jnp.tile(jnp.arange(0, C, 2), 2)                          # residual src channel
    r_odd = jnp.tile(jnp.arange(1, C, 2), 2)
    w_even = w_even + jax.nn.one_hot(r_even, C, dtype=jnp.float32).T
    w_odd = w_odd + jax.nn.one_hot(r_odd, C, dtype=jnp.float32).T
    # ... expanded to the block-diagonal lane-dense form.
    mlp_w = jnp.concatenate(
        [jnp.kron(eye_w, w_even), jnp.kron(eye_w, w_odd)], axis=1)     # (WC, 2*WC)
    mlp_b = jnp.concatenate([jnp.tile(b_even, W), jnp.tile(b_odd, W)])[None, :]

    # Grouped-conv tap weights as lane rows (tap k = kh*3 + kw).
    we = jnp.transpose(conv_w[:, 0], (1, 2, 0))                        # (3, 3, C)
    wo = jnp.transpose(conv_w[:, 1], (1, 2, 0))
    wce = jnp.tile(we, (1, 1, W)).reshape(9, WC)                       # (9, WC)
    wco = jnp.tile(wo, (1, 1, W)).reshape(9, WC)
    cb_row = jnp.tile(conv_b, W)[None, :]                              # (1, WC)
    return avg, gamma_t, beta_t, mlp_w, mlp_b, wce, wco, cb_row


# ------------------------------ forward wrapper -------------------------------
@partial(jax.jit, static_argnums=(2, 3))
def ucm_block1_forward(x, params, H, W):
    B, N, C = x.shape
    # TODO(synk): generalize to shapes where W*C is not a multiple of 128 / C odd.
    assert N == H * W and C % 2 == 0
    WC = W * C
    PADW = WC + 2 * C
    derived = _derived_params(params, H, W)
    x_d = x.reshape(B, H, WC)            # contiguous -> free, lane-dense view

    def const_spec(shape):
        return pl.BlockSpec(shape, lambda b: (0,) * len(shape))

    out = pl.pallas_call(
        _make_kernel(H, W, C),
        out_shape=jax.ShapeDtypeStruct((B, H, WC), jnp.float32),
        grid_spec=pltpu.PrefetchScalarGridSpec(
            num_scalar_prefetch=0,
            grid=(B,),
            in_specs=[pl.BlockSpec((1, H, WC), lambda b: (b, 0, 0)),
                      const_spec((WC, WC)),         # LN1 averaging matrix
                      const_spec((1, WC)),          # gamma (tiled)
                      const_spec((1, WC)),          # beta (tiled)
                      const_spec((WC, 2 * WC)),     # fused fc1/fc2 (+residual)
                      const_spec((1, 2 * WC)),      # fused fc1/fc2 bias
                      const_spec((9, WC)),          # conv taps, even plane
                      const_spec((9, WC)),          # conv taps, odd plane
                      const_spec((1, WC))],         # conv bias (tiled)
            out_specs=pl.BlockSpec((1, H, WC), lambda b: (b, 0, 0)),
            scratch_shapes=[pltpu.VMEM((H + 2, 2 * PADW), jnp.float32)]),
        compiler_params=pltpu.CompilerParams(
            dimension_semantics=("parallel",)),
    )(x_d, *derived)
    return out.reshape(B, N, C)


# ------------------------- pure-JAX reference (check) -------------------------
def reference_forward(x, params, H, W):
    gamma, beta, w1, b1, w2, b2, conv_w, conv_b = params
    B, N, C = x.shape
    mean = x.mean(-1, keepdims=True)
    var = ((x - mean) ** 2).mean(-1, keepdims=True)
    u = (x - mean) / jnp.sqrt(var + LN_EPS) * gamma + beta
    a = u @ w1.T + b1 + u
    uf = u.reshape(B * N, C)
    idx = jnp.array([0, B * N - 1])
    swp = jnp.array([B * N - 1, 0])
    uf2 = uf.at[idx].set(uf[swp])
    y2 = uf2 @ w2.T + b2
    y2 = y2.at[idx].set(y2[swp])
    y2 = y2.reshape(B, N, C) + u
    cat = jnp.concatenate([a, y2], axis=-1)
    v = jnp.transpose(cat, (0, 2, 1)).reshape(B, 2 * C, H, W)
    m = v.mean(axis=(1, 2, 3), keepdims=True)
    vv = ((v - m) ** 2).mean(axis=(1, 2, 3), keepdims=True)
    vn = (v - m) / jnp.sqrt(vv + LN_EPS)
    conv = lax.conv_general_dilated(
        vn, conv_w, (1, 1), 'SAME',
        dimension_numbers=('NCHW', 'OIHW', 'NCHW'),
        feature_group_count=C) + conv_b[None, :, None, None]
    w_out = conv.reshape(B, C, N).transpose(0, 2, 1)
    out = w_out + u
    return out + out                                              # x = x + drop_path(x)


if __name__ == "__main__":
    dim = 32
    # int(dim * mlp_ratio) must equal dim for the module to be valid -> mlp_ratio = 1.0
    B, H, W = 2, 16, 16
    N = H * W

    keys = jax.random.split(jax.random.PRNGKey(0), 9)

    # Parameter init mirroring _init_weights; the bias/affine terms get small
    # random values (instead of exact zeros/ones) so every kernel path is
    # actually exercised by the numerical check.
    gamma = 1.0 + 0.1 * jax.random.normal(keys[0], (dim,), jnp.float32)
    beta = 0.1 * jax.random.normal(keys[1], (dim,), jnp.float32)
    # TODO(synk): trunc_normal_ approximated by plain normal (std=0.02)
    w1 = 0.02 * jax.random.normal(keys[2], (dim, dim), jnp.float32)
    b1 = 0.02 * jax.random.normal(keys[3], (dim,), jnp.float32)
    w2 = 0.02 * jax.random.normal(keys[4], (dim, dim), jnp.float32)
    b2 = 0.02 * jax.random.normal(keys[5], (dim,), jnp.float32)
    fan_out = 3 * 3 * dim // dim                                  # = 9 (grouped conv)
    conv_w = math.sqrt(2.0 / fan_out) * jax.random.normal(keys[6], (dim, 2, 3, 3),
                                                          jnp.float32)
    conv_b = 0.02 * jax.random.normal(keys[7], (dim,), jnp.float32)
    params = (gamma, beta, w1, b1, w2, b2, conv_w, conv_b)

    x = jax.random.normal(keys[8], (B, N, dim), jnp.float32)

    out = jax.block_until_ready(ucm_block1_forward(x, params, H, W))
    ref = jax.block_until_ready(reference_forward(x, params, H, W))

    assert out.shape == (B, N, dim)
    assert jnp.allclose(out, ref, rtol=1e-3, atol=1e-3), float(jnp.max(jnp.abs(out - ref)))
    print("KERNEL_OK")
</pallas_src>

<mosaic_0001>
module attributes {stable_mosaic.version = 11 : i64} {
  func.func @kernel(%arg0: i32, %arg1: memref<1x16x512xf32, #tpu.memory_space<vmem>>, %arg2: memref<512x512xf32, #tpu.memory_space<vmem>>, %arg3: memref<1x512xf32, #tpu.memory_space<vmem>>, %arg4: memref<1x512xf32, #tpu.memory_space<vmem>>, %arg5: memref<512x1024xf32, #tpu.memory_space<vmem>>, %arg6: memref<1x1024xf32, #tpu.memory_space<vmem>>, %arg7: memref<9x512xf32, #tpu.memory_space<vmem>>, %arg8: memref<9x512xf32, #tpu.memory_space<vmem>>, %arg9: memref<1x512xf32, #tpu.memory_space<vmem>>, %arg10: memref<1x16x512xf32, #tpu.memory_space<vmem>>, %arg11: memref<18x1152xf32, #tpu.memory_space<vmem>>) attributes {dimension_semantics = [#tpu.dimension_semantics<parallel>], iteration_bounds = array<i64: 2>, scalar_prefetch = 0 : i64, scratch_operands = 1 : i64, tpu.core_type = #tpu.core_type<tc>, window_params = [{transform_indices = @transform_0, window_bounds = array<i64: 1, 16, 512>}, {pipeline_mode = #tpu.pipeline_mode<synchronous>, transform_indices = @transform_1, window_bounds = array<i64: 512, 512>}, {pipeline_mode = #tpu.pipeline_mode<synchronous>, transform_indices = @transform_2, window_bounds = array<i64: 1, 512>}, {pipeline_mode = #tpu.pipeline_mode<synchronous>, transform_indices = @transform_3, window_bounds = array<i64: 1, 512>}, {pipeline_mode = #tpu.pipeline_mode<synchronous>, transform_indices = @transform_4, window_bounds = array<i64: 512, 1024>}, {pipeline_mode = #tpu.pipeline_mode<synchronous>, transform_indices = @transform_5, window_bounds = array<i64: 1, 1024>}, {pipeline_mode = #tpu.pipeline_mode<synchronous>, transform_indices = @transform_6, window_bounds = array<i64: 9, 512>}, {pipeline_mode = #tpu.pipeline_mode<synchronous>, transform_indices = @transform_7, window_bounds = array<i64: 9, 512>}, {pipeline_mode = #tpu.pipeline_mode<synchronous>, transform_indices = @transform_8, window_bounds = array<i64: 1, 512>}, {transform_indices = @transform_9, window_bounds = array<i64: 1, 16, 512>}]} {
    %c0 = arith.constant 0 : index
    %c0_0 = arith.constant 0 : index
    %c0_1 = arith.constant 0 : index
    %0 = vector.load %arg1[%c0, %c0_0, %c0_1] : memref<1x16x512xf32, #tpu.memory_space<vmem>>, vector<1x16x512xf32>
    %1 = vector.shape_cast %0 : vector<1x16x512xf32> to vector<16x512xf32>
    %c0_2 = arith.constant 0 : index
    %c0_3 = arith.constant 0 : index
    %2 = vector.load %arg2[%c0_2, %c0_3] : memref<512x512xf32, #tpu.memory_space<vmem>>, vector<512x512xf32>
    %cst = arith.constant dense<0.000000e+00> : vector<16x512xf32>
    %3 = tpu.matmul %1, %2, %cst {dimension_numbers = #tpu.dot_dimension_numbers<[1], [0], [0], [1], [0, 0, 1, 1], [], []>} : vector<16x512xf32>, vector<512x512xf32>, vector<16x512xf32> -> vector<16x512xf32>
    %4 = arith.subf %1, %3 : vector<16x512xf32>
    %5 = arith.mulf %4, %4 : vector<16x512xf32>
    %c0_4 = arith.constant 0 : index
    %c0_5 = arith.constant 0 : index
    %6 = vector.load %arg2[%c0_4, %c0_5] : memref<512x512xf32, #tpu.memory_space<vmem>>, vector<512x512xf32>
    %cst_6 = arith.constant dense<0.000000e+00> : vector<16x512xf32>
    %7 = tpu.matmul %5, %6, %cst_6 {dimension_numbers = #tpu.dot_dimension_numbers<[1], [0], [0], [1], [0, 0, 1, 1], [], []>} : vector<16x512xf32>, vector<512x512xf32>, vector<16x512xf32> -> vector<16x512xf32>
    %cst_7 = arith.constant 9.99999974E-6 : f32
    %8 = vector.broadcast %cst_7 : f32 to vector<16x512xf32>
    %9 = arith.addf %7, %8 : vector<16x512xf32>
    %10 = math.rsqrt %9 : vector<16x512xf32>
    %11 = arith.mulf %4, %10 : vector<16x512xf32>
    %c0_8 = arith.constant 0 : index
    %c0_9 = arith.constant 0 : index
    %12 = vector.load %arg3[%c0_8, %c0_9] : memref<1x512xf32, #tpu.memory_space<vmem>>, vector<1x512xf32>
    %13 = vector.broadcast %12 : vector<1x512xf32> to vector<16x512xf32>
    %14 = arith.mulf %11, %13 : vector<16x512xf32>
    %c0_10 = arith.constant 0 : index
    %c0_11 = arith.constant 0 : index
    %15 = vector.load %arg4[%c0_10, %c0_11] : memref<1x512xf32, #tpu.memory_space<vmem>>, vector<1x512xf32>
    %16 = vector.broadcast %15 : vector<1x512xf32> to vector<16x512xf32>
    %17 = arith.addf %14, %16 : vector<16x512xf32>
    %c0_12 = arith.constant 0 : index
    %c0_13 = arith.constant 0 : index
    %18 = vector.load %arg5[%c0_12, %c0_13] : memref<512x1024xf32, #tpu.memory_space<vmem>>, vector<512x1024xf32>
    %cst_14 = arith.constant dense<0.000000e+00> : vector<16x1024xf32>
    %19 = tpu.matmul %17, %18, %cst_14 {dimension_numbers = #tpu.dot_dimension_numbers<[1], [0], [0], [1], [0, 0, 1, 1], [], []>} : vector<16x512xf32>, vector<512x1024xf32>, vector<16x1024xf32> -> vector<16x1024xf32>
    %c0_15 = arith.constant 0 : index
    %c0_16 = arith.constant 0 : index
    %20 = vector.load %arg6[%c0_15, %c0_16] : memref<1x1024xf32, #tpu.memory_space<vmem>>, vector<1x1024xf32>
    %21 = vector.broadcast %20 : vector<1x1024xf32> to vector<16x1024xf32>
    %22 = arith.addf %19, %21 : vector<16x1024xf32>
    %23 = vector.shape_cast %22 : vector<16x1024xf32> to vector<1x16x1024xf32>
    %cst_17 = arith.constant dense<0.000000e+00> : vector<1xf32>
    %24 = vector.multi_reduction <add>, %23, %cst_17 [1, 2] : vector<1x16x1024xf32> to vector<1xf32>
    %25 = vector.shape_cast %24 : vector<1xf32> to vector<1x1x1xf32>
    %26 = vector.extract %25[0, 0, 0] : f32 from vector<1x1x1xf32>
    %cst_18 = arith.constant 1.638400e+04 : f32
    %27 = arith.divf %26, %cst_18 : f32
    %28 = vector.broadcast %27 : f32 to vector<16x1024xf32>
    %29 = arith.subf %22, %28 : vector<16x1024xf32>
    %30 = arith.mulf %29, %29 : vector<16x1024xf32>
    %31 = vector.shape_cast %30 : vector<16x1024xf32> to vector<1x16x1024xf32>
    %cst_19 = arith.constant dense<0.000000e+00> : vector<1xf32>
    %32 = vector.multi_reduction <add>, %31, %cst_19 [1, 2] : vector<1x16x1024xf32> to vector<1xf32>
    %33 = vector.shape_cast %32 : vector<1xf32> to vector<1x1x1xf32>
    %34 = vector.extract %33[0, 0, 0] : f32 from vector<1x1x1xf32>
    %cst_20 = arith.constant 1.638400e+04 : f32
    %35 = arith.divf %34, %cst_20 : f32
    %36 = vector.broadcast %27 : f32 to vector<16x1024xf32>
    %37 = arith.subf %22, %36 : vector<16x1024xf32>
    %cst_21 = arith.constant 9.99999974E-6 : f32
    %38 = arith.addf %35, %cst_21 : f32
    %39 = math.rsqrt %38 : f32
    %40 = vector.broadcast %39 : f32 to vector<16x1024xf32>
    %41 = arith.mulf %37, %40 : vector<16x1024xf32>
    %cst_22 = arith.constant 0.000000e+00 : f32
    %42 = vector.broadcast %cst_22 : f32 to vector<1x1152xf32>
    %c0_23 = arith.constant 0 : index
    %c0_24 = arith.constant 0 : index
    %43 = vector.load %arg11[%c0_23, %c0_24] : memref<18x1152xf32, #tpu.memory_space<vmem>>, vector<1x1152xf32>
    tpu.vector_store %arg11[%c0_23, %c0_24], %42 {strides = array<i32>} : memref<18x1152xf32, #tpu.memory_space<vmem>>, vector<1x1152xf32>,
    %cst_25 = arith.constant 0.000000e+00 : f32
    %44 = vector.broadcast %cst_25 : f32 to vector<1x1152xf32>
    %c17 = arith.constant 17 : index
    %c0_26 = arith.constant 0 : index
    %45 = vector.load %arg11[%c17, %c0_26] : memref<18x1152xf32, #tpu.memory_space<vmem>>, vector<1x1152xf32>
    tpu.vector_store %arg11[%c17, %c0_26], %44 {strides = array<i32>} : memref<18x1152xf32, #tpu.memory_space<vmem>>, vector<1x1152xf32>,
    %cst_27 = arith.constant 0.000000e+00 : f32
    %46 = vector.broadcast %cst_27 : f32 to vector<16x32xf32>
    %c1 = arith.constant 1 : index
    %c0_28 = arith.constant 0 : index
    %47 = vector.load %arg11[%c1, %c0_28] : memref<18x1152xf32, #tpu.memory_space<vmem>>, vector<16x32xf32>
    tpu.vector_store %arg11[%c1, %c0_28], %46 {strides = array<i32>} : memref<18x1152xf32, #tpu.memory_space<vmem>>, vector<16x32xf32>,
    %cst_29 = arith.constant 0.000000e+00 : f32
    %48 = vector.broadcast %cst_29 : f32 to vector<16x64xf32>
    %c1_30 = arith.constant 1 : index
    %c544 = arith.constant 544 : index
    %49 = vector.load %arg11[%c1_30, %c544] : memref<18x1152xf32, #tpu.memory_space<vmem>>, vector<16x64xf32>
    tpu.vector_store %arg11[%c1_30, %c544], %48 {strides = array<i32>} : memref<18x1152xf32, #tpu.memory_space<vmem>>, vector<16x64xf32>,
    %cst_31 = arith.constant 0.000000e+00 : f32
    %50 = vector.broadcast %cst_31 : f32 to vector<16x32xf32>
    %c1_32 = arith.constant 1 : index
    %c1120 = arith.constant 1120 : index
    %51 = vector.load %arg11[%c1_32, %c1120] : memref<18x1152xf32, #tpu.memory_space<vmem>>, vector<16x32xf32>
    tpu.vector_store %arg11[%c1_32, %c1120], %50 {strides = array<i32>} : memref<18x1152xf32, #tpu.memory_space<vmem>>, vector<16x32xf32>,
    %52 = vector.extract_strided_slice %41 {offsets = [0, 0], sizes = [16, 512], strides = [1, 1]} : vector<16x1024xf32> to vector<16x512xf32>
    %c1_33 = arith.constant 1 : index
    %c32 = arith.constant 32 : index
    %53 = vector.load %arg11[%c1_33, %c32] : memref<18x1152xf32, #tpu.memory_space<vmem>>, vector<16x512xf32>
    tpu.vector_store %arg11[%c1_33, %c32], %52 {strides = array<i32>} : memref<18x1152xf32, #tpu.memory_space<vmem>>, vector<16x512xf32>,
    %54 = vector.extract_strided_slice %41 {offsets = [0, 512], sizes = [16, 512], strides = [1, 1]} : vector<16x1024xf32> to vector<16x512xf32>
    %c1_34 = arith.constant 1 : index
    %c608 = arith.constant 608 : index
    %55 = vector.load %arg11[%c1_34, %c608] : memref<18x1152xf32, #tpu.memory_space<vmem>>, vector<16x512xf32>
    tpu.vector_store %arg11[%c1_34, %c608], %54 {strides = array<i32>} : memref<18x1152xf32, #tpu.memory_space<vmem>>, vector<16x512xf32>,
    %cst_35 = arith.constant 0.000000e+00 : f32
    %56 = vector.broadcast %cst_35 : f32 to vector<16x512xf32>
    %c0_36 = arith.constant 0 : index
    %c0_37 = arith.constant 0 : index
    %57 = vector.load %arg11[%c0_36, %c0_37] : memref<18x1152xf32, #tpu.memory_space<vmem>>, vector<16x512xf32>
    %c0_38 = arith.constant 0 : index
    %c576 = arith.constant 576 : index
    %58 = vector.load %arg11[%c0_38, %c576] : memref<18x1152xf32, #tpu.memory_space<vmem>>, vector<16x512xf32>
    %c0_39 = arith.constant 0 : index
    %c0_40 = arith.constant 0 : index
    %59 = vector.load %arg7[%c0_39, %c0_40] : memref<9x512xf32, #tpu.memory_space<vmem>>, vector<1x512xf32>
    %60 = vector.broadcast %59 : vector<1x512xf32> to vector<16x512xf32>
    %61 = arith.mulf %57, %60 : vector<16x512xf32>
    %62 = arith.addf %56, %61 : vector<16x512xf32>
    %c0_41 = arith.constant 0 : index
    %c0_42 = arith.constant 0 : index
    %63 = vector.load %arg8[%c0_41, %c0_42] : memref<9x512xf32, #tpu.memory_space<vmem>>, vector<1x512xf32>
    %64 = vector.broadcast %63 : vector<1x512xf32> to vector<16x512xf32>
    %65 = arith.mulf %58, %64 : vector<16x512xf32>
    %66 = arith.addf %62, %65 : vector<16x512xf32>
    %c0_43 = arith.constant 0 : index
    %c32_44 = arith.constant 32 : index
    %67 = vector.load %arg11[%c0_43, %c32_44] : memref<18x1152xf32, #tpu.memory_space<vmem>>, vector<16x512xf32>
    %c0_45 = arith.constant 0 : index
    %c608_46 = arith.constant 608 : index
    %68 = vector.load %arg11[%c0_45, %c608_46] : memref<18x1152xf32, #tpu.memory_space<vmem>>, vector<16x512xf32>
    %c1_47 = arith.constant 1 : index
    %c0_48 = arith.constant 0 : index
    %69 = vector.load %arg7[%c1_47, %c0_48] : memref<9x512xf32, #tpu.memory_space<vmem>>, vector<1x512xf32>
    %70 = vector.broadcast %69 : vector<1x512xf32> to vector<16x512xf32>
    %71 = arith.mulf %67, %70 : vector<16x512xf32>
    %72 = arith.addf %66, %71 : vector<16x512xf32>
    %c1_49 = arith.constant 1 : index
    %c0_50 = arith.constant 0 : index
    %73 = vector.load %arg8[%c1_49, %c0_50] : memref<9x512xf32, #tpu.memory_space<vmem>>, vector<1x512xf32>
    %74 = vector.broadcast %73 : vector<1x512xf32> to vector<16x512xf32>
    %75 = arith.mulf %68, %74 : vector<16x512xf32>
    %76 = arith.addf %72, %75 : vector<16x512xf32>
    %c0_51 = arith.constant 0 : index
    %c64 = arith.constant 64 : index
    %77 = vector.load %arg11[%c0_51, %c64] : memref<18x1152xf32, #tpu.memory_space<vmem>>, vector<16x512xf32>
    %c0_52 = arith.constant 0 : index
    %c640 = arith.constant 640 : index
    %78 = vector.load %arg11[%c0_52, %c640] : memref<18x1152xf32, #tpu.memory_space<vmem>>, vector<16x512xf32>
    %c2 = arith.constant 2 : index
    %c0_53 = arith.constant 0 : index
    %79 = vector.load %arg7[%c2, %c0_53] : memref<9x512xf32, #tpu.memory_space<vmem>>, vector<1x512xf32>
    %80 = vector.broadcast %79 : vector<1x512xf32> to vector<16x512xf32>
    %81 = arith.mulf %77, %80 : vector<16x512xf32>
    %82 = arith.addf %76, %81 : vector<16x512xf32>
    %c2_54 = arith.constant 2 : index
    %c0_55 = arith.constant 0 : index
    %83 = vector.load %arg8[%c2_54, %c0_55] : memref<9x512xf32, #tpu.memory_space<vmem>>, vector<1x512xf32>
    %84 = vector.broadcast %83 : vector<1x512xf32> to vector<16x512xf32>
    %85 = arith.mulf %78, %84 : vector<16x512xf32>
    %86 = arith.addf %82, %85 : vector<16x512xf32>
    %c1_56 = arith.constant 1 : index
    %c0_57 = arith.constant 0 : index
    %87 = vector.load %arg11[%c1_56, %c0_57] : memref<18x1152xf32, #tpu.memory_space<vmem>>, vector<16x512xf32>
    %c1_58 = arith.constant 1 : index
    %c576_59 = arith.constant 576 : index
    %88 = vector.load %arg11[%c1_58, %c576_59] : memref<18x1152xf32, #tpu.memory_space<vmem>>, vector<16x512xf32>
    %c3 = arith.constant 3 : index
    %c0_60 = arith.constant 0 : index
    %89 = vector.load %arg7[%c3, %c0_60] : memref<9x512xf32, #tpu.memory_space<vmem>>, vector<1x512xf32>
    %90 = vector.broadcast %89 : vector<1x512xf32> to vector<16x512xf32>
    %91 = arith.mulf %87, %90 : vector<16x512xf32>
    %92 = arith.addf %86, %91 : vector<16x512xf32>
    %c3_61 = arith.constant 3 : index
    %c0_62 = arith.constant 0 : index
    %93 = vector.load %arg8[%c3_61, %c0_62] : memref<9x512xf32, #tpu.memory_space<vmem>>, vector<1x512xf32>
    %94 = vector.broadcast %93 : vector<1x512xf32> to vector<16x512xf32>
    %95 = arith.mulf %88, %94 : vector<16x512xf32>
    %96 = arith.addf %92, %95 : vector<16x512xf32>
    %c1_63 = arith.constant 1 : index
    %c32_64 = arith.constant 32 : index
    %97 = vector.load %arg11[%c1_63, %c32_64] : memref<18x1152xf32, #tpu.memory_space<vmem>>, vector<16x512xf32>
    %c1_65 = arith.constant 1 : index
    %c608_66 = arith.constant 608 : index
    %98 = vector.load %arg11[%c1_65, %c608_66] : memref<18x1152xf32, #tpu.memory_space<vmem>>, vector<16x512xf32>
    %c4 = arith.constant 4 : index
    %c0_67 = arith.constant 0 : index
    %99 = vector.load %arg7[%c4, %c0_67] : memref<9x512xf32, #tpu.memory_space<vmem>>, vector<1x512xf32>
    %100 = vector.broadcast %99 : vector<1x512xf32> to vector<16x512xf32>
    %101 = arith.mulf %97, %100 : vector<16x512xf32>
    %102 = arith.addf %96, %101 : vector<16x512xf32>
    %c4_68 = arith.constant 4 : index
    %c0_69 = arith.constant 0 : index
    %103 = vector.load %arg8[%c4_68, %c0_69] : memref<9x512xf32, #tpu.memory_space<vmem>>, vector<1x512xf32>
    %104 = vector.broadcast %103 : vector<1x512xf32> to vector<16x512xf32>
    %105 = arith.mulf %98, %104 : vector<16x512xf32>
    %106 = arith.addf %102, %105 : vector<16x512xf32>
    %c1_70 = arith.constant 1 : index
    %c64_71 = arith.constant 64 : index
    %107 = vector.load %arg11[%c1_70, %c64_71] : memref<18x1152xf32, #tpu.memory_space<vmem>>, vector<16x512xf32>
    %c1_72 = arith.constant 1 : index
    %c640_73 = arith.constant 640 : index
    %108 = vector.load %arg11[%c1_72, %c640_73] : memref<18x1152xf32, #tpu.memory_space<vmem>>, vector<16x512xf32>
    %c5 = arith.constant 5 : index
    %c0_74 = arith.constant 0 : index
    %109 = vector.load %arg7[%c5, %c0_74] : memref<9x512xf32, #tpu.memory_space<vmem>>, vector<1x512xf32>
    %110 = vector.broadcast %109 : vector<1x512xf32> to vector<16x512xf32>
    %111 = arith.mulf %107, %110 : vector<16x512xf32>
    %112 = arith.addf %106, %111 : vector<16x512xf32>
    %c5_75 = arith.constant 5 : index
    %c0_76 = arith.constant 0 : index
    %113 = vector.load %arg8[%c5_75, %c0_76] : memref<9x512xf32, #tpu.memory_space<vmem>>, vector<1x512xf32>
    %114 = vector.broadcast %113 : vector<1x512xf32> to vector<16x512xf32>
    %115 = arith.mulf %108, %114 : vector<16x512xf32>
    %116 = arith.addf %112, %115 : vector<16x512xf32>
    %c2_77 = arith.constant 2 : index
    %c0_78 = arith.constant 0 : index
    %117 = vector.load %arg11[%c2_77, %c0_78] : memref<18x1152xf32, #tpu.memory_space<vmem>>, vector<16x512xf32>
    %c2_79 = arith.constant 2 : index
    %c576_80 = arith.constant 576 : index
    %118 = vector.load %arg11[%c2_79, %c576_80] : memref<18x1152xf32, #tpu.memory_space<vmem>>, vector<16x512xf32>
    %c6 = arith.constant 6 : index
    %c0_81 = arith.constant 0 : index
    %119 = vector.load %arg7[%c6, %c0_81] : memref<9x512xf32, #tpu.memory_space<vmem>>, vector<1x512xf32>
    %120 = vector.broadcast %119 : vector<1x512xf32> to vector<16x512xf32>
    %121 = arith.mulf %117, %120 : vector<16x512xf32>
    %122 = arith.addf %116, %121 : vector<16x512xf32>
    %c6_82 = arith.constant 6 : index
    %c0_83 = arith.constant 0 : index
    %123 = vector.load %arg8[%c6_82, %c0_83] : memref<9x512xf32, #tpu.memory_space<vmem>>, vector<1x512xf32>
    %124 = vector.broadcast %123 : vector<1x512xf32> to vector<16x512xf32>
    %125 = arith.mulf %118, %124 : vector<16x512xf32>
    %126 = arith.addf %122, %125 : vector<16x512xf32>
    %c2_84 = arith.constant 2 : index
    %c32_85 = arith.constant 32 : index
    %127 = vector.load %arg11[%c2_84, %c32_85] : memref<18x1152xf32, #tpu.memory_space<vmem>>, vector<16x512xf32>
    %c2_86 = arith.constant 2 : index
    %c608_87 = arith.constant 608 : index
    %128 = vector.load %arg11[%c2_86, %c608_87] : memref<18x1152xf32, #tpu.memory_space<vmem>>, vector<16x512xf32>
    %c7 = arith.constant 7 : index
    %c0_88 = arith.constant 0 : index
    %129 = vector.load %arg7[%c7, %c0_88] : memref<9x512xf32, #tpu.memory_space<vmem>>, vector<1x512xf32>
    %130 = vector.broadcast %129 : vector<1x512xf32> to vector<16x512xf32>
    %131 = arith.mulf %127, %130 : vector<16x512xf32>
    %132 = arith.addf %126, %131 : vector<16x512xf32>
    %c7_89 = arith.constant 7 : index
    %c0_90 = arith.constant 0 : index
    %133 = vector.load %arg8[%c7_89, %c0_90] : memref<9x512xf32, #tpu.memory_space<vmem>>, vector<1x512xf32>
    %134 = vector.broadcast %133 : vector<1x512xf32> to vector<16x512xf32>
    %135 = arith.mulf %128, %134 : vector<16x512xf32>
    %136 = arith.addf %132, %135 : vector<16x512xf32>
    %c2_91 = arith.constant 2 : index
    %c64_92 = arith.constant 64 : index
    %137 = vector.load %arg11[%c2_91, %c64_92] : memref<18x1152xf32, #tpu.memory_space<vmem>>, vector<16x512xf32>
    %c2_93 = arith.constant 2 : index
    %c640_94 = arith.constant 640 : index
    %138 = vector.load %arg11[%c2_93, %c640_94] : memref<18x1152xf32, #tpu.memory_space<vmem>>, vector<16x512xf32>
    %c8 = arith.constant 8 : index
    %c0_95 = arith.constant 0 : index
    %139 = vector.load %arg7[%c8, %c0_95] : memref<9x512xf32, #tpu.memory_space<vmem>>, vector<1x512xf32>
    %140 = vector.broadcast %139 : vector<1x512xf32> to vector<16x512xf32>
    %141 = arith.mulf %137, %140 : vector<16x512xf32>
    %142 = arith.addf %136, %141 : vector<16x512xf32>
    %c8_96 = arith.constant 8 : index
    %c0_97 = arith.constant 0 : index
    %143 = vector.load %arg8[%c8_96, %c0_97] : memref<9x512xf32, #tpu.memory_space<vmem>>, vector<1x512xf32>
    %144 = vector.broadcast %143 : vector<1x512xf32> to vector<16x512xf32>
    %145 = arith.mulf %138, %144 : vector<16x512xf32>
    %146 = arith.addf %142, %145 : vector<16x512xf32>
    %c0_98 = arith.constant 0 : index
    %c0_99 = arith.constant 0 : index
    %147 = vector.load %arg9[%c0_98, %c0_99] : memref<1x512xf32, #tpu.memory_space<vmem>>, vector<1x512xf32>
    %148 = vector.broadcast %147 : vector<1x512xf32> to vector<16x512xf32>
    %149 = arith.addf %146, %148 : vector<16x512xf32>
    %150 = arith.addf %149, %17 : vector<16x512xf32>
    %cst_100 = arith.constant 2.000000e+00 : f32
    %151 = vector.broadcast %cst_100 : f32 to vector<16x512xf32>
    %152 = arith.mulf %151, %150 : vector<16x512xf32>
    %c0_101 = arith.constant 0 : index
    %c0_102 = arith.constant 0 : index
    %c0_103 = arith.constant 0 : index
    %153 = vector.load %arg10[%c0_101, %c0_102, %c0_103] : memref<1x16x512xf32, #tpu.memory_space<vmem>>, vector<1x16x512xf32>
    %154 = vector.shape_cast %153 : vector<1x16x512xf32> to vector<16x512xf32>
    %155 = vector.shape_cast %152 : vector<16x512xf32> to vector<1x16x512xf32>
    tpu.vector_store %arg10[%c0_101, %c0_102, %c0_103], %155 {strides = array<i32>} : memref<1x16x512xf32, #tpu.memory_space<vmem>>, vector<1x16x512xf32>,
    return
  }
  func.func @transform_0(%arg0: i32) -> (i32, i32, i32) {
    %c0_i32 = arith.constant 0 : i32
    %c0_i32_0 = arith.constant 0 : i32
    %c0_i32_1 = arith.constant 0 : i32
    return %arg0, %c0_i32, %c0_i32_0 : i32, i32, i32
  }
  func.func @transform_1(%arg0: i32) -> (i32, i32) {
    %c0_i32 = arith.constant 0 : i32
    %c0_i32_0 = arith.constant 0 : i32
    %c0_i32_1 = arith.constant 0 : i32
    return %c0_i32, %c0_i32_0 : i32, i32
  }
  func.func @transform_2(%arg0: i32) -> (i32, i32) {
    %c0_i32 = arith.constant 0 : i32
    %c0_i32_0 = arith.constant 0 : i32
    %c0_i32_1 = arith.constant 0 : i32
    return %c0_i32, %c0_i32_0 : i32, i32
  }
  func.func @transform_3(%arg0: i32) -> (i32, i32) {
    %c0_i32 = arith.constant 0 : i32
    %c0_i32_0 = arith.constant 0 : i32
    %c0_i32_1 = arith.constant 0 : i32
    return %c0_i32, %c0_i32_0 : i32, i32
  }
  func.func @transform_4(%arg0: i32) -> (i32, i32) {
    %c0_i32 = arith.constant 0 : i32
    %c0_i32_0 = arith.constant 0 : i32
    %c0_i32_1 = arith.constant 0 : i32
    return %c0_i32, %c0_i32_0 : i32, i32
  }
  func.func @transform_5(%arg0: i32) -> (i32, i32) {
    %c0_i32 = arith.constant 0 : i32
    %c0_i32_0 = arith.constant 0 : i32
    %c0_i32_1 = arith.constant 0 : i32
    return %c0_i32, %c0_i32_0 : i32, i32
  }
  func.func @transform_6(%arg0: i32) -> (i32, i32) {
    %c0_i32 = arith.constant 0 : i32
    %c0_i32_0 = arith.constant 0 : i32
    %c0_i32_1 = arith.constant 0 : i32
    return %c0_i32, %c0_i32_0 : i32, i32
  }
  func.func @transform_7(%arg0: i32) -> (i32, i32) {
    %c0_i32 = arith.constant 0 : i32
    %c0_i32_0 = arith.constant 0 : i32
    %c0_i32_1 = arith.constant 0 : i32
    return %c0_i32, %c0_i32_0 : i32, i32
  }
  func.func @transform_8(%arg0: i32) -> (i32, i32) {
    %c0_i32 = arith.constant 0 : i32
    %c0_i32_0 = arith.constant 0 : i32
    %c0_i32_1 = arith.constant 0 : i32
    return %c0_i32, %c0_i32_0 : i32, i32
  }
  func.func @transform_9(%arg0: i32) -> (i32, i32, i32) {
    %c0_i32 = arith.constant 0 : i32
    %c0_i32_0 = arith.constant 0 : i32
    %c0_i32_1 = arith.constant 0 : i32
    return %arg0, %c0_i32, %c0_i32_0 : i32, i32, i32
  }
}

</mosaic_0001>

<bundles_post_ra>
// kernel: tile.79
= control target key start
LH: loop header
LB: loop body
LE: loop exit
PB: predicated region body
PF: predicated region fallthrough
CT: control target
= control target key end

     0   :  { %s34_s6 = smov 3  ;;  %s37_s7 = smov 12  ;;  %vm39_vm0 = vcmask 1043458   ;;  %vm44_vm1 = vcmask 1045508   ;;  %vm49_vm2 = vcmask 1047558   ;;  %vm110_vm3 = vcmask 1042433   ;;  %s847_s0 = inlined_call_operand.vmem [shape: f32[3,1,3,16,32], index: 0, kind: input, shape index: {}]   ;;  %s848_s1 = inlined_call_operand.vmem [shape: f32[9,512], index: 1, kind: output, shape index: {}]  }
   0x1   :  { %v390_v0 = vld [vmem:[%s847_s0 + $0x3] ss:$16 sm:%s34_s6]   ;;  %s42_s12 = smov 48  ;;  %s47_s13 = smov 192  ;;  %v406_v10 = vld [vmem:[%s847_s0 + $0x8b] sm:$0x1]  }
   0x2   :  { %v391_v1 = vld [vmem:[%s847_s0 + $0x3] ss:$16 sm:%s37_s7]   ;;  %s81_s18 = smov 3  ;;  %s84_s21 = smov 12  ;;  %vm115_vm4 = vcmask 1044483   ;;  %vm120_vm5 = vcmask 1046533  }
   0x3   :  { %v40_v2 = vsel %vm39_vm0, %v391_v1, %v390_v0  ;;  %v392_v3 = vld [vmem:[%s847_s0 + $0x3] ss:$16 sm:%s42_s12]   ;;  %v400_v6 = vld [vmem:[%s847_s0 + $0x87] ss:$-16 sm:%s81_s18]   ;;  %s89_s22 = smov 48  ;;  %s94_s27 = smov 192 }
   0x4   :  { %v393_v4 = vld [vmem:[%s847_s0 + $0x3] ss:$16 sm:%s47_s13]   ;;  %v45_v5 = vsel %vm44_vm1, %v392_v3, %v40_v2  ;;  %v401_v8 = vld [vmem:[%s847_s0 - $0x15] ss:$16 sm:%s84_s21]   ;;  %s56_s28 = smov 3  ;;  %s474_s2 = smov 96  }
   0x5   :  { %v50_v7 = vsel %vm49_vm2, %v393_v4, %v45_v5  ;;  %v402_v9 = vld [vmem:[%s847_s0 - $0x15] ss:$16 sm:%s89_s22]   ;;  %v87_v11 = vsel %vm39_vm0, %v401_v8, %v400_v6  ;;  %s59_s5 = smov 12  ;;  %s64_s6 = smov 48  ;;  %v410_v22 = vld [vmem:[%s847_s0 + $0x48] sm:$0x80]  }
   0x6   :  { %51 = vrot.lane.b32.xlu0 %v50_v7, %s474_s2  ;;  %v403_v12 = vld [vmem:[%s847_s0 - $0x15] ss:$16 sm:%s94_s27]   ;;  %v92_v13 = vsel %vm44_vm1, %v402_v9, %v87_v11  ;;  %s69_s11 = smov 192  ;;  %s108_s12 = smov 6  ;;  %vm124_vm6 = vcmask 1047559   ;;  %vm3_vm7 = vcmask 261120  }
   0x7   :  { %v394_v14 = vld [vmem:[%s847_s0 + $0x83] ss:$-124 sm:%s56_s28]   ;;  %v97_v16 = vsel %vm49_vm2, %v403_v12, %v92_v13  ;;  %s113_s17 = smov 24  ;;  %s118_s18 = smov 96  ;;  %v433_v48 = vld [vmem:[%s847_s0 + $0x8a] sm:$0x1]  }
   0x8   :  { %v395_v15 = vld [vmem:[%s847_s0 - $0x9] ss:$16 sm:%s59_s5]   ;;  %98 = vrot.lane.b32.xlu1 %v97_v16, %s474_s2  ;;  %s134_s23 = smov 3  ;;  %s137_s28 = smov 12  ;;  %v437_v53 = vld [vmem:[%s847_s0 + $0x47] sm:$0x80]  }
   0x9   :  { %v62_v17 = vsel %vm39_vm0, %v395_v15, %v394_v14  ;;  %v396_v18 = vld [vmem:[%s847_s0 - $0x9] ss:$16 sm:%s64_s6]   ;;  %v407_v21 = vld [vmem:[%s847_s0 + $0x5b] ss:$16 sm:%s108_s12]   ;;  %s149_s29 = smov 3  ;;  %s152_s4 = smov 12 }
   0xa   :  { %v397_v19 = vld [vmem:[%s847_s0 - $0x9] ss:$16 sm:%s69_s11]   ;;  %v67_v20 = vsel %vm44_vm1, %v396_v18, %v62_v17  ;;  %v111_v24 = vsel %vm110_vm3, %v407_v21, %v406_v10  ;;  %v408_v25 = vld [vmem:[%s847_s0 - $0x21] ss:$16 sm:%s113_s17]   ;;  %s157_s5 = smov 48  ;;  %s162_s10 = smov 192 }
   0xb   :  { %v72_v23 = vsel %vm49_vm2, %v397_v19, %v67_v20  ;;  %v409_v26 = vld [vmem:[%s847_s0 - $0x21] ss:$16 sm:%s118_s18]   ;;  %v116_v27 = vsel %vm115_vm4, %v408_v25, %v111_v24  ;;  %v417_v31 = vld [vmem:[%s847_s0 + $0x2] ss:$16 sm:%s149_s29]   ;;  %s171_s15 = smov 3  ;;  %s174_s16 = smov 12 }
   0xc   :  { %73 = vrot.lane.b32.xlu0 %v72_v23, %s474_s2  ;;  %v413_v28 = vld [vmem:[%s847_s0 + $0x8f] ss:$-48 sm:%s134_s23]   ;;  %v121_v29 = vsel %vm120_vm5, %v409_v26, %v116_v27  ;;  %s179_s19 = smov 48  ;;  %s184_s20 = smov 192  ;;  %v385_v62 = vld [vmem:[%s847_s0 + $0x60] ss:$4 sm:$0xff]  }
   0xd   :  { %v414_v30 = vld [vmem:[%s847_s0 + $0x4f] ss:$16 sm:%s137_s28]   ;;  %v125_v32 = vsel %vm124_vm6, %v410_v22, %v121_v29  ;;  %v418_v34 = vld [vmem:[%s847_s0 + $0x2] ss:$16 sm:%s152_s4]   ;;  %s196_s22 = smov 3  ;;  %s199_s23 = smov 12 }
   0xe   :  { %v140_v33 = vsel %vm39_vm0, %v414_v30, %v413_v28  ;;  %v419_v35 = vld [vmem:[%s847_s0 + $0x2] ss:$16 sm:%s157_s5]   ;;  %126 = vrot.lane.b32.xlu1 %v125_v32, %s474_s2  ;;  %v155_v36 = vsel %vm39_vm0, %v418_v34, %v417_v31  ;;  %s204_s28 = smov 48  ;;  %s209_s29 = smov 192  ;;  %v2_v8 = vld [vmem:[%s847_s0] ss:$4 sm:$0xff]  }
   0xf   :  { %v420_v37 = vld [vmem:[%s847_s0 + $0x2] ss:$16 sm:%s162_s10]   ;;  %v160_v38 = vsel %vm44_vm1, %v419_v35, %v155_v36  ;;  %v422_v41 = vld [vmem:[%s847_s0 - $0xa] ss:$16 sm:%s174_s16]   ;;  %s223_s6 = smov 6  ;;  %s475_s7 = smov 64  }
  0x10   :  { %141 = vrot.lane.b32.xlu0 %v140_v33, %s474_s2  ;;  %v421_v39 = vld [vmem:[%s847_s0 + $0x82] ss:$-124 sm:%s171_s15]   ;;  %v165_v40 = vsel %vm49_vm2, %v420_v37, %v160_v38  ;;  %s228_s12 = smov 24  ;;  %s233_s13 = smov 96  ;;  %v382_v11 = vld [vmem:[%s847_s0 + $0x40] ss:$4 sm:$0xff]  }
  0x11   :  { %v423_v42 = vld [vmem:[%s847_s0 - $0xa] ss:$16 sm:%s179_s19]   ;;  %v177_v43 = vsel %vm39_vm0, %v422_v41, %v421_v39  ;;  %v428_v47 = vld [vmem:[%s847_s0 - $0x16] ss:$16 sm:%s199_s23]   ;;  %s264_s23 = smov 3  ;;  %s277_s4 = smov 192 }
  0x12   :  { %v424_v44 = vld [vmem:[%s847_s0 - $0xa] ss:$16 sm:%s184_s20]   ;;  %166 = vrot.lane.b32.xlu1 %v165_v40, %s475_s7  ;;  %v182_v46 = vsel %vm44_vm1, %v423_v42, %v177_v43  ;;  %s249_s20 = smov 3  ;;  %387 = vst.msk [vmem:[%s848_s1 - $0x19] ss:$8 sm:$0xf0] %vm3_vm7, %v385_v62  }
  0x13   :  { %v427_v45 = vld [vmem:[%s847_s0 + $0x86] ss:$-16 sm:%s196_s22]   ;;  %v187_v49 = vsel %vm49_vm2, %v424_v44, %v182_v46  ;;  %v429_v51 = vld [vmem:[%s847_s0 - $0x16] ss:$16 sm:%s204_s28]   ;;  %s252_s22 = smov 12  ;;  %s267_s28 = smov 12 }
  0x14   :  { %v202_v50 = vsel %vm39_vm0, %v428_v47, %v427_v45  ;;  %v430_v52 = vld [vmem:[%s847_s0 - $0x16] ss:$16 sm:%s209_s29]   ;;  %188 = vrot.lane.b32.xlu0 %v187_v49, %s475_s7  ;;  %s272_s29 = smov 48  ;;  %386 = vst.msk [vmem:[%s848_s1 + $0x6] ss:$8 sm:$0xf] %vm3_vm7, %v385_v62  }
  0x15   :  { %v207_v54 = vsel %vm44_vm1, %v429_v51, %v202_v50  ;;  %v434_v55 = vld [vmem:[%s847_s0 + $0x5a] ss:$16 sm:%s223_s6]   ;;  %v435_v58 = vld [vmem:[%s847_s0 - $0x22] ss:$16 sm:%s228_s12]   ;;  %s286_s12 = smov 3  ;;  %s289_s2 = smov 12 }
  0x16   :  { %v212_v56 = vsel %vm49_vm2, %v430_v52, %v207_v54  ;;  %v226_v57 = vsel %vm110_vm3, %v434_v55, %v433_v48  ;;  %v436_v59 = vld [vmem:[%s847_s0 - $0x22] ss:$16 sm:%s233_s13]   ;;  %v444_v1 = vld [vmem:[%s847_s0 + $0x1] ss:$16 sm:%s264_s23]   ;;  %s294_s21 = smov 48  ;;  %s299_s24 = smov 192 }
  0x17   :  { %213 = vrot.lane.b32.xlu1 %v212_v56, %s475_s7  ;;  %v231_v60 = vsel %vm115_vm4, %v435_v58, %v226_v57  ;;  %v440_v61 = vld [vmem:[%s847_s0 + $0x8e] ss:$-48 sm:%s249_s20]   ;;  %s311_s25 = smov 3  ;;  %4 = vst.msk [vmem:[%s848_s1] ss:$8 sm:$0xf] %vm3_vm7, %v2_v8  }
  0x18   :  { %v236_v63 = vsel %vm120_vm5, %v436_v59, %v231_v60  ;;  %v441_v0 = vld [vmem:[%s847_s0 + $0x4e] ss:$16 sm:%s252_s22]   ;;  %v445_v4 = vld [vmem:[%s847_s0 + $0x1] ss:$16 sm:%s267_s28]   ;;  %s319_s13 = smov 48  ;;  %s324_s14 = smov 192 }
  0x19   :  { %v240_v2 = vsel %vm124_vm6, %v437_v53, %v236_v63  ;;  %v255_v3 = vsel %vm39_vm0, %v441_v0, %v440_v61  ;;  %v446_v5 = vld [vmem:[%s847_s0 + $0x1] ss:$16 sm:%s272_s29]   ;;  %v270_v6 = vsel %vm39_vm0, %v445_v4, %v444_v1  ;;  %s314_s29 = smov 12  ;;  %378 = vst.msk [vmem:[%s848_s1 - $0x1f] ss:$8 sm:$0xf0] %vm3_vm7, %v2_v8  }
  0x1a   :  { %241 = vrot.lane.b32.xlu0 %v240_v2, %s475_s7  ;;  %v447_v7 = vld [vmem:[%s847_s0 + $0x1] ss:$16 sm:%s277_s4]   ;;  %v275_v9 = vsel %vm44_vm1, %v446_v5, %v270_v6  ;;  %v460_v15 = vld [vmem:[%s847_s0 + $0x89] sm:$0x1]   ;;  %s476_s26 = smov 32   ;;  %s348_s28 = smov 96 }
  0x1b   :  { %256 = vrot.lane.b32.xlu1 %v255_v3, %s475_s7  ;;  %v448_v10 = vld [vmem:[%s847_s0 + $0x81] ss:$-124 sm:%s286_s12]   ;;  %v280_v12 = vsel %vm49_vm2, %v447_v7, %v275_v9  ;;  %383 = vst.msk [vmem:[%s848_s1 + $0x4] ss:$8 sm:$0xf] %vm3_vm7, %v382_v11   ;;  %s364_s10 = smov 3 }
  0x1c   :  { %v449_v13 = vld [vmem:[%s847_s0 - $0xb] ss:$16 sm:%s289_s2]   ;;  %384 = vst.msk [vmem:[%s848_s1 - $0x1b] ss:$8 sm:$0xf0] %vm3_vm7, %v382_v11   ;;  %s367_s15 = smov 12 }
  0x1d   :  { %v450_v14 = vld [vmem:[%s847_s0 - $0xb] ss:$16 sm:%s294_s21]   ;;  %v292_v16 = vsel %vm39_vm0, %v449_v13, %v448_v10  ;;  %v455_v20 = vld [vmem:[%s847_s0 - $0x17] ss:$16 sm:%s314_s29]   ;;  %vm53_vm8 = vcmask 1048320   ;;  %vm168_vm9 = vcmask 785920  }
  0x1e   :  { %v451_v17 = vld [vmem:[%s847_s0 - $0xb] ss:$16 sm:%s299_s24]   ;;  %s338_s24 = smov 6  ;;  %281 = vrot.lane.b32.xlu0 %v280_v12, %s476_s26  ;;  %v297_v19 = vsel %vm44_vm1, %v450_v14, %v292_v16  ;;  %v388_v21 = vld [vmem:[%s847_s0 + $0x80] ss:$4 sm:$0xf]  }
  0x1f   :  { %v454_v18 = vld [vmem:[%s847_s0 + $0x85] ss:$-16 sm:%s311_s25]   ;;  %s343_s25 = smov 24  ;;  %v302_v22 = vsel %vm49_vm2, %v451_v17, %v297_v19  ;;  %v456_v24 = vld [vmem:[%s847_s0 - $0x17] ss:$16 sm:%s319_s13]   ;;  %vm283_vm10 = vcmask 523520  }
  0x20   :  { %v317_v23 = vsel %vm39_vm0, %v455_v20, %v454_v18  ;;  %v457_v25 = vld [vmem:[%s847_s0 - $0x17] ss:$16 sm:%s324_s14]   ;;  %v464_v26 = vld [vmem:[%s847_s0 + $0x46] sm:$0x80]   ;;  %303 = vrot.lane.b32.xlu1 %v302_v22, %s476_s26 }
  0x21   :  { %389 = vst.msk [vmem:[%s848_s1 + $0x20] ss:$8 sm:$0xf] %vm3_vm7, %v388_v21   ;;  %v322_v27 = vsel %vm44_vm1, %v456_v24, %v317_v23  ;;  %v461_v28 = vld [vmem:[%s847_s0 + $0x59] ss:$16 sm:%s338_s24]  }
  0x22   :  { %v379_v29 = vld [vmem:[%s847_s0 + $0x20] ss:$4 sm:$0xff]   ;;  %v327_v30 = vsel %vm49_vm2, %v457_v25, %v322_v27  ;;  %v341_v31 = vsel %vm110_vm3, %v461_v28, %v460_v15  ;;  %v462_v32 = vld [vmem:[%s847_s0 - $0x23] ss:$16 sm:%s343_s25]  }
  0x23   :  { %v463_v33 = vld [vmem:[%s847_s0 - $0x23] ss:$16 sm:%s348_s28]   ;;  %380 = vst.msk [vmem:[%s848_s1 + $0x2] ss:$8 sm:$0xf] %vm3_vm7, %v379_v29   ;;  %328 = vrot.lane.b32.xlu0 %v327_v30, %s476_s26  ;;  %v346_v34 = vsel %vm115_vm4, %v462_v32, %v341_v31 }
  0x24   :  { %381 = vst.msk [vmem:[%s848_s1 - $0x1d] ss:$8 sm:$0xf0] %vm3_vm7, %v379_v29   ;;  %v467_v35 = vld [vmem:[%s847_s0 + $0x8d] ss:$-48 sm:%s364_s10]   ;;  %v351_v36 = vsel %vm120_vm5, %v463_v33, %v346_v34 }
  0x25   :  { %v468_v37 = vld [vmem:[%s847_s0 + $0x4d] ss:$16 sm:%s367_s15]   ;;  %v355_v38 = vsel %vm124_vm6, %v464_v26, %v351_v36 }
  0x26   :  { %v370_v39 = vsel %vm39_vm0, %v468_v37, %v467_v35  ;;  %356 = vrot.lane.b32.xlu1 %v355_v38, %s476_s26 }
  0x27   :  { %371 = vrot.lane.b32.xlu0 %v370_v39, %s476_s26 }
  0x78   :  { %v52_v40 = vpop.permute.xlu0 %51  }
  0x79   :  { %54 = vst.msk [vmem:[%s848_s1] sm:$0xff] %vm53_vm8, %v52_v40  }
  0x7a   :  { %v99_v41 = vpop.permute.xlu1 %98  }
  0x7b   :  { %404 = vst.msk [vmem:[%s848_s1 + $0x28] ss:$-25 sm:$0x3] %vm53_vm8, %v99_v41   ;;  %405 = vst.msk [vmem:[%s848_s1 + $0xe] sm:$0xfc] %vm53_vm8, %v99_v41  }
  0x7e   :  { %v74_v42 = vpop.permute.xlu0 %73  }
  0x7f   :  { %398 = vst.msk [vmem:[%s848_s1 + $0x20] ss:$-24 sm:$0x3] %vm53_vm8, %v74_v42   ;;  %399 = vst.msk [vmem:[%s848_s1 + $0x7] sm:$0xfc] %vm53_vm8, %v74_v42  }
  0x80   :  { %v127_v43 = vpop.permute.xlu1 %126  }
  0x81   :  { %411 = vst.msk [vmem:[%s848_s1 + $0x30] ss:$-26 sm:$0x3] %vm53_vm8, %v127_v43   ;;  %412 = vst.msk [vmem:[%s848_s1 + $0x15] sm:$0xfc] %vm53_vm8, %v127_v43  }
  0x82   :  { %v142_v44 = vpop.permute.xlu0 %141  }
  0x83   :  { %415 = vst.msk [vmem:[%s848_s1 + $0x38] ss:$-27 sm:$0x3] %vm53_vm8, %v142_v44   ;;  %416 = vst.msk [vmem:[%s848_s1 + $0x1c] sm:$0xc] %vm53_vm8, %v142_v44  }
  0x84   :  { %v167_v45 = vpop.permute.xlu1 %166  }
  0x85   :  { %169 = vst.msk [vmem:[%s848_s1] sm:$0xff] %vm168_vm9, %v167_v45  }
  0x86   :  { %v189_v46 = vpop.permute.xlu0 %188  }
  0x87   :  { %425 = vst.msk [vmem:[%s848_s1 + $0x20] ss:$-24 sm:$0x3] %vm168_vm9, %v189_v46   ;;  %426 = vst.msk [vmem:[%s848_s1 + $0x7] sm:$0xfc] %vm168_vm9, %v189_v46  }
  0x89   :  { %v214_v47 = vpop.permute.xlu1 %213  }
  0x8a   :  { %431 = vst.msk [vmem:[%s848_s1 + $0x28] ss:$-25 sm:$0x3] %vm168_vm9, %v214_v47   ;;  %432 = vst.msk [vmem:[%s848_s1 + $0xe] sm:$0xfc] %vm168_vm9, %v214_v47  }
  0x8c   :  { %v242_v48 = vpop.permute.xlu0 %241  }
  0x8d   :  { %438 = vst.msk [vmem:[%s848_s1 + $0x30] ss:$-26 sm:$0x3] %vm168_vm9, %v242_v48   ;;  %439 = vst.msk [vmem:[%s848_s1 + $0x15] sm:$0xfc] %vm168_vm9, %v242_v48   ;;  %v257_v49 = vpop.permute.xlu1 %256  }
  0x8e   :  { %442 = vst.msk [vmem:[%s848_s1 + $0x38] ss:$-27 sm:$0x3] %vm168_vm9, %v257_v49   ;;  %443 = vst.msk [vmem:[%s848_s1 + $0x1c] sm:$0xc] %vm168_vm9, %v257_v49  }
  0x90   :  { %v282_v50 = vpop.permute.xlu0 %281  }
  0x91   :  { %284 = vst.msk [vmem:[%s848_s1] sm:$0xff] %vm283_vm10, %v282_v50  }
  0x92   :  { %v304_v51 = vpop.permute.xlu1 %303  }
  0x93   :  { %452 = vst.msk [vmem:[%s848_s1 + $0x20] ss:$-24 sm:$0x3] %vm283_vm10, %v304_v51   ;;  %453 = vst.msk [vmem:[%s848_s1 + $0x7] sm:$0xfc] %vm283_vm10, %v304_v51  }
  0x95   :  { %v329_v52 = vpop.permute.xlu0 %328  }
  0x96   :  { %458 = vst.msk [vmem:[%s848_s1 + $0x28] ss:$-25 sm:$0x3] %vm283_vm10, %v329_v52   ;;  %459 = vst.msk [vmem:[%s848_s1 + $0xe] sm:$0xfc] %vm283_vm10, %v329_v52  }
  0x98   :  { %v357_v53 = vpop.permute.xlu1 %356  }
  0x99   :  { %465 = vst.msk [vmem:[%s848_s1 + $0x30] ss:$-26 sm:$0x3] %vm283_vm10, %v357_v53   ;;  %466 = vst.msk [vmem:[%s848_s1 + $0x15] sm:$0xfc] %vm283_vm10, %v357_v53   ;;  %v372_v54 = vpop.permute.xlu0 %371  }
  0x9a   :  { %469 = vst.msk [vmem:[%s848_s1 + $0x38] ss:$-27 sm:$0x3] %vm283_vm10, %v372_v54   ;;  %470 = vst.msk [vmem:[%s848_s1 + $0x1c] sm:$0xc] %vm283_vm10, %v372_v54  }

// kernel: tile.58
= control target key start
LH: loop header
LB: loop body
LE: loop exit
PB: predicated region body
PF: predicated region fallthrough
CT: control target
= control target key end

     0   :  { %s22_s0 = inlined_call_operand.vmem [shape: s32[16], index: 0, kind: input, shape index: {}]   ;;  %s23_s1 = inlined_call_operand.vmem [shape: s32[2,16], index: 1, kind: output, shape index: {}]  }
   0x1   :  { %v4_v0 = vld [vmem:[%s22_s0] ss:$0 sm:$0xff] }
   0x2   :  { %5 = vst [vmem:[%s23_s1] sm:$0x3] %v4_v0 }

// kernel: eq.1
= control target key start
LH: loop header
LB: loop body
LE: loop exit
PB: predicated region body
PF: predicated region fallthrough
CT: control target
= control target key end

     0   :  { %vm7_vm0 = vcmask 130048   ;;  %vm13_vm1 = vcmask 261248   ;;  %s39_s0 = inlined_call_operand.vmem [shape: s32[2,16], index: 0, kind: input, shape index: {}]   ;;  %s40_s1 = inlined_call_operand.vmem [shape: s32[32], index: 1, kind: output, shape index: {}]  }
   0x1   :  { %v4_v0 = vld [vmem:[%s39_s0] sm:$0x3]  ;;  %s22_s0 = smov 16  }
   0x2   :  { %5 = vst [vmem:[#allocation1] sm:$0x3] %v4_v0 }
   0x9   :  { %v10_v1 = vld [vmem:[#allocation1 + $0x1] sm:$0x1]   ;;  %v6_v2 = vld [vmem:[#allocation1] sm:$0x1]  }
   0xa   :  { %11 = vrot.lane.b32.xlu0 %v10_v1, %s22_s0  ;;  %8 = vst.msk [vmem:[#allocation0] sm:$0x1] %vm7_vm0, %v6_v2  }
  0x7c   :  { %v12_v3 = vpop.permute.xlu0 %11  }
  0x7d   :  { %14 = vst.msk [vmem:[#allocation0] sm:$0x1] %vm13_vm1, %v12_v3  }
  0x84   :  { %v18_v4 = vld [vmem:[#allocation0] sm:$0x1] }
  0x85   :  { %20 = vst [vmem:[%s40_s1] sm:$0x1] %v18_v4 }

// kernel: tile.68
= control target key start
LH: loop header
LB: loop body
LE: loop exit
PB: predicated region body
PF: predicated region fallthrough
CT: control target
= control target key end

     0   :  { %s28_s0 = inlined_call_operand.vmem [shape: f32[32], index: 0, kind: input, shape index: {}]   ;;  %s29_s1 = inlined_call_operand.vmem [shape: f32[16,32], index: 1, kind: output, shape index: {}]  }
   0x1   :  { %v4_v0 = vld [vmem:[%s28_s0] ss:$0 sm:$0xff] }
   0x2   :  { %5 = vst [vmem:[%s29_s1] sm:$0xff] %v4_v0  ;;  %8 = vst [vmem:[%s29_s1 + $0x8] sm:$0xff] %v4_v0 }

// kernel: tile.69
= control target key start
LH: loop header
LB: loop body
LE: loop exit
PB: predicated region body
PF: predicated region fallthrough
CT: control target
= control target key end

     0   :  { %s35_s8 = smov 96   ;;  %vm3_vm0 = vcmask 261120   ;;  %s37_s15 = smov 64   ;;  %vm9_vm1 = vcmask 1048320   ;;  %vm15_vm2 = vcmask 785920   ;;  %vm21_vm3 = vcmask 523520   ;;  %s63_s0 = inlined_call_operand.vmem [shape: f32[16,32], index: 0, kind: input, shape index: {}]   ;;  %s64_s1 = inlined_call_operand.vmem [shape: f32[512], index: 1, kind: output, shape index: {}]  }
   0x1   :  { %v29_v0 = vld [vmem:[%s63_s0 + $0x3] ss:$4 sm:$0xf]   ;;  %v30_v1 = vld [vmem:[%s63_s0 + $0x2] ss:$4 sm:$0xf]  }
   0x2   :  { %7 = vrot.lane.b32.xlu0 %v29_v0, %s35_s8  ;;  %v31_v2 = vld [vmem:[%s63_s0 + $0x1] ss:$4 sm:$0xf]   ;;  %v2_v3 = vld [vmem:[%s63_s0] ss:$4 sm:$0xf]  }
   0x3   :  { %s36_s0 = smov 32   ;;  %4 = vst.msk [vmem:[#allocation0] sm:$0xf] %vm3_vm0, %v2_v3  }
   0x4   :  { %19 = vrot.lane.b32.xlu1 %v31_v2, %s36_s0 }
   0x6   :  { %13 = vrot.lane.b32.xlu0 %v30_v1, %s37_s15 }
  0x74   :  { %v8_v4 = vpop.permute.xlu0 %7  }
  0x75   :  { %10 = vst.msk [vmem:[#allocation0] sm:$0xf] %vm9_vm1, %v8_v4  }
  0x76   :  { %v20_v5 = vpop.permute.xlu1 %19  }
  0x78   :  { %v14_v6 = vpop.permute.xlu0 %13  }
  0x79   :  { %16 = vst.msk [vmem:[#allocation0] sm:$0xf] %vm15_vm2, %v14_v6  }
  0x7a   :  { %22 = vst.msk [vmem:[#allocation0] sm:$0xf] %vm21_vm3, %v20_v5  }
  0x81   :  { %v26_v7 = vld [vmem:[#allocation0] sm:$0xf] }
  0x82   :  { %28 = vst [vmem:[%s64_s1] sm:$0xf] %v26_v7 }

// kernel: tile.49
= control target key start
LH: loop header
LB: loop body
LE: loop exit
PB: predicated region body
PF: predicated region fallthrough
CT: control target
= control target key end

     0   :  { %s57_s8 = smov 96   ;;  %vm3_vm0 = vcmask 261120   ;;  %s59_s15 = smov 64   ;;  %vm9_vm1 = vcmask 1048320   ;;  %vm15_vm2 = vcmask 785920   ;;  %vm21_vm3 = vcmask 523520   ;;  %s94_s0 = inlined_call_operand.vmem [shape: f32[16,32], index: 0, kind: input, shape index: {}]   ;;  %s95_s1 = inlined_call_operand.vmem [shape: f32[1,512], index: 1, kind: output, shape index: {}]  }
   0x1   :  { %v48_v0 = vld [vmem:[%s94_s0 + $0x3] ss:$4 sm:$0xf]   ;;  %v49_v1 = vld [vmem:[%s94_s0 + $0x2] ss:$4 sm:$0xf]  }
   0x2   :  { %7 = vrot.lane.b32.xlu0 %v48_v0, %s57_s8  ;;  %v50_v2 = vld [vmem:[%s94_s0 + $0x1] ss:$4 sm:$0xf]   ;;  %v2_v3 = vld [vmem:[%s94_s0] ss:$4 sm:$0xf]  }
   0x3   :  { %s58_s0 = smov 32   ;;  %4 = vst.msk [vmem:[#allocation0] ss:$8 sm:$0xf] %vm3_vm0, %v2_v3  }
   0x4   :  { %19 = vrot.lane.b32.xlu1 %v50_v2, %s58_s0 }
   0x6   :  { %13 = vrot.lane.b32.xlu0 %v49_v1, %s59_s15 }
  0x74   :  { %v8_v4 = vpop.permute.xlu0 %7  }
  0x75   :  { %10 = vst.msk [vmem:[#allocation0] ss:$8 sm:$0xf] %vm9_vm1, %v8_v4  }
  0x76   :  { %v20_v5 = vpop.permute.xlu1 %19  }
  0x78   :  { %v14_v6 = vpop.permute.xlu0 %13  }
  0x79   :  { %16 = vst.msk [vmem:[#allocation0] ss:$8 sm:$0xf] %vm15_vm2, %v14_v6  }
  0x7a   :  { %22 = vst.msk [vmem:[#allocation0] ss:$8 sm:$0xf] %vm21_vm3, %v20_v5  }
  0x81   :  { %v26_v7 = vld [vmem:[#allocation0] sm:$0x1]  ;;  %v30_v8 = vld [vmem:[#allocation0 + $0x8] sm:$0x1]  ;;  %v35_v9 = vld [vmem:[#allocation0 + $0x10] sm:$0x1] }
  0x82   :  { %28 = vst [vmem:[%s95_s1] sm:$0x1] %v26_v7  ;;  %51 = vst [vmem:[%s95_s1 + $0x1] sm:$0x1] %v30_v8  ;;  %v41_v10 = vld [vmem:[#allocation0 + $0x18] sm:$0x1] }
  0x83   :  { %52 = vst [vmem:[%s95_s1 + $0x2] sm:$0x1] %v35_v9  ;;  %53 = vst [vmem:[%s95_s1 + $0x3] sm:$0x1] %v41_v10 }

// kernel: ucm_block1_forward.1
= control target key start
LH: loop header
LB: loop body
LE: loop exit
PB: predicated region body
PF: predicated region fallthrough
CT: control target
= control target key end

     0   :  { %s6060_s30 = smov 0   ;;  %s11251_s0 = inlined_call_operand.vmem [shape: f32[2,16,512], index: 0, kind: input, shape index: {}]   ;;  %s11252_s1 = inlined_call_operand.vmem [shape: f32[512,512], index: 1, kind: input, shape index: {}]   ;;  %s11253_s2 = inlined_call_operand.vmem [shape: f32[1,512], index: 2, kind: input, shape index: {}]   ;;  %s11254_s3 = inlined_call_operand.vmem [shape: f32[1,512], index: 3, kind: input, shape index: {}]   ;;  %s11255_s4 = inlined_call_operand.vmem [shape: f32[512,1024], index: 4, kind: input, shape index: {}]   ;;  %s11256_s5 = inlined_call_operand.vmem [shape: f32[1,1024], index: 5, kind: input, shape index: {}]   ;;  %s11257_s6 = inlined_call_operand.vmem [shape: f32[9,512], index: 6, kind: input, shape index: {}]   ;;  %s11258_s7 = inlined_call_operand.vmem [shape: f32[9,512], index: 7, kind: input, shape index: {}]   ;;  %s11259_s8 = inlined_call_operand.vmem [shape: f32[1,512], index: 8, kind: input, shape index: {}]   ;;  %s11260_s9 = inlined_call_operand.vmem [shape: f32[2,16,512], index: 9, kind: output, shape index: {}]  }
   0x1 LB: > { %s4831_s10 = sadd.s32 4294967295, %s6004_s30   ;;  %p4835_p0 = scmp.ge.s32.totalorder %s6004_s30, 1  ;;  %s6004_s30 = sphi %s6060_s30, %s19_s30  }
   0x2   : > { %p287_p1 = scmp.lt.s32.totalorder %s6004_s30, 3 }
   0x4   : > { %p288_p2 = pnand %p4835_p0, %p287_p1 }
   0x6   : > { %291 = sbr.rel (%p288_p2) target bundleno = 2120 (0x848), region = 56 }
   0xd   : > { %v342_v0 = vld [vmem:[%s11252_s1 + $0x8] sm:$0xff]  ;;  %v344_v2 = vld [vmem:[%s11252_s1 + $0x18] sm:$0xff]  ;;  %v341_v5 = vld [vmem:[%s11252_s1] sm:$0xff]  ;;  %p6363_p3 = scmp.lt.s32.totalorder %s4831_s10, 1  ;;  %s6006_s19 = smov 64   ;;  %vm2600_vm0 = vcmask 261120  }
   0xe   : > { %v346_v1 = vld [vmem:[%s11252_s1 + $0x28] sm:$0xff]  ;;  %v348_v4 = vld [vmem:[%s11252_s1 + $0x38] sm:$0xff]  ;;  %v345_v6 = vld [vmem:[%s11252_s1 + $0x20] sm:$0xff]  ;;  %s6007_s22 = smov 32   ;;  %s6008_s25 = smov 96   ;;  %vm2598_vm1 = vcmask 261121  }
   0xf   : > { %v6077_v3 = vpack.c.bf16 %v346_v1, %v342_v0  ;;  %v6088_v7 = vpack.c.bf16 %v348_v4, %v344_v2  ;;  %v6090_v8 = vpack.c.bf16 %v345_v6, %v341_v5  ;;  %v343_v9 = vld [vmem:[%s11252_s1 + $0x10] sm:$0xff]  ;;  %v350_v11 = vld [vmem:[%s11252_s1 + $0x48] sm:$0xff]  ;;  %v352_v14 = vld [vmem:[%s11252_s1 + $0x58] sm:$0xff]  ;;  %s11764_s10 = smov (!%p6363_p3, %s4831_s10), 1  ;;  %vm2604_vm2 = vcmask 785665  }
  0x10   : > { %v347_v10 = vld [vmem:[%s11252_s1 + $0x30] sm:$0xff]  ;;  %v354_v13 = vld [vmem:[%s11252_s1 + $0x68] sm:$0xff]  ;;  %v356_v15 = vld [vmem:[%s11252_s1 + $0x78] sm:$0xff]  ;;  %s4858_s28 = sshll.u32 %s11764_s10, 6  ;;  %vm2602_vm3 = vcmask 253952   ;;  %vm2608_vm4 = vcmask 778496  }
  0x11   : > { %4861 = vmatprep.subr.bf16.mxu0 %v6077_v3  ;;  %v6102_v12 = vpack.c.bf16 %v347_v10, %v343_v9  ;;  %4989 = vmatprep.subr.bf16.mxu1 %v6088_v7  ;;  %v6115_v16 = vpack.c.bf16 %v354_v13, %v350_v11  ;;  %v6117_v17 = vpack.c.bf16 %v356_v15, %v352_v14  ;;  %v349_v18 = vld [vmem:[%s11252_s1 + $0x40] sm:$0xff]  ;;  %v351_v20 = vld [vmem:[%s11252_s1 + $0x50] sm:$0xff]  ;;  %v358_v23 = vld [vmem:[%s11252_s1 + $0x88] sm:$0xff]  ;;  %s6484_s29 = scalar_lea.vmem %s11251_s0, %s4858_s28  ;;  %vm2610_vm5 = vcmask 1048321  }
  0x12   : > { %4863 = vmatpush1.bf16.msra.mxu0 %v6090_v8  ;;  %v353_v19 = vld [vmem:[%s11252_s1 + $0x60] sm:$0xff]  ;;  %v355_v22 = vld [vmem:[%s11252_s1 + $0x70] sm:$0xff]  ;;  %v362_v24 = vld [vmem:[%s11252_s1 + $0xa8] sm:$0xff]  ;;  %vm2614_vm7 = vcmask 1041152   ;;  %vm2612_vm8 = vcmask 1048320   ;;  %vm2624_vm9 = vcmask 1040384  }
  0x13   : > { %4991 = vmatpush1.bf16.msra.mxu1 %v6102_v12  ;;  %v6129_v21 = vpack.c.bf16 %v353_v19, %v349_v18  ;;  %4865 = vmatprep.subr.bf16.mxu0 %v6115_v16  ;;  %v6142_v25 = vpack.c.bf16 %v355_v22, %v351_v20  ;;  %v6144_v26 = vpack.c.bf16 %v362_v24, %v358_v23  ;;  %v360_v27 = vld [vmem:[%s11252_s1 + $0x98] sm:$0xff]  ;;  %v357_v29 = vld [vmem:[%s11252_s1 + $0x80] sm:$0xff]  ;;  %v359_v32 = vld [vmem:[%s11252_s1 + $0x90] sm:$0xff]  ;;  %vm2606_vm10 = vcmask 785664  }
  0x14   : > { %4993 = vmatprep.subr.bf16.mxu1 %v6117_v17  ;;  %v364_v28 = vld [vmem:[%s11252_s1 + $0xb8] sm:$0xff]  ;;  %v361_v31 = vld [vmem:[%s11252_s1 + $0xa0] sm:$0xff]  ;;  %v363_v33 = vld [vmem:[%s11252_s1 + $0xb0] sm:$0xff]  ;;  %vm2685_vm11 = vcmask 1047809   ;;  %vm2697_vm12 = vcmask 1040640   ;;  %vm2776_vm13 = vcmask 785409  }
  0x15   : > { %v6155_v30 = vpack.c.bf16 %v364_v28, %v360_v27  ;;  %v6167_v34 = vpack.c.bf16 %v361_v31, %v357_v29  ;;  %v366_v35 = vld [vmem:[%s11252_s1 + $0xc8] sm:$0xff]  ;;  %v368_v37 = vld [vmem:[%s11252_s1 + $0xd8] sm:$0xff]  ;;  %v6180_v38 = vpack.c.bf16 %v363_v33, %v359_v32  ;;  %v365_v41 = vld [vmem:[%s11252_s1 + $0xc0] sm:$0xff]  ;;  %vm2747_vm14 = vcmask 785408  }
  0x16   : > { %4867 = vmatpush1.bf16.msra.mxu0 %v6129_v21  ;;  %v370_v36 = vld [vmem:[%s11252_s1 + $0xe8] sm:$0xff]  ;;  %v372_v40 = vld [vmem:[%s11252_s1 + $0xf8] sm:$0xff]  ;;  %v369_v42 = vld [vmem:[%s11252_s1 + $0xe0] sm:$0xff]  ;;  %vm2787_vm15 = vcmask 778240  }
  0x17   : > { %4995 = vmatpush1.bf16.msra.mxu1 %v6142_v25  ;;  %4869 = vmatprep.subr.bf16.mxu0 %v6144_v26  ;;  %v6182_v39 = vpack.c.bf16 %v370_v36, %v366_v35  ;;  %v6194_v43 = vpack.c.bf16 %v372_v40, %v368_v37  ;;  %v367_v44 = vld [vmem:[%s11252_s1 + $0xd0] sm:$0xff]  ;;  %v374_v46 = vld [vmem:[%s11252_s1 + $0x108] sm:$0xff]  ;;  %v376_v48 = vld [vmem:[%s11252_s1 + $0x118] sm:$0xff]  ;;  %v6215_v50 = vpack.c.bf16 %v369_v42, %v365_v41 }
  0x18   : > { %4997 = vmatprep.subr.bf16.mxu1 %v6155_v30  ;;  %v371_v45 = vld [vmem:[%s11252_s1 + $0xf0] sm:$0xff]  ;;  %v378_v47 = vld [vmem:[%s11252_s1 + $0x128] sm:$0xff]  ;;  %v380_v49 = vld [vmem:[%s11252_s1 + $0x138] sm:$0xff] }
  0x19   : > { %v6219_v51 = vpack.c.bf16 %v371_v45, %v367_v44  ;;  %v6221_v52 = vpack.c.bf16 %v378_v47, %v374_v46  ;;  %v373_v53 = vld [vmem:[%s11252_s1 + $0x100] sm:$0xff]  ;;  %v375_v55 = vld [vmem:[%s11252_s1 + $0x110] sm:$0xff]  ;;  %v6233_v56 = vpack.c.bf16 %v380_v49, %v376_v48  ;;  %v382_v58 = vld [vmem:[%s11252_s1 + $0x148] sm:$0xff] }
  0x1a   : > { %4871 = vmatpush1.bf16.msra.mxu0 %v6167_v34  ;;  %v377_v54 = vld [vmem:[%s11252_s1 + $0x120] sm:$0xff]  ;;  %v379_v57 = vld [vmem:[%s11252_s1 + $0x130] sm:$0xff]  ;;  %v386_v59 = vld [vmem:[%s11252_s1 + $0x168] sm:$0xff] }
  0x1b   : > { %4999 = vmatpush1.bf16.msra.mxu1 %v6180_v38  ;;  %4873 = vmatprep.subr.bf16.mxu0 %v6182_v39  ;;  %v384_v60 = vld [vmem:[%s11252_s1 + $0x158] sm:$0xff]  ;;  %v6251_v62 = vpack.c.bf16 %v377_v54, %v373_v53  ;;  %v6255_v63 = vpack.c.bf16 %v379_v57, %v375_v55  ;;  %v6257_v0 = vpack.c.bf16 %v386_v59, %v382_v58  ;;  %v381_v1 = vld [vmem:[%s11252_s1 + $0x140] sm:$0xff]  ;;  %v383_v4 = vld [vmem:[%s11252_s1 + $0x150] sm:$0xff] }
  0x1c   : > { %5001 = vmatprep.subr.bf16.mxu1 %v6194_v43  ;;  %v388_v61 = vld [vmem:[%s11252_s1 + $0x178] sm:$0xff]  ;;  %v385_v2 = vld [vmem:[%s11252_s1 + $0x160] sm:$0xff]  ;;  %v387_v6 = vld [vmem:[%s11252_s1 + $0x170] sm:$0xff] }
  0x1d   : > { %v6269_v5 = vpack.c.bf16 %v388_v61, %v384_v60  ;;  %v390_v9 = vld [vmem:[%s11252_s1 + $0x188] sm:$0xff]  ;;  %v392_v11 = vld [vmem:[%s11252_s1 + $0x198] sm:$0xff]  ;;  %v6287_v14 = vpack.c.bf16 %v385_v2, %v381_v1  ;;  %v6291_v15 = vpack.c.bf16 %v387_v6, %v383_v4  ;;  %v389_v19 = vld [vmem:[%s11252_s1 + $0x180] sm:$0xff] }
  0x1e   : > { %4875 = vmatpush1.bf16.msra.mxu0 %v6215_v50  ;;  %v394_v10 = vld [vmem:[%s11252_s1 + $0x1a8] sm:$0xff]  ;;  %v396_v13 = vld [vmem:[%s11252_s1 + $0x1b8] sm:$0xff]  ;;  %v393_v20 = vld [vmem:[%s11252_s1 + $0x1a0] sm:$0xff] }
  0x1f   : > { %5003 = vmatpush1.bf16.msra.mxu1 %v6219_v51  ;;  %4877 = vmatprep.subr.bf16.mxu0 %v6221_v52  ;;  %v6293_v18 = vpack.c.bf16 %v394_v10, %v390_v9  ;;  %v391_v22 = vld [vmem:[%s11252_s1 + $0x190] sm:$0xff]  ;;  %v6305_v23 = vpack.c.bf16 %v396_v13, %v392_v11  ;;  %v398_v27 = vld [vmem:[%s11252_s1 + $0x1c8] sm:$0xff]  ;;  %v400_v29 = vld [vmem:[%s11252_s1 + $0x1d8] sm:$0xff]  ;;  %v6323_v32 = vpack.c.bf16 %v393_v20, %v389_v19 }
  0x20   : > { %5005 = vmatprep.subr.bf16.mxu1 %v6233_v56  ;;  %v395_v24 = vld [vmem:[%s11252_s1 + $0x1b0] sm:$0xff]  ;;  %v402_v28 = vld [vmem:[%s11252_s1 + $0x1e8] sm:$0xff]  ;;  %v404_v31 = vld [vmem:[%s11252_s1 + $0x1f8] sm:$0xff] }
  0x21   : > { %v6327_v33 = vpack.c.bf16 %v395_v24, %v391_v22  ;;  %v6329_v35 = vpack.c.bf16 %v402_v28, %v398_v27  ;;  %v397_v36 = vld [vmem:[%s11252_s1 + $0x1c0] sm:$0xff]  ;;  %v399_v40 = vld [vmem:[%s11252_s1 + $0x1d0] sm:$0xff]  ;;  %v6341_v41 = vpack.c.bf16 %v404_v31, %v400_v29  ;;  %v406_v44 = vld [vmem:[%s11252_s1 + $0x208] sm:$0xff] }
  0x22   : > { %4879 = vmatpush1.bf16.msra.mxu0 %v6251_v62  ;;  %v401_v37 = vld [vmem:[%s11252_s1 + $0x1e0] sm:$0xff]  ;;  %v403_v42 = vld [vmem:[%s11252_s1 + $0x1f0] sm:$0xff]  ;;  %v410_v45 = vld [vmem:[%s11252_s1 + $0x228] sm:$0xff] }
  0x23   : > { %5007 = vmatpush1.bf16.msra.mxu1 %v6255_v63  ;;  %4881 = vmatprep.subr.bf16.mxu0 %v6257_v0  ;;  %v408_v46 = vld [vmem:[%s11252_s1 + $0x218] sm:$0xff]  ;;  %v6359_v48 = vpack.c.bf16 %v401_v37, %v397_v36  ;;  %v6369_v49 = vpack.c.bf16 %v403_v42, %v399_v40  ;;  %v6371_v53 = vpack.c.bf16 %v410_v45, %v406_v44  ;;  %v405_v54 = vld [vmem:[%s11252_s1 + $0x200] sm:$0xff]  ;;  %v407_v57 = vld [vmem:[%s11252_s1 + $0x210] sm:$0xff] }
  0x24   : > { %5009 = vmatprep.subr.bf16.mxu1 %v6269_v5  ;;  %v412_v47 = vld [vmem:[%s11252_s1 + $0x238] sm:$0xff]  ;;  %v409_v55 = vld [vmem:[%s11252_s1 + $0x220] sm:$0xff]  ;;  %v411_v59 = vld [vmem:[%s11252_s1 + $0x230] sm:$0xff] }
  0x25   : > { %v6383_v58 = vpack.c.bf16 %v412_v47, %v408_v46  ;;  %v414_v60 = vld [vmem:[%s11252_s1 + $0x248] sm:$0xff]  ;;  %v416_v1 = vld [vmem:[%s11252_s1 + $0x258] sm:$0xff]  ;;  %v6401_v4 = vpack.c.bf16 %v409_v55, %v405_v54  ;;  %v6411_v6 = vpack.c.bf16 %v411_v59, %v407_v57  ;;  %v413_v10 = vld [vmem:[%s11252_s1 + $0x240] sm:$0xff] }
  0x26   : > { %4883 = vmatpush1.bf16.msra.mxu0 %v6287_v14  ;;  %v418_v61 = vld [vmem:[%s11252_s1 + $0x268] sm:$0xff]  ;;  %v420_v2 = vld [vmem:[%s11252_s1 + $0x278] sm:$0xff]  ;;  %v417_v11 = vld [vmem:[%s11252_s1 + $0x260] sm:$0xff] }
  0x27   : > { %5011 = vmatpush1.bf16.msra.mxu1 %v6291_v15  ;;  %4885 = vmatprep.subr.bf16.mxu0 %v6293_v18  ;;  %v6413_v9 = vpack.c.bf16 %v418_v61, %v414_v60  ;;  %v415_v13 = vld [vmem:[%s11252_s1 + $0x250] sm:$0xff]  ;;  %v6425_v19 = vpack.c.bf16 %v420_v2, %v416_v1  ;;  %v422_v22 = vld [vmem:[%s11252_s1 + $0x288] sm:$0xff]  ;;  %v424_v27 = vld [vmem:[%s11252_s1 + $0x298] sm:$0xff]  ;;  %v6443_v29 = vpack.c.bf16 %v417_v11, %v413_v10 }
  0x28   : > { %5013 = vmatprep.subr.bf16.mxu1 %v6305_v23  ;;  %v419_v20 = vld [vmem:[%s11252_s1 + $0x270] sm:$0xff]  ;;  %v426_v24 = vld [vmem:[%s11252_s1 + $0x2a8] sm:$0xff]  ;;  %v428_v28 = vld [vmem:[%s11252_s1 + $0x2b8] sm:$0xff] }
  0x29   : > { %v6448_v31 = vpack.c.bf16 %v419_v20, %v415_v13  ;;  %v6450_v36 = vpack.c.bf16 %v426_v24, %v422_v22  ;;  %v421_v37 = vld [vmem:[%s11252_s1 + $0x280] sm:$0xff]  ;;  %v423_v42 = vld [vmem:[%s11252_s1 + $0x290] sm:$0xff]  ;;  %v6462_v44 = vpack.c.bf16 %v428_v28, %v424_v27  ;;  %v430_v46 = vld [vmem:[%s11252_s1 + $0x2c8] sm:$0xff] }
  0x2a   : > { %4887 = vmatpush1.bf16.msra.mxu0 %v6323_v32  ;;  %v425_v40 = vld [vmem:[%s11252_s1 + $0x2a0] sm:$0xff]  ;;  %v427_v45 = vld [vmem:[%s11252_s1 + $0x2b0] sm:$0xff]  ;;  %v434_v47 = vld [vmem:[%s11252_s1 + $0x2e8] sm:$0xff] }
  0x2b   : > { %5015 = vmatpush1.bf16.msra.mxu1 %v6327_v33  ;;  %4889 = vmatprep.subr.bf16.mxu0 %v6329_v35  ;;  %v432_v54 = vld [vmem:[%s11252_s1 + $0x2d8] sm:$0xff]  ;;  %v6487_v57 = vpack.c.bf16 %v425_v40, %v421_v37  ;;  %v429_v59 = vld [vmem:[%s11252_s1 + $0x2c0] sm:$0xff]  ;;  %v6494_v60 = vpack.c.bf16 %v427_v45, %v423_v42  ;;  %v6496_v61 = vpack.c.bf16 %v434_v47, %v430_v46  ;;  %v431_v2 = vld [vmem:[%s11252_s1 + $0x2d0] sm:$0xff] }
  0x2c   : > { %5017 = vmatprep.subr.bf16.mxu1 %v6341_v41  ;;  %v436_v55 = vld [vmem:[%s11252_s1 + $0x2f8] sm:$0xff]  ;;  %v433_v1 = vld [vmem:[%s11252_s1 + $0x2e0] sm:$0xff]  ;;  %v435_v10 = vld [vmem:[%s11252_s1 + $0x2f0] sm:$0xff] }
  0x2d   : > { %v6508_v11 = vpack.c.bf16 %v436_v55, %v432_v54  ;;  %v438_v13 = vld [vmem:[%s11252_s1 + $0x308] sm:$0xff]  ;;  %v440_v24 = vld [vmem:[%s11252_s1 + $0x318] sm:$0xff]  ;;  %v6528_v28 = vpack.c.bf16 %v433_v1, %v429_v59  ;;  %v6532_v37 = vpack.c.bf16 %v435_v10, %v431_v2  ;;  %v437_v42 = vld [vmem:[%s11252_s1 + $0x300] sm:$0xff] }
  0x2e   : > { %4891 = vmatpush1.bf16.msra.mxu0 %v6359_v48  ;;  %v442_v20 = vld [vmem:[%s11252_s1 + $0x328] sm:$0xff]  ;;  %v444_v27 = vld [vmem:[%s11252_s1 + $0x338] sm:$0xff]  ;;  %v441_v45 = vld [vmem:[%s11252_s1 + $0x320] sm:$0xff] }
  0x2f   : > { %5019 = vmatpush1.bf16.msra.mxu1 %v6369_v49  ;;  %4893 = vmatprep.subr.bf16.mxu0 %v6371_v53  ;;  %v6517_v22 = vld [vmem:[%s6484_s29 + $0x8] sm:$0xff]  ;;  %11427 = vst [vmem:[#allocation4_spill] sm:$0xff] %v6528_v28  ;;  %11428 = vst [vmem:[#allocation5_spill] sm:$0xff] %v6532_v37  ;;  %v6534_v40 = vpack.c.bf16 %v442_v20, %v438_v13  ;;  %v439_v46 = vld [vmem:[%s11252_s1 + $0x310] sm:$0xff]  ;;  %v6546_v47 = vpack.c.bf16 %v444_v27, %v440_v24 }
  0x30   : > { %5021 = vmatprep.subr.bf16.mxu1 %v6383_v58  ;;  %11426 = vst [vmem:[#allocation3_spill] sm:$0xff] %v6517_v22  ;;  %661 = vmatprep.mubr.f32.mxu0 %v6517_v22  ;;  %v443_v54 = vld [vmem:[%s11252_s1 + $0x330] sm:$0xff]  ;;  %v446_v55 = vld [vmem:[%s11252_s1 + $0x348] sm:$0xff]  ;;  %v448_v1 = vld [vmem:[%s11252_s1 + $0x358] sm:$0xff]  ;;  %v6564_v10 = vpack.c.bf16 %v441_v45, %v437_v42 }
  0x31   : > { %815 = vmatprep.mubr.f32.mxu1 %v6517_v22  ;;  %11429 = vst [vmem:[#allocation6_spill] sm:$0xff] %v6534_v40  ;;  %11430 = vst [vmem:[#allocation7_spill] sm:$0xff] %v6546_v47  ;;  %v450_v59 = vld [vmem:[%s11252_s1 + $0x368] sm:$0xff]  ;;  %v452_v2 = vld [vmem:[%s11252_s1 + $0x378] sm:$0xff]  ;;  %v6568_v13 = vpack.c.bf16 %v443_v54, %v439_v46 }
  0x32   : > { %4895 = vmatpush1.bf16.msra.mxu0 %v6401_v4  ;;  %11431 = vst [vmem:[#allocation8_spill] sm:$0xff] %v6564_v10  ;;  %v6570_v20 = vpack.c.bf16 %v450_v59, %v446_v55  ;;  %v445_v24 = vld [vmem:[%s11252_s1 + $0x340] sm:$0xff]  ;;  %v447_v42 = vld [vmem:[%s11252_s1 + $0x350] sm:$0xff]  ;;  %v6582_v45 = vpack.c.bf16 %v452_v2, %v448_v1  ;;  %v454_v54 = vld [vmem:[%s11252_s1 + $0x388] sm:$0xff] }
  0x33   : > { %5023 = vmatpush1.bf16.msra.mxu1 %v6411_v6  ;;  %4897 = vmatprep.subr.bf16.mxu0 %v6413_v9  ;;  %11432 = vst [vmem:[#allocation9_spill] sm:$0xff] %v6568_v13  ;;  %v449_v27 = vld [vmem:[%s11252_s1 + $0x360] sm:$0xff]  ;;  %v451_v46 = vld [vmem:[%s11252_s1 + $0x370] sm:$0xff]  ;;  %v458_v55 = vld [vmem:[%s11252_s1 + $0x3a8] sm:$0xff] }
  0x34   : > { %5025 = vmatprep.subr.bf16.mxu1 %v6425_v19  ;;  %11433 = vst [vmem:[#allocation10_spill] sm:$0xff] %v6570_v20  ;;  %11434 = vst [vmem:[#allocation11_spill] sm:$0xff] %v6582_v45  ;;  %v456_v59 = vld [vmem:[%s11252_s1 + $0x398] sm:$0xff]  ;;  %v6600_v2 = vpack.c.bf16 %v449_v27, %v445_v24  ;;  %v6604_v22 = vpack.c.bf16 %v451_v46, %v447_v42  ;;  %v455_v24 = vld [vmem:[%s11252_s1 + $0x390] sm:$0xff] }
  0x35   : > { %v460_v1 = vld [vmem:[%s11252_s1 + $0x3b8] sm:$0xff]  ;;  %v459_v42 = vld [vmem:[%s11252_s1 + $0x3b0] sm:$0xff]  ;;  %v462_v46 = vld [vmem:[%s11252_s1 + $0x3c8] sm:$0xff] }
  0x36   : > { %4899 = vmatpush1.bf16.msra.mxu0 %v6443_v29  ;;  %11435 = vst [vmem:[#allocation12_spill] sm:$0xff] %v6600_v2  ;;  %11436 = vst [vmem:[#allocation13_spill] sm:$0xff] %v6604_v22  ;;  %v6618_v27 = vpack.c.bf16 %v460_v1, %v456_v59  ;;  %v468_v59 = vld [vmem:[%s11252_s1 + $0x3f8] sm:$0xff] }
  0x37   : > { %5027 = vmatpush1.bf16.msra.mxu1 %v6448_v31  ;;  %4901 = vmatprep.subr.bf16.mxu0 %v6450_v36 }
  0x38   : > { %5029 = vmatprep.subr.bf16.mxu1 %v6462_v44  ;;  %11438 = vst [vmem:[#allocation15_spill] sm:$0xff] %v6618_v27 }
  0x3a   : > { %4903 = vmatpush1.bf16.msra.mxu0 %v6487_v57 }
  0x3b   : > { %5031 = vmatpush1.bf16.msra.mxu1 %v6494_v60  ;;  %4905 = vmatprep.subr.bf16.mxu0 %v6496_v61 }
  0x3c   : > { %5033 = vmatprep.subr.bf16.mxu1 %v6508_v11 }
  0x3e   : > { %4907 = vmatpush1.bf16.msra.mxu0 %v6528_v28 }
  0x3f   : > { %5035 = vmatpush1.bf16.msra.mxu1 %v6532_v37  ;;  %4909 = vmatprep.subr.bf16.mxu0 %v6534_v40  ;;  %v453_v40 = vld [vmem:[%s11252_s1 + $0x380] sm:$0xff] }
  0x40   : > { %5037 = vmatprep.subr.bf16.mxu1 %v6546_v47  ;;  %v6606_v47 = vpack.c.bf16 %v458_v55, %v454_v54  ;;  %v457_v37 = vld [vmem:[%s11252_s1 + $0x3a0] sm:$0xff]  ;;  %v466_v54 = vld [vmem:[%s11252_s1 + $0x3e8] sm:$0xff]  ;;  %v464_v55 = vld [vmem:[%s11252_s1 + $0x3d8] sm:$0xff] }
  0x41   : > { %v6636_v1 = vpack.c.bf16 %v457_v37, %v453_v40  ;;  %v463_v37 = vld [vmem:[%s11252_s1 + $0x3d0] sm:$0xff]  ;;  %v6654_v40 = vpack.c.bf16 %v468_v59, %v464_v55  ;;  %v476_v55 = vld [vmem:[%s11252_s1 + $0x438] sm:$0xff] }
  0x42   : > { %4911 = vmatpush1.bf16.msra.mxu0 %v6564_v10  ;;  %11437 = vst [vmem:[#allocation14_spill] sm:$0xff] %v6606_v47  ;;  %v465_v10 = vld [vmem:[%s11252_s1 + $0x3e0] sm:$0xff] }
  0x43   : > { %5039 = vmatpush1.bf16.msra.mxu1 %v6568_v13  ;;  %4913 = vmatprep.subr.bf16.mxu0 %v6570_v20  ;;  %11439 = vst [vmem:[#allocation16_spill] sm:$0xff] %v6636_v1  ;;  %v6642_v20 = vpack.c.bf16 %v466_v54, %v462_v46  ;;  %v461_v13 = vld [vmem:[%s11252_s1 + $0x3c0] sm:$0xff]  ;;  %11442 = vst [vmem:[#allocation19_spill] sm:$0xff] %v6654_v40  ;;  %v474_v46 = vld [vmem:[%s11252_s1 + $0x428] sm:$0xff] }
  0x44   : > { %5041 = vmatprep.subr.bf16.mxu1 %v6582_v45  ;;  %v6640_v45 = vpack.c.bf16 %v459_v42, %v455_v24  ;;  %v467_v24 = vld [vmem:[%s11252_s1 + $0x3f0] sm:$0xff]  ;;  %v470_v42 = vld [vmem:[%s11252_s1 + $0x408] sm:$0xff]  ;;  %v472_v54 = vld [vmem:[%s11252_s1 + $0x418] sm:$0xff]  ;;  %v6672_v59 = vpack.c.bf16 %v465_v10, %v461_v13 }
  0x45   : > { %11441 = vst [vmem:[#allocation18_spill] sm:$0xff] %v6642_v20  ;;  %v471_v10 = vld [vmem:[%s11252_s1 + $0x410] sm:$0xff]  ;;  %v6690_v13 = vpack.c.bf16 %v476_v55, %v472_v54  ;;  %v484_v54 = vld [vmem:[%s11252_s1 + $0x478] sm:$0xff]  ;;  %v6709_v55 = vld [vmem:[%s6484_s29] sm:$0xff] }
  0x46   : > { %4915 = vmatpush1.bf16.msra.mxu0 %v6600_v2  ;;  %11440 = vst [vmem:[#allocation17_spill] sm:$0xff] %v6640_v45  ;;  %11443 = vst [vmem:[#allocation20_spill] sm:$0xff] %v6672_v59  ;;  %v473_v2 = vld [vmem:[%s11252_s1 + $0x420] sm:$0xff] }
  0x47   : > { %5043 = vmatpush1.bf16.msra.mxu1 %v6604_v22  ;;  %4917 = vmatprep.subr.bf16.mxu0 %v6606_v47  ;;  %v6678_v47 = vpack.c.bf16 %v474_v46, %v470_v42  ;;  %v469_v22 = vld [vmem:[%s11252_s1 + $0x400] sm:$0xff]  ;;  %11446 = vst [vmem:[#allocation23_spill] sm:$0xff] %v6690_v13  ;;  %v482_v42 = vld [vmem:[%s11252_s1 + $0x468] sm:$0xff]  ;;  %v480_v46 = vld [vmem:[%s11252_s1 + $0x458] sm:$0xff] }
  0x48   : > { %5045 = vmatprep.subr.bf16.mxu1 %v6618_v27  ;;  %v6676_v27 = vpack.c.bf16 %v467_v24, %v463_v37  ;;  %v475_v37 = vld [vmem:[%s11252_s1 + $0x430] sm:$0xff]  ;;  %v478_v24 = vld [vmem:[%s11252_s1 + $0x448] sm:$0xff]  ;;  %11447 = vst [vmem:[#allocation24_spill] sm:$0xff] %v6709_v55 }
  0x49   : > { %11445 = vst [vmem:[#allocation22_spill] sm:$0xff] %v6678_v47 }
  0x4a   : > { %4919 = vmatpush1.bf16.msra.mxu0 %v6636_v1  ;;  %11444 = vst [vmem:[#allocation21_spill] sm:$0xff] %v6676_v27  ;;  %v477_v1 = vld [vmem:[%s11252_s1 + $0x440] sm:$0xff] }
  0x4b   : > { %5047 = vmatpush1.bf16.msra.mxu1 %v6640_v45  ;;  %4921 = vmatprep.subr.bf16.mxu0 %v6642_v20  ;;  %v6715_v20 = vpack.c.bf16 %v475_v37, %v471_v10  ;;  %v6717_v45 = vpack.c.bf16 %v482_v42, %v478_v24  ;;  %v483_v10 = vld [vmem:[%s11252_s1 + $0x470] sm:$0xff]  ;;  %v486_v37 = vld [vmem:[%s11252_s1 + $0x488] sm:$0xff]  ;;  %v488_v42 = vld [vmem:[%s11252_s1 + $0x498] sm:$0xff] }
  0x4c   : > { %5049 = vmatprep.subr.bf16.mxu1 %v6654_v40  ;;  %v6711_v40 = vpack.c.bf16 %v473_v2, %v469_v22  ;;  %v479_v22 = vld [vmem:[%s11252_s1 + $0x450] sm:$0xff]  ;;  %v6729_v2 = vpack.c.bf16 %v484_v54, %v480_v46  ;;  %v490_v24 = vld [vmem:[%s11252_s1 + $0x4a8] sm:$0xff]  ;;  %v492_v46 = vld [vmem:[%s11252_s1 + $0x4b8] sm:$0xff] }
  0x4d   : > { %11449 = vst [vmem:[#allocation26_spill] sm:$0xff] %v6715_v20  ;;  %11450 = vst [vmem:[#allocation27_spill] sm:$0xff] %v6717_v45 }
  0x4e   : > { %4923 = vmatpush1.bf16.msra.mxu0 %v6672_v59  ;;  %11448 = vst [vmem:[#allocation25_spill] sm:$0xff] %v6711_v40  ;;  %v481_v59 = vld [vmem:[%s11252_s1 + $0x460] sm:$0xff]  ;;  %11451 = vst [vmem:[#allocation28_spill] sm:$0xff] %v6729_v2 }
  0x4f   : > { %5051 = vmatpush1.bf16.msra.mxu1 %v6676_v27  ;;  %4925 = vmatprep.subr.bf16.mxu0 %v6678_v47  ;;  %v6749_v54 = vpack.c.bf16 %v481_v59, %v477_v1  ;;  %v6755_v47 = vpack.c.bf16 %v490_v24, %v486_v37  ;;  %v485_v27 = vld [vmem:[%s11252_s1 + $0x480] sm:$0xff]  ;;  %v487_v1 = vld [vmem:[%s11252_s1 + $0x490] sm:$0xff]  ;;  %v6767_v59 = vpack.c.bf16 %v492_v46, %v488_v42  ;;  %v498_v37 = vld [vmem:[%s11252_s1 + $0x4e8] sm:$0xff] }
  0x50   : > { %5053 = vmatprep.subr.bf16.mxu1 %v6690_v13  ;;  %v6753_v13 = vpack.c.bf16 %v483_v10, %v479_v22  ;;  %v491_v22 = vld [vmem:[%s11252_s1 + $0x4b0] sm:$0xff]  ;;  %v494_v10 = vld [vmem:[%s11252_s1 + $0x4c8] sm:$0xff]  ;;  %v496_v24 = vld [vmem:[%s11252_s1 + $0x4d8] sm:$0xff] }
  0x51   : > { %662 = vmatmul.mubr.f32.vlgmr.msra.gmra.mrb[0].mxu0 %v6709_v55  ;;  %11452 = vst [vmem:[#allocation29_spill] sm:$0xff] %v6749_v54  ;;  %11454 = vst [vmem:[#allocation31_spill] sm:$0xff] %v6755_v47  ;;  %v500_v42 = vld [vmem:[%s11252_s1 + $0x4f8] sm:$0xff] }
  0x52   : > { %4927 = vmatpush1.bf16.msra.mxu0 %v6711_v40  ;;  %816 = vmatmul.mubr.f32.vlgmr.msra.gmra.mrb[0].mxu1 %v6709_v55  ;;  %11453 = vst [vmem:[#allocation30_spill] sm:$0xff] %v6753_v13  ;;  %v489_v40 = vld [vmem:[%s11252_s1 + $0x4a0] sm:$0xff]  ;;  %11455 = vst [vmem:[#allocation32_spill] sm:$0xff] %v6767_v59 }
  0x53   : > { %5055 = vmatpush1.bf16.msra.mxu1 %v6715_v20  ;;  %4929 = vmatprep.subr.bf16.mxu0 %v6717_v45  ;;  %v6785_v46 = vpack.c.bf16 %v489_v40, %v485_v27  ;;  %v6791_v45 = vpack.c.bf16 %v498_v37, %v494_v10  ;;  %v493_v20 = vld [vmem:[%s11252_s1 + $0x4c0] sm:$0xff]  ;;  %v495_v27 = vld [vmem:[%s11252_s1 + $0x4d0] sm:$0xff]  ;;  %v6803_v40 = vpack.c.bf16 %v500_v42, %v496_v24  ;;  %v506_v10 = vld [vmem:[%s11252_s1 + $0x528] sm:$0xff] }
  0x54   : > { %5057 = vmatprep.subr.bf16.mxu1 %v6729_v2  ;;  %v6789_v2 = vpack.c.bf16 %v491_v22, %v487_v1  ;;  %v497_v55 = vld [vmem:[%s11252_s1 + $0x4e0] sm:$0xff]  ;;  %v499_v1 = vld [vmem:[%s11252_s1 + $0x4f0] sm:$0xff]  ;;  %v502_v22 = vld [vmem:[%s11252_s1 + $0x508] sm:$0xff] }
  0x55   : > { %11456 = vst [vmem:[#allocation33_spill] sm:$0xff] %v6785_v46  ;;  %11458 = vst [vmem:[#allocation35_spill] sm:$0xff] %v6791_v45  ;;  %v504_v37 = vld [vmem:[%s11252_s1 + $0x518] sm:$0xff]  ;;  %v6821_v42 = vpack.c.bf16 %v497_v55, %v493_v20  ;;  %v503_v20 = vld [vmem:[%s11252_s1 + $0x510] sm:$0xff] }
  0x56   : > { %4931 = vmatpush1.bf16.msra.mxu0 %v6749_v54  ;;  %11457 = vst [vmem:[#allocation34_spill] sm:$0xff] %v6789_v2  ;;  %11459 = vst [vmem:[#allocation36_spill] sm:$0xff] %v6803_v40  ;;  %v508_v24 = vld [vmem:[%s11252_s1 + $0x538] sm:$0xff]  ;;  %v505_v54 = vld [vmem:[%s11252_s1 + $0x520] sm:$0xff] }
  0x57   : > { %5059 = vmatpush1.bf16.msra.mxu1 %v6753_v13  ;;  %4933 = vmatprep.subr.bf16.mxu0 %v6755_v47  ;;  %11460 = vst [vmem:[#allocation37_spill] sm:$0xff] %v6821_v42  ;;  %v6827_v47 = vpack.c.bf16 %v506_v10, %v502_v22  ;;  %v501_v13 = vld [vmem:[%s11252_s1 + $0x500] sm:$0xff]  ;;  %v6839_v55 = vpack.c.bf16 %v508_v24, %v504_v37  ;;  %v514_v22 = vld [vmem:[%s11252_s1 + $0x568] sm:$0xff]  ;;  %v512_v10 = vld [vmem:[%s11252_s1 + $0x558] sm:$0xff] }
  0x58   : > { %5061 = vmatprep.subr.bf16.mxu1 %v6767_v59  ;;  %v6825_v59 = vpack.c.bf16 %v499_v1, %v495_v27  ;;  %v507_v27 = vld [vmem:[%s11252_s1 + $0x530] sm:$0xff]  ;;  %v510_v1 = vld [vmem:[%s11252_s1 + $0x548] sm:$0xff]  ;;  %v516_v37 = vld [vmem:[%s11252_s1 + $0x578] sm:$0xff]  ;;  %v6857_v24 = vpack.c.bf16 %v505_v54, %v501_v13 }
  0x59   : > { %11462 = vst [vmem:[#allocation39_spill] sm:$0xff] %v6827_v47  ;;  %11463 = vst [vmem:[#allocation40_spill] sm:$0xff] %v6839_v55  ;;  %v511_v13 = vld [vmem:[%s11252_s1 + $0x550] sm:$0xff]  ;;  %v6875_v54 = vpack.c.bf16 %v516_v37, %v512_v10  ;;  %v524_v10 = vld [vmem:[%s11252_s1 + $0x5b8] sm:$0xff] }
  0x5a   : > { %4935 = vmatpush1.bf16.msra.mxu0 %v6785_v46  ;;  %11461 = vst [vmem:[#allocation38_spill] sm:$0xff] %v6825_v59  ;;  %11464 = vst [vmem:[#allocation41_spill] sm:$0xff] %v6857_v24  ;;  %v6893_v37 = vld [vmem:[%s6484_s29 + $0x28] sm:$0xff] }
  0x5b   : > { %5063 = vmatpush1.bf16.msra.mxu1 %v6789_v2  ;;  %4937 = vmatprep.subr.bf16.mxu0 %v6791_v45  ;;  %v6863_v45 = vpack.c.bf16 %v514_v22, %v510_v1  ;;  %v509_v2 = vld [vmem:[%s11252_s1 + $0x540] sm:$0xff]  ;;  %11467 = vst [vmem:[#allocation44_spill] sm:$0xff] %v6875_v54  ;;  %v522_v1 = vld [vmem:[%s11252_s1 + $0x5a8] sm:$0xff]  ;;  %v520_v22 = vld [vmem:[%s11252_s1 + $0x598] sm:$0xff] }
  0x5c   : > { %5065 = vmatprep.subr.bf16.mxu1 %v6803_v40  ;;  %v6861_v40 = vpack.c.bf16 %v507_v27, %v503_v20  ;;  %v515_v20 = vld [vmem:[%s11252_s1 + $0x570] sm:$0xff]  ;;  %v518_v27 = vld [vmem:[%s11252_s1 + $0x588] sm:$0xff]  ;;  %11468 = vst [vmem:[#allocation45_spill] sm:$0xff] %v6893_v37  ;;  %667 = vmatprep.mubr.f32.mxu0 %v6893_v37 }
  0x5d   : > { %11466 = vst [vmem:[#allocation43_spill] sm:$0xff] %v6863_v45  ;;  %v6907_v46 = vpack.c.bf16 %v515_v20, %v511_v13  ;;  %v6909_v28 = vpack.c.bf16 %v522_v1, %v518_v27  ;;  %v526_v13 = vld [vmem:[%s11252_s1 + $0x5c8] sm:$0xff]  ;;  %821 = vmatprep.mubr.f32.mxu1 %v6893_v37  ;;  %v6931_v27 = vld [vmem:[%s6484_s29 + $0x18] sm:$0xff]  ;;  %v525_v37 = vld [vmem:[%s11252_s1 + $0x5c0] sm:$0xff] }
  0x5e   : > { %4939 = vmatpush1.bf16.msra.mxu0 %v6821_v42  ;;  %11465 = vst [vmem:[#allocation42_spill] sm:$0xff] %v6861_v40  ;;  %v513_v42 = vld [vmem:[%s11252_s1 + $0x560] sm:$0xff]  ;;  %v530_v20 = vld [vmem:[%s11252_s1 + $0x5e8] sm:$0xff]  ;;  %11473 = vst [vmem:[#allocation50_spill] sm:$0xff] %v6931_v27 }
  0x5f   : > { %5067 = vmatpush1.bf16.msra.mxu1 %v6825_v59  ;;  %4941 = vmatprep.subr.bf16.mxu0 %v6827_v47  ;;  %v517_v47 = vld [vmem:[%s11252_s1 + $0x580] sm:$0xff]  ;;  %11470 = vst [vmem:[#allocation47_spill] sm:$0xff] %v6907_v46  ;;  %11471 = vst [vmem:[#allocation48_spill] sm:$0xff] %v6909_v28  ;;  %v528_v1 = vld [vmem:[%s11252_s1 + $0x5d8] sm:$0xff] }
  0x60   : > { %5069 = vmatprep.subr.bf16.mxu1 %v6839_v55  ;;  %v6896_v55 = vpack.c.bf16 %v513_v42, %v509_v2  ;;  %v6903_v59 = vld [vmem:[%s6484_s29 + $0x20] sm:$0xff]  ;;  %v519_v42 = vld [vmem:[%s11252_s1 + $0x590] sm:$0xff] }
  0x61   : > { %v521_v2 = vld [vmem:[%s11252_s1 + $0x5a0] sm:$0xff]  ;;  %668 = vmatmul.mubr.f32.gmra.mrb[2].mxu0 %v6903_v59  ;;  %822 = vmatmul.mubr.f32.gmra.mrb[2].mxu1 %v6903_v59 }
  0x62   : > { %4943 = vmatpush1.bf16.msra.mxu0 %v6857_v24  ;;  %11469 = vst [vmem:[#allocation46_spill] sm:$0xff] %v6896_v55  ;;  %v523_v24 = vld [vmem:[%s11252_s1 + $0x5b0] sm:$0xff]  ;;  %738 = vmatprep.mubr.f32.mxu0 %v6931_v27 }
  0x63   : > { %5071 = vmatpush1.bf16.msra.mxu1 %v6861_v40  ;;  %4945 = vmatprep.subr.bf16.mxu0 %v6863_v45  ;;  %v6921_v40 = vpack.c.bf16 %v524_v10, %v520_v22  ;;  %v532_v22 = vld [vmem:[%s11252_s1 + $0x5f8] sm:$0xff]  ;;  %v6942_v10 = vpack.c.bf16 %v521_v2, %v517_v47  ;;  %v6949_v45 = vpack.c.bf16 %v530_v20, %v526_v13  ;;  %v527_v47 = vld [vmem:[%s11252_s1 + $0x5d0] sm:$0xff]  ;;  %v538_v13 = vld [vmem:[%s11252_s1 + $0x628] sm:$0xff] }
  0x64   : > { %5073 = vmatprep.subr.bf16.mxu1 %v6875_v54  ;;  %v6947_v54 = vpack.c.bf16 %v523_v24, %v519_v42  ;;  %v6961_v2 = vpack.c.bf16 %v532_v22, %v528_v1  ;;  %v531_v24 = vld [vmem:[%s11252_s1 + $0x5f0] sm:$0xff]  ;;  %v534_v42 = vld [vmem:[%s11252_s1 + $0x608] sm:$0xff]  ;;  %892 = vmatprep.mubr.f32.mxu1 %v6931_v27  ;;  %v536_v20 = vld [vmem:[%s11252_s1 + $0x618] sm:$0xff] }
  0x65   : > { %11472 = vst [vmem:[#allocation49_spill] sm:$0xff] %v6921_v40  ;;  %11474 = vst [vmem:[#allocation51_spill] sm:$0xff] %v6942_v10  ;;  %v540_v1 = vld [vmem:[%s11252_s1 + $0x638] sm:$0xff]  ;;  %v537_v27 = vld [vmem:[%s11252_s1 + $0x620] sm:$0xff] }
  0x66   : > { %4947 = vmatpush1.bf16.msra.mxu0 %v6896_v55  ;;  %11475 = vst [vmem:[#allocation52_spill] sm:$0xff] %v6947_v54  ;;  %11476 = vst [vmem:[#allocation53_spill] sm:$0xff] %v6949_v45  ;;  %v529_v55 = vld [vmem:[%s11252_s1 + $0x5e0] sm:$0xff] }
  0x67   : > { %5075 = vmatpush1.bf16.msra.mxu1 %v6907_v46  ;;  %4949 = vmatprep.subr.bf16.mxu0 %v6909_v28  ;;  %11477 = vst [vmem:[#allocation54_spill] sm:$0xff] %v6961_v2  ;;  %v6980_v22 = vpack.c.bf16 %v529_v55, %v525_v37  ;;  %v6986_v28 = vpack.c.bf16 %v538_v13, %v534_v42  ;;  %v533_v46 = vld [vmem:[%s11252_s1 + $0x600] sm:$0xff]  ;;  %v535_v55 = vld [vmem:[%s11252_s1 + $0x610] sm:$0xff]  ;;  %v546_v42 = vld [vmem:[%s11252_s1 + $0x668] sm:$0xff] }
  0x68   : > { %5077 = vmatprep.subr.bf16.mxu1 %v6921_v40  ;;  %v6984_v40 = vpack.c.bf16 %v531_v24, %v527_v47  ;;  %v6998_v37 = vpack.c.bf16 %v540_v1, %v536_v20  ;;  %v539_v47 = vld [vmem:[%s11252_s1 + $0x630] sm:$0xff]  ;;  %v542_v24 = vld [vmem:[%s11252_s1 + $0x648] sm:$0xff]  ;;  %v544_v13 = vld [vmem:[%s11252_s1 + $0x658] sm:$0xff]  ;;  %v7016_v1 = vpack.c.bf16 %v537_v27, %v533_v46 }
  0x69   : > { %11478 = vst [vmem:[#allocation55_spill] sm:$0xff] %v6980_v22  ;;  %11480 = vst [vmem:[#allocation57_spill] sm:$0xff] %v6986_v28  ;;  %v548_v20 = vld [vmem:[%s11252_s1 + $0x678] sm:$0xff]  ;;  %v543_v46 = vld [vmem:[%s11252_s1 + $0x650] sm:$0xff] }
  0x6a   : > { %4951 = vmatpush1.bf16.msra.mxu0 %v6942_v10  ;;  %11479 = vst [vmem:[#allocation56_spill] sm:$0xff] %v6984_v40  ;;  %11481 = vst [vmem:[#allocation58_spill] sm:$0xff] %v6998_v37  ;;  %v545_v10 = vld [vmem:[%s11252_s1 + $0x660] sm:$0xff]  ;;  %v7034_v27 = vpack.c.bf16 %v548_v20, %v544_v13  ;;  %v556_v13 = vld [vmem:[%s11252_s1 + $0x6b8] sm:$0xff] }
  0x6b   : > { %5079 = vmatpush1.bf16.msra.mxu1 %v6947_v54  ;;  %4953 = vmatprep.subr.bf16.mxu0 %v6949_v45  ;;  %11482 = vst [vmem:[#allocation59_spill] sm:$0xff] %v7016_v1  ;;  %v7022_v45 = vpack.c.bf16 %v546_v42, %v542_v24  ;;  %v541_v54 = vld [vmem:[%s11252_s1 + $0x640] sm:$0xff]  ;;  %v554_v24 = vld [vmem:[%s11252_s1 + $0x6a8] sm:$0xff]  ;;  %v552_v42 = vld [vmem:[%s11252_s1 + $0x698] sm:$0xff] }
  0x6c   : > { %5081 = vmatprep.subr.bf16.mxu1 %v6961_v2  ;;  %v7020_v2 = vpack.c.bf16 %v539_v47, %v535_v55  ;;  %11485 = vst [vmem:[#allocation62_spill] sm:$0xff] %v7034_v27  ;;  %v547_v55 = vld [vmem:[%s11252_s1 + $0x670] sm:$0xff]  ;;  %v550_v47 = vld [vmem:[%s11252_s1 + $0x688] sm:$0xff]  ;;  %v7052_v20 = vpack.c.bf16 %v545_v10, %v541_v54  ;;  %v7070_v10 = vpack.c.bf16 %v556_v13, %v552_v42  ;;  %v564_v42 = vld [vmem:[%s11252_s1 + $0x6f8] sm:$0xff] }
  0x6d   : > { %11484 = vst [vmem:[#allocation61_spill] sm:$0xff] %v7022_v45  ;;  %v551_v54 = vld [vmem:[%s11252_s1 + $0x690] sm:$0xff] }
  0x6e   : > { %4955 = vmatpush1.bf16.msra.mxu0 %v6980_v22  ;;  %11483 = vst [vmem:[#allocation60_spill] sm:$0xff] %v7020_v2  ;;  %11486 = vst [vmem:[#allocation63_spill] sm:$0xff] %v7052_v20  ;;  %v553_v22 = vld [vmem:[%s11252_s1 + $0x6a0] sm:$0xff] }
  0x6f   : > { %5083 = vmatpush1.bf16.msra.mxu1 %v6984_v40  ;;  %4957 = vmatprep.subr.bf16.mxu0 %v6986_v28  ;;  %v7058_v28 = vpack.c.bf16 %v554_v24, %v550_v47  ;;  %v549_v40 = vld [vmem:[%s11252_s1 + $0x680] sm:$0xff]  ;;  %11489 = vst [vmem:[#allocation66_spill] sm:$0xff] %v7070_v10  ;;  %v562_v47 = vld [vmem:[%s11252_s1 + $0x6e8] sm:$0xff]  ;;  %v560_v24 = vld [vmem:[%s11252_s1 + $0x6d8] sm:$0xff] }
  0x70   : > { %5085 = vmatprep.subr.bf16.mxu1 %v6998_v37  ;;  %v7056_v37 = vpack.c.bf16 %v547_v55, %v543_v46  ;;  %v555_v46 = vld [vmem:[%s11252_s1 + $0x6b0] sm:$0xff]  ;;  %v558_v55 = vld [vmem:[%s11252_s1 + $0x6c8] sm:$0xff]  ;;  %v7088_v13 = vpack.c.bf16 %v553_v22, %v549_v40  ;;  %v7106_v22 = vpack.c.bf16 %v564_v42, %v560_v24  ;;  %v572_v24 = vld [vmem:[%s11252_s1 + $0x738] sm:$0xff] }
  0x71   : > { %11488 = vst [vmem:[#allocation65_spill] sm:$0xff] %v7058_v28  ;;  %v559_v40 = vld [vmem:[%s11252_s1 + $0x6d0] sm:$0xff] }
  0x72   : > { %4959 = vmatpush1.bf16.msra.mxu0 %v7016_v1  ;;  %11487 = vst [vmem:[#allocation64_spill] sm:$0xff] %v7056_v37  ;;  %11490 = vst [vmem:[#allocation67_spill] sm:$0xff] %v7088_v13  ;;  %v561_v1 = vld [vmem:[%s11252_s1 + $0x6e0] sm:$0xff] }
  0x73   : > { %5087 = vmatpush1.bf16.msra.mxu1 %v7020_v2  ;;  %4961 = vmatprep.subr.bf16.mxu0 %v7022_v45  ;;  %v7094_v45 = vpack.c.bf16 %v562_v47, %v558_v55  ;;  %v557_v2 = vld [vmem:[%s11252_s1 + $0x6c0] sm:$0xff]  ;;  %11493 = vst [vmem:[#allocation70_spill] sm:$0xff] %v7106_v22  ;;  %v570_v55 = vld [vmem:[%s11252_s1 + $0x728] sm:$0xff]  ;;  %v568_v47 = vld [vmem:[%s11252_s1 + $0x718] sm:$0xff] }
  0x74   : > { %5089 = vmatprep.subr.bf16.mxu1 %v7034_v27  ;;  %v7092_v27 = vpack.c.bf16 %v555_v46, %v551_v54  ;;  %v563_v54 = vld [vmem:[%s11252_s1 + $0x6f0] sm:$0xff]  ;;  %v566_v46 = vld [vmem:[%s11252_s1 + $0x708] sm:$0xff]  ;;  %v7124_v42 = vpack.c.bf16 %v561_v1, %v557_v2  ;;  %v7142_v1 = vpack.c.bf16 %v572_v24, %v568_v47  ;;  %v580_v47 = vld [vmem:[%s11252_s1 + $0x778] sm:$0xff] }
  0x75   : > { %11492 = vst [vmem:[#allocation69_spill] sm:$0xff] %v7094_v45  ;;  %v567_v2 = vld [vmem:[%s11252_s1 + $0x710] sm:$0xff] }
  0x76   : > { %4963 = vmatpush1.bf16.msra.mxu0 %v7052_v20  ;;  %11491 = vst [vmem:[#allocation68_spill] sm:$0xff] %v7092_v27  ;;  %11494 = vst [vmem:[#allocation71_spill] sm:$0xff] %v7124_v42  ;;  %v569_v20 = vld [vmem:[%s11252_s1 + $0x720] sm:$0xff] }
  0x77   : > { %5091 = vmatpush1.bf16.msra.mxu1 %v7056_v37  ;;  %4965 = vmatprep.subr.bf16.mxu0 %v7058_v28  ;;  %v7130_v28 = vpack.c.bf16 %v570_v55, %v566_v46  ;;  %v565_v37 = vld [vmem:[%s11252_s1 + $0x700] sm:$0xff]  ;;  %11497 = vst [vmem:[#allocation74_spill] sm:$0xff] %v7142_v1  ;;  %v578_v46 = vld [vmem:[%s11252_s1 + $0x768] sm:$0xff]  ;;  %v576_v55 = vld [vmem:[%s11252_s1 + $0x758] sm:$0xff] }
  0x78   : > { %5093 = vmatprep.subr.bf16.mxu1 %v7070_v10  ;;  %v7128_v10 = vpack.c.bf16 %v563_v54, %v559_v40  ;;  %v571_v40 = vld [vmem:[%s11252_s1 + $0x730] sm:$0xff]  ;;  %v574_v54 = vld [vmem:[%s11252_s1 + $0x748] sm:$0xff]  ;;  %v7160_v24 = vpack.c.bf16 %v569_v20, %v565_v37  ;;  %v7178_v20 = vpack.c.bf16 %v580_v47, %v576_v55  ;;  %v588_v55 = vld [vmem:[%s11252_s1 + $0x7b8] sm:$0xff] }
  0x79   : > { %11496 = vst [vmem:[#allocation73_spill] sm:$0xff] %v7130_v28  ;;  %v575_v37 = vld [vmem:[%s11252_s1 + $0x750] sm:$0xff] }
  0x7a   : > { %4967 = vmatpush1.bf16.msra.mxu0 %v7088_v13  ;;  %11495 = vst [vmem:[#allocation72_spill] sm:$0xff] %v7128_v10  ;;  %v577_v13 = vld [vmem:[%s11252_s1 + $0x760] sm:$0xff]  ;;  %11500 = vst [vmem:[#allocation77_spill] sm:$0xff] %v7178_v20 }
  0x7b   : > { %5095 = vmatpush1.bf16.msra.mxu1 %v7092_v27  ;;  %4969 = vmatprep.subr.bf16.mxu0 %v7094_v45  ;;  %v7166_v45 = vpack.c.bf16 %v578_v46, %v574_v54  ;;  %v573_v27 = vld [vmem:[%s11252_s1 + $0x740] sm:$0xff]  ;;  %v586_v54 = vld [vmem:[%s11252_s1 + $0x7a8] sm:$0xff]  ;;  %v584_v46 = vld [vmem:[%s11252_s1 + $0x798] sm:$0xff] }
  0x7c   : > { %5097 = vmatprep.subr.bf16.mxu1 %v7106_v22  ;;  %v7164_v22 = vpack.c.bf16 %v571_v40, %v567_v2  ;;  %v579_v2 = vld [vmem:[%s11252_s1 + $0x770] sm:$0xff]  ;;  %v582_v40 = vld [vmem:[%s11252_s1 + $0x788] sm:$0xff]  ;;  %v7196_v47 = vpack.c.bf16 %v577_v13, %v573_v27  ;;  %v7214_v13 = vpack.c.bf16 %v588_v55, %v584_v46  ;;  %v596_v46 = vld [vmem:[%s11252_s1 + $0x7f8] sm:$0xff] }
  0x7d   : > { %11499 = vst [vmem:[#allocation76_spill] sm:$0xff] %v7166_v45  ;;  %v583_v27 = vld [vmem:[%s11252_s1 + $0x790] sm:$0xff] }
  0x7e   : > { %4971 = vmatpush1.bf16.msra.mxu0 %v7124_v42  ;;  %11498 = vst [vmem:[#allocation75_spill] sm:$0xff] %v7164_v22  ;;  %11501 = vst [vmem:[#allocation78_spill] sm:$0xff] %v7196_v47  ;;  %v585_v42 = vld [vmem:[%s11252_s1 + $0x7a0] sm:$0xff] }
  0x7f   : > { %5099 = vmatpush1.bf16.msra.mxu1 %v7128_v10  ;;  %4973 = vmatprep.subr.bf16.mxu0 %v7130_v28  ;;  %v7202_v28 = vpack.c.bf16 %v586_v54, %v582_v40  ;;  %v581_v10 = vld [vmem:[%s11252_s1 + $0x780] sm:$0xff]  ;;  %v594_v40 = vld [vmem:[%s11252_s1 + $0x7e8] sm:$0xff]  ;;  %v592_v54 = vld [vmem:[%s11252_s1 + $0x7d8] sm:$0xff] }
  0x80   : > { %5101 = vmatprep.subr.bf16.mxu1 %v7142_v1  ;;  %v7200_v1 = vpack.c.bf16 %v579_v2, %v575_v37  ;;  %v587_v37 = vld [vmem:[%s11252_s1 + $0x7b0] sm:$0xff]  ;;  %v590_v2 = vld [vmem:[%s11252_s1 + $0x7c8] sm:$0xff]  ;;  %v7232_v55 = vpack.c.bf16 %v585_v42, %v581_v10  ;;  %v7247_v10 = vpack.c.bf16 %v596_v46, %v592_v54  ;;  %v7269_v54 = vld [vmem:[%s6484_s29 + $0x38] sm:$0xff] }
  0x81   : > { %v591_v42 = vld [vmem:[%s11252_s1 + $0x7d0] sm:$0xff]  ;;  %v11532_v46 = vld [vmem:[#allocation31_spill] sm:$0xff] }
  0x82   : > { %4975 = vmatpush1.bf16.msra.mxu0 %v7160_v24 }
  0x83   : > { %5103 = vmatpush1.bf16.msra.mxu1 %v7164_v22  ;;  %4977 = vmatprep.subr.bf16.mxu0 %v7166_v45  ;;  %v7238_v45 = vpack.c.bf16 %v594_v40, %v590_v2  ;;  %v589_v22 = vld [vmem:[%s11252_s1 + $0x7c0] sm:$0xff]  ;;  %v7265_v40 = vld [vmem:[%s6484_s29 + $0x10] sm:$0xff] }
  0x84   : > { %5105 = vmatprep.subr.bf16.mxu1 %v7178_v20  ;;  %v7236_v20 = vpack.c.bf16 %v587_v37, %v583_v27  ;;  %v595_v27 = vld [vmem:[%s11252_s1 + $0x7f0] sm:$0xff] }
  0x85   : > { %v7260_v2 = vpack.c.bf16 %v595_v27, %v591_v42  ;;  %v11533_v42 = vld [vmem:[#allocation32_spill] sm:$0xff]  ;;  %v11534_v27 = vld [vmem:[#allocation33_spill] sm:$0xff] }
  0x86   : > { %4979 = vmatpush1.bf16.msra.mxu0 %v7196_v47  ;;  %v593_v47 = vld [vmem:[%s11252_s1 + $0x7e0] sm:$0xff] }
  0x87   : > { %5107 = vmatpush1.bf16.msra.mxu1 %v7200_v1  ;;  %4981 = vmatprep.subr.bf16.mxu0 %v7202_v28  ;;  %v7256_v37 = vpack.c.bf16 %v593_v47, %v589_v22  ;;  %v7277_v22 = vld [vmem:[%s6484_s29 + $0x30] sm:$0xff] }
  0x88   : > { %5109 = vmatprep.subr.bf16.mxu1 %v7214_v13  ;;  %v11531_v47 = vld [vmem:[#allocation30_spill] sm:$0xff] }
  0x8a   : > { %4983 = vmatpush1.bf16.msra.mxu0 %v7232_v55 }
  0x8b   : > { %5111 = vmatpush1.bf16.msra.mxu1 %v7236_v20  ;;  %4985 = vmatprep.subr.bf16.mxu0 %v7238_v45 }
  0x8c   : > { %5113 = vmatprep.subr.bf16.mxu1 %v7247_v10 }
  0x8e   : > { %4987 = vmatpush1.bf16.msra.mxu0 %v7256_v37 }
  0x8f   : > { %5115 = vmatpush1.bf16.msra.mxu1 %v7260_v2  ;;  %5117 = vmatprep.subr.bf16.mxu0 %v6077_v3  ;;  %v11502_v3 = vld [vmem:[#allocation4_spill] sm:$0xff] }
  0x90   : > { %5245 = vmatprep.subr.bf16.mxu1 %v6088_v7  ;;  %v11503_v7 = vld [vmem:[#allocation5_spill] sm:$0xff] }
  0x91   : > { %739 = vmatmul.mubr.f32.vlgmr.msra.gmra.mrb[0].mxu0 %v7265_v40 }
  0x92   : > { %893 = vmatmul.mubr.f32.vlgmr.msra.gmra.mrb[0].mxu1 %v7265_v40  ;;  %744 = vmatprep.mubr.f32.mxu0 %v7269_v54 }
  0x93   : > { %898 = vmatprep.mubr.f32.mxu1 %v7269_v54  ;;  %5119 = vmatpush1.bf16.msra.mxu0 %v6090_v8  ;;  %v11504_v8 = vld [vmem:[#allocation6_spill] sm:$0xff] }
  0x94   : > { %5247 = vmatpush1.bf16.msra.mxu1 %v6102_v12  ;;  %5121 = vmatprep.subr.bf16.mxu0 %v6115_v16  ;;  %v11505_v12 = vld [vmem:[#allocation7_spill] sm:$0xff]  ;;  %v11506_v16 = vld [vmem:[#allocation8_spill] sm:$0xff] }
  0x95   : > { %745 = vmatmul.mubr.f32.gmra.mrb[2].mxu0 %v7277_v22  ;;  %5249 = vmatprep.subr.bf16.mxu1 %v6117_v17  ;;  %v11507_v17 = vld [vmem:[#allocation9_spill] sm:$0xff] }
  0x96   : > { %899 = vmatmul.mubr.f32.gmra.mrb[2].mxu1 %v7277_v22 }
  0x97   : > { %5123 = vmatpush1.bf16.msra.mxu0 %v6129_v21  ;;  %v11508_v21 = vld [vmem:[#allocation10_spill] sm:$0xff] }
  0x98   : > { %5251 = vmatpush1.bf16.msra.mxu1 %v6142_v25  ;;  %5125 = vmatprep.subr.bf16.mxu0 %v6144_v26  ;;  %v11509_v25 = vld [vmem:[#allocation11_spill] sm:$0xff]  ;;  %v11510_v26 = vld [vmem:[#allocation12_spill] sm:$0xff] }
  0x99   : > { %5253 = vmatprep.subr.bf16.mxu1 %v6155_v30  ;;  %v11511_v30 = vld [vmem:[#allocation13_spill] sm:$0xff] }
  0x9b   : > { %5127 = vmatpush1.bf16.msra.mxu0 %v6167_v34  ;;  %v11512_v34 = vld [vmem:[#allocation14_spill] sm:$0xff] }
  0x9c   : > { %5255 = vmatpush1.bf16.msra.mxu1 %v6180_v38  ;;  %5129 = vmatprep.subr.bf16.mxu0 %v6182_v39  ;;  %v11513_v38 = vld [vmem:[#allocation15_spill] sm:$0xff]  ;;  %v11514_v39 = vld [vmem:[#allocation16_spill] sm:$0xff] }
  0x9d   : > { %5257 = vmatprep.subr.bf16.mxu1 %v6194_v43  ;;  %v11515_v43 = vld [vmem:[#allocation17_spill] sm:$0xff] }
  0x9f   : > { %5131 = vmatpush1.bf16.msra.mxu0 %v6215_v50  ;;  %v11516_v50 = vld [vmem:[#allocation18_spill] sm:$0xff] }
  0xa0   : > { %5259 = vmatpush1.bf16.msra.mxu1 %v6219_v51  ;;  %5133 = vmatprep.subr.bf16.mxu0 %v6221_v52  ;;  %v11517_v51 = vld [vmem:[#allocation19_spill] sm:$0xff]  ;;  %v11518_v52 = vld [vmem:[#allocation20_spill] sm:$0xff] }
  0xa1   : > { %5261 = vmatprep.subr.bf16.mxu1 %v6233_v56  ;;  %v11519_v56 = vld [vmem:[#allocation21_spill] sm:$0xff] }
  0xa3   : > { %5135 = vmatpush1.bf16.msra.mxu0 %v6251_v62  ;;  %v11520_v62 = vld [vmem:[#allocation22_spill] sm:$0xff] }
  0xa4   : > { %5263 = vmatpush1.bf16.msra.mxu1 %v6255_v63  ;;  %5137 = vmatprep.subr.bf16.mxu0 %v6257_v0  ;;  %v11521_v63 = vld [vmem:[#allocation23_spill] sm:$0xff] }
  0xa5   : > { %5265 = vmatprep.subr.bf16.mxu1 %v6269_v5  ;;  %v11522_v5 = vld [vmem:[#allocation24_spill] sm:$0xff] }
  0xa7   : > { %5139 = vmatpush1.bf16.msra.mxu0 %v6287_v14 }
  0xa8   : > { %5267 = vmatpush1.bf16.msra.mxu1 %v6291_v15  ;;  %5141 = vmatprep.subr.bf16.mxu0 %v6293_v18 }
  0xa9   : > { %5269 = vmatprep.subr.bf16.mxu1 %v6305_v23  ;;  %v11523_v23 = vld [vmem:[#allocation3_spill] sm:$0xff] }
  0xab   : > { %5143 = vmatpush1.bf16.msra.mxu0 %v6323_v32 }
  0xac   : > { %5271 = vmatpush1.bf16.msra.mxu1 %v6327_v33  ;;  %5145 = vmatprep.subr.bf16.mxu0 %v6329_v35 }
  0xad   : > { %5273 = vmatprep.subr.bf16.mxu1 %v6341_v41 }
  0xaf   : > { %5147 = vmatpush1.bf16.msra.mxu0 %v6359_v48 }
  0xb0   : > { %5275 = vmatpush1.bf16.msra.mxu1 %v6369_v49  ;;  %5149 = vmatprep.subr.bf16.mxu0 %v6371_v53 }
  0xb1   : > { %5277 = vmatprep.subr.bf16.mxu1 %v6383_v58 }
  0xb3   : > { %5151 = vmatpush1.bf16.msra.mxu0 %v6401_v4  ;;  %v11524_v4 = vld [vmem:[#allocation45_spill] sm:$0xff] }
  0xb4   : > { %5279 = vmatpush1.bf16.msra.mxu1 %v6411_v6  ;;  %5153 = vmatprep.subr.bf16.mxu0 %v6413_v9 }
  0xb5   : > { %5281 = vmatprep.subr.bf16.mxu1 %v6425_v19  ;;  %v11525_v19 = vld [vmem:[#allocation50_spill] sm:$0xff] }
  0xb7   : > { %5155 = vmatpush1.bf16.msra.mxu0 %v6443_v29 }
  0xb8   : > { %5283 = vmatpush1.bf16.msra.mxu1 %v6448_v31  ;;  %5157 = vmatprep.subr.bf16.mxu0 %v6450_v36  ;;  %v11526_v36 = vld [vmem:[#allocation25_spill] sm:$0xff] }
  0xb9   : > { %5285 = vmatprep.subr.bf16.mxu1 %v6462_v44  ;;  %v11527_v44 = vld [vmem:[#allocation26_spill] sm:$0xff] }
  0xbb   : > { %5159 = vmatpush1.bf16.msra.mxu0 %v6487_v57 }
  0xbc   : > { %5287 = vmatpush1.bf16.msra.mxu1 %v6494_v60  ;;  %5161 = vmatprep.subr.bf16.mxu0 %v6496_v61  ;;  %v11528_v60 = vld [vmem:[#allocation27_spill] sm:$0xff]  ;;  %v11529_v61 = vld [vmem:[#allocation28_spill] sm:$0xff] }
  0xbd   : > { %5289 = vmatprep.subr.bf16.mxu1 %v6508_v11 }
  0xbf   : > { %5163 = vmatpush1.bf16.msra.mxu0 %v11502_v3  ;;  %v11535_v3 = vld [vmem:[#allocation34_spill] sm:$0xff] }
  0xc0   : > { %5291 = vmatpush1.bf16.msra.mxu1 %v11503_v7  ;;  %5165 = vmatprep.subr.bf16.mxu0 %v11504_v8  ;;  %v11536_v7 = vld [vmem:[#allocation35_spill] sm:$0xff]  ;;  %v11537_v8 = vld [vmem:[#allocation36_spill] sm:$0xff] }
  0xc1   : > { %5293 = vmatprep.subr.bf16.mxu1 %v11505_v12  ;;  %v11538_v12 = vld [vmem:[#allocation37_spill] sm:$0xff] }
  0xc3   : > { %5167 = vmatpush1.bf16.msra.mxu0 %v11506_v16  ;;  %v11539_v16 = vld [vmem:[#allocation38_spill] sm:$0xff] }
  0xc4   : > { %5295 = vmatpush1.bf16.msra.mxu1 %v11507_v17  ;;  %5169 = vmatprep.subr.bf16.mxu0 %v11508_v21  ;;  %v11540_v17 = vld [vmem:[#allocation39_spill] sm:$0xff]  ;;  %v11541_v21 = vld [vmem:[#allocation40_spill] sm:$0xff] }
  0xc5   : > { %5297 = vmatprep.subr.bf16.mxu1 %v11509_v25  ;;  %v11542_v25 = vld [vmem:[#allocation41_spill] sm:$0xff] }
  0xc7   : > { %5171 = vmatpush1.bf16.msra.mxu0 %v11510_v26  ;;  %v11543_v26 = vld [vmem:[#allocation42_spill] sm:$0xff] }
  0xc8   : > { %5299 = vmatpush1.bf16.msra.mxu1 %v11511_v30  ;;  %5173 = vmatprep.subr.bf16.mxu0 %v11512_v34  ;;  %v11544_v30 = vld [vmem:[#allocation43_spill] sm:$0xff]  ;;  %v11545_v34 = vld [vmem:[#allocation44_spill] sm:$0xff] }
  0xc9   : > { %5301 = vmatprep.subr.bf16.mxu1 %v11513_v38  ;;  %v11546_v38 = vld [vmem:[#allocation46_spill] sm:$0xff] }
  0xcb   : > { %5175 = vmatpush1.bf16.msra.mxu0 %v11514_v39  ;;  %v11547_v39 = vld [vmem:[#allocation47_spill] sm:$0xff] }
  0xcc   : > { %5303 = vmatpush1.bf16.msra.mxu1 %v11515_v43  ;;  %5177 = vmatprep.subr.bf16.mxu0 %v11516_v50  ;;  %v11548_v43 = vld [vmem:[#allocation48_spill] sm:$0xff]  ;;  %v11549_v50 = vld [vmem:[#allocation49_spill] sm:$0xff] }
  0xcd   : > { %5305 = vmatprep.subr.bf16.mxu1 %v11517_v51  ;;  %v11550_v51 = vld [vmem:[#allocation51_spill] sm:$0xff] }
  0xcf   : > { %5179 = vmatpush1.bf16.msra.mxu0 %v11518_v52  ;;  %v11551_v52 = vld [vmem:[#allocation52_spill] sm:$0xff] }
  0xd0   : > { %5307 = vmatpush1.bf16.msra.mxu1 %v11519_v56  ;;  %5181 = vmatprep.subr.bf16.mxu0 %v11520_v62  ;;  %v11552_v56 = vld [vmem:[#allocation53_spill] sm:$0xff]  ;;  %v11553_v62 = vld [vmem:[#allocation54_spill] sm:$0xff] }
  0xd1   : > { %5309 = vmatprep.subr.bf16.mxu1 %v11521_v63  ;;  %v11554_v63 = vld [vmem:[#allocation55_spill] sm:$0xff] }
 0x164   : > { %v740_v0 = vpop.f32.mrb[0].mxu0 }
 0x165   : > { %v7347_v14 = vsub.f32 %v11522_v5, %v740_v0  ;;  %v7349_v15 = vpop.f32.mrb[0].mxu1  ;;  %v742_v18 = vpop.f32.mrb[1].mxu0  ;;  %v11555_v0 = vld [vmem:[#allocation56_spill] sm:$0xff]  ;;  %v11556_v5 = vld [vmem:[#allocation57_spill] sm:$0xff] }
 0x166   : > { %v7352_v32 = vsub.f32 %v11523_v23, %v742_v18  ;;  %v896_v33 = vpop.f32.mrb[1].mxu1  ;;  %v11557_v18 = vld [vmem:[#allocation58_spill] sm:$0xff]  ;;  %v11558_v23 = vld [vmem:[#allocation59_spill] sm:$0xff] }
 0x167   : > { %v913_v48 = vmul.f32 %v7347_v14, %v7347_v14  ;;  %v7369_v29 = vsub.f32 %v11525_v19, %v896_v33  ;;  %v11559_v33 = vld [vmem:[#allocation60_spill] sm:$0xff]  ;;  %v11565_v19 = vld [vmem:[#allocation66_spill] sm:$0xff] }
 0x168   : > { %v914_v35 = vmul.f32 %v7352_v32, %v7352_v32  ;;  %v746_v41 = vpop.f32.mrb[2].mxu0 }
 0x169   : > { %v7359_v49 = vsub.f32 %v6903_v59, %v746_v41  ;;  %v748_v53 = vpop.f32.mrb[3].mxu0  ;;  %v7361_v58 = vpop.f32.mrb[2].mxu1  ;;  %v916_v11 = vmul.f32 %v7369_v29, %v7369_v29  ;;  %v11530_v59 = vld [vmem:[#allocation29_spill] sm:$0xff]  ;;  %v11561_v41 = vld [vmem:[#allocation62_spill] sm:$0xff] }
 0x16a   : > { %v7364_v6 = vsub.f32 %v11524_v4, %v748_v53  ;;  %985 = vmatprep.mubr.f32.mxu0 %v914_v35  ;;  %1139 = vmatprep.mubr.f32.mxu1 %v914_v35  ;;  %v7366_v9 = vpop.f32.mrb[3].mxu1  ;;  %v11560_v35 = vld [vmem:[#allocation61_spill] sm:$0xff]  ;;  %v11563_v53 = vld [vmem:[#allocation64_spill] sm:$0xff] }
 0x16b   : > { %986 = vmatmul.mubr.f32.vlgmr.msra.gmra.mrb[4].mxu0 %v913_v48  ;;  %1140 = vmatmul.mubr.f32.vlgmr.msra.gmra.mrb[4].mxu1 %v913_v48  ;;  %v917_v57 = vmul.f32 %v7359_v49, %v7359_v49  ;;  %v11562_v48 = vld [vmem:[#allocation63_spill] sm:$0xff]  ;;  %v11564_v4 = vld [vmem:[#allocation65_spill] sm:$0xff] }
 0x16c   : > { %v918_v31 = vmul.f32 %v7364_v6, %v7364_v6  ;;  %5183 = vmatpush1.bf16.msra.mxu0 %v11526_v36  ;;  %5311 = vmatpush1.bf16.msra.mxu1 %v11527_v44  ;;  %v11567_v36 = vld [vmem:[#allocation68_spill] sm:$0xff]  ;;  %v11568_v44 = vld [vmem:[#allocation69_spill] sm:$0xff] }
 0x16d   : > { %5185 = vmatprep.subr.bf16.mxu0 %v11528_v60  ;;  %5313 = vmatprep.subr.bf16.mxu1 %v11529_v61  ;;  %v11570_v60 = vld [vmem:[#allocation71_spill] sm:$0xff]  ;;  %v11571_v61 = vld [vmem:[#allocation72_spill] sm:$0xff] }
 0x16e   : > { %991 = vmatprep.mubr.f32.mxu0 %v918_v31  ;;  %1145 = vmatprep.mubr.f32.mxu1 %v918_v31  ;;  %v11566_v31 = vld [vmem:[#allocation67_spill] sm:$0xff] }
 0x16f   : > { %992 = vmatmul.mubr.f32.gmra.mrb[6].mxu0 %v917_v57  ;;  %1146 = vmatmul.mubr.f32.gmra.mrb[6].mxu1 %v917_v57  ;;  %v11569_v57 = vld [vmem:[#allocation70_spill] sm:$0xff] }
 0x170   : > { %5187 = vmatpush1.bf16.msra.mxu0 %v11530_v59  ;;  %5315 = vmatpush1.bf16.msra.mxu1 %v11531_v47  ;;  %v11573_v59 = vld [vmem:[#allocation74_spill] sm:$0xff]  ;;  %v11574_v47 = vld [vmem:[#allocation75_spill] sm:$0xff] }
 0x171   : > { %1062 = vmatprep.mubr.f32.mxu0 %v916_v11  ;;  %1216 = vmatprep.mubr.f32.mxu1 %v916_v11  ;;  %v11572_v11 = vld [vmem:[#allocation73_spill] sm:$0xff] }
 0x172   : > { %5189 = vmatprep.subr.bf16.mxu0 %v11532_v46  ;;  %5317 = vmatprep.subr.bf16.mxu1 %v11533_v42  ;;  %v11575_v46 = vld [vmem:[#allocation76_spill] sm:$0xff]  ;;  %v11576_v42 = vld [vmem:[#allocation77_spill] sm:$0xff] }
 0x174   : > { %5191 = vmatpush1.bf16.msra.mxu0 %v11534_v27  ;;  %5319 = vmatpush1.bf16.msra.mxu1 %v11535_v3  ;;  %v11577_v27 = vld [vmem:[#allocation78_spill] sm:$0xff]  ;;  %v1306_v3 = vld [vmem:[%s11255_s4 + $0x8] sm:$0xff] }
 0x175   : > { %5193 = vmatprep.subr.bf16.mxu0 %v11536_v7  ;;  %5321 = vmatprep.subr.bf16.mxu1 %v11537_v8  ;;  %v1308_v7 = vld [vmem:[%s11255_s4 + $0x18] sm:$0xff] }
 0x178   : > { %5195 = vmatpush1.bf16.msra.mxu0 %v11538_v12  ;;  %5323 = vmatpush1.bf16.msra.mxu1 %v11539_v16  ;;  %v1305_v12 = vld [vmem:[%s11255_s4] sm:$0xff] }
 0x179   : > { %5197 = vmatprep.subr.bf16.mxu0 %v11540_v17  ;;  %5325 = vmatprep.subr.bf16.mxu1 %v11541_v21  ;;  %v7487_v21 = vsub.f32 %v7277_v22, %v7361_v58  ;;  %v1323_v22 = vld [vmem:[%s11255_s4 + $0x90] sm:$0xff] }
 0x17a   : > { %v1331_v58 = vld [vmem:[%s11255_s4 + $0xd0] sm:$0xff] }
 0x17c   : > { %5199 = vmatpush1.bf16.msra.mxu0 %v11542_v25  ;;  %5327 = vmatpush1.bf16.msra.mxu1 %v11543_v26  ;;  %v1321_v26 = vld [vmem:[%s11255_s4 + $0x80] sm:$0xff] }
 0x17d   : > { %5201 = vmatprep.subr.bf16.mxu0 %v11544_v30  ;;  %5329 = vmatprep.subr.bf16.mxu1 %v11545_v34 }
 0x180   : > { %5203 = vmatpush1.bf16.msra.mxu0 %v11546_v38  ;;  %5331 = vmatpush1.bf16.msra.mxu1 %v11547_v39  ;;  %v1338_v38 = vld [vmem:[%s11255_s4 + $0x108] sm:$0xff] }
 0x181   : > { %5205 = vmatprep.subr.bf16.mxu0 %v11548_v43  ;;  %5333 = vmatprep.subr.bf16.mxu1 %v11549_v50  ;;  %v1346_v39 = vld [vmem:[%s11255_s4 + $0x148] sm:$0xff]  ;;  %v1340_v43 = vld [vmem:[%s11255_s4 + $0x118] sm:$0xff] }
 0x182   : > { %v1348_v50 = vld [vmem:[%s11255_s4 + $0x158] sm:$0xff] }
 0x184   : > { %5207 = vmatpush1.bf16.msra.mxu0 %v11550_v51  ;;  %5335 = vmatpush1.bf16.msra.mxu1 %v11551_v52  ;;  %v919_v51 = vmul.f32 %v7487_v21, %v7487_v21 }
 0x185   : > { %5209 = vmatprep.subr.bf16.mxu0 %v11552_v56  ;;  %5337 = vmatprep.subr.bf16.mxu1 %v11553_v62  ;;  %v5506_v56 = vpack.c.bf16 %v1331_v58, %v1323_v22  ;;  %v1337_v62 = vld [vmem:[%s11255_s4 + $0x100] sm:$0xff] }
 0x186   : > { %v1401_v58 = vld [vmem:[%s11255_s4 + $0x300] sm:$0xff] }
 0x188   : > { %5211 = vmatpush1.bf16.msra.mxu0 %v11554_v63  ;;  %5339 = vmatpush1.bf16.msra.mxu1 %v11555_v0  ;;  %v1345_v63 = vld [vmem:[%s11255_s4 + $0x140] sm:$0xff]  ;;  %v5380_v0 = vpack.c.bf16 %v1346_v39, %v1338_v38 }
 0x189   : > { %5213 = vmatprep.subr.bf16.mxu0 %v11556_v5  ;;  %5341 = vmatprep.subr.bf16.mxu1 %v11557_v18  ;;  %v5508_v5 = vpack.c.bf16 %v1348_v50, %v1340_v43  ;;  %v1339_v18 = vld [vmem:[%s11255_s4 + $0x110] sm:$0xff]  ;;  %v1409_v38 = vld [vmem:[%s11255_s4 + $0x340] sm:$0xff] }
 0x18a   : > { %v1403_v50 = vld [vmem:[%s11255_s4 + $0x310] sm:$0xff] }
 0x18c   : > { %5215 = vmatpush1.bf16.msra.mxu0 %v11558_v23  ;;  %5343 = vmatpush1.bf16.msra.mxu1 %v11559_v33  ;;  %v1347_v23 = vld [vmem:[%s11255_s4 + $0x150] sm:$0xff]  ;;  %v1354_v33 = vld [vmem:[%s11255_s4 + $0x188] sm:$0xff] }
 0x18d   : > { %5217 = vmatprep.subr.bf16.mxu0 %v11560_v35  ;;  %5345 = vmatprep.subr.bf16.mxu1 %v11561_v41  ;;  %v1362_v35 = vld [vmem:[%s11255_s4 + $0x1c8] sm:$0xff]  ;;  %v1356_v41 = vld [vmem:[%s11255_s4 + $0x198] sm:$0xff] }
 0x190   : > { %5219 = vmatpush1.bf16.msra.mxu0 %v11562_v48  ;;  %5347 = vmatpush1.bf16.msra.mxu1 %v11563_v53  ;;  %v1364_v48 = vld [vmem:[%s11255_s4 + $0x1d8] sm:$0xff]  ;;  %v5382_v53 = vpack.c.bf16 %v1345_v63, %v1337_v62 }
 0x191   : > { %5221 = vmatprep.subr.bf16.mxu0 %v11564_v4  ;;  %5349 = vmatprep.subr.bf16.mxu1 %v11565_v19  ;;  %v5510_v4 = vpack.c.bf16 %v1347_v23, %v1339_v18  ;;  %v1353_v19 = vld [vmem:[%s11255_s4 + $0x180] sm:$0xff]  ;;  %v1420_v62 = vld [vmem:[%s11255_s4 + $0x398] sm:$0xff] }
 0x192   : > { %v1428_v63 = vld [vmem:[%s11255_s4 + $0x3d8] sm:$0xff]  ;;  %v1417_v18 = vld [vmem:[%s11255_s4 + $0x380] sm:$0xff] }
 0x193   : > { %v1425_v23 = vld [vmem:[%s11255_s4 + $0x3c0] sm:$0xff] }
 0x194   : > { %5223 = vmatpush1.bf16.msra.mxu0 %v11566_v31  ;;  %5351 = vmatpush1.bf16.msra.mxu1 %v11567_v36  ;;  %v1361_v31 = vld [vmem:[%s11255_s4 + $0x1c0] sm:$0xff]  ;;  %v5384_v36 = vpack.c.bf16 %v1362_v35, %v1354_v33  ;;  %v5528_v35 = vpack.c.bf16 %v1428_v63, %v1420_v62  ;;  %v1483_v63 = vld [vmem:[%s11255_s4 + $0x590] sm:$0xff] }
 0x195   : > { %5225 = vmatprep.subr.bf16.mxu0 %v11568_v44  ;;  %5353 = vmatprep.subr.bf16.mxu1 %v11569_v57  ;;  %v5512_v44 = vpack.c.bf16 %v1364_v48, %v1356_v41  ;;  %v1355_v57 = vld [vmem:[%s11255_s4 + $0x190] sm:$0xff] }
 0x196   : > { %v1419_v41 = vld [vmem:[%s11255_s4 + $0x390] sm:$0xff] }
 0x197   : > { %v1427_v48 = vld [vmem:[%s11255_s4 + $0x3d0] sm:$0xff] }
 0x198   : > { %5227 = vmatpush1.bf16.msra.mxu0 %v11570_v60  ;;  %5355 = vmatpush1.bf16.msra.mxu1 %v11571_v61  ;;  %v1363_v60 = vld [vmem:[%s11255_s4 + $0x1d0] sm:$0xff]  ;;  %v1370_v61 = vld [vmem:[%s11255_s4 + $0x208] sm:$0xff] }
 0x199   : > { %5229 = vmatprep.subr.bf16.mxu0 %v11572_v11  ;;  %5357 = vmatprep.subr.bf16.mxu1 %v11573_v59  ;;  %v1378_v11 = vld [vmem:[%s11255_s4 + $0x248] sm:$0xff]  ;;  %v1372_v59 = vld [vmem:[%s11255_s4 + $0x218] sm:$0xff] }
 0x19c   : > { %5231 = vmatpush1.bf16.msra.mxu0 %v7160_v24  ;;  %5359 = vmatpush1.bf16.msra.mxu1 %v11574_v47  ;;  %v1314_v24 = vld [vmem:[%s11255_s4 + $0x48] sm:$0xff]  ;;  %v1380_v47 = vld [vmem:[%s11255_s4 + $0x258] sm:$0xff] }
 0x19d   : > { %5233 = vmatprep.subr.bf16.mxu0 %v11575_v46  ;;  %5361 = vmatprep.subr.bf16.mxu1 %v11576_v42  ;;  %v5386_v46 = vpack.c.bf16 %v1361_v31, %v1353_v19  ;;  %v5514_v42 = vpack.c.bf16 %v1363_v60, %v1355_v57  ;;  %v1436_v19 = vld [vmem:[%s11255_s4 + $0x418] sm:$0xff]  ;;  %v1433_v57 = vld [vmem:[%s11255_s4 + $0x400] sm:$0xff] }
 0x19e   : > { %v1444_v31 = vld [vmem:[%s11255_s4 + $0x458] sm:$0xff]  ;;  %v1441_v60 = vld [vmem:[%s11255_s4 + $0x440] sm:$0xff] }
 0x1a0   : > { %5235 = vmatpush1.bf16.msra.mxu0 %v11577_v27  ;;  %5363 = vmatpush1.bf16.msra.mxu1 %v7200_v1  ;;  %v1316_v1 = vld [vmem:[%s11255_s4 + $0x58] sm:$0xff]  ;;  %v1369_v27 = vld [vmem:[%s11255_s4 + $0x200] sm:$0xff] }
 0x1a1   : > { %5237 = vmatprep.subr.bf16.mxu0 %v7202_v28  ;;  %5365 = vmatprep.subr.bf16.mxu1 %v7214_v13  ;;  %v7449_v28 = vsub.f32 %v7265_v40, %v7349_v15  ;;  %v5372_v13 = vpack.c.bf16 %v1314_v24, %v1306_v3  ;;  %v5500_v8 = vpack.c.bf16 %v1316_v1, %v1308_v7  ;;  %v1322_v40 = vld [vmem:[%s11255_s4 + $0x88] sm:$0xff]  ;;  %v1377_v3 = vld [vmem:[%s11255_s4 + $0x240] sm:$0xff]  ;;  %v1371_v1 = vld [vmem:[%s11255_s4 + $0x210] sm:$0xff] }
 0x1a2   : > { %v1330_v15 = vld [vmem:[%s11255_s4 + $0xc8] sm:$0xff]  ;;  %v5388_v24 = vpack.c.bf16 %v1378_v11, %v1370_v61  ;;  %v5516_v7 = vpack.c.bf16 %v1380_v47, %v1372_v59  ;;  %v5532_v11 = vpack.c.bf16 %v1444_v31, %v1436_v19  ;;  %v1435_v59 = vld [vmem:[%s11255_s4 + $0x410] sm:$0xff] }
 0x1a3   : > { %v915_v17 = vmul.f32 %v7449_v28, %v7449_v28  ;;  %v5376_v30 = vpack.c.bf16 %v1330_v15, %v1322_v40  ;;  %v1385_v15 = vld [vmem:[%s11255_s4 + $0x280] sm:$0xff]  ;;  %v1443_v47 = vld [vmem:[%s11255_s4 + $0x450] sm:$0xff] }
 0x1a4   : > { %5239 = vmatpush1.bf16.msra.mxu0 %v7232_v55  ;;  %5367 = vmatpush1.bf16.msra.mxu1 %v7236_v20  ;;  %v1313_v55 = vld [vmem:[%s11255_s4 + $0x40] sm:$0xff]  ;;  %v7461_v20 = vsub.f32 %v7269_v54, %v7366_v9  ;;  %v1324_v54 = vld [vmem:[%s11255_s4 + $0x98] sm:$0xff]  ;;  %v1499_v31 = vld [vmem:[%s11255_s4 + $0x610] sm:$0xff] }
 0x1a5   : > { %5241 = vmatprep.subr.bf16.mxu0 %v7238_v45  ;;  %5369 = vmatprep.subr.bf16.mxu1 %v7247_v10  ;;  %v1307_v45 = vld [vmem:[%s11255_s4 + $0x10] sm:$0xff]  ;;  %v1332_v9 = vld [vmem:[%s11255_s4 + $0xd8] sm:$0xff]  ;;  %v5374_v16 = vpack.c.bf16 %v1313_v55, %v1305_v12  ;;  %v1394_v12 = vld [vmem:[%s11255_s4 + $0x2c8] sm:$0xff] }
 0x1a6   : > { %v1315_v10 = vld [vmem:[%s11255_s4 + $0x50] sm:$0xff]  ;;  %v5504_v34 = vpack.c.bf16 %v1332_v9, %v1324_v54  ;;  %v1388_v55 = vld [vmem:[%s11255_s4 + $0x298] sm:$0xff]  ;;  %v1393_v54 = vld [vmem:[%s11255_s4 + $0x2c0] sm:$0xff] }
 0x1a7   : > { %v5502_v25 = vpack.c.bf16 %v1315_v10, %v1307_v45  ;;  %v1396_v45 = vld [vmem:[%s11255_s4 + $0x2d8] sm:$0xff]  ;;  %v5390_v10 = vpack.c.bf16 %v1377_v3, %v1369_v27 }
 0x1a8   : > { %5243 = vmatpush1.bf16.msra.mxu0 %v7256_v37  ;;  %5371 = vmatpush1.bf16.msra.mxu1 %v7260_v2  ;;  %v1329_v37 = vld [vmem:[%s11255_s4 + $0xc0] sm:$0xff]  ;;  %v920_v2 = vmul.f32 %v7461_v20, %v7461_v20  ;;  %v1452_v27 = vld [vmem:[%s11255_s4 + $0x498] sm:$0xff] }
 0x1a9   : > { %5373 = vmatprep.subr.bf16.mxu0 %v5372_v13  ;;  %5501 = vmatprep.subr.bf16.mxu1 %v5500_v8  ;;  %v5378_v52 = vpack.c.bf16 %v1329_v37, %v1321_v26  ;;  %v1379_v13 = vld [vmem:[%s11255_s4 + $0x250] sm:$0xff]  ;;  %v1386_v8 = vld [vmem:[%s11255_s4 + $0x288] sm:$0xff]  ;;  %v1460_v3 = vld [vmem:[%s11255_s4 + $0x4d8] sm:$0xff] }
 0x1aa   : > { %v5518_v40 = vpack.c.bf16 %v1379_v13, %v1371_v1  ;;  %v5392_v9 = vpack.c.bf16 %v1394_v12, %v1386_v8  ;;  %v1402_v26 = vld [vmem:[%s11255_s4 + $0x308] sm:$0xff]  ;;  %v1449_v1 = vld [vmem:[%s11255_s4 + $0x480] sm:$0xff]  ;;  %v5536_v12 = vpack.c.bf16 %v1460_v3, %v1452_v27  ;;  %v1515_v3 = vld [vmem:[%s11255_s4 + $0x690] sm:$0xff] }
 0x1ab   : > { %1063 = vmatmul.mubr.f32.vlgmr.msra.gmra.mrb[4].mxu0 %v915_v17  ;;  %1217 = vmatmul.mubr.f32.vlgmr.msra.gmra.mrb[4].mxu1 %v915_v17  ;;  %v1387_v17 = vld [vmem:[%s11255_s4 + $0x290] sm:$0xff]  ;;  %v1410_v37 = vld [vmem:[%s11255_s4 + $0x348] sm:$0xff]  ;;  %v1457_v13 = vld [vmem:[%s11255_s4 + $0x4c0] sm:$0xff] }
 0x1ac   : > { %1068 = vmatprep.mubr.f32.mxu0 %v920_v2  ;;  %1222 = vmatprep.mubr.f32.mxu1 %v920_v2  ;;  %v1404_v2 = vld [vmem:[%s11255_s4 + $0x318] sm:$0xff]  ;;  %v5396_v39 = vpack.c.bf16 %v1410_v37, %v1402_v26  ;;  %v1473_v37 = vld [vmem:[%s11255_s4 + $0x540] sm:$0xff] }
 0x1ad   : > { %5375 = vmatpush1.bf16.msra.mxu0 %v5374_v16  ;;  %5503 = vmatpush1.bf16.msra.mxu1 %v5502_v25  ;;  %v5520_v16 = vpack.c.bf16 %v1396_v45, %v1388_v55  ;;  %v1395_v25 = vld [vmem:[%s11255_s4 + $0x2d0] sm:$0xff] }
 0x1ae   : > { %5377 = vmatprep.subr.bf16.mxu0 %v5376_v30  ;;  %5505 = vmatprep.subr.bf16.mxu1 %v5504_v34  ;;  %v1412_v30 = vld [vmem:[%s11255_s4 + $0x358] sm:$0xff]  ;;  %v5394_v34 = vpack.c.bf16 %v1393_v54, %v1385_v15  ;;  %v5522_v22 = vpack.c.bf16 %v1395_v25, %v1387_v17  ;;  %v1451_v55 = vld [vmem:[%s11255_s4 + $0x490] sm:$0xff]  ;;  %v1465_v17 = vld [vmem:[%s11255_s4 + $0x500] sm:$0xff] }
 0x1af   : > { %1069 = vmatmul.mubr.f32.gmra.mrb[6].mxu0 %v919_v51  ;;  %1223 = vmatmul.mubr.f32.gmra.mrb[6].mxu1 %v919_v51  ;;  %v5524_v43 = vpack.c.bf16 %v1412_v30, %v1404_v2  ;;  %v1411_v51 = vld [vmem:[%s11255_s4 + $0x350] sm:$0xff]  ;;  %v1468_v15 = vld [vmem:[%s11255_s4 + $0x518] sm:$0xff] }
 0x1b0   : > { %v1459_v45 = vld [vmem:[%s11255_s4 + $0x4d0] sm:$0xff]  ;;  %v1476_v54 = vld [vmem:[%s11255_s4 + $0x558] sm:$0xff] }
 0x1b1   : > { %5379 = vmatpush1.bf16.msra.mxu0 %v5378_v52  ;;  %5507 = vmatpush1.bf16.msra.mxu1 %v5506_v56  ;;  %v1418_v52 = vld [vmem:[%s11255_s4 + $0x388] sm:$0xff]  ;;  %v5540_v26 = vpack.c.bf16 %v1476_v54, %v1468_v15  ;;  %v1467_v2 = vld [vmem:[%s11255_s4 + $0x510] sm:$0xff] }
 0x1b2   : > { %5381 = vmatprep.subr.bf16.mxu0 %v5380_v0  ;;  %5509 = vmatprep.subr.bf16.mxu1 %v5508_v5  ;;  %v1426_v56 = vld [vmem:[%s11255_s4 + $0x3c8] sm:$0xff]  ;;  %v5398_v0 = vpack.c.bf16 %v1409_v38, %v1401_v58  ;;  %v5526_v5 = vpack.c.bf16 %v1411_v51, %v1403_v50  ;;  %v1475_v30 = vld [vmem:[%s11255_s4 + $0x550] sm:$0xff]  ;;  %v1492_v50 = vld [vmem:[%s11255_s4 + $0x5d8] sm:$0xff] }
 0x1b3   : > { %v5400_v33 = vpack.c.bf16 %v1426_v56, %v1418_v52  ;;  %v1482_v58 = vld [vmem:[%s11255_s4 + $0x588] sm:$0xff]  ;;  %v1481_v51 = vld [vmem:[%s11255_s4 + $0x580] sm:$0xff]  ;;  %v1531_v54 = vld [vmem:[%s11255_s4 + $0x710] sm:$0xff] }
 0x1b4   : > { %v1490_v38 = vld [vmem:[%s11255_s4 + $0x5c8] sm:$0xff]  ;;  %v1489_v52 = vld [vmem:[%s11255_s4 + $0x5c0] sm:$0xff] }
 0x1b5   : > { %5383 = vmatpush1.bf16.msra.mxu0 %v5382_v53  ;;  %5511 = vmatpush1.bf16.msra.mxu1 %v5510_v4  ;;  %v1434_v53 = vld [vmem:[%s11255_s4 + $0x408] sm:$0xff]  ;;  %v5418_v62 = vpack.c.bf16 %v1489_v52, %v1481_v51  ;;  %v1564_v52 = vld [vmem:[%s11255_s4 + $0x818] sm:$0xff] }
 0x1b6   : > { %5385 = vmatprep.subr.bf16.mxu0 %v5384_v36  ;;  %5513 = vmatprep.subr.bf16.mxu1 %v5512_v44  ;;  %v1442_v4 = vld [vmem:[%s11255_s4 + $0x448] sm:$0xff]  ;;  %v5402_v36 = vpack.c.bf16 %v1425_v23, %v1417_v18  ;;  %v5530_v44 = vpack.c.bf16 %v1427_v48, %v1419_v41  ;;  %v1508_v41 = vld [vmem:[%s11255_s4 + $0x658] sm:$0xff]  ;;  %v1497_v48 = vld [vmem:[%s11255_s4 + $0x600] sm:$0xff] }
 0x1b7   : > { %v5404_v61 = vpack.c.bf16 %v1442_v4, %v1434_v53  ;;  %v1498_v18 = vld [vmem:[%s11255_s4 + $0x608] sm:$0xff]  ;;  %v1505_v53 = vld [vmem:[%s11255_s4 + $0x640] sm:$0xff] }
 0x1b8   : > { %v1506_v23 = vld [vmem:[%s11255_s4 + $0x648] sm:$0xff]  ;;  %v5422_v19 = vpack.c.bf16 %v1505_v53, %v1497_v48 }
 0x1b9   : > { %5387 = vmatpush1.bf16.msra.mxu0 %v5386_v46  ;;  %5515 = vmatpush1.bf16.msra.mxu1 %v5514_v42  ;;  %v1450_v46 = vld [vmem:[%s11255_s4 + $0x488] sm:$0xff] }
 0x1ba   : > { %5389 = vmatprep.subr.bf16.mxu0 %v5388_v24  ;;  %5517 = vmatprep.subr.bf16.mxu1 %v5516_v7  ;;  %v1458_v42 = vld [vmem:[%s11255_s4 + $0x4c8] sm:$0xff]  ;;  %v5406_v24 = vpack.c.bf16 %v1441_v60, %v1433_v57  ;;  %v5534_v7 = vpack.c.bf16 %v1443_v47, %v1435_v59  ;;  %v1524_v59 = vld [vmem:[%s11255_s4 + $0x6d8] sm:$0xff]  ;;  %v1513_v47 = vld [vmem:[%s11255_s4 + $0x680] sm:$0xff] }
 0x1bb   : > { %v5408_v8 = vpack.c.bf16 %v1458_v42, %v1450_v46  ;;  %v1514_v57 = vld [vmem:[%s11255_s4 + $0x688] sm:$0xff]  ;;  %v1521_v46 = vld [vmem:[%s11255_s4 + $0x6c0] sm:$0xff] }
 0x1bc   : > { %v1522_v60 = vld [vmem:[%s11255_s4 + $0x6c8] sm:$0xff]  ;;  %v5426_v27 = vpack.c.bf16 %v1521_v46, %v1513_v47  ;;  %v1245_v47 = vld [vmem:[%s11253_s2] sm:$0xf] }
 0x1bd   : > { %5391 = vmatpush1.bf16.msra.mxu0 %v5390_v10  ;;  %5519 = vmatpush1.bf16.msra.mxu1 %v5518_v40  ;;  %v1466_v10 = vld [vmem:[%s11255_s4 + $0x508] sm:$0xff] }
 0x1be   : > { %5393 = vmatprep.subr.bf16.mxu0 %v5392_v9  ;;  %5521 = vmatprep.subr.bf16.mxu1 %v5520_v16  ;;  %v1474_v40 = vld [vmem:[%s11255_s4 + $0x548] sm:$0xff]  ;;  %v5410_v9 = vpack.c.bf16 %v1457_v13, %v1449_v1  ;;  %v5538_v16 = vpack.c.bf16 %v1459_v45, %v1451_v55  ;;  %v1540_v55 = vld [vmem:[%s11255_s4 + $0x758] sm:$0xff]  ;;  %v1529_v45 = vld [vmem:[%s11255_s4 + $0x700] sm:$0xff] }
 0x1bf   : > { %v5412_v25 = vpack.c.bf16 %v1474_v40, %v1466_v10  ;;  %v1530_v1 = vld [vmem:[%s11255_s4 + $0x708] sm:$0xff]  ;;  %v1537_v10 = vld [vmem:[%s11255_s4 + $0x740] sm:$0xff] }
 0x1c0   : > { %v1538_v13 = vld [vmem:[%s11255_s4 + $0x748] sm:$0xff]  ;;  %v5430_v15 = vpack.c.bf16 %v1537_v10, %v1529_v45 }
 0x1c1   : > { %5395 = vmatpush1.bf16.msra.mxu0 %v5394_v34  ;;  %5523 = vmatpush1.bf16.msra.mxu1 %v5522_v22  ;;  %v5414_v34 = vpack.c.bf16 %v1473_v37, %v1465_v17  ;;  %v5542_v22 = vpack.c.bf16 %v1475_v30, %v1467_v2  ;;  %v1546_v17 = vld [vmem:[%s11255_s4 + $0x788] sm:$0xff]  ;;  %v1556_v2 = vld [vmem:[%s11255_s4 + $0x7d8] sm:$0xff]  ;;  %v1545_v30 = vld [vmem:[%s11255_s4 + $0x780] sm:$0xff] }
 0x1c2   : > { %5397 = vmatprep.subr.bf16.mxu0 %v5396_v39  ;;  %5525 = vmatprep.subr.bf16.mxu1 %v5524_v43  ;;  %v1484_v39 = vld [vmem:[%s11255_s4 + $0x598] sm:$0xff]  ;;  %v5416_v43 = vpack.c.bf16 %v1490_v38, %v1482_v58  ;;  %v1547_v38 = vld [vmem:[%s11255_s4 + $0x790] sm:$0xff]  ;;  %v1570_v51 = vld [vmem:[%s11255_s4 + $0x848] sm:$0xff] }
 0x1c3   : > { %v5544_v56 = vpack.c.bf16 %v1492_v50, %v1484_v39  ;;  %v1555_v39 = vld [vmem:[%s11255_s4 + $0x7d0] sm:$0xff]  ;;  %v1562_v50 = vld [vmem:[%s11255_s4 + $0x808] sm:$0xff] }
 0x1c5   : > { %5399 = vmatpush1.bf16.msra.mxu0 %v5398_v0  ;;  %5527 = vmatpush1.bf16.msra.mxu1 %v5526_v5  ;;  %v1491_v0 = vld [vmem:[%s11255_s4 + $0x5d0] sm:$0xff] }
 0x1c6   : > { %5401 = vmatprep.subr.bf16.mxu0 %v5400_v33  ;;  %5529 = vmatprep.subr.bf16.mxu1 %v5528_v35  ;;  %v5546_v5 = vpack.c.bf16 %v1491_v0, %v1483_v63  ;;  %v1500_v33 = vld [vmem:[%s11255_s4 + $0x618] sm:$0xff]  ;;  %v5420_v35 = vpack.c.bf16 %v1506_v23, %v1498_v18  ;;  %v11337_v18 = vlaneseq }
 0x1c7   : > { %v5548_v4 = vpack.c.bf16 %v1508_v41, %v1500_v33 }
 0x1c9   : > { %5403 = vmatpush1.bf16.msra.mxu0 %v5402_v36  ;;  %5531 = vmatpush1.bf16.msra.mxu1 %v5530_v44  ;;  %v1507_v36 = vld [vmem:[%s11255_s4 + $0x650] sm:$0xff] }
 0x1ca   : > { %5405 = vmatprep.subr.bf16.mxu0 %v5404_v61  ;;  %5533 = vmatprep.subr.bf16.mxu1 %v5532_v11  ;;  %v5550_v44 = vpack.c.bf16 %v1507_v36, %v1499_v31  ;;  %v1516_v61 = vld [vmem:[%s11255_s4 + $0x698] sm:$0xff]  ;;  %v5424_v11 = vpack.c.bf16 %v1522_v60, %v1514_v57  ;;  %v7854_v31 = vshrl.u32 %v11337_v18, 7 }
 0x1cb   : > { %v5552_v42 = vpack.c.bf16 %v1524_v59, %v1516_v61 }
 0x1cc   : > { %v7862_v59 = vsub.s32 2, %v7854_v31  ;;  %v7868_v46 = vsub.s32 1, %v7854_v31 }
 0x1cd   : > { %5407 = vmatpush1.bf16.msra.mxu0 %v5406_v24  ;;  %5535 = vmatpush1.bf16.msra.mxu1 %v5534_v7  ;;  %v1523_v24 = vld [vmem:[%s11255_s4 + $0x6d0] sm:$0xff] }
 0x1ce   : > { %5409 = vmatprep.subr.bf16.mxu0 %v5408_v8  ;;  %5537 = vmatprep.subr.bf16.mxu1 %v5536_v12  ;;  %v5554_v7 = vpack.c.bf16 %v1523_v24, %v1515_v3  ;;  %v1532_v8 = vld [vmem:[%s11255_s4 + $0x718] sm:$0xff]  ;;  %v5428_v12 = vpack.c.bf16 %v1538_v13, %v1530_v1  ;;  %11579 = vst [vmem:[#allocation5_spill] sm:$0xff] %v7862_v59  ;;  %11580 = vst [vmem:[#allocation6_spill] sm:$0xff] %v7868_v46 }
 0x1cf   : > { %v5556_v40 = vpack.c.bf16 %v1540_v55, %v1532_v8  ;;  %v1258_v24 = vrot.slane %v1245_v47, %v7862_v59  ;;  %v1254_v13 = vrot.slane %v1245_v47, %v7868_v46  ;;  %v7878_v8 = vsub.s32 3, %v7854_v31 }
 0x1d1   : > { %5411 = vmatpush1.bf16.msra.mxu0 %v5410_v9  ;;  %5539 = vmatpush1.bf16.msra.mxu1 %v5538_v16  ;;  %v1539_v9 = vld [vmem:[%s11255_s4 + $0x750] sm:$0xff]  ;;  %11581 = vst [vmem:[#allocation7_spill] sm:$0xff] %v7878_v8 }
 0x1d2   : > { %5413 = vmatprep.subr.bf16.mxu0 %v5412_v25  ;;  %5541 = vmatprep.subr.bf16.mxu1 %v5540_v26  ;;  %v5558_v16 = vpack.c.bf16 %v1539_v9, %v1531_v54  ;;  %v1554_v25 = vld [vmem:[%s11255_s4 + $0x7c8] sm:$0xff]  ;;  %v1548_v26 = vld [vmem:[%s11255_s4 + $0x798] sm:$0xff]  ;;  %v1561_v54 = vld [vmem:[%s11255_s4 + $0x800] sm:$0xff] }
 0x1d3   : > { %v5432_v37 = vpack.c.bf16 %v1554_v25, %v1546_v17  ;;  %v1563_v9 = vld [vmem:[%s11255_s4 + $0x810] sm:$0xff]  ;;  %v1578_v25 = vld [vmem:[%s11255_s4 + $0x888] sm:$0xff] }
 0x1d5   : > { %5415 = vmatpush1.bf16.msra.mxu0 %v5414_v34  ;;  %5543 = vmatpush1.bf16.msra.mxu1 %v5542_v22  ;;  %v1553_v34 = vld [vmem:[%s11255_s4 + $0x7c0] sm:$0xff]  ;;  %v5560_v22 = vpack.c.bf16 %v1556_v2, %v1548_v26  ;;  %v1586_v26 = vld [vmem:[%s11255_s4 + $0x8c8] sm:$0xff] }
 0x1d6   : > { %5417 = vmatprep.subr.bf16.mxu0 %v5416_v43  ;;  %5545 = vmatprep.subr.bf16.mxu1 %v5544_v56  ;;  %v5434_v58 = vpack.c.bf16 %v1553_v34, %v1545_v30  ;;  %v5562_v43 = vpack.c.bf16 %v1555_v39, %v1547_v38  ;;  %v5436_v56 = vpack.c.bf16 %v1570_v51, %v1562_v50 }
 0x1d7   : > { %v7911_v38 = vrot.slane %v1245_v47, %v7878_v8 }
 0x1d9   : > { %5419 = vmatpush1.bf16.msra.mxu0 %v5418_v62  ;;  %5547 = vmatpush1.bf16.msra.mxu1 %v5546_v5  ;;  %v1572_v62 = vld [vmem:[%s11255_s4 + $0x858] sm:$0xff] }
 0x1da   : > { %5421 = vmatprep.subr.bf16.mxu0 %v5420_v35  ;;  %5549 = vmatprep.subr.bf16.mxu1 %v5548_v4  ;;  %v5564_v63 = vpack.c.bf16 %v1572_v62, %v1564_v52 }
 0x1dd   : > { %5423 = vmatpush1.bf16.msra.mxu0 %v5422_v19  ;;  %5551 = vmatpush1.bf16.msra.mxu1 %v5550_v44 }
 0x1de   : > { %5425 = vmatprep.subr.bf16.mxu0 %v5424_v11  ;;  %5553 = vmatprep.subr.bf16.mxu1 %v5552_v42  ;;  %v7859_v11 = vsub.s32 0, %v7854_v31  ;;  %v1275_v42 = vld [vmem:[%s11254_s3] sm:$0xf] }
 0x1df   : > { %v1288_v45 = vrot.slane %v1275_v42, %v7862_v59 }
 0x1e0   : > { %11578 = vst [vmem:[#allocation4_spill] sm:$0xff] %v7859_v11  ;;  %v1250_v3 = vrot.slane %v1245_v47, %v7859_v11  ;;  %v1280_v17 = vrot.slane %v1275_v42, %v7859_v11 }
 0x1e1   : > { %5427 = vmatpush1.bf16.msra.mxu0 %v5426_v27  ;;  %5555 = vmatpush1.bf16.msra.mxu1 %v5554_v7 }
 0x1e2   : > { %5429 = vmatprep.subr.bf16.mxu0 %v5428_v12  ;;  %5557 = vmatprep.subr.bf16.mxu1 %v5556_v40 }
 0x1e5   : > { %5431 = vmatpush1.bf16.msra.mxu0 %v5430_v15  ;;  %5559 = vmatpush1.bf16.msra.mxu1 %v5558_v16  ;;  %v1284_v15 = vrot.slane %v1275_v42, %v7868_v46 }
 0x1e6   : > { %5433 = vmatprep.subr.bf16.mxu0 %v5432_v37  ;;  %5561 = vmatprep.subr.bf16.mxu1 %v5560_v22  ;;  %v1580_v22 = vld [vmem:[%s11255_s4 + $0x898] sm:$0xff] }
 0x1e9   : > { %5435 = vmatpush1.bf16.msra.mxu0 %v5434_v58  ;;  %5563 = vmatpush1.bf16.msra.mxu1 %v5562_v43  ;;  %v1588_v58 = vld [vmem:[%s11255_s4 + $0x8d8] sm:$0xff] }
 0x1ea   : > { %5437 = vmatprep.subr.bf16.mxu0 %v5436_v56  ;;  %5565 = vmatprep.subr.bf16.mxu1 %v5564_v63  ;;  %v5440_v63 = vpack.c.bf16 %v1586_v26, %v1578_v25  ;;  %v1619_v25 = vld [vmem:[%s11255_s4 + $0x9d0] sm:$0xff]  ;;  %v1626_v26 = vld [vmem:[%s11255_s4 + $0xa08] sm:$0xff] }
 0x27e   : > { %v1064_v0 = vpop.f32.mrb[4].mxu0  ;;  %v1218_v5 = vpop.f32.mrb[4].mxu1 }
 0x27f   : > { %v5884_v23 = vadd.f32 1e-05, %v1064_v0  ;;  %v5888_v33 = vadd.f32 1e-05, %v1218_v5  ;;  %v1066_v35 = vpop.f32.mrb[5].mxu0  ;;  %v1220_v41 = vpop.f32.mrb[5].mxu1 }
 0x280   : > { %v5885_v48 = vadd.f32 1e-05, %v1066_v35  ;;  %v5889_v53 = vadd.f32 1e-05, %v1220_v41  ;;  %v1577_v0 = vld [vmem:[%s11255_s4 + $0x880] sm:$0xff] }
 0x281   : > { %5958 = vrsqrt.f32 %v5884_v23  ;;  %v5568_v23 = vpack.c.bf16 %v1588_v58, %v1580_v22  ;;  %v1625_v58 = vld [vmem:[%s11255_s4 + $0xa00] sm:$0xff] }
 0x282   : > { %5960 = vrsqrt.f32 %v5888_v33  ;;  %v1070_v4 = vpop.f32.mrb[6].mxu0  ;;  %v1224_v19 = vpop.f32.mrb[6].mxu1 }
 0x283   : > { %5962 = vrsqrt.f32 %v5885_v48  ;;  %v5886_v36 = vadd.f32 1e-05, %v1070_v4  ;;  %v5890_v44 = vadd.f32 1e-05, %v1224_v19  ;;  %v1072_v57 = vpop.f32.mrb[7].mxu0  ;;  %v7856_v60 = vpop.f32.mrb[7].mxu1  ;;  %v7943_v4 = vrot.slane %v1275_v42, %v7878_v8 }
 0x284   : > { %5964 = vrsqrt.f32 %v5889_v53  ;;  %v5887_v61 = vadd.f32 1e-05, %v1072_v57  ;;  %v1594_v48 = vld [vmem:[%s11255_s4 + $0x908] sm:$0xff] }
 0x285   : > { %5966 = vrsqrt.f32 %v5886_v36  ;;  %v1602_v19 = vld [vmem:[%s11255_s4 + $0x948] sm:$0xff]  ;;  %v1596_v36 = vld [vmem:[%s11255_s4 + $0x918] sm:$0xff] }
 0x286   : > { %5968 = vrsqrt.f32 %v5890_v44  ;;  %v1604_v44 = vld [vmem:[%s11255_s4 + $0x958] sm:$0xff] }
 0x287   : > { %5970 = vrsqrt.f32 %v5887_v61 }
 0x28b   : > { %v5959_v27 = vpop.eup %5958 }
 0x28c   : > { %v5961_v7 = vpop.eup %5960  ;;  %v1237_v1 = vmul.f32 %v5959_v27, %v7347_v14  ;;  %v1569_v14 = vld [vmem:[%s11255_s4 + $0x840] sm:$0xff] }
 0x28d   : > { %v5963_v12 = vpop.eup %5962  ;;  %v1239_v55 = vmul.f32 %v5961_v7, %v7449_v28  ;;  %v5438_v51 = vpack.c.bf16 %v1569_v14, %v1561_v54  ;;  %v1593_v27 = vld [vmem:[%s11255_s4 + $0x900] sm:$0xff]  ;;  %v1595_v7 = vld [vmem:[%s11255_s4 + $0x910] sm:$0xff] }
 0x28e   : > { %v5965_v10 = vpop.eup %5964  ;;  %v1238_v40 = vmul.f32 %v5963_v12, %v7352_v32  ;;  %v1267_v16 = vmul.f32 %v1250_v3, %v1237_v1  ;;  %v1571_v32 = vld [vmem:[%s11255_s4 + $0x850] sm:$0xff]  ;;  %v5444_v12 = vpack.c.bf16 %v1602_v19, %v1594_v48  ;;  %v1658_v19 = vld [vmem:[%s11255_s4 + $0xb08] sm:$0xff] }
 0x28f   : > { %v5967_v28 = vpop.eup %5966  ;;  %v1269_v37 = vmul.f32 %v1258_v24, %v1239_v55  ;;  %v1240_v43 = vmul.f32 %v5965_v10, %v7369_v29  ;;  %v5566_v62 = vpack.c.bf16 %v1571_v32, %v1563_v9  ;;  %v1585_v29 = vld [vmem:[%s11255_s4 + $0x8c0] sm:$0xff]  ;;  %v1603_v1 = vld [vmem:[%s11255_s4 + $0x950] sm:$0xff]  ;;  %v5572_v55 = vpack.c.bf16 %v1604_v44, %v1596_v36  ;;  %v1612_v10 = vld [vmem:[%s11255_s4 + $0x998] sm:$0xff] }
 0x290   : > { %v5969_v2 = vpop.eup %5968  ;;  %v1241_v30 = vmul.f32 %v5967_v28, %v7359_v49  ;;  %v1268_v34 = vmul.f32 %v1254_v13, %v1238_v40  ;;  %v7923_v5 = vadd.f32 %v1280_v17, %v1267_v16  ;;  %v5442_v47 = vpack.c.bf16 %v1585_v29, %v1577_v0  ;;  %v1620_v40 = vld [vmem:[%s11255_s4 + $0x9d8] sm:$0xff]  ;;  %v1609_v9 = vld [vmem:[%s11255_s4 + $0x980] sm:$0xff]  ;;  %v1611_v32 = vld [vmem:[%s11255_s4 + $0x990] sm:$0xff] }
 0x291   : > { %v5971_v39 = vpop.eup %5970  ;;  %v1243_v50 = vmul.f32 %v5969_v2, %v7487_v21  ;;  %v7915_v52 = vadd.f32 %v1288_v45, %v1269_v37  ;;  %v1587_v21 = vld [vmem:[%s11255_s4 + $0x8d0] sm:$0xff]  ;;  %v1270_v53 = vmul.f32 %v7911_v38, %v1240_v43  ;;  %v5574_v14 = vpack.c.bf16 %v1603_v1, %v1595_v7  ;;  %v1617_v28 = vld [vmem:[%s11255_s4 + $0x9c0] sm:$0xff]  ;;  %v1634_v37 = vld [vmem:[%s11255_s4 + $0xa48] sm:$0xff] }
 0x292   : > { %v1242_v49 = vmul.f32 %v5971_v39, %v7364_v6  ;;  %v7918_v56 = vadd.f32 %v1284_v15, %v1268_v34  ;;  %11584 = vst [vmem:[#allocation10_spill] sm:$0xff] %v7923_v5  ;;  %v1271_v33 = vmul.f32 %v1250_v3, %v1241_v30  ;;  %v1579_v6 = vld [vmem:[%s11255_s4 + $0x890] sm:$0xff]  ;;  %v1601_v3 = vld [vmem:[%s11255_s4 + $0x940] sm:$0xff]  ;;  %v1628_v2 = vld [vmem:[%s11255_s4 + $0xa18] sm:$0xff]  ;;  %v5450_v34 = vpack.c.bf16 %v1617_v28, %v1609_v9 }
 0x293   : > { %11582 = vst [vmem:[#allocation8_spill] sm:$0xff] %v7915_v52  ;;  %v1273_v35 = vmul.f32 %v1258_v24, %v1243_v50  ;;  %v5570_v42 = vpack.c.bf16 %v1587_v21, %v1579_v6  ;;  %v5446_v54 = vpack.c.bf16 %v1601_v3, %v1593_v27  ;;  %v1636_v30 = vld [vmem:[%s11255_s4 + $0xa58] sm:$0xff]  ;;  %v5578_v22 = vpack.c.bf16 %v1619_v25, %v1611_v32  ;;  %v1633_v39 = vld [vmem:[%s11255_s4 + $0xa40] sm:$0xff]  ;;  %v1643_v48 = vld [vmem:[%s11255_s4 + $0xa90] sm:$0xff] }
 0x294   : > { %11583 = vst [vmem:[#allocation9_spill] sm:$0xff] %v7918_v56  ;;  %1923 = vmatprep.mubr.f32.mxu0 %v7918_v56  ;;  %2077 = vmatprep.mubr.f32.mxu1 %v7918_v56  ;;  %v1272_v41 = vmul.f32 %v1254_v13, %v1242_v49  ;;  %v7964_v24 = vadd.f32 %v1280_v17, %v1271_v33  ;;  %v1610_v13 = vld [vmem:[%s11255_s4 + $0x988] sm:$0xff]  ;;  %v1635_v49 = vld [vmem:[%s11255_s4 + $0xa50] sm:$0xff]  ;;  %v1644_v0 = vld [vmem:[%s11255_s4 + $0xa98] sm:$0xff] }
 0x295   : > { %1924 = vmatmul.mubr.f32.vlgmr.msra.gmra.mrb[8].mxu0 %v7923_v5  ;;  %2078 = vmatmul.mubr.f32.vlgmr.msra.gmra.mrb[8].mxu1 %v7923_v5  ;;  %v7954_v57 = vadd.f32 %v1288_v45, %v1273_v35  ;;  %v1618_v45 = vld [vmem:[%s11255_s4 + $0x9c8] sm:$0xff]  ;;  %v5576_v17 = vpack.c.bf16 %v1620_v40, %v1612_v10  ;;  %v5452_v43 = vpack.c.bf16 %v1634_v37, %v1626_v26  ;;  %v1641_v6 = vld [vmem:[%s11255_s4 + $0xa80] sm:$0xff]  ;;  %v1660_v44 = vld [vmem:[%s11255_s4 + $0xb18] sm:$0xff] }
 0x296   : > { %5439 = vmatpush1.bf16.msra.mxu0 %v5438_v51  ;;  %5567 = vmatpush1.bf16.msra.mxu1 %v5566_v62  ;;  %v7956_v61 = vadd.f32 %v1284_v15, %v1272_v41  ;;  %11587 = vst [vmem:[#allocation13_spill] sm:$0xff] %v7964_v24  ;;  %v7989_v15 = vadd.f32 %v7943_v4, %v1270_v53  ;;  %v1627_v51 = vld [vmem:[%s11255_s4 + $0xa10] sm:$0xff]  ;;  %v1642_v62 = vld [vmem:[%s11255_s4 + $0xa88] sm:$0xff]  ;;  %v1649_v21 = vld [vmem:[%s11255_s4 + $0xac0] sm:$0xff] }
 0x297   : > { %11585 = vst [vmem:[#allocation11_spill] sm:$0xff] %v7954_v57  ;;  %5441 = vmatprep.subr.bf16.mxu0 %v5440_v63  ;;  %5569 = vmatprep.subr.bf16.mxu1 %v5568_v23  ;;  %v5448_v16 = vpack.c.bf16 %v1618_v45, %v1610_v13  ;;  %v5580_v50 = vpack.c.bf16 %v1636_v30, %v1628_v2  ;;  %v1650_v63 = vld [vmem:[%s11255_s4 + $0xac8] sm:$0xff]  ;;  %v1652_v23 = vld [vmem:[%s11255_s4 + $0xad8] sm:$0xff]  ;;  %v1651_v53 = vld [vmem:[%s11255_s4 + $0xad0] sm:$0xff] }
 0x298   : > { %11586 = vst [vmem:[#allocation12_spill] sm:$0xff] %v7956_v61  ;;  %1929 = vmatprep.mubr.f32.mxu0 %v7956_v61  ;;  %2083 = vmatprep.mubr.f32.mxu1 %v7956_v61  ;;  %11588 = vst [vmem:[#allocation14_spill] sm:$0xff] %v7989_v15  ;;  %v5454_v33 = vpack.c.bf16 %v1633_v39, %v1625_v58  ;;  %v5582_v29 = vpack.c.bf16 %v1635_v49, %v1627_v51  ;;  %v1666_v36 = vld [vmem:[%s11255_s4 + $0xb48] sm:$0xff]  ;;  %v1657_v3 = vld [vmem:[%s11255_s4 + $0xb00] sm:$0xff] }
 0x299   : > { %1930 = vmatmul.mubr.f32.gmra.mrb[10].mxu0 %v7964_v24  ;;  %2084 = vmatmul.mubr.f32.gmra.mrb[10].mxu1 %v7964_v24  ;;  %v5456_v35 = vpack.c.bf16 %v1650_v63, %v1642_v62  ;;  %v5584_v41 = vpack.c.bf16 %v1652_v23, %v1644_v0  ;;  %v5586_v27 = vpack.c.bf16 %v1651_v53, %v1643_v48  ;;  %v1665_v7 = vld [vmem:[%s11255_s4 + $0xb40] sm:$0xff]  ;;  %v1674_v45 = vld [vmem:[%s11255_s4 + $0xb88] sm:$0xff]  ;;  %v1676_v40 = vld [vmem:[%s11255_s4 + $0xb98] sm:$0xff] }
 0x29a   : > { %5443 = vmatpush1.bf16.msra.mxu0 %v5442_v47  ;;  %5571 = vmatpush1.bf16.msra.mxu1 %v5570_v42  ;;  %v1668_v47 = vld [vmem:[%s11255_s4 + $0xb58] sm:$0xff]  ;;  %v5458_v42 = vpack.c.bf16 %v1649_v21, %v1641_v6  ;;  %v5460_v1 = vpack.c.bf16 %v1666_v36, %v1658_v19  ;;  %v1682_v10 = vld [vmem:[%s11255_s4 + $0xbc8] sm:$0xff]  ;;  %v1673_v28 = vld [vmem:[%s11255_s4 + $0xb80] sm:$0xff] }
 0x29b   : > { %2000 = vmatprep.mubr.f32.mxu0 %v7989_v15  ;;  %2154 = vmatprep.mubr.f32.mxu1 %v7989_v15  ;;  %v5588_v13 = vpack.c.bf16 %v1668_v47, %v1660_v44  ;;  %v1675_v25 = vld [vmem:[%s11255_s4 + $0xb90] sm:$0xff]  ;;  %v1690_v37 = vld [vmem:[%s11255_s4 + $0xc08] sm:$0xff]  ;;  %v1692_v30 = vld [vmem:[%s11255_s4 + $0xc18] sm:$0xff] }
 0x29c   : > { %5445 = vmatprep.subr.bf16.mxu0 %v5444_v12  ;;  %5573 = vmatprep.subr.bf16.mxu1 %v5572_v55  ;;  %v1659_v12 = vld [vmem:[%s11255_s4 + $0xb10] sm:$0xff]  ;;  %v1698_v2 = vld [vmem:[%s11255_s4 + $0xc48] sm:$0xff]  ;;  %v1689_v39 = vld [vmem:[%s11255_s4 + $0xc00] sm:$0xff] }
 0x29d   : > { %v1667_v55 = vld [vmem:[%s11255_s4 + $0xb50] sm:$0xff]  ;;  %v1706_v63 = vld [vmem:[%s11255_s4 + $0xc88] sm:$0xff]  ;;  %v1708_v23 = vld [vmem:[%s11255_s4 + $0xc98] sm:$0xff] }
 0x29e   : > { %5447 = vmatpush1.bf16.msra.mxu0 %v5446_v54  ;;  %5575 = vmatpush1.bf16.msra.mxu1 %v5574_v14  ;;  %v1684_v54 = vld [vmem:[%s11255_s4 + $0xbd8] sm:$0xff]  ;;  %v5462_v14 = vpack.c.bf16 %v1665_v7, %v1657_v3  ;;  %v5590_v9 = vpack.c.bf16 %v1667_v55, %v1659_v12  ;;  %v1683_v26 = vld [vmem:[%s11255_s4 + $0xbd0] sm:$0xff]  ;;  %v1714_v0 = vld [vmem:[%s11255_s4 + $0xcc8] sm:$0xff] }
 0x29f   : > { %5449 = vmatprep.subr.bf16.mxu0 %v5448_v16  ;;  %5577 = vmatprep.subr.bf16.mxu1 %v5576_v17  ;;  %v1681_v16 = vld [vmem:[%s11255_s4 + $0xbc0] sm:$0xff]  ;;  %v5464_v17 = vpack.c.bf16 %v1682_v10, %v1674_v45  ;;  %v5592_v32 = vpack.c.bf16 %v1684_v54, %v1676_v40  ;;  %v5594_v58 = vpack.c.bf16 %v1683_v26, %v1675_v25  ;;  %v1691_v49 = vld [vmem:[%s11255_s4 + $0xc10] sm:$0xff]  ;;  %v1722_v36 = vld [vmem:[%s11255_s4 + $0xd08] sm:$0xff] }
 0x2a0   : > { %v1699_v62 = vld [vmem:[%s11255_s4 + $0xc50] sm:$0xff]  ;;  %v1705_v21 = vld [vmem:[%s11255_s4 + $0xc80] sm:$0xff]  ;;  %v1730_v44 = vld [vmem:[%s11255_s4 + $0xd48] sm:$0xff] }
 0x2a1   : > { %v5598_v6 = vpack.c.bf16 %v1699_v62, %v1691_v49  ;;  %v1707_v53 = vld [vmem:[%s11255_s4 + $0xc90] sm:$0xff]  ;;  %v1724_v47 = vld [vmem:[%s11255_s4 + $0xd18] sm:$0xff]  ;;  %v1721_v7 = vld [vmem:[%s11255_s4 + $0xd00] sm:$0xff] }
 0x2a2   : > { %5451 = vmatpush1.bf16.msra.mxu0 %v5450_v34  ;;  %5579 = vmatpush1.bf16.msra.mxu1 %v5578_v22  ;;  %v1700_v34 = vld [vmem:[%s11255_s4 + $0xc58] sm:$0xff]  ;;  %v5466_v22 = vpack.c.bf16 %v1681_v16, %v1673_v28  ;;  %v1715_v19 = vld [vmem:[%s11255_s4 + $0xcd0] sm:$0xff]  ;;  %v1738_v10 = vld [vmem:[%s11255_s4 + $0xd88] sm:$0xff] }
 0x2a3   : > { %5453 = vmatprep.subr.bf16.mxu0 %v5452_v43  ;;  %5581 = vmatprep.subr.bf16.mxu1 %v5580_v50  ;;  %v1697_v43 = vld [vmem:[%s11255_s4 + $0xc40] sm:$0xff]  ;;  %v5468_v50 = vpack.c.bf16 %v1698_v2, %v1690_v37  ;;  %v5596_v51 = vpack.c.bf16 %v1700_v34, %v1692_v30  ;;  %v5602_v3 = vpack.c.bf16 %v1715_v19, %v1707_v53  ;;  %v1723_v55 = vld [vmem:[%s11255_s4 + $0xd10] sm:$0xff]  ;;  %v1746_v40 = vld [vmem:[%s11255_s4 + $0xdc8] sm:$0xff] }
 0x2a4   : > { %v1731_v45 = vld [vmem:[%s11255_s4 + $0xd50] sm:$0xff]  ;;  %v1740_v54 = vld [vmem:[%s11255_s4 + $0xd98] sm:$0xff]  ;;  %v1737_v16 = vld [vmem:[%s11255_s4 + $0xd80] sm:$0xff]  ;;  %v5480_v25 = vpack.c.bf16 %v1746_v40, %v1738_v10 }
 0x2a5   : > { %v5606_v28 = vpack.c.bf16 %v1731_v45, %v1723_v55  ;;  %v1739_v37 = vld [vmem:[%s11255_s4 + $0xd90] sm:$0xff]  ;;  %v1754_v30 = vld [vmem:[%s11255_s4 + $0xe08] sm:$0xff]  ;;  %v1756_v34 = vld [vmem:[%s11255_s4 + $0xe18] sm:$0xff] }
 0x2a6   : > { %5455 = vmatpush1.bf16.msra.mxu0 %v5454_v33  ;;  %5583 = vmatpush1.bf16.msra.mxu1 %v5582_v29  ;;  %v1716_v33 = vld [vmem:[%s11255_s4 + $0xcd8] sm:$0xff]  ;;  %v5470_v29 = vpack.c.bf16 %v1697_v43, %v1689_v39  ;;  %v1747_v2 = vld [vmem:[%s11255_s4 + $0xdd0] sm:$0xff]  ;;  %v1753_v43 = vld [vmem:[%s11255_s4 + $0xe00] sm:$0xff] }
 0x2a7   : > { %5457 = vmatprep.subr.bf16.mxu0 %v5456_v35  ;;  %5585 = vmatprep.subr.bf16.mxu1 %v5584_v41  ;;  %v1713_v35 = vld [vmem:[%s11255_s4 + $0xcc0] sm:$0xff]  ;;  %v5472_v41 = vpack.c.bf16 %v1714_v0, %v1706_v63  ;;  %v5600_v48 = vpack.c.bf16 %v1716_v33, %v1708_v23  ;;  %v5610_v39 = vpack.c.bf16 %v1747_v2, %v1739_v37  ;;  %v1755_v62 = vld [vmem:[%s11255_s4 + $0xe10] sm:$0xff]  ;;  %v1770_v0 = vld [vmem:[%s11255_s4 + $0xe88] sm:$0xff] }
 0x2a8   : > { %v1763_v63 = vld [vmem:[%s11255_s4 + $0xe50] sm:$0xff]  ;;  %v1778_v23 = vld [vmem:[%s11255_s4 + $0xec8] sm:$0xff]  ;;  %v1772_v33 = vld [vmem:[%s11255_s4 + $0xe98] sm:$0xff] }
 0x2a9   : > { %v1771_v19 = vld [vmem:[%s11255_s4 + $0xe90] sm:$0xff]  ;;  %v1802_v40 = vld [vmem:[%s11255_s4 + $0xf88] sm:$0xff] }
 0x2aa   : > { %5459 = vmatpush1.bf16.msra.mxu0 %v5458_v42  ;;  %5587 = vmatpush1.bf16.msra.mxu1 %v5586_v27  ;;  %v1732_v42 = vld [vmem:[%s11255_s4 + $0xd58] sm:$0xff]  ;;  %v5474_v27 = vpack.c.bf16 %v1713_v35, %v1705_v21  ;;  %v5614_v21 = vpack.c.bf16 %v1763_v63, %v1755_v62  ;;  %v1769_v35 = vld [vmem:[%s11255_s4 + $0xe80] sm:$0xff]  ;;  %v1787_v45 = vld [vmem:[%s11255_s4 + $0xf10] sm:$0xff] }
 0x2ab   : > { %5461 = vmatprep.subr.bf16.mxu0 %v5460_v1  ;;  %5589 = vmatprep.subr.bf16.mxu1 %v5588_v13  ;;  %v1729_v1 = vld [vmem:[%s11255_s4 + $0xd40] sm:$0xff]  ;;  %v5476_v13 = vpack.c.bf16 %v1730_v44, %v1722_v36  ;;  %v5604_v12 = vpack.c.bf16 %v1732_v42, %v1724_v47  ;;  %v1779_v36 = vld [vmem:[%s11255_s4 + $0xed0] sm:$0xff]  ;;  %v1786_v44 = vld [vmem:[%s11255_s4 + $0xf08] sm:$0xff] }
 0x2ac   : > { %v1794_v47 = vld [vmem:[%s11255_s4 + $0xf48] sm:$0xff]  ;;  %v1788_v42 = vld [vmem:[%s11255_s4 + $0xf18] sm:$0xff]  ;;  %v1795_v10 = vld [vmem:[%s11255_s4 + $0xf50] sm:$0xff] }
 0x2ad   : > { %v1803_v2 = vld [vmem:[%s11255_s4 + $0xf90] sm:$0xff]  ;;  %v1317_v62 = vld [vmem:[%s11255_s4 + $0x60] sm:$0xff] }
 0x2ae   : > { %5463 = vmatpush1.bf16.msra.mxu0 %v5462_v14  ;;  %5591 = vmatpush1.bf16.msra.mxu1 %v5590_v9  ;;  %v1748_v14 = vld [vmem:[%s11255_s4 + $0xdd8] sm:$0xff]  ;;  %v5478_v9 = vpack.c.bf16 %v1729_v1, %v1721_v7  ;;  %v5618_v7 = vpack.c.bf16 %v1779_v36, %v1771_v19  ;;  %v1785_v1 = vld [vmem:[%s11255_s4 + $0xf00] sm:$0xff] }
 0x2af   : > { %5465 = vmatprep.subr.bf16.mxu0 %v5464_v17  ;;  %5593 = vmatprep.subr.bf16.mxu1 %v5592_v32  ;;  %v1745_v17 = vld [vmem:[%s11255_s4 + $0xdc0] sm:$0xff]  ;;  %v5891_v32 = vadd.f32 1e-05, %v7856_v60  ;;  %v5608_v26 = vpack.c.bf16 %v1748_v14, %v1740_v54  ;;  %v1762_v60 = vld [vmem:[%s11255_s4 + $0xe48] sm:$0xff]  ;;  %v1804_v14 = vld [vmem:[%s11255_s4 + $0xf98] sm:$0xff] }
 0x2b0   : > { %v1810_v54 = vld [vmem:[%s11255_s4 + $0xfc8] sm:$0xff] }
 0x2b1   : > { %5972 = vrsqrt.f32 %v5891_v32  ;;  %v1801_v32 = vld [vmem:[%s11255_s4 + $0xf80] sm:$0xff] }
 0x2b2   : > { %5467 = vmatpush1.bf16.msra.mxu0 %v5466_v22  ;;  %5595 = vmatpush1.bf16.msra.mxu1 %v5594_v58  ;;  %v1764_v22 = vld [vmem:[%s11255_s4 + $0xe58] sm:$0xff]  ;;  %v5482_v58 = vpack.c.bf16 %v1745_v17, %v1737_v16  ;;  %v5622_v17 = vpack.c.bf16 %v1795_v10, %v1787_v45  ;;  %v1343_v10 = vld [vmem:[%s11255_s4 + $0x130] sm:$0xff] }
 0x2b3   : > { %5469 = vmatprep.subr.bf16.mxu0 %v5468_v50  ;;  %5597 = vmatprep.subr.bf16.mxu1 %v5596_v51  ;;  %v1761_v50 = vld [vmem:[%s11255_s4 + $0xe40] sm:$0xff]  ;;  %v5484_v51 = vpack.c.bf16 %v1762_v60, %v1754_v30  ;;  %v5612_v49 = vpack.c.bf16 %v1764_v22, %v1756_v34  ;;  %v1811_v30 = vld [vmem:[%s11255_s4 + $0xfd0] sm:$0xff]  ;;  %v1310_v60 = vld [vmem:[%s11255_s4 + $0x28] sm:$0xff] }
 0x2b4   : > { %v1318_v22 = vld [vmem:[%s11255_s4 + $0x68] sm:$0xff] }
 0x2b6   : > { %5471 = vmatpush1.bf16.msra.mxu0 %v5470_v29  ;;  %5599 = vmatpush1.bf16.msra.mxu1 %v5598_v6  ;;  %v1780_v29 = vld [vmem:[%s11255_s4 + $0xed8] sm:$0xff]  ;;  %v5486_v6 = vpack.c.bf16 %v1761_v50, %v1753_v43  ;;  %v5626_v50 = vpack.c.bf16 %v1811_v30, %v1803_v2  ;;  %v1359_v2 = vld [vmem:[%s11255_s4 + $0x1b0] sm:$0xff] }
 0x2b7   : > { %5473 = vmatprep.subr.bf16.mxu0 %v5472_v41  ;;  %5601 = vmatprep.subr.bf16.mxu1 %v5600_v48  ;;  %v1777_v41 = vld [vmem:[%s11255_s4 + $0xec0] sm:$0xff]  ;;  %v5488_v48 = vpack.c.bf16 %v1778_v23, %v1770_v0  ;;  %v5616_v53 = vpack.c.bf16 %v1780_v29, %v1772_v33  ;;  %v1311_v0 = vld [vmem:[%s11255_s4 + $0x30] sm:$0xff]  ;;  %v1326_v33 = vld [vmem:[%s11255_s4 + $0xa8] sm:$0xff] }
 0x2b8   : > { %v1319_v23 = vld [vmem:[%s11255_s4 + $0x70] sm:$0xff]  ;;  %v1334_v29 = vld [vmem:[%s11255_s4 + $0xe8] sm:$0xff] }
 0x2b9   : > { %v5632_v19 = vpack.c.bf16 %v1334_v29, %v1326_v33  ;;  %v1367_v30 = vld [vmem:[%s11255_s4 + $0x1f0] sm:$0xff]  ;;  %v1392_v33 = vld [vmem:[%s11255_s4 + $0x2b8] sm:$0xff] }
 0x2ba   : > { %5475 = vmatpush1.bf16.msra.mxu0 %v5474_v27  ;;  %5603 = vmatpush1.bf16.msra.mxu1 %v5602_v3  ;;  %v1796_v27 = vld [vmem:[%s11255_s4 + $0xf58] sm:$0xff]  ;;  %v5490_v3 = vpack.c.bf16 %v1777_v41, %v1769_v35  ;;  %v5758_v35 = vpack.c.bf16 %v1319_v23, %v1311_v0  ;;  %v1325_v41 = vld [vmem:[%s11255_s4 + $0xa0] sm:$0xff]  ;;  %v1390_v0 = vld [vmem:[%s11255_s4 + $0x2a8] sm:$0xff] }
 0x2bb   : > { %5477 = vmatprep.subr.bf16.mxu0 %v5476_v13  ;;  %5605 = vmatprep.subr.bf16.mxu1 %v5604_v12  ;;  %v1793_v13 = vld [vmem:[%s11255_s4 + $0xf40] sm:$0xff]  ;;  %v5492_v12 = vpack.c.bf16 %v1794_v47, %v1786_v44  ;;  %v5620_v55 = vpack.c.bf16 %v1796_v27, %v1788_v42  ;;  %v1327_v44 = vld [vmem:[%s11255_s4 + $0xb0] sm:$0xff]  ;;  %v1342_v42 = vld [vmem:[%s11255_s4 + $0x128] sm:$0xff] }
 0x2bc   : > { %v5494_v16 = vpack.c.bf16 %v1793_v13, %v1785_v1  ;;  %v1335_v47 = vld [vmem:[%s11255_s4 + $0xf0] sm:$0xff]  ;;  %v1344_v27 = vld [vmem:[%s11255_s4 + $0x138] sm:$0xff]  ;;  %v1341_v13 = vld [vmem:[%s11255_s4 + $0x120] sm:$0xff] }
 0x2bd   : > { %v5762_v1 = vpack.c.bf16 %v1335_v47, %v1327_v44  ;;  %v1398_v23 = vld [vmem:[%s11255_s4 + $0x2e8] sm:$0xff]  ;;  %v1400_v29 = vld [vmem:[%s11255_s4 + $0x2f8] sm:$0xff] }
 0x2be   : > { %5479 = vmatpush1.bf16.msra.mxu0 %v5478_v9  ;;  %5607 = vmatpush1.bf16.msra.mxu1 %v5606_v28  ;;  %v1812_v9 = vld [vmem:[%s11255_s4 + $0xfd8] sm:$0xff]  ;;  %v5973_v28 = vpop.eup %5972  ;;  %v1406_v44 = vld [vmem:[%s11255_s4 + $0x328] sm:$0xff] }
 0x2bf   : > { %5481 = vmatprep.subr.bf16.mxu0 %v5480_v25  ;;  %5609 = vmatprep.subr.bf16.mxu1 %v5608_v26  ;;  %v1809_v25 = vld [vmem:[%s11255_s4 + $0xfc0] sm:$0xff]  ;;  %v5496_v26 = vpack.c.bf16 %v1810_v54, %v1802_v40  ;;  %v5624_v37 = vpack.c.bf16 %v1812_v9, %v1804_v14  ;;  %v1244_v34 = vmul.f32 %v5973_v28, %v7461_v20  ;;  %v1351_v40 = vld [vmem:[%s11255_s4 + $0x170] sm:$0xff]  ;;  %v1358_v54 = vld [vmem:[%s11255_s4 + $0x1a8] sm:$0xff] }
 0x2c0   : > { %v5498_v43 = vpack.c.bf16 %v1809_v25, %v1801_v32  ;;  %v1366_v14 = vld [vmem:[%s11255_s4 + $0x1e8] sm:$0xff]  ;;  %v1360_v9 = vld [vmem:[%s11255_s4 + $0x1b8] sm:$0xff]  ;;  %v1357_v32 = vld [vmem:[%s11255_s4 + $0x1a0] sm:$0xff] }
 0x2c1   : > { %v1274_v63 = vmul.f32 %v7911_v38, %v1244_v34  ;;  %v1328_v38 = vld [vmem:[%s11255_s4 + $0xb8] sm:$0xff]  ;;  %v1365_v25 = vld [vmem:[%s11255_s4 + $0x1e0] sm:$0xff]  ;;  %v1382_v34 = vld [vmem:[%s11255_s4 + $0x268] sm:$0xff] }
 0x2c2   : > { %5483 = vmatpush1.bf16.msra.mxu0 %v5482_v58  ;;  %5611 = vmatpush1.bf16.msra.mxu1 %v5610_v39  ;;  %v1312_v58 = vld [vmem:[%s11255_s4 + $0x38] sm:$0xff]  ;;  %v1414_v47 = vld [vmem:[%s11255_s4 + $0x368] sm:$0xff] }
 0x2c3   : > { %5485 = vmatprep.subr.bf16.mxu0 %v5484_v51  ;;  %5613 = vmatprep.subr.bf16.mxu1 %v5612_v49  ;;  %v1320_v39 = vld [vmem:[%s11255_s4 + $0x78] sm:$0xff]  ;;  %v5628_v51 = vpack.c.bf16 %v1318_v22, %v1310_v60  ;;  %v1309_v49 = vld [vmem:[%s11255_s4 + $0x20] sm:$0xff]  ;;  %v1374_v60 = vld [vmem:[%s11255_s4 + $0x228] sm:$0xff] }
 0x2c4   : > { %v5756_v20 = vpack.c.bf16 %v1320_v39, %v1312_v58  ;;  %v1368_v28 = vld [vmem:[%s11255_s4 + $0x1f8] sm:$0xff]  ;;  %v5642_v39 = vpack.c.bf16 %v1365_v25, %v1357_v32 }
 0x2c5   : > { %v1376_v22 = vld [vmem:[%s11255_s4 + $0x238] sm:$0xff] }
 0x2c6   : > { %5487 = vmatpush1.bf16.msra.mxu0 %v5486_v6  ;;  %5615 = vmatpush1.bf16.msra.mxu1 %v5614_v21  ;;  %v1336_v6 = vld [vmem:[%s11255_s4 + $0xf8] sm:$0xff]  ;;  %v5630_v21 = vpack.c.bf16 %v1317_v62, %v1309_v49  ;;  %v1375_v62 = vld [vmem:[%s11255_s4 + $0x230] sm:$0xff] }
 0x2c7   : > { %5489 = vmatprep.subr.bf16.mxu0 %v5488_v48  ;;  %5617 = vmatprep.subr.bf16.mxu1 %v5616_v53  ;;  %v1333_v48 = vld [vmem:[%s11255_s4 + $0xe0] sm:$0xff]  ;;  %v8339_v53 = vadd.f32 %v7943_v4, %v1274_v63  ;;  %v5760_v36 = vpack.c.bf16 %v1336_v6, %v1328_v38  ;;  %v1350_v4 = vld [vmem:[%s11255_s4 + $0x168] sm:$0xff]  ;;  %v1384_v58 = vld [vmem:[%s11255_s4 + $0x278] sm:$0xff] }
 0x2c8   : > { %v5772_v49 = vpack.c.bf16 %v1384_v58, %v1376_v22  ;;  %v1383_v63 = vld [vmem:[%s11255_s4 + $0x270] sm:$0xff] }
 0x2c9   : > { %11589 = vst [vmem:[#allocation15_spill] sm:$0xff] %v8339_v53  ;;  %v5774_v6 = vpack.c.bf16 %v1383_v63, %v1375_v62  ;;  %v1454_v62 = vld [vmem:[%s11255_s4 + $0x4a8] sm:$0xff] }
 0x2ca   : > { %5491 = vmatpush1.bf16.msra.mxu0 %v5490_v3  ;;  %5619 = vmatpush1.bf16.msra.mxu1 %v5618_v7  ;;  %v1352_v3 = vld [vmem:[%s11255_s4 + $0x178] sm:$0xff]  ;;  %v5634_v7 = vpack.c.bf16 %v1333_v48, %v1325_v41  ;;  %v5648_v41 = vpack.c.bf16 %v1398_v23, %v1390_v0  ;;  %v5776_v48 = vpack.c.bf16 %v1400_v29, %v1392_v33  ;;  %v1462_v63 = vld [vmem:[%s11255_s4 + $0x4e8] sm:$0xff] }
 0x2cb   : > { %5493 = vmatprep.subr.bf16.mxu0 %v5492_v12  ;;  %5621 = vmatprep.subr.bf16.mxu1 %v5620_v55  ;;  %v1349_v12 = vld [vmem:[%s11255_s4 + $0x160] sm:$0xff]  ;;  %v5636_v55 = vpack.c.bf16 %v1350_v4, %v1342_v42  ;;  %v5764_v45 = vpack.c.bf16 %v1352_v3, %v1344_v27  ;;  %v1408_v42 = vld [vmem:[%s11255_s4 + $0x338] sm:$0xff] }
 0x2cc   : > { %v1416_v4 = vld [vmem:[%s11255_s4 + $0x378] sm:$0xff] }
 0x2cd   : > { %v1456_v0 = vld [vmem:[%s11255_s4 + $0x4b8] sm:$0xff] }
 0x2ce   : > { %5495 = vmatpush1.bf16.msra.mxu0 %v5494_v16  ;;  %5623 = vmatpush1.bf16.msra.mxu1 %v5622_v17  ;;  %v5638_v16 = vpack.c.bf16 %v1349_v12, %v1341_v13  ;;  %v5766_v17 = vpack.c.bf16 %v1351_v40, %v1343_v10  ;;  %v5652_v13 = vpack.c.bf16 %v1414_v47, %v1406_v44  ;;  %v1422_v10 = vld [vmem:[%s11255_s4 + $0x3a8] sm:$0xff]  ;;  %v1464_v23 = vld [vmem:[%s11255_s4 + $0x4f8] sm:$0xff] }
 0x2cf   : > { %5497 = vmatprep.subr.bf16.mxu0 %v5496_v26  ;;  %5625 = vmatprep.subr.bf16.mxu1 %v5624_v37  ;;  %v5640_v26 = vpack.c.bf16 %v1366_v14, %v1358_v54  ;;  %v5768_v37 = vpack.c.bf16 %v1368_v28, %v1360_v9  ;;  %v5780_v12 = vpack.c.bf16 %v1416_v4, %v1408_v42  ;;  %v1430_v40 = vld [vmem:[%s11255_s4 + $0x3e8] sm:$0xff]  ;;  %v1424_v54 = vld [vmem:[%s11255_s4 + $0x3b8] sm:$0xff] }
 0x2d0   : > { %v1432_v14 = vld [vmem:[%s11255_s4 + $0x3f8] sm:$0xff]  ;;  %v5656_v32 = vpack.c.bf16 %v1430_v40, %v1422_v10 }
 0x2d1   : > { %v5784_v25 = vpack.c.bf16 %v1432_v14, %v1424_v54  ;;  %v1472_v44 = vld [vmem:[%s11255_s4 + $0x538] sm:$0xff] }
 0x2d2   : > { %5499 = vmatpush1.bf16.msra.mxu0 %v5498_v43  ;;  %5627 = vmatpush1.bf16.msra.mxu1 %v5626_v50  ;;  %v5770_v43 = vpack.c.bf16 %v1367_v30, %v1359_v2  ;;  %v1373_v50 = vld [vmem:[%s11255_s4 + $0x220] sm:$0xff]  ;;  %v1438_v2 = vld [vmem:[%s11255_s4 + $0x428] sm:$0xff]  ;;  %v1480_v47 = vld [vmem:[%s11255_s4 + $0x578] sm:$0xff] }
 0x2d3   : > { %5629 = vmatprep.subr.bf16.mxu0 %v5628_v51  ;;  %5757 = vmatprep.subr.bf16.mxu1 %v5756_v20  ;;  %v1381_v51 = vld [vmem:[%s11255_s4 + $0x260] sm:$0xff]  ;;  %v5644_v20 = vpack.c.bf16 %v1382_v34, %v1374_v60  ;;  %v1446_v30 = vld [vmem:[%s11255_s4 + $0x468] sm:$0xff]  ;;  %v1440_v60 = vld [vmem:[%s11255_s4 + $0x438] sm:$0xff] }
 0x2d4   : > { %v5646_v38 = vpack.c.bf16 %v1381_v51, %v1373_v50  ;;  %v1448_v34 = vld [vmem:[%s11255_s4 + $0x478] sm:$0xff]  ;;  %v5660_v50 = vpack.c.bf16 %v1446_v30, %v1438_v2 }
 0x2d5   : > { %2001 = vmatmul.mubr.f32.vlgmr.msra.gmra.mrb[8].mxu0 %v7915_v52  ;;  %2155 = vmatmul.mubr.f32.vlgmr.msra.gmra.mrb[8].mxu1 %v7915_v52  ;;  %v5788_v51 = vpack.c.bf16 %v1448_v34, %v1440_v60  ;;  %v1488_v10 = vld [vmem:[%s11255_s4 + $0x5b8] sm:$0xff] }
 0x2d6   : > { %2006 = vmatprep.mubr.f32.mxu0 %v8339_v53  ;;  %2160 = vmatprep.mubr.f32.mxu1 %v8339_v53  ;;  %v1496_v40 = vld [vmem:[%s11255_s4 + $0x5f8] sm:$0xff] }
 0x2d7   : > { %5631 = vmatpush1.bf16.msra.mxu0 %v5630_v21  ;;  %5759 = vmatpush1.bf16.msra.mxu1 %v5758_v35  ;;  %v1389_v21 = vld [vmem:[%s11255_s4 + $0x2a0] sm:$0xff]  ;;  %v1504_v2 = vld [vmem:[%s11255_s4 + $0x638] sm:$0xff] }
 0x2d8   : > { %5633 = vmatprep.subr.bf16.mxu0 %v5632_v19  ;;  %5761 = vmatprep.subr.bf16.mxu1 %v5760_v36  ;;  %v1397_v35 = vld [vmem:[%s11255_s4 + $0x2e0] sm:$0xff]  ;;  %v1391_v19 = vld [vmem:[%s11255_s4 + $0x2b0] sm:$0xff]  ;;  %v1512_v30 = vld [vmem:[%s11255_s4 + $0x678] sm:$0xff] }
 0x2d9   : > { %2007 = vmatmul.mubr.f32.gmra.mrb[10].mxu0 %v7954_v57  ;;  %2161 = vmatmul.mubr.f32.gmra.mrb[10].mxu1 %v7954_v57  ;;  %v1399_v36 = vld [vmem:[%s11255_s4 + $0x2f0] sm:$0xff]  ;;  %v5650_v27 = vpack.c.bf16 %v1397_v35, %v1389_v21  ;;  %v5664_v21 = vpack.c.bf16 %v1462_v63, %v1454_v62  ;;  %v5792_v35 = vpack.c.bf16 %v1464_v23, %v1456_v0  ;;  %v1520_v62 = vld [vmem:[%s11255_s4 + $0x6b8] sm:$0xff] }
 0x2da   : > { %2231 = vmatprep.mubr.f32.mxu0 %v7918_v56  ;;  %2385 = vmatprep.mubr.f32.mxu1 %v7918_v56  ;;  %v5778_v3 = vpack.c.bf16 %v1399_v36, %v1391_v19  ;;  %v1470_v19 = vld [vmem:[%s11255_s4 + $0x528] sm:$0xff]  ;;  %v1528_v63 = vld [vmem:[%s11255_s4 + $0x6f8] sm:$0xff] }
 0x2db   : > { %5635 = vmatpush1.bf16.msra.mxu0 %v5634_v7  ;;  %5763 = vmatpush1.bf16.msra.mxu1 %v5762_v1  ;;  %v1405_v7 = vld [vmem:[%s11255_s4 + $0x320] sm:$0xff]  ;;  %v1478_v36 = vld [vmem:[%s11255_s4 + $0x568] sm:$0xff] }
 0x2dc   : > { %5637 = vmatprep.subr.bf16.mxu0 %v5636_v55  ;;  %5765 = vmatprep.subr.bf16.mxu1 %v5764_v45  ;;  %v1413_v1 = vld [vmem:[%s11255_s4 + $0x360] sm:$0xff]  ;;  %v1407_v55 = vld [vmem:[%s11255_s4 + $0x330] sm:$0xff] }
 0x2dd   : > { %v1415_v45 = vld [vmem:[%s11255_s4 + $0x370] sm:$0xff]  ;;  %v5654_v9 = vpack.c.bf16 %v1413_v1, %v1405_v7  ;;  %v5668_v7 = vpack.c.bf16 %v1478_v36, %v1470_v19  ;;  %v5796_v1 = vpack.c.bf16 %v1480_v47, %v1472_v44  ;;  %v1536_v19 = vld [vmem:[%s11255_s4 + $0x738] sm:$0xff] }
 0x2de   : > { %v5782_v28 = vpack.c.bf16 %v1415_v45, %v1407_v55  ;;  %v1486_v55 = vld [vmem:[%s11255_s4 + $0x5a8] sm:$0xff]  ;;  %v1544_v36 = vld [vmem:[%s11255_s4 + $0x778] sm:$0xff] }
 0x2df   : > { %5639 = vmatpush1.bf16.msra.mxu0 %v5638_v16  ;;  %5767 = vmatpush1.bf16.msra.mxu1 %v5766_v17  ;;  %v1421_v16 = vld [vmem:[%s11255_s4 + $0x3a0] sm:$0xff]  ;;  %v1494_v45 = vld [vmem:[%s11255_s4 + $0x5e8] sm:$0xff] }
 0x2e0   : > { %5641 = vmatprep.subr.bf16.mxu0 %v5640_v26  ;;  %5769 = vmatprep.subr.bf16.mxu1 %v5768_v37  ;;  %v1429_v17 = vld [vmem:[%s11255_s4 + $0x3e0] sm:$0xff]  ;;  %v1423_v26 = vld [vmem:[%s11255_s4 + $0x3b0] sm:$0xff] }
 0x2e1   : > { %v1431_v37 = vld [vmem:[%s11255_s4 + $0x3f0] sm:$0xff]  ;;  %v5658_v22 = vpack.c.bf16 %v1429_v17, %v1421_v16  ;;  %v5672_v16 = vpack.c.bf16 %v1494_v45, %v1486_v55  ;;  %v5800_v17 = vpack.c.bf16 %v1496_v40, %v1488_v10  ;;  %v1552_v55 = vld [vmem:[%s11255_s4 + $0x7b8] sm:$0xff] }
 0x2e2   : > { %v5786_v58 = vpack.c.bf16 %v1431_v37, %v1423_v26  ;;  %v1502_v26 = vld [vmem:[%s11255_s4 + $0x628] sm:$0xff]  ;;  %v1560_v45 = vld [vmem:[%s11255_s4 + $0x7f8] sm:$0xff] }
 0x2e3   : > { %5643 = vmatpush1.bf16.msra.mxu0 %v5642_v39  ;;  %5771 = vmatpush1.bf16.msra.mxu1 %v5770_v43  ;;  %v1437_v39 = vld [vmem:[%s11255_s4 + $0x420] sm:$0xff]  ;;  %v1510_v37 = vld [vmem:[%s11255_s4 + $0x668] sm:$0xff] }
 0x2e4   : > { %5645 = vmatprep.subr.bf16.mxu0 %v5644_v20  ;;  %5773 = vmatprep.subr.bf16.mxu1 %v5772_v49  ;;  %v1445_v43 = vld [vmem:[%s11255_s4 + $0x460] sm:$0xff]  ;;  %v1439_v20 = vld [vmem:[%s11255_s4 + $0x430] sm:$0xff] }
 0x2e5   : > { %v1447_v49 = vld [vmem:[%s11255_s4 + $0x470] sm:$0xff]  ;;  %v5662_v33 = vpack.c.bf16 %v1445_v43, %v1437_v39  ;;  %v5676_v39 = vpack.c.bf16 %v1510_v37, %v1502_v26  ;;  %v5804_v43 = vpack.c.bf16 %v1512_v30, %v1504_v2  ;;  %v1568_v26 = vld [vmem:[%s11255_s4 + $0x838] sm:$0xff] }
 0x2e6   : > { %v5790_v29 = vpack.c.bf16 %v1447_v49, %v1439_v20  ;;  %v1518_v20 = vld [vmem:[%s11255_s4 + $0x6a8] sm:$0xff]  ;;  %v1576_v37 = vld [vmem:[%s11255_s4 + $0x878] sm:$0xff] }
 0x2e7   : > { %5647 = vmatpush1.bf16.msra.mxu0 %v5646_v38  ;;  %5775 = vmatpush1.bf16.msra.mxu1 %v5774_v6  ;;  %v1453_v38 = vld [vmem:[%s11255_s4 + $0x4a0] sm:$0xff]  ;;  %v1526_v49 = vld [vmem:[%s11255_s4 + $0x6e8] sm:$0xff] }
 0x2e8   : > { %5649 = vmatprep.subr.bf16.mxu0 %v5648_v41  ;;  %5777 = vmatprep.subr.bf16.mxu1 %v5776_v48  ;;  %v1461_v6 = vld [vmem:[%s11255_s4 + $0x4e0] sm:$0xff]  ;;  %v1455_v41 = vld [vmem:[%s11255_s4 + $0x4b0] sm:$0xff] }
 0x2e9   : > { %v1463_v48 = vld [vmem:[%s11255_s4 + $0x4f0] sm:$0xff]  ;;  %v5666_v42 = vpack.c.bf16 %v1461_v6, %v1453_v38  ;;  %v5680_v38 = vpack.c.bf16 %v1526_v49, %v1518_v20  ;;  %v5808_v6 = vpack.c.bf16 %v1528_v63, %v1520_v62  ;;  %v1584_v20 = vld [vmem:[%s11255_s4 + $0x8b8] sm:$0xff] }
 0x2ea   : > { %v5794_v4 = vpack.c.bf16 %v1463_v48, %v1455_v41  ;;  %v1534_v41 = vld [vmem:[%s11255_s4 + $0x728] sm:$0xff]  ;;  %v1592_v49 = vld [vmem:[%s11255_s4 + $0x8f8] sm:$0xff] }
 0x2eb   : > { %5651 = vmatpush1.bf16.msra.mxu0 %v5650_v27  ;;  %5779 = vmatpush1.bf16.msra.mxu1 %v5778_v3  ;;  %v1469_v27 = vld [vmem:[%s11255_s4 + $0x520] sm:$0xff]  ;;  %v1542_v48 = vld [vmem:[%s11255_s4 + $0x768] sm:$0xff] }
 0x2ec   : > { %5653 = vmatprep.subr.bf16.mxu0 %v5652_v13  ;;  %5781 = vmatprep.subr.bf16.mxu1 %v5780_v12  ;;  %v1477_v3 = vld [vmem:[%s11255_s4 + $0x560] sm:$0xff]  ;;  %v1471_v13 = vld [vmem:[%s11255_s4 + $0x530] sm:$0xff] }
 0x2ed   : > { %v1479_v12 = vld [vmem:[%s11255_s4 + $0x570] sm:$0xff]  ;;  %v5670_v54 = vpack.c.bf16 %v1477_v3, %v1469_v27  ;;  %v5684_v27 = vpack.c.bf16 %v1542_v48, %v1534_v41  ;;  %v5812_v3 = vpack.c.bf16 %v1544_v36, %v1536_v19  ;;  %v1600_v41 = vld [vmem:[%s11255_s4 + $0x938] sm:$0xff] }
 0x2ee   : > { %v5798_v14 = vpack.c.bf16 %v1479_v12, %v1471_v13  ;;  %v1550_v13 = vld [vmem:[%s11255_s4 + $0x7a8] sm:$0xff]  ;;  %v1608_v48 = vld [vmem:[%s11255_s4 + $0x978] sm:$0xff] }
 0x2ef   : > { %5655 = vmatpush1.bf16.msra.mxu0 %v5654_v9  ;;  %5783 = vmatpush1.bf16.msra.mxu1 %v5782_v28  ;;  %v1485_v9 = vld [vmem:[%s11255_s4 + $0x5a0] sm:$0xff]  ;;  %v1558_v12 = vld [vmem:[%s11255_s4 + $0x7e8] sm:$0xff] }
 0x2f0   : > { %5657 = vmatprep.subr.bf16.mxu0 %v5656_v32  ;;  %5785 = vmatprep.subr.bf16.mxu1 %v5784_v25  ;;  %v1493_v28 = vld [vmem:[%s11255_s4 + $0x5e0] sm:$0xff]  ;;  %v1487_v32 = vld [vmem:[%s11255_s4 + $0x5b0] sm:$0xff] }
 0x2f1   : > { %v1495_v25 = vld [vmem:[%s11255_s4 + $0x5f0] sm:$0xff]  ;;  %v5674_v60 = vpack.c.bf16 %v1493_v28, %v1485_v9  ;;  %v5688_v9 = vpack.c.bf16 %v1558_v12, %v1550_v13  ;;  %v5816_v28 = vpack.c.bf16 %v1560_v45, %v1552_v55  ;;  %v1616_v13 = vld [vmem:[%s11255_s4 + $0x9b8] sm:$0xff] }
 0x2f2   : > { %v5802_v34 = vpack.c.bf16 %v1495_v25, %v1487_v32  ;;  %v1566_v32 = vld [vmem:[%s11255_s4 + $0x828] sm:$0xff]  ;;  %v1624_v12 = vld [vmem:[%s11255_s4 + $0x9f8] sm:$0xff] }
 0x2f3   : > { %5659 = vmatpush1.bf16.msra.mxu0 %v5658_v22  ;;  %5787 = vmatpush1.bf16.msra.mxu1 %v5786_v58  ;;  %v1501_v22 = vld [vmem:[%s11255_s4 + $0x620] sm:$0xff]  ;;  %v1574_v25 = vld [vmem:[%s11255_s4 + $0x868] sm:$0xff] }
 0x2f4   : > { %5661 = vmatprep.subr.bf16.mxu0 %v5660_v50  ;;  %5789 = vmatprep.subr.bf16.mxu1 %v5788_v51  ;;  %v1509_v58 = vld [vmem:[%s11255_s4 + $0x660] sm:$0xff]  ;;  %v1503_v50 = vld [vmem:[%s11255_s4 + $0x630] sm:$0xff] }
 0x2f5   : > { %v1511_v51 = vld [vmem:[%s11255_s4 + $0x670] sm:$0xff]  ;;  %v5678_v0 = vpack.c.bf16 %v1509_v58, %v1501_v22  ;;  %v1565_v22 = vld [vmem:[%s11255_s4 + $0x820] sm:$0xff] }
 0x2f6   : > { %v5806_v23 = vpack.c.bf16 %v1511_v51, %v1503_v50  ;;  %v1573_v58 = vld [vmem:[%s11255_s4 + $0x860] sm:$0xff]  ;;  %v1582_v50 = vld [vmem:[%s11255_s4 + $0x8a8] sm:$0xff] }
 0x2f7   : > { %5663 = vmatpush1.bf16.msra.mxu0 %v5662_v33  ;;  %5791 = vmatpush1.bf16.msra.mxu1 %v5790_v29  ;;  %v1517_v33 = vld [vmem:[%s11255_s4 + $0x6a0] sm:$0xff]  ;;  %v1590_v51 = vld [vmem:[%s11255_s4 + $0x8e8] sm:$0xff]  ;;  %v5694_v62 = vpack.c.bf16 %v1573_v58, %v1565_v22  ;;  %v1639_v58 = vld [vmem:[%s11255_s4 + $0xa70] sm:$0xff] }
 0x2f8   : > { %5665 = vmatprep.subr.bf16.mxu0 %v5664_v21  ;;  %5793 = vmatprep.subr.bf16.mxu1 %v5792_v35  ;;  %v1525_v29 = vld [vmem:[%s11255_s4 + $0x6e0] sm:$0xff]  ;;  %v1519_v21 = vld [vmem:[%s11255_s4 + $0x6b0] sm:$0xff] }
 0x2f9   : > { %v1527_v35 = vld [vmem:[%s11255_s4 + $0x6f0] sm:$0xff]  ;;  %v5682_v44 = vpack.c.bf16 %v1525_v29, %v1517_v33  ;;  %v5696_v33 = vpack.c.bf16 %v1590_v51, %v1582_v50  ;;  %v5824_v29 = vpack.c.bf16 %v1592_v49, %v1584_v20  ;;  %v1648_v50 = vld [vmem:[%s11255_s4 + $0xab8] sm:$0xff] }
 0x2fa   : > { %v5810_v47 = vpack.c.bf16 %v1527_v35, %v1519_v21  ;;  %v1598_v21 = vld [vmem:[%s11255_s4 + $0x928] sm:$0xff]  ;;  %v1656_v51 = vld [vmem:[%s11255_s4 + $0xaf8] sm:$0xff] }
 0x2fb   : > { %5667 = vmatpush1.bf16.msra.mxu0 %v5666_v42  ;;  %5795 = vmatpush1.bf16.msra.mxu1 %v5794_v4  ;;  %v1533_v42 = vld [vmem:[%s11255_s4 + $0x720] sm:$0xff]  ;;  %v1606_v35 = vld [vmem:[%s11255_s4 + $0x968] sm:$0xff] }
 0x2fc   : > { %5669 = vmatprep.subr.bf16.mxu0 %v5668_v7  ;;  %5797 = vmatprep.subr.bf16.mxu1 %v5796_v1  ;;  %v1541_v4 = vld [vmem:[%s11255_s4 + $0x760] sm:$0xff]  ;;  %v1535_v7 = vld [vmem:[%s11255_s4 + $0x730] sm:$0xff] }
 0x2fd   : > { %v1543_v1 = vld [vmem:[%s11255_s4 + $0x770] sm:$0xff]  ;;  %v5686_v10 = vpack.c.bf16 %v1541_v4, %v1533_v42  ;;  %v5700_v4 = vpack.c.bf16 %v1606_v35, %v1598_v21  ;;  %v1664_v21 = vld [vmem:[%s11255_s4 + $0xb38] sm:$0xff] }
 0x2fe   : > { %v5814_v40 = vpack.c.bf16 %v1543_v1, %v1535_v7  ;;  %v1599_v42 = vld [vmem:[%s11255_s4 + $0x930] sm:$0xff]  ;;  %v1614_v7 = vld [vmem:[%s11255_s4 + $0x9a8] sm:$0xff]  ;;  %v1672_v35 = vld [vmem:[%s11255_s4 + $0xb78] sm:$0xff] }
 0x2ff   : > { %5671 = vmatpush1.bf16.msra.mxu0 %v5670_v54  ;;  %5799 = vmatpush1.bf16.msra.mxu1 %v5798_v14  ;;  %v1549_v54 = vld [vmem:[%s11255_s4 + $0x7a0] sm:$0xff]  ;;  %v1622_v1 = vld [vmem:[%s11255_s4 + $0x9e8] sm:$0xff] }
 0x300   : > { %5673 = vmatprep.subr.bf16.mxu0 %v5672_v16  ;;  %5801 = vmatprep.subr.bf16.mxu1 %v5800_v17  ;;  %v1557_v14 = vld [vmem:[%s11255_s4 + $0x7e0] sm:$0xff]  ;;  %v1551_v16 = vld [vmem:[%s11255_s4 + $0x7b0] sm:$0xff] }
 0x301   : > { %v1559_v17 = vld [vmem:[%s11255_s4 + $0x7f0] sm:$0xff]  ;;  %v5690_v2 = vpack.c.bf16 %v1557_v14, %v1549_v54  ;;  %v1621_v54 = vld [vmem:[%s11255_s4 + $0x9e0] sm:$0xff] }
 0x302   : > { %v5818_v30 = vpack.c.bf16 %v1559_v17, %v1551_v16  ;;  %v1615_v14 = vld [vmem:[%s11255_s4 + $0x9b0] sm:$0xff]  ;;  %v1630_v16 = vld [vmem:[%s11255_s4 + $0xa28] sm:$0xff] }
 0x303   : > { %5675 = vmatpush1.bf16.msra.mxu0 %v5674_v60  ;;  %5803 = vmatpush1.bf16.msra.mxu1 %v5802_v34  ;;  %v5692_v60 = vpack.c.bf16 %v1574_v25, %v1566_v32  ;;  %v5820_v34 = vpack.c.bf16 %v1576_v37, %v1568_v26  ;;  %v1638_v17 = vld [vmem:[%s11255_s4 + $0xa68] sm:$0xff]  ;;  %v1632_v32 = vld [vmem:[%s11255_s4 + $0xa38] sm:$0xff] }
 0x304   : > { %5677 = vmatprep.subr.bf16.mxu0 %v5676_v39  ;;  %5805 = vmatprep.subr.bf16.mxu1 %v5804_v43  ;;  %v1567_v39 = vld [vmem:[%s11255_s4 + $0x830] sm:$0xff]  ;;  %v1640_v25 = vld [vmem:[%s11255_s4 + $0xa78] sm:$0xff] }
 0x305   : > { %v1575_v43 = vld [vmem:[%s11255_s4 + $0x870] sm:$0xff]  ;;  %v5836_v22 = vpack.c.bf16 %v1640_v25, %v1632_v32 }
 0x306   : > { %v5822_v63 = vpack.c.bf16 %v1575_v43, %v1567_v39  ;;  %v1646_v39 = vld [vmem:[%s11255_s4 + $0xaa8] sm:$0xff] }
 0x307   : > { %5679 = vmatpush1.bf16.msra.mxu0 %v5678_v0  ;;  %5807 = vmatpush1.bf16.msra.mxu1 %v5806_v23  ;;  %v1581_v0 = vld [vmem:[%s11255_s4 + $0x8a0] sm:$0xff]  ;;  %v1654_v43 = vld [vmem:[%s11255_s4 + $0xae8] sm:$0xff] }
 0x308   : > { %5681 = vmatprep.subr.bf16.mxu0 %v5680_v38  ;;  %5809 = vmatprep.subr.bf16.mxu1 %v5808_v6  ;;  %v1589_v23 = vld [vmem:[%s11255_s4 + $0x8e0] sm:$0xff]  ;;  %v1583_v38 = vld [vmem:[%s11255_s4 + $0x8b0] sm:$0xff] }
 0x309   : > { %v1591_v6 = vld [vmem:[%s11255_s4 + $0x8f0] sm:$0xff]  ;;  %v5698_v19 = vpack.c.bf16 %v1589_v23, %v1581_v0  ;;  %v1653_v0 = vld [vmem:[%s11255_s4 + $0xae0] sm:$0xff] }
 0x30a   : > { %v5826_v36 = vpack.c.bf16 %v1591_v6, %v1583_v38  ;;  %v1647_v23 = vld [vmem:[%s11255_s4 + $0xab0] sm:$0xff]  ;;  %v1662_v38 = vld [vmem:[%s11255_s4 + $0xb28] sm:$0xff] }
 0x30b   : > { %5683 = vmatpush1.bf16.msra.mxu0 %v5682_v44  ;;  %5811 = vmatpush1.bf16.msra.mxu1 %v5810_v47  ;;  %v1597_v44 = vld [vmem:[%s11255_s4 + $0x920] sm:$0xff]  ;;  %v1670_v6 = vld [vmem:[%s11255_s4 + $0xb68] sm:$0xff] }
 0x30c   : > { %5685 = vmatprep.subr.bf16.mxu0 %v5684_v27  ;;  %5813 = vmatprep.subr.bf16.mxu1 %v5812_v3  ;;  %v1605_v47 = vld [vmem:[%s11255_s4 + $0x960] sm:$0xff]  ;;  %v5828_v27 = vpack.c.bf16 %v1608_v48, %v1600_v41  ;;  %v1607_v3 = vld [vmem:[%s11255_s4 + $0x970] sm:$0xff] }
 0x30d   : > { %v5702_v55 = vpack.c.bf16 %v1605_v47, %v1597_v44  ;;  %v5830_v45 = vpack.c.bf16 %v1607_v3, %v1599_v42  ;;  %v1669_v44 = vld [vmem:[%s11255_s4 + $0xb60] sm:$0xff]  ;;  %v1663_v47 = vld [vmem:[%s11255_s4 + $0xb30] sm:$0xff]  ;;  %v5844_v42 = vpack.c.bf16 %v1672_v35, %v1664_v21  ;;  %v1686_v3 = vld [vmem:[%s11255_s4 + $0xbe8] sm:$0xff] }
 0x30f   : > { %5687 = vmatpush1.bf16.msra.mxu0 %v5686_v10  ;;  %5815 = vmatpush1.bf16.msra.mxu1 %v5814_v40  ;;  %v5704_v10 = vpack.c.bf16 %v1622_v1, %v1614_v7  ;;  %v1613_v40 = vld [vmem:[%s11255_s4 + $0x9a0] sm:$0xff]  ;;  %v1680_v7 = vld [vmem:[%s11255_s4 + $0xbb8] sm:$0xff] }
 0x310   : > { %5689 = vmatprep.subr.bf16.mxu0 %v5688_v9  ;;  %5817 = vmatprep.subr.bf16.mxu1 %v5816_v28  ;;  %v5832_v9 = vpack.c.bf16 %v1624_v12, %v1616_v13  ;;  %v1623_v28 = vld [vmem:[%s11255_s4 + $0x9f0] sm:$0xff]  ;;  %v5706_v26 = vpack.c.bf16 %v1621_v54, %v1613_v40  ;;  %v1688_v1 = vld [vmem:[%s11255_s4 + $0xbf8] sm:$0xff] }
 0x311   : > { %v5834_v37 = vpack.c.bf16 %v1623_v28, %v1615_v14  ;;  %v1679_v40 = vld [vmem:[%s11255_s4 + $0xbb0] sm:$0xff]  ;;  %v5848_v54 = vpack.c.bf16 %v1688_v1, %v1680_v7  ;;  %v1702_v28 = vld [vmem:[%s11255_s4 + $0xc68] sm:$0xff] }
 0x312   : > { %v1687_v14 = vld [vmem:[%s11255_s4 + $0xbf0] sm:$0xff] }
 0x313   : > { %5691 = vmatpush1.bf16.msra.mxu0 %v5690_v2  ;;  %5819 = vmatpush1.bf16.msra.mxu1 %v5818_v30  ;;  %v5708_v2 = vpack.c.bf16 %v1638_v17, %v1630_v16  ;;  %v1629_v30 = vld [vmem:[%s11255_s4 + $0xa20] sm:$0xff]  ;;  %v1696_v16 = vld [vmem:[%s11255_s4 + $0xc38] sm:$0xff]  ;;  %v5850_v25 = vpack.c.bf16 %v1687_v14, %v1679_v40  ;;  %v1751_v40 = vld [vmem:[%s11255_s4 + $0xdf0] sm:$0xff] }
 0x314   : > { %5693 = vmatprep.subr.bf16.mxu0 %v5692_v60  ;;  %5821 = vmatprep.subr.bf16.mxu1 %v5820_v34  ;;  %v1637_v60 = vld [vmem:[%s11255_s4 + $0xa60] sm:$0xff]  ;;  %v1631_v34 = vld [vmem:[%s11255_s4 + $0xa30] sm:$0xff]  ;;  %v1704_v17 = vld [vmem:[%s11255_s4 + $0xc78] sm:$0xff] }
 0x315   : > { %v5710_v20 = vpack.c.bf16 %v1637_v60, %v1629_v30  ;;  %v5838_v49 = vpack.c.bf16 %v1639_v58, %v1631_v34  ;;  %v1695_v30 = vld [vmem:[%s11255_s4 + $0xc30] sm:$0xff]  ;;  %v5852_v60 = vpack.c.bf16 %v1704_v17, %v1696_v16  ;;  %v1718_v58 = vld [vmem:[%s11255_s4 + $0xce8] sm:$0xff] }
 0x316   : > { %2232 = vmatmul.mubr.f32.vlgmr.msra.gmra.mrb[12].mxu0 %v7923_v5  ;;  %2386 = vmatmul.mubr.f32.vlgmr.msra.gmra.mrb[12].mxu1 %v7923_v5  ;;  %v1703_v34 = vld [vmem:[%s11255_s4 + $0xc70] sm:$0xff]  ;;  %v1766_v14 = vld [vmem:[%s11255_s4 + $0xe68] sm:$0xff] }
 0x317   : > { %2237 = vmatprep.mubr.f32.mxu0 %v7956_v61  ;;  %5695 = vmatpush1.bf16.msra.mxu0 %v5694_v62  ;;  %v5712_v62 = vpack.c.bf16 %v1654_v43, %v1646_v39  ;;  %v1712_v39 = vld [vmem:[%s11255_s4 + $0xcb8] sm:$0xff] }
 0x318   : > { %2391 = vmatprep.mubr.f32.mxu1 %v7956_v61  ;;  %5823 = vmatpush1.bf16.msra.mxu1 %v5822_v63  ;;  %v1645_v63 = vld [vmem:[%s11255_s4 + $0xaa0] sm:$0xff]  ;;  %v1720_v43 = vld [vmem:[%s11255_s4 + $0xcf8] sm:$0xff] }
 0x319   : > { %5697 = vmatprep.subr.bf16.mxu0 %v5696_v33  ;;  %5825 = vmatprep.subr.bf16.mxu1 %v5824_v29  ;;  %v5840_v33 = vpack.c.bf16 %v1656_v51, %v1648_v50  ;;  %v1655_v29 = vld [vmem:[%s11255_s4 + $0xaf0] sm:$0xff]  ;;  %v5714_v41 = vpack.c.bf16 %v1653_v0, %v1645_v63  ;;  %v5854_v51 = vpack.c.bf16 %v1703_v34, %v1695_v30  ;;  %v1782_v34 = vld [vmem:[%s11255_s4 + $0xee8] sm:$0xff] }
 0x31a   : > { %2238 = vmatmul.mubr.f32.gmra.mrb[14].mxu0 %v7964_v24  ;;  %2392 = vmatmul.mubr.f32.gmra.mrb[14].mxu1 %v7964_v24  ;;  %v5842_v48 = vpack.c.bf16 %v1655_v29, %v1647_v23  ;;  %v1711_v63 = vld [vmem:[%s11255_s4 + $0xcb0] sm:$0xff]  ;;  %v5856_v0 = vpack.c.bf16 %v1720_v43, %v1712_v39  ;;  %v1734_v29 = vld [vmem:[%s11255_s4 + $0xd68] sm:$0xff] }
 0x31b   : > { %5699 = vmatpush1.bf16.msra.mxu0 %v5698_v19  ;;  %2308 = vmatprep.mubr.f32.mxu0 %v7989_v15  ;;  %v5716_v19 = vpack.c.bf16 %v1670_v6, %v1662_v38  ;;  %v1719_v23 = vld [vmem:[%s11255_s4 + $0xcf0] sm:$0xff]  ;;  %v1728_v38 = vld [vmem:[%s11255_s4 + $0xd38] sm:$0xff] }
 0x31c   : > { %5827 = vmatpush1.bf16.msra.mxu1 %v5826_v36  ;;  %2462 = vmatprep.mubr.f32.mxu1 %v7989_v15  ;;  %v1661_v36 = vld [vmem:[%s11255_s4 + $0xb20] sm:$0xff]  ;;  %v1736_v6 = vld [vmem:[%s11255_s4 + $0xd78] sm:$0xff]  ;;  %v5858_v35 = vpack.c.bf16 %v1719_v23, %v1711_v63  ;;  %v1767_v30 = vld [vmem:[%s11255_s4 + $0xe70] sm:$0xff] }
 0x31d   : > { %5701 = vmatprep.subr.bf16.mxu0 %v5700_v4  ;;  %5829 = vmatprep.subr.bf16.mxu1 %v5828_v27  ;;  %v1671_v4 = vld [vmem:[%s11255_s4 + $0xb70] sm:$0xff]  ;;  %v1678_v27 = vld [vmem:[%s11255_s4 + $0xba8] sm:$0xff]  ;;  %v5718_v13 = vpack.c.bf16 %v1669_v44, %v1661_v36  ;;  %v5860_v44 = vpack.c.bf16 %v1736_v6, %v1728_v38 }
 0x31e   : > { %v5846_v12 = vpack.c.bf16 %v1671_v4, %v1663_v47  ;;  %v1727_v36 = vld [vmem:[%s11255_s4 + $0xd30] sm:$0xff]  ;;  %v1750_v4 = vld [vmem:[%s11255_s4 + $0xde8] sm:$0xff] }
 0x31f   : > { %5703 = vmatpush1.bf16.msra.mxu0 %v5702_v55  ;;  %v5720_v55 = vpack.c.bf16 %v1686_v3, %v1678_v27  ;;  %v1735_v47 = vld [vmem:[%s11255_s4 + $0xd70] sm:$0xff]  ;;  %v1744_v27 = vld [vmem:[%s11255_s4 + $0xdb8] sm:$0xff]  ;;  %v1798_v23 = vld [vmem:[%s11255_s4 + $0xf68] sm:$0xff] }
 0x320   : > { %5831 = vmatpush1.bf16.msra.mxu1 %v5830_v45  ;;  %5705 = vmatprep.subr.bf16.mxu0 %v5704_v10  ;;  %v1677_v45 = vld [vmem:[%s11255_s4 + $0xba0] sm:$0xff]  ;;  %v1752_v3 = vld [vmem:[%s11255_s4 + $0xdf8] sm:$0xff]  ;;  %v5862_v1 = vpack.c.bf16 %v1735_v47, %v1727_v36  ;;  %v1783_v63 = vld [vmem:[%s11255_s4 + $0xef0] sm:$0xff] }
 0x321   : > { %5833 = vmatprep.subr.bf16.mxu1 %v5832_v9  ;;  %v1685_v10 = vld [vmem:[%s11255_s4 + $0xbe0] sm:$0xff]  ;;  %v1694_v9 = vld [vmem:[%s11255_s4 + $0xc28] sm:$0xff]  ;;  %v1799_v36 = vld [vmem:[%s11255_s4 + $0xf70] sm:$0xff] }
 0x322   : > { %v5722_v32 = vpack.c.bf16 %v1685_v10, %v1677_v45  ;;  %v1743_v45 = vld [vmem:[%s11255_s4 + $0xdb0] sm:$0xff]  ;;  %v5864_v10 = vpack.c.bf16 %v1752_v3, %v1744_v27  ;;  %v1814_v47 = vld [vmem:[%s11255_s4 + $0xfe8] sm:$0xff] }
 0x323   : > { %5707 = vmatpush1.bf16.msra.mxu0 %v5706_v26  ;;  %v5724_v26 = vpack.c.bf16 %v1702_v28, %v1694_v9  ;;  %v1760_v9 = vld [vmem:[%s11255_s4 + $0xe38] sm:$0xff]  ;;  %v5866_v17 = vpack.c.bf16 %v1751_v40, %v1743_v45  ;;  %v1815_v45 = vld [vmem:[%s11255_s4 + $0xff0] sm:$0xff] }
 0x324   : > { %5835 = vmatpush1.bf16.msra.mxu1 %v5834_v37  ;;  %5709 = vmatprep.subr.bf16.mxu0 %v5708_v2  ;;  %v1693_v37 = vld [vmem:[%s11255_s4 + $0xc20] sm:$0xff]  ;;  %v1768_v28 = vld [vmem:[%s11255_s4 + $0xe78] sm:$0xff] }
 0x325   : > { %5837 = vmatprep.subr.bf16.mxu1 %v5836_v22  ;;  %v1701_v2 = vld [vmem:[%s11255_s4 + $0xc60] sm:$0xff]  ;;  %v1710_v22 = vld [vmem:[%s11255_s4 + $0xca8] sm:$0xff] }
 0x326   : > { %v5726_v50 = vpack.c.bf16 %v1701_v2, %v1693_v37  ;;  %v1759_v37 = vld [vmem:[%s11255_s4 + $0xe30] sm:$0xff]  ;;  %v5868_v2 = vpack.c.bf16 %v1768_v28, %v1760_v9 }
 0x327   : > { %5711 = vmatpush1.bf16.msra.mxu0 %v5710_v20  ;;  %v5728_v20 = vpack.c.bf16 %v1718_v58, %v1710_v22  ;;  %v1776_v22 = vld [vmem:[%s11255_s4 + $0xeb8] sm:$0xff]  ;;  %v5870_v43 = vpack.c.bf16 %v1767_v30, %v1759_v37 }
 0x328   : > { %5839 = vmatpush1.bf16.msra.mxu1 %v5838_v49  ;;  %5713 = vmatprep.subr.bf16.mxu0 %v5712_v62  ;;  %v1709_v49 = vld [vmem:[%s11255_s4 + $0xca0] sm:$0xff]  ;;  %v1784_v58 = vld [vmem:[%s11255_s4 + $0xef8] sm:$0xff] }
 0x329   : > { %5841 = vmatprep.subr.bf16.mxu1 %v5840_v33  ;;  %v1717_v62 = vld [vmem:[%s11255_s4 + $0xce0] sm:$0xff]  ;;  %v1726_v33 = vld [vmem:[%s11255_s4 + $0xd28] sm:$0xff] }
 0x32a   : > { %v5730_v21 = vpack.c.bf16 %v1717_v62, %v1709_v49  ;;  %v1775_v49 = vld [vmem:[%s11255_s4 + $0xeb0] sm:$0xff]  ;;  %v5872_v62 = vpack.c.bf16 %v1784_v58, %v1776_v22 }
 0x32b   : > { %5715 = vmatpush1.bf16.msra.mxu0 %v5714_v41  ;;  %v5732_v41 = vpack.c.bf16 %v1734_v29, %v1726_v33  ;;  %v1792_v33 = vld [vmem:[%s11255_s4 + $0xf38] sm:$0xff]  ;;  %v5874_v6 = vpack.c.bf16 %v1783_v63, %v1775_v49 }
 0x32c   : > { %5843 = vmatpush1.bf16.msra.mxu1 %v5842_v48  ;;  %5717 = vmatprep.subr.bf16.mxu0 %v5716_v19  ;;  %v1725_v48 = vld [vmem:[%s11255_s4 + $0xd20] sm:$0xff]  ;;  %v1800_v29 = vld [vmem:[%s11255_s4 + $0xf78] sm:$0xff] }
 0x32d   : > { %5845 = vmatprep.subr.bf16.mxu1 %v5844_v42  ;;  %v1733_v19 = vld [vmem:[%s11255_s4 + $0xd60] sm:$0xff]  ;;  %v1742_v42 = vld [vmem:[%s11255_s4 + $0xda8] sm:$0xff] }
 0x32e   : > { %v5734_v7 = vpack.c.bf16 %v1733_v19, %v1725_v48  ;;  %v1791_v48 = vld [vmem:[%s11255_s4 + $0xf30] sm:$0xff]  ;;  %v5876_v19 = vpack.c.bf16 %v1800_v29, %v1792_v33 }
 0x32f   : > { %5719 = vmatpush1.bf16.msra.mxu0 %v5718_v13  ;;  %v5736_v13 = vpack.c.bf16 %v1750_v4, %v1742_v42  ;;  %v1808_v42 = vld [vmem:[%s11255_s4 + $0xfb8] sm:$0xff]  ;;  %v5878_v3 = vpack.c.bf16 %v1799_v36, %v1791_v48  ;;  %v1849_v48 = vsub.s32 7, %v7854_v31 }
 0x330   : > { %5847 = vmatpush1.bf16.msra.mxu1 %v5846_v12  ;;  %5721 = vmatprep.subr.bf16.mxu0 %v5720_v55  ;;  %v1741_v12 = vld [vmem:[%s11255_s4 + $0xda0] sm:$0xff]  ;;  %v1816_v4 = vld [vmem:[%s11255_s4 + $0xff8] sm:$0xff] }
 0x331   : > { %5849 = vmatprep.subr.bf16.mxu1 %v5848_v54  ;;  %v1749_v55 = vld [vmem:[%s11255_s4 + $0xde0] sm:$0xff]  ;;  %v1758_v54 = vld [vmem:[%s11255_s4 + $0xe28] sm:$0xff] }
 0x332   : > { %v5738_v16 = vpack.c.bf16 %v1749_v55, %v1741_v12  ;;  %v5880_v12 = vpack.c.bf16 %v1816_v4, %v1808_v42  ;;  %v1807_v55 = vld [vmem:[%s11255_s4 + $0xfb0] sm:$0xff] }
 0x333   : > { %5723 = vmatpush1.bf16.msra.mxu0 %v5722_v32  ;;  %v5740_v32 = vpack.c.bf16 %v1766_v14, %v1758_v54  ;;  %v5882_v40 = vpack.c.bf16 %v1815_v45, %v1807_v55  ;;  %v9103_v30 = vld [vmem:[%s11257_s6 + $0x1] ss:$8 sm:$0xf] }
 0x334   : > { %5851 = vmatpush1.bf16.msra.mxu1 %v5850_v25  ;;  %5725 = vmatprep.subr.bf16.mxu0 %v5724_v26  ;;  %v1757_v25 = vld [vmem:[%s11255_s4 + $0xe20] sm:$0xff] }
 0x335   : > { %5853 = vmatprep.subr.bf16.mxu1 %v5852_v60  ;;  %v1765_v26 = vld [vmem:[%s11255_s4 + $0xe60] sm:$0xff]  ;;  %v1774_v60 = vld [vmem:[%s11255_s4 + $0xea8] sm:$0xff] }
 0x336   : > { %v5742_v39 = vpack.c.bf16 %v1765_v26, %v1757_v25  ;;  %v9092_v26 = vld [vmem:[%s11258_s7] ss:$8 sm:$0xf]  ;;  %v9114_v22 = vld [vmem:[%s11258_s7 + $0x1] ss:$8 sm:$0xf] }
 0x337   : > { %5727 = vmatpush1.bf16.msra.mxu0 %v5726_v50  ;;  %v5744_v50 = vpack.c.bf16 %v1782_v34, %v1774_v60  ;;  %v2850_v37 = vrot.slane %v9092_v26, %v7859_v11  ;;  %v2950_v60 = vrot.slane %v9103_v30, %v7859_v11  ;;  %v2958_v34 = vrot.slane %v9103_v30, %v7862_v59 }
 0x338   : > { %5855 = vmatpush1.bf16.msra.mxu1 %v5854_v51  ;;  %5729 = vmatprep.subr.bf16.mxu0 %v5728_v20  ;;  %v1773_v51 = vld [vmem:[%s11255_s4 + $0xea0] sm:$0xff]  ;;  %v3049_v58 = vrot.slane %v9114_v22, %v7859_v11 }
 0x339   : > { %5857 = vmatprep.subr.bf16.mxu1 %v5856_v0  ;;  %v1781_v20 = vld [vmem:[%s11255_s4 + $0xee0] sm:$0xff]  ;;  %v1790_v0 = vld [vmem:[%s11255_s4 + $0xf28] sm:$0xff]  ;;  %2863 = vrot.lane.b32.xlu1 %v2850_v37, %s6006_s19 }
 0x33a   : > { %v5746_v38 = vpack.c.bf16 %v1781_v20, %v1773_v51 }
 0x33b   : > { %5731 = vmatpush1.bf16.msra.mxu0 %v5730_v21  ;;  %v5748_v21 = vpack.c.bf16 %v1798_v23, %v1790_v0  ;;  %v1837_v0 = vsub.s32 4, %v7854_v31  ;;  %v1841_v23 = vsub.s32 5, %v7854_v31 }
 0x33c   : > { %5859 = vmatpush1.bf16.msra.mxu1 %v5858_v35  ;;  %5733 = vmatprep.subr.bf16.mxu0 %v5732_v41  ;;  %v1789_v35 = vld [vmem:[%s11255_s4 + $0xf20] sm:$0xff] }
 0x33d   : > { %5861 = vmatprep.subr.bf16.mxu1 %v5860_v44  ;;  %v1797_v41 = vld [vmem:[%s11255_s4 + $0xf60] sm:$0xff]  ;;  %v1806_v44 = vld [vmem:[%s11255_s4 + $0xfa8] sm:$0xff] }
 0x33e   : > { %v5750_v27 = vpack.c.bf16 %v1797_v41, %v1789_v35 }
 0x33f   : > { %5735 = vmatpush1.bf16.msra.mxu0 %v5734_v7  ;;  %v5752_v7 = vpack.c.bf16 %v1814_v47, %v1806_v44 }
 0x340   : > { %5863 = vmatpush1.bf16.msra.mxu1 %v5862_v1  ;;  %5737 = vmatprep.subr.bf16.mxu0 %v5736_v13  ;;  %v1805_v1 = vld [vmem:[%s11255_s4 + $0xfa0] sm:$0xff] }
 0x341   : > { %5865 = vmatprep.subr.bf16.mxu1 %v5864_v10  ;;  %v1813_v13 = vld [vmem:[%s11255_s4 + $0xfe0] sm:$0xff] }
 0x342   : > { %v5754_v10 = vpack.c.bf16 %v1813_v13, %v1805_v1 }
 0x343   : > { %5739 = vmatpush1.bf16.msra.mxu0 %v5738_v16 }
 0x344   : > { %5867 = vmatpush1.bf16.msra.mxu1 %v5866_v17  ;;  %5741 = vmatprep.subr.bf16.mxu0 %v5740_v32 }
 0x345   : > { %5869 = vmatprep.subr.bf16.mxu1 %v5868_v2  ;;  %v2858_v2 = vrot.slane %v9092_v26, %v7862_v59 }
 0x347   : > { %5743 = vmatpush1.bf16.msra.mxu0 %v5742_v39  ;;  %2867 = vrot.lane.b32.xlu1 %v2858_v2, %s6006_s19  ;;  %v3057_v39 = vrot.slane %v9114_v22, %v7862_v59 }
 0x348   : > { %5871 = vmatpush1.bf16.msra.mxu1 %v5870_v43  ;;  %5745 = vmatprep.subr.bf16.mxu0 %v5744_v50  ;;  %v1817_v43 = vld [vmem:[%s11256_s5] sm:$0xff] }
 0x349   : > { %5873 = vmatprep.subr.bf16.mxu1 %v5872_v62  ;;  %v1822_v50 = vrot.slane %v1817_v43, %v7859_v11  ;;  %v1826_v51 = vrot.slane %v1817_v43, %v7868_v46  ;;  %v1830_v62 = vrot.slane %v1817_v43, %v7862_v59  ;;  %v1834_v29 = vrot.slane %v1817_v43, %v7878_v8 }
 0x34a   : > { %v1842_v35 = vrot.slane %v1817_v43, %v1841_v23  ;;  %v1850_v1 = vrot.slane %v1817_v43, %v1849_v48  ;;  %v2954_v48 = vrot.slane %v9103_v30, %v7868_v46 }
 0x34b   : > { %5747 = vmatpush1.bf16.msra.mxu0 %v5746_v38  ;;  %2963 = vrot.lane.b32.xlu1 %v2950_v60, %s6007_s22 }
 0x34c   : > { %5875 = vmatpush1.bf16.msra.mxu1 %v5874_v6  ;;  %5749 = vmatprep.subr.bf16.mxu0 %v5748_v21  ;;  %v1838_v6 = vrot.slane %v1817_v43, %v1837_v0  ;;  %v1845_v21 = vsub.s32 6, %v7854_v31 }
 0x34d   : > { %5877 = vmatprep.subr.bf16.mxu1 %v5876_v19 }
 0x34e   : > { %v1846_v47 = vrot.slane %v1817_v43, %v1845_v21  ;;  %v2862_v21 = vrot.slane %v9092_v26, %v7878_v8 }
 0x34f   : > { %5751 = vmatpush1.bf16.msra.mxu0 %v5750_v27  ;;  %2967 = vrot.lane.b32.xlu1 %v2958_v34, %s6007_s22 }
 0x350   : > { %5879 = vmatpush1.bf16.msra.mxu1 %v5878_v3  ;;  %5753 = vmatprep.subr.bf16.mxu0 %v5752_v7 }
 0x351   : > { %5881 = vmatprep.subr.bf16.mxu1 %v5880_v12 }
 0x353   : > { %5755 = vmatpush1.bf16.msra.mxu0 %v5754_v10  ;;  %3062 = vrot.lane.b32.xlu1 %v3049_v58, %s6008_s25 }
 0x354   : > { %5883 = vmatpush1.bf16.msra.mxu1 %v5882_v40 }
 0x356   : > { %2309 = vmatmul.mubr.f32.vlgmr.msra.gmra.mrb[12].mxu0 %v7915_v52 }
 0x357   : > { %2463 = vmatmul.mubr.f32.vlgmr.msra.gmra.mrb[12].mxu1 %v7915_v52  ;;  %2314 = vmatprep.mubr.f32.mxu0 %v8339_v53 }
 0x358   : > { %2468 = vmatprep.mubr.f32.mxu1 %v8339_v53  ;;  %3066 = vrot.lane.b32.xlu1 %v3057_v39, %s6008_s25 }
 0x35a   : > { %2315 = vmatmul.mubr.f32.gmra.mrb[14].mxu0 %v7954_v57 }
 0x35b   : > { %2469 = vmatmul.mubr.f32.gmra.mrb[14].mxu1 %v7954_v57 }
 0x3a8   : > { %v2002_v54 = vpop.f32.mrb[8].mxu0  ;;  %v2156_v14 = vpop.f32.mrb[8].mxu1 }
 0x3a9   : > { %v2004_v9 = vpop.f32.mrb[9].mxu0  ;;  %v2158_v28 = vpop.f32.mrb[9].mxu1  ;;  %v9127_v20 = vadd.f32 %v2002_v54, %v1822_v50  ;;  %v9136_v33 = vadd.f32 %v2156_v14, %v1830_v62 }
 0x3aa   : > { %v9129_v49 = vadd.f32 %v2004_v9, %v1826_v51  ;;  %v9141_v41 = vadd.f32 %v2158_v28, %v1834_v29 }
 0x3ac   : > { %v2008_v16 = vpop.f32.mrb[10].mxu0  ;;  %v2162_v17 = vpop.f32.mrb[10].mxu1  ;;  %v2475_v63 = vadd.f32 %v9129_v49, %v9127_v20 }
 0x3ad   : > { %v2010_v32 = vpop.f32.mrb[11].mxu0  ;;  %v2164_v25 = vpop.f32.mrb[11].mxu1  ;;  %v9156_v14 = vadd.f32 %v2008_v16, %v1822_v50  ;;  %v9162_v2 = vadd.f32 %v2162_v17, %v1830_v62 }
 0x3ae   : > { %v2476_v38 = vadd.f32 %v9136_v33, %v2475_v63  ;;  %v9159_v28 = vadd.f32 %v2010_v32, %v1826_v51  ;;  %v9165_v34 = vadd.f32 %v2164_v25, %v1834_v29  ;;  %v4842_v63 = vld [vmem:[%s11257_s6 + $0x2] ss:$8 sm:$0xf]  ;;  %v4845_v29 = vld [vmem:[%s11258_s7 + $0x3] ss:$8 sm:$0xf] }
 0x3af   : > { %v3148_v0 = vrot.slane %v4842_v63, %v7859_v11  ;;  %v3156_v23 = vrot.slane %v4842_v63, %v7862_v59 }
 0x3b0   : > { %v2477_v36 = vadd.f32 %v9141_v41, %v2476_v38  ;;  %v2854_v38 = vrot.slane %v9092_v26, %v7868_v46  ;;  %v2962_v26 = vrot.slane %v9103_v30, %v7878_v8  ;;  %v3061_v30 = vrot.slane %v9114_v22, %v7878_v8 }
 0x3b1   : > { %3161 = vrot.lane.b32.xlu1 %v3148_v0, %s6006_s19 }
 0x3b5   : > { %3165 = vrot.lane.b32.xlu1 %v3156_v23, %s6006_s19 }
 0x429   : > { %v2310_v19 = vpop.f32.mrb[12].mxu0 }
 0x42a   : > { %v9145_v44 = vadd.f32 %v2310_v19, %v1838_v6  ;;  %v2464_v42 = vpop.f32.mrb[12].mxu1  ;;  %v2312_v4 = vpop.f32.mrb[13].mxu0  ;;  %v4846_v19 = vld [vmem:[%s11257_s6 + $0x4] ss:$8 sm:$0xf] }
 0x42b   : > { %v9147_v27 = vadd.f32 %v2312_v4, %v1842_v35  ;;  %v2466_v3 = vpop.f32.mrb[13].mxu1  ;;  %v9150_v12 = vadd.f32 %v2464_v42, %v1846_v47  ;;  %v4847_v42 = vld [vmem:[%s11258_s7 + $0x4] ss:$8 sm:$0xf]  ;;  %v3053_v4 = vrot.slane %v9114_v22, %v7868_v46  ;;  %v3160_v22 = vrot.slane %v4842_v63, %v7878_v8 }
 0x42c   : > { %v2478_v7 = vadd.f32 %v9145_v44, %v2477_v36  ;;  %v9153_v40 = vadd.f32 %v2466_v3, %v1850_v1  ;;  %v3522_v36 = vrot.slane %v4846_v19, %v7859_v11  ;;  %v3656_v3 = vrot.slane %v4847_v42, %v7859_v11 }
 0x42d   : > { %v2316_v13 = vpop.f32.mrb[14].mxu0  ;;  %v3668_v0 = vrot.slane %v4847_v42, %v7878_v8 }
 0x42e   : > { %v2479_v55 = vadd.f32 %v9147_v27, %v2478_v7  ;;  %v2470_v31 = vpop.f32.mrb[14].mxu1  ;;  %v2318_v45 = vpop.f32.mrb[15].mxu0  ;;  %v9168_v39 = vadd.f32 %v2316_v13, %v1838_v6  ;;  %v3388_v6 = vrot.slane %v4845_v29, %v7859_v11  ;;  %v3664_v7 = vrot.slane %v4847_v42, %v7862_v59 }
 0x42f   : > { %v2472_v10 = vpop.f32.mrb[15].mxu1  ;;  %v9172_v50 = vadd.f32 %v2318_v45, %v1842_v35  ;;  %v9174_v32 = vadd.f32 %v2470_v31, %v1846_v47  ;;  %v3396_v35 = vrot.slane %v4845_v29, %v7862_v59  ;;  %v3530_v47 = vrot.slane %v4846_v19, %v7862_v59  ;;  %v4851_v45 = vld [vmem:[%s11258_s7 + $0x6] ss:$8 sm:$0xf] }
 0x430   : > { %v2480_v54 = vadd.f32 %v9150_v12, %v2479_v55  ;;  %v9177_v17 = vadd.f32 %v2472_v10, %v1850_v1  ;;  %3401 = vrot.lane.b32.xlu1 %v3388_v6, %s6006_s19  ;;  %v4848_v1 = vld [vmem:[%s11257_s6 + $0x5] ss:$8 sm:$0xf]  ;;  %v3152_v13 = vrot.slane %v4842_v63, %v7868_v46  ;;  %v3392_v10 = vrot.slane %v4845_v29, %v7868_v46 }
 0x431   : > { %v3790_v55 = vrot.slane %v4848_v1, %v7859_v11  ;;  %v3798_v31 = vrot.slane %v4848_v1, %v7862_v59 }
 0x432   : > { %v2481_v9 = vadd.f32 %v9153_v40, %v2480_v54  ;;  %v4109_v54 = vrot.slane %v4851_v45, %v7859_v11 }
 0x434   : > { %v2482_v37 = vadd.f32 %v9156_v14, %v2481_v9  ;;  %3405 = vrot.lane.b32.xlu1 %v3396_v35, %s6006_s19  ;;  %v3400_v9 = vrot.slane %v4845_v29, %v7878_v8  ;;  %v3794_v29 = vrot.slane %v4848_v1, %v7868_v46 }
 0x436   : > { %v2483_v60 = vadd.f32 %v9159_v28, %v2482_v37  ;;  %v4117_v37 = vrot.slane %v4851_v45, %v7862_v59 }
 0x438   : > { %v2484_v58 = vadd.f32 %v9162_v2, %v2483_v60  ;;  %3535 = vrot.lane.b32.xlu1 %v3522_v36, %s6007_s22  ;;  %v4852_v60 = vld [vmem:[%s11257_s6 + $0x7] ss:$8 sm:$0xf] }
 0x439   : > { %v4247_v36 = vrot.slane %v4852_v60, %v7868_v46 }
 0x43a   : > { %v2485_v43 = vadd.f32 %v9165_v34, %v2484_v58  ;;  %v3526_v58 = vrot.slane %v4846_v19, %v7868_v46 }
 0x43c   : > { %v2486_v16 = vadd.f32 %v9168_v39, %v2485_v43  ;;  %3539 = vrot.lane.b32.xlu1 %v3530_v47, %s6007_s22  ;;  %v4243_v43 = vrot.slane %v4852_v60, %v7859_v11 }
 0x43e   : > { %v2487_v51 = vadd.f32 %v9172_v50, %v2486_v16  ;;  %v3534_v16 = vrot.slane %v4846_v19, %v7878_v8  ;;  %v4121_v19 = vrot.slane %v4851_v45, %v7878_v8 }
 0x440   : > { %v2488_v62 = vadd.f32 %v9174_v32, %v2487_v51  ;;  %3669 = vrot.lane.b32.xlu1 %v3656_v3, %s6008_s25  ;;  %v4251_v51 = vrot.slane %v4852_v60, %v7862_v59 }
 0x442   : > { %v2489_v25 = vadd.f32 %v9177_v17, %v2488_v62  ;;  %v4853_v62 = vld [vmem:[%s11258_s7 + $0x7] ss:$8 sm:$0xf] }
 0x443   : > { %v4377_v63 = vrot.slane %v4853_v62, %v7859_v11  ;;  %v4385_v23 = vrot.slane %v4853_v62, %v7862_v59  ;;  %v4381_v47 = vrot.slane %v4853_v62, %v7868_v46 }
 0x444   : > { %2490 = vadd.xlane.f32.xlu0 %v2489_v25  ;;  %3673 = vrot.lane.b32.xlu1 %v3664_v7, %s6008_s25  ;;  %v3660_v25 = vrot.slane %v4847_v42, %v7868_v46  ;;  %v4389_v42 = vrot.slane %v4853_v62, %v7878_v8 }
 0x448   : > { %3803 = vrot.lane.b32.xlu1 %v3790_v55, %s6006_s19 }
 0x44c   : > { %3807 = vrot.lane.b32.xlu1 %v3798_v31, %s6006_s19 }
 0x450   : > { %4122 = vrot.lane.b32.xlu1 %v4109_v54, %s6006_s19 }
 0x454   : > { %4126 = vrot.lane.b32.xlu1 %v4117_v37, %s6006_s19 }
 0x458   : > { %4256 = vrot.lane.b32.xlu1 %v4243_v43, %s6007_s22 }
 0x45a   : > { %2865 = vrot.lane.b32.xlu0 %v2854_v38, %s6006_s19  ;;  %v9275_v38 = vld [vmem:[%s11257_s6 + $0x20] ss:$8 sm:$0xf] }
 0x45b   : > { %v4511_v6 = vrot.slane %v9275_v38, %v7859_v11  ;;  %v4519_v35 = vrot.slane %v9275_v38, %v7862_v59 }
 0x45c   : > { %4260 = vrot.lane.b32.xlu1 %v4251_v51, %s6007_s22 }
 0x45e   : > { %2869 = vrot.lane.b32.xlu0 %v2862_v21, %s6006_s19  ;;  %v3802_v21 = vrot.slane %v4848_v1, %v7878_v8 }
 0x460   : > { %4390 = vrot.lane.b32.xlu1 %v4377_v63, %s6008_s25 }
 0x462   : > { %2965 = vrot.lane.b32.xlu0 %v2954_v48, %s6007_s22  ;;  %v4113_v48 = vrot.slane %v4851_v45, %v7868_v46 }
 0x464   : > { %4394 = vrot.lane.b32.xlu1 %v4385_v23, %s6008_s25 }
 0x466   : > { %2969 = vrot.lane.b32.xlu0 %v2962_v26, %s6007_s22  ;;  %v4255_v26 = vrot.slane %v4852_v60, %v7878_v8 }
 0x468   : > { %4524 = vrot.lane.b32.xlu1 %v4511_v6, %s6006_s19 }
 0x46a   : > { %3064 = vrot.lane.b32.xlu0 %v3053_v4, %s6008_s25  ;;  %v4515_v4 = vrot.slane %v9275_v38, %v7868_v46 }
 0x46c   : > { %4528 = vrot.lane.b32.xlu1 %v4519_v35, %s6006_s19 }
 0x46e   : > { %3068 = vrot.lane.b32.xlu0 %v3061_v30, %s6008_s25 }
 0x472   : > { %3163 = vrot.lane.b32.xlu0 %v3152_v13, %s6006_s19 }
 0x476   : > { %3167 = vrot.lane.b32.xlu0 %v3160_v22, %s6006_s19 }
 0x47a   : > { %3403 = vrot.lane.b32.xlu0 %v3392_v10, %s6006_s19 }
 0x47e   : > { %3407 = vrot.lane.b32.xlu0 %v3400_v9, %s6006_s19 }
 0x482   : > { %3537 = vrot.lane.b32.xlu0 %v3526_v58, %s6007_s22 }
 0x486   : > { %3541 = vrot.lane.b32.xlu0 %v3534_v16, %s6007_s22 }
 0x48a   : > { %3671 = vrot.lane.b32.xlu0 %v3660_v25, %s6008_s25 }
 0x48e   : > { %3675 = vrot.lane.b32.xlu0 %v3668_v0, %s6008_s25 }
 0x492   : > { %3805 = vrot.lane.b32.xlu0 %v3794_v29, %s6006_s19 }
 0x496   : > { %3809 = vrot.lane.b32.xlu0 %v3802_v21, %s6006_s19 }
 0x49a   : > { %4124 = vrot.lane.b32.xlu0 %v4113_v48, %s6006_s19 }
 0x49e   : > { %4128 = vrot.lane.b32.xlu0 %v4121_v19, %s6006_s19 }
 0x4a2   : > { %4258 = vrot.lane.b32.xlu0 %v4247_v36, %s6007_s22 }
 0x4a6   : > { %4262 = vrot.lane.b32.xlu0 %v4255_v26, %s6007_s22 }
 0x4aa   : > { %4392 = vrot.lane.b32.xlu0 %v4381_v47, %s6008_s25 }
 0x4ae   : > { %4396 = vrot.lane.b32.xlu0 %v4389_v42, %s6008_s25 }
 0x4b2   : > { %4526 = vrot.lane.b32.xlu0 %v4515_v4, %s6006_s19 }
 0x4d1   : > { %v2491_v3 = vpop.xlane.xlu0 %2490 }
 0x4d2   : > { %v2492_v30 = vrot.slane %v2491_v3, 4 }
 0x4d4   : > { %v2493_v7 = vadd.f32 %v2492_v30, %v2491_v3 }
 0x4d6   : > { %v2494_v1 = vrot.slane %v2493_v7, 2 }
 0x4d8   : > { %v2495_v13 = vadd.f32 %v2494_v1, %v2493_v7 }
 0x4da   : > { %v2496_v55 = vrot.slane %v2495_v13, 1 }
 0x4dc   : > { %v2497_v22 = vadd.f32 %v2496_v55, %v2495_v13 }
 0x4de   : > { %5940 = vpush %v2497_v22  ;;  %v9381_v22 = vpop.permute.xlu0 %2865 }
 0x50f   : > { %s5941_s15 = spop %5940 }
 0x510   : > { %s2501_s16 = smul.f32 6.1035156e-05, %s5941_s15 }
 0x512   : > { %v2502_v31 = vstv %s2501_s16 }
 0x513   : > { %v9302_v45 = vsub.f32 %v9127_v20, %v2502_v31  ;;  %v9305_v10 = vsub.f32 %v9129_v49, %v2502_v31  ;;  %v9308_v54 = vsub.f32 %v9136_v33, %v2502_v31  ;;  %v9315_v60 = vsub.f32 %v9141_v41, %v2502_v31 }
 0x514   : > { %v9318_v58 = vsub.f32 %v9145_v44, %v2502_v31  ;;  %v9323_v43 = vsub.f32 %v9147_v27, %v2502_v31  ;;  %v9328_v51 = vsub.f32 %v9150_v12, %v2502_v31  ;;  %v9333_v44 = vsub.f32 %v9153_v40, %v2502_v31 }
 0x515   : > { %v2519_v9 = vmul.f32 %v9302_v45, %v9302_v45  ;;  %v2520_v37 = vmul.f32 %v9305_v10, %v9305_v10  ;;  %v2521_v20 = vmul.f32 %v9308_v54, %v9308_v54  ;;  %v2522_v33 = vmul.f32 %v9315_v60, %v9315_v60 }
 0x516   : > { %v2523_v41 = vmul.f32 %v9318_v58, %v9318_v58  ;;  %v2524_v25 = vmul.f32 %v9323_v43, %v9323_v43  ;;  %v9338_v27 = vsub.f32 %v9156_v14, %v2502_v31  ;;  %v2525_v0 = vmul.f32 %v9328_v51, %v9328_v51 }
 0x517   : > { %v2535_v49 = vadd.f32 %v2520_v37, %v2519_v9  ;;  %v9343_v12 = vsub.f32 %v9159_v28, %v2502_v31  ;;  %v2526_v29 = vmul.f32 %v9333_v44, %v9333_v44  ;;  %v9348_v40 = vsub.f32 %v9162_v2, %v2502_v31  ;;  %v9383_v9 = vpop.permute.xlu0 %2869 }
 0x518   : > { %v2527_v21 = vmul.f32 %v9338_v27, %v9338_v27  ;;  %v9353_v14 = vsub.f32 %v9165_v34, %v2502_v31  ;;  %v9358_v28 = vsub.f32 %v9168_v39, %v2502_v31  ;;  %v9363_v2 = vsub.f32 %v9172_v50, %v2502_v31 }
 0x519   : > { %v2536_v16 = vadd.f32 %v2535_v49, %v2521_v20  ;;  %v2528_v48 = vmul.f32 %v9343_v12, %v9343_v12  ;;  %v2529_v36 = vmul.f32 %v9348_v40, %v9348_v40  ;;  %v9368_v34 = vsub.f32 %v9174_v32, %v2502_v31 }
 0x51a   : > { %v2530_v47 = vmul.f32 %v9353_v14, %v9353_v14  ;;  %v2531_v4 = vmul.f32 %v9358_v28, %v9358_v28  ;;  %v9373_v39 = vsub.f32 %v9177_v17, %v2502_v31  ;;  %v2532_v30 = vmul.f32 %v9363_v2, %v9363_v2 }
 0x51b   : > { %v2537_v62 = vadd.f32 %v2536_v16, %v2522_v33  ;;  %v2533_v50 = vmul.f32 %v9368_v34, %v9368_v34  ;;  %v9385_v17 = vpop.permute.xlu0 %2965 }
 0x51c   : > { %v2534_v13 = vmul.f32 %v9373_v39, %v9373_v39 }
 0x51d   : > { %v2538_v63 = vadd.f32 %v2537_v62, %v2523_v41 }
 0x51f   : > { %v2539_v23 = vadd.f32 %v2538_v63, %v2524_v25  ;;  %v9387_v31 = vpop.permute.xlu0 %2969 }
 0x521   : > { %v2540_v6 = vadd.f32 %v2539_v23, %v2525_v0 }
 0x523   : > { %v2541_v35 = vadd.f32 %v2540_v6, %v2526_v29  ;;  %v9389_v37 = vpop.permute.xlu0 %3064 }
 0x525   : > { %v2542_v19 = vadd.f32 %v2541_v35, %v2527_v21 }
 0x527   : > { %v2543_v26 = vadd.f32 %v2542_v19, %v2528_v48  ;;  %v9391_v20 = vpop.permute.xlu0 %3068 }
 0x529   : > { %v2544_v42 = vadd.f32 %v2543_v26, %v2529_v36 }
 0x52b   : > { %v2545_v3 = vadd.f32 %v2544_v42, %v2530_v47  ;;  %v9393_v49 = vpop.permute.xlu0 %3163 }
 0x52d   : > { %v2546_v7 = vadd.f32 %v2545_v3, %v2531_v4  ;;  %v4523_v4 = vrot.slane %v9275_v38, %v7878_v8 }
 0x52f   : > { %v2547_v1 = vadd.f32 %v2546_v7, %v2532_v30  ;;  %v9395_v33 = vpop.permute.xlu0 %3167 }
 0x531   : > { %v2548_v32 = vadd.f32 %v2547_v1, %v2533_v50 }
 0x533   : > { %v2549_v55 = vadd.f32 %v2548_v32, %v2534_v13  ;;  %v9397_v16 = vpop.permute.xlu0 %3403  ;;  %v11340_v13 = vmov 0.0  }
 0x534   : > { %2599 = vst.msk [vmem:[#allocation2] sm:$0xfe] %vm2598_vm1, %v11340_v13  ;;  %2583 = vst [vmem:[#allocation2] ss:$8 sm:$0xf] %v11340_v13 }
 0x535   : > { %2550 = vadd.xlane.f32.xlu0 %v2549_v55  ;;  %2584 = vst [vmem:[#allocation2] ss:$8 sm:$0xf0] %v11340_v13  ;;  %2593 = vst [vmem:[#allocation2 + $0x91] ss:$8 sm:$0xf] %v11340_v13  ;;  %v9438_v55 = vpop.permute.xlu1 %2863 }
 0x536   : > { %2594 = vst [vmem:[#allocation2 + $0x91] ss:$8 sm:$0xf0] %v11340_v13  ;;  %2601 = vst.msk [vmem:[#allocation2 + $0x48] sm:$0xff] %vm2600_vm0, %v11340_v13 }
 0x537   : > { %v9399_v41 = vpop.permute.xlu0 %3407  ;;  %2605 = vst.msk [vmem:[#allocation2 + $0x20] sm:$0xfe] %vm2604_vm2, %v11340_v13  ;;  %vm2691_vm2 = vcmask 1047808  }
 0x538   : > { %2603 = vst.msk [vmem:[#allocation2 + $0x90] sm:$0x1] %vm2602_vm3, %v11340_v13 }
 0x53b   : > { %v9401_v62 = vpop.permute.xlu0 %3537 }
 0x53f   : > { %v9403_v25 = vpop.permute.xlu0 %3541 }
 0x543   : > { %v9405_v63 = vpop.permute.xlu0 %3671 }
 0x547   : > { %v9407_v0 = vpop.permute.xlu0 %3675 }
 0x54b   : > { %v9409_v23 = vpop.permute.xlu0 %3805  ;;  %4530 = vrot.lane.b32.xlu0 %v4523_v4, %s6006_s19 }
 0x54f   : > { %v9411_v29 = vpop.permute.xlu0 %3809 }
 0x553   : > { %v9413_v6 = vpop.permute.xlu0 %4124 }
 0x554   : > { %11590 = vst [vmem:[#allocation16_spill] sm:$0xff] %v9413_v6 }
 0x557   : > { %v9415_v21 = vpop.permute.xlu0 %4128 }
 0x558   : > { %11591 = vst [vmem:[#allocation17_spill] sm:$0xff] %v9415_v21 }
 0x55b   : > { %v9417_v35 = vpop.permute.xlu0 %4258 }
 0x55c   : > { %11592 = vst [vmem:[#allocation18_spill] sm:$0xff] %v9417_v35 }
 0x55f   : > { %v9419_v48 = vpop.permute.xlu0 %4262 }
 0x560   : > { %11593 = vst [vmem:[#allocation19_spill] sm:$0xff] %v9419_v48 }
 0x563   : > { %v9421_v19 = vpop.permute.xlu0 %4392 }
 0x564   : > { %11594 = vst [vmem:[#allocation20_spill] sm:$0xff] %v9421_v19 }
 0x567   : > { %v9423_v36 = vpop.permute.xlu0 %4396 }
 0x568   : > { %11595 = vst [vmem:[#allocation21_spill] sm:$0xff] %v9423_v36 }
 0x56b   : > { %v9425_v26 = vpop.permute.xlu0 %4526 }
 0x56c   : > { %11596 = vst [vmem:[#allocation22_spill] sm:$0xff] %v9425_v26 }
 0x5c2   : > { %v2551_v47 = vpop.xlane.xlu0 %2550 }
 0x5c3   : > { %v2552_v42 = vrot.slane %v2551_v47, 4 }
 0x5c5   : > { %v2553_v3 = vadd.f32 %v2552_v42, %v2551_v47  ;;  %v9440_v47 = vpop.permute.xlu1 %2867 }
 0x5c7   : > { %v2554_v30 = vrot.slane %v2553_v3, 2 }
 0x5c9   : > { %v2555_v7 = vadd.f32 %v2554_v30, %v2553_v3  ;;  %v9442_v42 = vpop.permute.xlu1 %2963 }
 0x5cb   : > { %v2556_v50 = vrot.slane %v2555_v7, 1 }
 0x5cd   : > { %v2557_v1 = vadd.f32 %v2556_v50, %v2555_v7  ;;  %v9444_v4 = vpop.permute.xlu1 %2967 }
 0x5cf   : > { %5942 = vpush %v2557_v1 }
 0x5d1   : > { %v9449_v30 = vpop.permute.xlu1 %3062 }
 0x600   : > { %s5943_s29 = spop %5942 }
 0x601   : > { %s2561_s14 = smul.f32 6.1035156e-05, %s5943_s29 }
 0x603   : > { %s2562_s17 = sadd.f32 1e-05, %s2561_s14 }
 0x605   : > { %v2563_v38 = vstv %s2562_s17  ;;  %s11210_s17 = scalar_lea.vmem %s11260_s9, %s4858_s28 }
 0x606   : > { %5974 = vrsqrt.f32 %v2563_v38 }
 0x610   : > { %v5975_v32 = vpop.eup %5974 }
 0x611   : > { %5944 = vpush %v5975_v32 }
 0x642   : > { %s5945_s18 = spop %5944 }
 0x643   : > { %v9447_v3 = vstv %s5945_s18 }
 0x644   : > { %v9453_v7 = vmul.f32 %v9447_v3, %v9308_v54  ;;  %v9457_v50 = vmul.f32 %v9447_v3, %v9302_v45  ;;  %v9463_v32 = vmul.f32 %v9447_v3, %v9343_v12  ;;  %v9467_v18 = vmul.f32 %v9447_v3, %v9305_v10  ;;  %v9477_v45 = vpop.permute.xlu1 %3066 }
 0x645   : > { %v9483_v10 = vmul.f32 %v9447_v3, %v9353_v14  ;;  %v2575_v13 = vmul.f32 %v9447_v3, %v9338_v27  ;;  %v2574_v57 = vmul.f32 %v9447_v3, %v9333_v44  ;;  %v2577_v61 = vmul.f32 %v9447_v3, %v9348_v40 }
 0x646   : > { %v11338_v1 = vrot.slane %v9453_v7, 7  ;;  %v11339_v38 = vrot.slane %v9457_v50, 7  ;;  %v11343_v54 = vrot.slane %v9463_v32, 7  ;;  %v11344_v12 = vrot.slane %v9467_v18, 7 }
 0x647   : > { %v11348_v14 = vrot.slane %v9483_v10, 7  ;;  %v2571_v44 = vmul.f32 %v9447_v3, %v9318_v58  ;;  %v2582_v15 = vmul.f32 %v9447_v3, %v9373_v39  ;;  %v2573_v52 = vmul.f32 %v9447_v3, %v9328_v51 }
 0x648   : > { %2641 = vrot.lane.b32.xlu0 %v11338_v1, %s6007_s22  ;;  %2637 = vrot.lane.b32.xlu1 %v11339_v38, %s6007_s22  ;;  %v9487_v1 = vmul.f32 %v9447_v3, %v9315_v60  ;;  %v2572_v38 = vmul.f32 %v9447_v3, %v9323_v43  ;;  %v11597_v60 = vmov 0.0   ;;  %v11598_v43 = vlaneseq }
 0x649   : > { %2609 = vst.msk [vmem:[#allocation2 + $0xb0] sm:$0x1] %vm2608_vm4, %v11597_v60  ;;  %v2713_v58 = vrot.slane %v2573_v52, 7  ;;  %vm4066_vm4 = vcmask 1045504  }
 0x64a   : > { %v11347_v53 = vrot.slane %v9487_v1, 7  ;;  %2611 = vst.msk [vmem:[#allocation2 + $0x40] sm:$0xfe] %vm2610_vm5, %v11597_v60  ;;  %vm2587_vm6 = vcmp.lt.s32.totalorder %v11598_v43, 128  ;;  %v2712_v27 = vrot.slane %v2572_v38, 7  ;;  %v2711_v38 = vrot.slane %v2571_v44, 7 }
 0x64b   : > { %2590 = vst.msk [vmem:[#allocation2 + $0x40] ss:$8 sm:$0x1] %vm2587_vm6, %v11597_v60  ;;  %2596 = vst.msk [vmem:[#allocation2 + $0xd1] ss:$8 sm:$0x1] %vm2587_vm6, %v11597_v60 }
 0x64c   : > { %2655 = vrot.lane.b32.xlu0 %v11343_v54, %s6007_s22  ;;  %2639 = vrot.lane.b32.xlu1 %v11344_v12, %s6007_s22  ;;  %v9504_v54 = vpop.permute.xlu1 %3161  ;;  %v2629_v12 = vrot.slane %v2575_v13, 7  ;;  %2615 = vst.msk [vmem:[#allocation2 + $0xd0] sm:$0x1] %vm2614_vm7, %v11597_v60  ;;  %v2580_v13 = vmul.f32 %v9447_v3, %v9363_v2  ;;  %v2579_v2 = vmul.f32 %v9447_v3, %v9358_v28 }
 0x64d   : > { %2613 = vst.msk [vmem:[#allocation2 + $0x88] sm:$0xff] %vm2612_vm8, %v11597_v60 }
 0x64e   : > { %v2717_v40 = vrot.slane %v2580_v13, 7  ;;  %v2715_v39 = vrot.slane %v2579_v2, 7  ;;  %v2581_v13 = vmul.f32 %v9447_v3, %v9368_v34  ;;  %2607 = vst.msk [vmem:[#allocation2 + $0x68] sm:$0xff] %vm2606_vm10, %v11597_v60  ;;  %v11599_v34 = vrot.slane %v9457_v50, 7 }
 0x64f   : > { %v11602_v2 = vrot.slane %v9453_v7, 7  ;;  %v11603_v50 = vrot.slane %v9483_v10, 7 }
 0x650   : > { %2659 = vrot.lane.b32.xlu0 %v11348_v14, %s6007_s22  ;;  %2643 = vrot.lane.b32.xlu1 %v11347_v53, %s6007_s22  ;;  %v9523_v43 = vpop.permute.xlu1 %3165  ;;  %v2714_v53 = vrot.slane %v2574_v57, 7  ;;  %v2633_v14 = vrot.slane %v2577_v61, 7  ;;  %v2721_v61 = vrot.slane %v2582_v15, 7  ;;  %v2718_v44 = vsel %vm2624_vm9, %v2712_v27, %v2717_v40 }
 0x651   : > { %v2719_v52 = vrot.slane %v2581_v13, 7  ;;  %v2630_v3 = vsel %vm2624_vm9, %v11599_v34, %v2629_v12 }
 0x652   : > { %v2722_v15 = vsel %vm2624_vm9, %v2714_v53, %v2721_v61  ;;  %v2634_v60 = vsel %vm2624_vm9, %v11602_v2, %v2633_v14 }
 0x653   : > { %v2720_v7 = vsel %vm2624_vm9, %v2713_v58, %v2719_v52 }
 0x654   : > { %2725 = vrot.lane.b32.xlu0 %v2712_v27, %s6008_s25  ;;  %2653 = vrot.lane.b32.xlu1 %v2629_v12, %s6007_s22  ;;  %v9535_v57 = vpop.permute.xlu1 %3401  ;;  %v11604_v12 = vrot.slane %v9487_v1, 7 }
 0x658   : > { %2729 = vrot.lane.b32.xlu0 %v2714_v53, %s6008_s25  ;;  %2657 = vrot.lane.b32.xlu1 %v2633_v14, %s6007_s22  ;;  %v9545_v51 = vpop.permute.xlu1 %3405  ;;  %v11601_v53 = vrot.slane %v9467_v18, 7 }
 0x65c   : > { %2741 = vrot.lane.b32.xlu0 %v2717_v40, %s6008_s25  ;;  %2723 = vrot.lane.b32.xlu1 %v2711_v38, %s6008_s25  ;;  %v9553_v28 = vpop.permute.xlu1 %3535  ;;  %v11600_v40 = vrot.slane %v9463_v32, 7  ;;  %v2636_v32 = vsel %vm2624_vm9, %v11604_v12, %v11603_v50 }
 0x660   : > { %2745 = vrot.lane.b32.xlu0 %v2721_v61, %s6008_s25  ;;  %2727 = vrot.lane.b32.xlu1 %v2713_v58, %s6008_s25  ;;  %v9562_v27 = vpop.permute.xlu1 %3539  ;;  %v2632_v61 = vsel %vm2624_vm9, %v11601_v53, %v11600_v40  ;;  %v9606_v58 = vpop.permute.xlu0 %4530 }
 0x661   : > { %11612 = vst [vmem:[#allocation27_spill] sm:$0xff] %v9606_v58 }
 0x664   : > { %2733 = vrot.lane.b32.xlu0 %v2718_v44, %s6008_s25  ;;  %2739 = vrot.lane.b32.xlu1 %v2715_v39, %s6008_s25  ;;  %v9573_v13 = vpop.permute.xlu1 %3669  ;;  %v2716_v44 = vsel %vm2624_vm9, %v2711_v38, %v2715_v39 }
 0x668   : > { %2737 = vrot.lane.b32.xlu0 %v2722_v15, %s6008_s25  ;;  %2743 = vrot.lane.b32.xlu1 %v2719_v52, %s6008_s25  ;;  %v9582_v18 = vpop.permute.xlu1 %3673 }
 0x66c   : > { %2645 = vrot.lane.b32.xlu1 %v2630_v3, %s6007_s22  ;;  %v9587_v14 = vpop.permute.xlu1 %3803 }
 0x670   : > { %2647 = vrot.lane.b32.xlu1 %v2632_v61, %s6007_s22  ;;  %v9590_v15 = vpop.permute.xlu1 %3807 }
 0x674   : > { %2649 = vrot.lane.b32.xlu1 %v2634_v60, %s6007_s22  ;;  %v9592_v10 = vpop.permute.xlu1 %4122 }
 0x675   : > { %11605 = vst [vmem:[#allocation23_spill] sm:$0xff] %v9592_v10 }
 0x678   : > { %2651 = vrot.lane.b32.xlu1 %v2636_v32, %s6007_s22  ;;  %v9594_v1 = vpop.permute.xlu1 %4126 }
 0x679   : > { %11606 = vst [vmem:[#allocation24_spill] sm:$0xff] %v9594_v1 }
 0x67c   : > { %2731 = vrot.lane.b32.xlu1 %v2716_v44, %s6008_s25  ;;  %v9596_v34 = vpop.permute.xlu1 %4256 }
 0x67d   : > { %11607 = vst [vmem:[#allocation3_spill] sm:$0xff] %v9596_v34 }
 0x680   : > { %2735 = vrot.lane.b32.xlu1 %v2720_v7, %s6008_s25  ;;  %v9598_v3 = vpop.permute.xlu1 %4260 }
 0x681   : > { %11608 = vst [vmem:[#allocation45_spill] sm:$0xff] %v9598_v3  ;;  %v2973_v3 = vsel %vm2600_vm0, %v9444_v4, %v9387_v31 }
 0x684   : > { %v9600_v40 = vpop.permute.xlu1 %4390 }
 0x685   : > { %11609 = vst [vmem:[#allocation50_spill] sm:$0xff] %v9600_v40 }
 0x688   : > { %v9602_v38 = vpop.permute.xlu1 %4394 }
 0x689   : > { %11610 = vst [vmem:[#allocation25_spill] sm:$0xff] %v9602_v38 }
 0x68c   : > { %v9604_v39 = vpop.permute.xlu1 %4524 }
 0x68d   : > { %11611 = vst [vmem:[#allocation26_spill] sm:$0xff] %v9604_v39 }
 0x690   : > { %v9608_v52 = vpop.permute.xlu1 %4528 }
 0x691   : > { %11613 = vst [vmem:[#allocation28_spill] sm:$0xff] %v9608_v52 }
 0x6ba   : > { %v2638_v53 = vpop.permute.xlu1 %2637  ;;  %v2642_v61 = vpop.permute.xlu0 %2641 }
 0x6bb   : > { %2686 = vst.msk [vmem:[#allocation2] sm:$0xfe] %vm2685_vm11, %v2638_v53 }
 0x6be   : > { %v2640_v2 = vpop.permute.xlu1 %2639  ;;  %v2656_v60 = vpop.permute.xlu0 %2655 }
 0x6bf   : > { %v2661_v50 = vsel %vm2600_vm0, %v2638_v53, %v2640_v2  ;;  %v2662_v12 = vsel %vm2600_vm0, %v2640_v2, %v2642_v61 }
 0x6c0   : > { %2687 = vst [vmem:[#allocation2 + $0x8] sm:$0xfe] %v2661_v50  ;;  %2688 = vst [vmem:[#allocation2 + $0x10] sm:$0xfe] %v2662_v12 }
 0x6c2   : > { %v2644_v32 = vpop.permute.xlu1 %2643  ;;  %v2660_v44 = vpop.permute.xlu0 %2659 }
 0x6c3   : > { %v2663_v7 = vsel %vm2600_vm0, %v2642_v61, %v2644_v32  ;;  %2690 = vst.msk [vmem:[#allocation2 + $0x20] sm:$0xfe] %vm2598_vm1, %v2644_v32  ;;  %vm2871_vm1 = vcmask 523264  }
 0x6c4   : > { %2702 = vst.msk [vmem:[#allocation2 + $0xb0] sm:$0x1] %vm2602_vm3, %v2660_v44  ;;  %2689 = vst [vmem:[#allocation2 + $0x18] sm:$0xfe] %v2663_v7  ;;  %vm3345_vm3 = vcmask 1046528  }
 0x6c6   : > { %v2654_v56 = vpop.permute.xlu1 %2653  ;;  %v2726_v5 = vpop.permute.xlu0 %2725 }
 0x6c7   : > { %v2667_v24 = vsel %vm2600_vm0, %v2654_v56, %v2656_v60  ;;  %2698 = vst.msk [vmem:[#allocation2 + $0x90] sm:$0x1] %vm2697_vm12, %v2654_v56  ;;  %v9679_v40 = vld [vmem:[#allocation2 + $0x8] sm:$0xff] }
 0x6c8   : > { %2699 = vst [vmem:[#allocation2 + $0x98] sm:$0x1] %v2667_v24 }
 0x6ca   : > { %v2658_v53 = vpop.permute.xlu1 %2657  ;;  %v2730_v2 = vpop.permute.xlu0 %2729 }
 0x6cb   : > { %v2668_v50 = vsel %vm2600_vm0, %v2656_v60, %v2658_v53  ;;  %v2669_v12 = vsel %vm2600_vm0, %v2658_v53, %v2660_v44  ;;  %2777 = vst.msk [vmem:[#allocation2 + $0x40] sm:$0xfe] %vm2776_vm13, %v2730_v2 }
 0x6cc   : > { %2700 = vst [vmem:[#allocation2 + $0xa0] sm:$0x1] %v2668_v50  ;;  %2701 = vst [vmem:[#allocation2 + $0xa8] sm:$0x1] %v2669_v12  ;;  %v9626_v50 = vld [vmem:[#allocation2] sm:$0xff] }
 0x6ce   : > { %v2724_v61 = vpop.permute.xlu1 %2723  ;;  %v2742_v32 = vpop.permute.xlu0 %2741 }
 0x6cf   : > { %v2748_v7 = vsel %vm2747_vm14, %v2724_v61, %v2726_v5  ;;  %2772 = vst.msk [vmem:[#allocation2 + $0x20] sm:$0xfe] %vm2610_vm5, %v2724_v61 }
 0x6d0   : > { %2773 = vst [vmem:[#allocation2 + $0x28] sm:$0xfe] %v2748_v7  ;;  %v2979_v7 = vmul.f32 %v9442_v42, %v9626_v50 }
 0x6d2   : > { %v2728_v56 = vpop.permute.xlu1 %2727  ;;  %v2746_v24 = vpop.permute.xlu0 %2745  ;;  %v9620_v58 = vld [vmem:[#allocation2 + $0x40] sm:$0xff] }
 0x6d3   : > { %11614 = vst [vmem:[#allocation29_spill] sm:$0xff] %v9620_v58  ;;  %v2749_v60 = vsel %vm2747_vm14, %v2726_v5, %v2728_v56  ;;  %v2750_v44 = vsel %vm2747_vm14, %v2728_v56, %v2730_v2  ;;  %2788 = vst.msk [vmem:[#allocation2 + $0xd0] sm:$0x1] %vm2787_vm15, %v2746_v24  ;;  %v2884_v53 = vmul.f32 %v9383_v9, %v9620_v58 }
 0x6d4   : > { %2774 = vst [vmem:[#allocation2 + $0x30] sm:$0xfe] %v2749_v60  ;;  %2775 = vst [vmem:[#allocation2 + $0x38] sm:$0xfe] %v2750_v44  ;;  %v9634_v5 = vsel %vm2871_vm1, %v9438_v55, %v9381_v22 }
 0x6d5   : > { %2908 = vrot.lane.b32.xlu1 %v2884_v53, %s6006_s19 }
 0x6d6   : > { %v2740_v12 = vpop.permute.xlu1 %2739  ;;  %v9629_v61 = vpop.permute.xlu0 %2733 }
 0x6d7   : > { %v2754_v2 = vsel %vm2747_vm14, %v2740_v12, %v2742_v32  ;;  %2783 = vst.msk [vmem:[#allocation2 + $0xb0] sm:$0x1] %vm2614_vm7, %v2740_v12  ;;  %v9640_v56 = vld [vmem:[#allocation2 + $0x28] sm:$0xff]  ;;  %v3082_v12 = vmul.f32 %v9391_v20, %v9620_v58 }
 0x6d8   : > { %2784 = vst [vmem:[#allocation2 + $0xb8] sm:$0x1] %v2754_v2  ;;  %v2881_v60 = vmul.f32 %v9634_v5, %v9640_v56  ;;  %v9656_v2 = vsel %vm2871_vm1, %v9440_v47, %v9383_v9 }
 0x6d9   : > { %2999 = vrot.lane.b32.xlu1 %v2979_v7, %s6008_s25  ;;  %v3177_v7 = vmul.f32 %v9504_v54, %v9626_v50 }
 0x6da   : > { %v2744_v44 = vpop.permute.xlu1 %2743  ;;  %2902 = vrot.lane.b32.xlu0 %v2881_v60, %s6006_s19  ;;  %v2738_v53 = vpop.permute.xlu0 %2737  ;;  %v9664_v60 = vld [vmem:[#allocation2 + $0x20] sm:$0xff] }
 0x6db   : > { %v2755_v26 = vsel %vm2747_vm14, %v2742_v32, %v2744_v44  ;;  %v2756_v52 = vsel %vm2747_vm14, %v2744_v44, %v2746_v24  ;;  %2782 = vst.msk [vmem:[#allocation2 + $0x88] sm:$0xff] %vm2747_vm14, %v2738_v53  ;;  %v9651_v19 = vld [vmem:[#allocation2 + $0x38] sm:$0xff]  ;;  %v9677_v38 = vld [vmem:[#allocation2 + $0x30] sm:$0xff] }
 0x6dc   : > { %2785 = vst [vmem:[#allocation2 + $0xc0] sm:$0x1] %v2755_v26  ;;  %2786 = vst [vmem:[#allocation2 + $0xc8] sm:$0x1] %v2756_v52  ;;  %v2883_v32 = vmul.f32 %v9656_v2, %v9651_v19 }
 0x6dd   : > { %3106 = vrot.lane.b32.xlu1 %v3082_v12, %s6007_s22  ;;  %v2880_v12 = vmul.f32 %v9438_v55, %v9664_v60 }
 0x6de   : > { %v2646_v24 = vpop.permute.xlu1 %2645  ;;  %2906 = vrot.lane.b32.xlu0 %v2883_v32, %s6006_s19 }
 0x6df   : > { %2692 = vst.msk [vmem:[#allocation2 + $0x48] sm:$0xff] %vm2691_vm2, %v2646_v24 }
 0x6e1   : > { %3197 = vrot.lane.b32.xlu1 %v3177_v7, %s6006_s19  ;;  %v9691_v7 = vsel %vm2600_vm0, %v9442_v42, %v9385_v17 }
 0x6e2   : > { %v2648_v44 = vpop.permute.xlu1 %2647  ;;  %v9667_v26 = vld [vmem:[#allocation2 + $0x88] sm:$0xff] }
 0x6e3   : > { %v9670_v52 = vsel %vm2600_vm0, %v2646_v24, %v2648_v44  ;;  %v2889_v32 = vmul.f32 %v9383_v9, %v9667_v26  ;;  %v9686_v24 = vsel %vm2871_vm1, %v9381_v22, %v9440_v47  ;;  %v9703_v22 = vld [vmem:[#allocation2 + $0x18] sm:$0xff]  ;;  %v9710_v47 = vsel %vm2600_vm0, %v9385_v17, %v9444_v4 }
 0x6e4   : > { %11615 = vst [vmem:[#allocation30_spill] sm:$0xff] %v9670_v52  ;;  %2693 = vst [vmem:[#allocation2 + $0x50] sm:$0xff] %v9670_v52  ;;  %v2882_v35 = vmul.f32 %v9686_v24, %v9677_v38 }
 0x6e5   : > { %2900 = vrot.lane.b32.xlu1 %v2880_v12, %s6006_s19  ;;  %2918 = vrot.lane.b32.xlu0 %v2889_v32, %s6006_s19  ;;  %v2980_v12 = vmul.f32 %v9691_v7, %v9679_v40  ;;  %v9701_v32 = vld [vmem:[#allocation2 + $0x10] sm:$0xff] }
 0x6e6   : > { %v2650_v9 = vpop.permute.xlu1 %2649  ;;  %v9723_v1 = vld [vmem:[#allocation2 + $0x48] sm:$0xff] }
 0x6e7   : > { %v9694_v48 = vsel %vm2600_vm0, %v2648_v44, %v2650_v9  ;;  %11617 = vst [vmem:[#allocation32_spill] sm:$0xff] %v9723_v1 }
 0x6e8   : > { %2694 = vst [vmem:[#allocation2 + $0x58] sm:$0xff] %v9694_v48 }
 0x6e9   : > { %2904 = vrot.lane.b32.xlu1 %v2882_v35, %s6006_s19  ;;  %3001 = vrot.lane.b32.xlu0 %v2980_v12, %s6008_s25  ;;  %v2981_v35 = vmul.f32 %v9710_v47, %v9701_v32  ;;  %v2982_v12 = vmul.f32 %v2973_v3, %v9703_v22 }
 0x6ea   : > { %v2652_v44 = vpop.permute.xlu1 %2651 }
 0x6eb   : > { %v9716_v6 = vsel %vm2600_vm0, %v2650_v9, %v2652_v44  ;;  %2696 = vst.msk [vmem:[#allocation2 + $0x68] sm:$0xff] %vm2600_vm0, %v2652_v44  ;;  %v2983_v9 = vmul.f32 %v9387_v31, %v9664_v60  ;;  %v2984_v44 = vmul.f32 %v9442_v42, %v9723_v1  ;;  %v3078_v42 = vmul.f32 %v9449_v30, %v9664_v60 }
 0x6ec   : > { %11616 = vst [vmem:[#allocation31_spill] sm:$0xff] %v9716_v6  ;;  %2695 = vst [vmem:[#allocation2 + $0x60] sm:$0xff] %v9716_v6 }
 0x6ed   : > { %3003 = vrot.lane.b32.xlu1 %v2981_v35, %s6008_s25  ;;  %3005 = vrot.lane.b32.xlu0 %v2982_v12, %s6008_s25  ;;  %v3070_v35 = vsel %vm2747_vm14, %v9449_v30, %v9389_v37 }
 0x6ee   : > { %v2732_v17 = vpop.permute.xlu1 %2731  ;;  %v3079_v58 = vmul.f32 %v3070_v35, %v9640_v56 }
 0x6ef   : > { %v9729_v4 = vsel %vm2747_vm14, %v2732_v17, %v9629_v61  ;;  %2778 = vst.msk [vmem:[#allocation2 + $0x68] sm:$0xff] %vm2612_vm8, %v2732_v17 }
 0x6f0   : > { %2779 = vst [vmem:[#allocation2 + $0x70] sm:$0xff] %v9729_v4 }
 0x6f1   : > { %3007 = vrot.lane.b32.xlu1 %v2983_v9, %s6008_s25  ;;  %3009 = vrot.lane.b32.xlu0 %v2984_v44, %s6008_s25 }
 0x6f2   : > { %v2736_v12 = vpop.permute.xlu1 %2735 }
 0x6f3   : > { %v9744_v17 = vsel %vm2747_vm14, %v9629_v61, %v2736_v12  ;;  %v9747_v10 = vsel %vm2747_vm14, %v2736_v12, %v2738_v53  ;;  %v3071_v61 = vsel %vm2747_vm14, %v9389_v37, %v9477_v45  ;;  %v3072_v53 = vsel %vm2747_vm14, %v9477_v45, %v9391_v20 }
 0x6f4   : > { %11618 = vst [vmem:[#allocation33_spill] sm:$0xff] %v9747_v10  ;;  %2780 = vst [vmem:[#allocation2 + $0x78] sm:$0xff] %v9744_v17  ;;  %v3080_v9 = vmul.f32 %v3071_v61, %v9677_v38  ;;  %v3081_v44 = vmul.f32 %v3072_v53, %v9651_v19  ;;  %v3087_v37 = vmul.f32 %v9391_v20, %v9667_v26 }
 0x6f5   : > { %2781 = vst [vmem:[#allocation2 + $0x80] sm:$0xff] %v9747_v10  ;;  %3098 = vrot.lane.b32.xlu1 %v3078_v42, %s6007_s22  ;;  %3100 = vrot.lane.b32.xlu0 %v3079_v58, %s6007_s22  ;;  %v3170_v58 = vsel %vm2871_vm1, %v9393_v49, %v9523_v43  ;;  %v3169_v45 = vsel %vm2871_vm1, %v9504_v54, %v9393_v49 }
 0x6f6   : > { %v3179_v12 = vmul.f32 %v3170_v58, %v9701_v32  ;;  %v3181_v42 = vmul.f32 %v9395_v33, %v9664_v60  ;;  %v3171_v20 = vsel %vm2871_vm1, %v9523_v43, %v9395_v33  ;;  %v3182_v49 = vmul.f32 %v9504_v54, %v9723_v1 }
 0x6f7   : > { %v2888_v60 = vmul.f32 %v9656_v2, %v9747_v10  ;;  %v2987_v54 = vmul.f32 %v2973_v3, %v9716_v6  ;;  %v2887_v2 = vmul.f32 %v9686_v24, %v9744_v17 }
 0x6f9   : > { %3102 = vrot.lane.b32.xlu1 %v3080_v9, %s6007_s22  ;;  %3104 = vrot.lane.b32.xlu0 %v3081_v44, %s6007_s22  ;;  %v3178_v9 = vmul.f32 %v3169_v45, %v9679_v40  ;;  %v2886_v44 = vmul.f32 %v9634_v5, %v9729_v4  ;;  %v2985_v5 = vmul.f32 %v9691_v7, %v9670_v52 }
 0x6fa   : > { %v3086_v7 = vmul.f32 %v3072_v53, %v9747_v10 }
 0x6fd   : > { %3201 = vrot.lane.b32.xlu1 %v3179_v12, %s6006_s19  ;;  %3116 = vrot.lane.b32.xlu0 %v3087_v37, %s6007_s22  ;;  %v3180_v12 = vmul.f32 %v3171_v20, %v9703_v22  ;;  %v9794_v37 = vld [vmem:[#allocation2 + $0x68] sm:$0xff] }
 0x6fe   : > { %v2885_v43 = vmul.f32 %v9438_v55, %v9794_v37  ;;  %v3084_v55 = vmul.f32 %v3070_v35, %v9729_v4  ;;  %v2988_v3 = vmul.f32 %v9387_v31, %v9794_v37  ;;  %v3083_v24 = vmul.f32 %v9449_v30, %v9794_v37 }
 0x6ff   : > { %v3426_v35 = vmul.f32 %v9399_v41, %v9667_v26  ;;  %v3185_v31 = vmul.f32 %v3171_v20, %v9716_v6  ;;  %v3556_v30 = vmul.f32 %v9553_v28, %v9723_v1  ;;  %v3297_v20 = vld [vmem:[#allocation2 + $0xd0] sm:$0x1] }
 0x701   : > { %3205 = vrot.lane.b32.xlu1 %v3181_v42, %s6006_s19  ;;  %3199 = vrot.lane.b32.xlu0 %v3178_v9, %s6006_s19  ;;  %v2986_v42 = vmul.f32 %v9710_v47, %v9694_v48  ;;  %v3183_v47 = vmul.f32 %v3169_v45, %v9670_v52  ;;  %v3292_v9 = vld [vmem:[#allocation2 + $0x40] sm:$0xfe] }
 0x702   : > { %v3421_v53 = vmul.f32 %v9399_v41, %v3292_v9 }
 0x704   : > { %v3459_v45 = vrot.slane %v3421_v53, 1 }
 0x705   : > { %2912 = vrot.lane.b32.xlu1 %v2886_v44, %s6006_s19  ;;  %3203 = vrot.lane.b32.xlu0 %v3180_v12, %s6006_s19  ;;  %v3085_v44 = vmul.f32 %v3071_v61, %v9744_v17  ;;  %v9829_v12 = vld [vmem:[#allocation2] sm:$0xfe] }
 0x709   : > { %3207 = vrot.lane.b32.xlu0 %v3182_v49, %s6006_s19  ;;  %2916 = vrot.lane.b32.xlu1 %v2888_v60, %s6006_s19  ;;  %v3460_v49 = vrot.slane %v3426_v35, 1  ;;  %v3551_v60 = vmul.f32 %v9553_v28, %v9829_v12 }
 0x70b   : > { %v3461_v61 = vsel %vm3345_vm3, %v3459_v45, %v3460_v49 }
 0x70d   : > { %2910 = vrot.lane.b32.xlu0 %v2885_v43, %s6006_s19  ;;  %3011 = vrot.lane.b32.xlu1 %v2985_v5, %s6008_s25  ;;  %v3184_v43 = vmul.f32 %v3170_v58, %v9694_v48  ;;  %v3582_v5 = vrot.slane %v3556_v30, 1  ;;  %v3284_v58 = vld [vmem:[#allocation2 + $0x90] sm:$0x1] }
 0x711   : > { %2914 = vrot.lane.b32.xlu0 %v2887_v2, %s6006_s19  ;;  %3015 = vrot.lane.b32.xlu1 %v2987_v54, %s6008_s25  ;;  %v3694_v54 = vmul.f32 %v9407_v0, %v9667_v26  ;;  %v3581_v2 = vrot.slane %v3551_v60, 1  ;;  %v4147_v60 = vmul.f32 %v9415_v21, %v9667_v26 }
 0x715   : > { %3013 = vrot.lane.b32.xlu0 %v2986_v42, %s6008_s25  ;;  %3110 = vrot.lane.b32.xlu1 %v3084_v55, %s6007_s22  ;;  %v3431_v42 = vmul.f32 %v9399_v41, %v3297_v20  ;;  %v3689_v55 = vmul.f32 %v9407_v0, %v3292_v9  ;;  %v3819_v9 = vmul.f32 %v9587_v14, %v9829_v12 }
 0x717   : > { %v3470_v35 = vrot.slane %v3431_v42, 1  ;;  %v3727_v53 = vrot.slane %v3689_v55, 1  ;;  %v4001_v42 = vld [vmem:[#allocation2] sm:$0xfc] }
 0x719   : > { %3017 = vrot.lane.b32.xlu0 %v2988_v3, %s6008_s25  ;;  %3114 = vrot.lane.b32.xlu1 %v3086_v7, %s6007_s22  ;;  %v3186_v7 = vmul.f32 %v9395_v33, %v9794_v37  ;;  %v3583_v3 = vsel %vm3345_vm3, %v3581_v2, %v3582_v5  ;;  %v3471_v33 = vsel %vm3345_vm3, %v3460_v49, %v3470_v35 }
 0x71d   : > { %3108 = vrot.lane.b32.xlu0 %v3083_v24, %s6007_s22  ;;  %3209 = vrot.lane.b32.xlu1 %v3183_v47, %s6006_s19  ;;  %v3728_v24 = vrot.slane %v3694_v54, 1  ;;  %v3824_v47 = vmul.f32 %v9587_v14, %v9723_v1  ;;  %v3699_v54 = vmul.f32 %v9407_v0, %v3297_v20  ;;  %v3829_v20 = vmul.f32 %v9587_v14, %v3284_v58 }
 0x71f   : > { %v3729_v30 = vsel %vm3345_vm3, %v3727_v53, %v3728_v24  ;;  %v3850_v45 = vrot.slane %v3824_v47, 1  ;;  %v3738_v47 = vrot.slane %v3699_v54, 1  ;;  %v4272_v53 = vmul.f32 %v9596_v34, %v4001_v42  ;;  %v4005_v54 = vld [vmem:[#allocation2 + $0x90] sm:$0x3] }
 0x721   : > { %3112 = vrot.lane.b32.xlu0 %v3085_v44, %s6007_s22  ;;  %3213 = vrot.lane.b32.xlu1 %v3185_v31, %s6006_s19  ;;  %v3561_v31 = vmul.f32 %v9553_v28, %v3284_v58  ;;  %v4013_v44 = vld [vmem:[#allocation2 + $0x40] sm:$0xfc] }
 0x722   : > { %v4142_v2 = vmul.f32 %v9415_v21, %v4013_v44  ;;  %v4410_v58 = vmul.f32 %v9423_v36, %v4013_v44  ;;  %v9887_v44 = vld [vmem:[#allocation2 + $0x20] sm:$0xfe] }
 0x724   : > { %v4180_v35 = vrot.slane %v4142_v2, 2 }
 0x725   : > { %3211 = vrot.lane.b32.xlu0 %v3184_v43, %s6006_s19  ;;  %3480 = vrot.lane.b32.xlu1 %v3461_v61, %s6006_s19  ;;  %v3596_v43 = vrot.slane %v3561_v31, 1  ;;  %v3849_v61 = vrot.slane %v3819_v9, 1  ;;  %v4018_v31 = vld [vmem:[#allocation2 + $0xd0] sm:$0x3] }
 0x727   : > { %v3597_v55 = vsel %vm3345_vm3, %v3582_v5, %v3596_v43  ;;  %v3851_v49 = vsel %vm3345_vm3, %v3849_v61, %v3850_v45  ;;  %v3739_v5 = vsel %vm3345_vm3, %v3728_v24, %v3738_v47  ;;  %v4302_v43 = vrot.slane %v4272_v53, 2 }
 0x728   : > { %v4152_v61 = vmul.f32 %v9415_v21, %v4018_v31  ;;  %v4282_v47 = vmul.f32 %v9596_v34, %v4005_v54  ;;  %v10056_v21 = vld [vmem:[#allocation2 + $0xa8] sm:$0x1] }
 0x729   : > { %3215 = vrot.lane.b32.xlu0 %v3186_v7, %s6006_s19  ;;  %3606 = vrot.lane.b32.xlu1 %v3583_v3, %s6008_s25  ;;  %v4181_v7 = vrot.slane %v4147_v60, 2  ;;  %v4277_v3 = vmul.f32 %v9596_v34, %v9723_v1  ;;  %v3864_v60 = vrot.slane %v3829_v20, 1  ;;  %v10003_v34 = vld [vmem:[#allocation2 + $0x8] sm:$0xfe]  ;;  %11630 = vst [vmem:[#allocation43_spill] sm:$0xff] %v10056_v21 }
 0x72b   : > { %v4182_v9 = vsel %vm4066_vm4, %v4180_v35, %v4181_v7  ;;  %v3865_v2 = vsel %vm3345_vm3, %v3850_v45, %v3864_v60  ;;  %v4540_v35 = vmul.f32 %v9604_v39, %v4001_v42  ;;  %v4420_v60 = vmul.f32 %v9423_v36, %v4018_v31 }
 0x72c   : > { %v3417_v42 = vmul.f32 %v9535_v57, %v9887_v44 }
 0x72d   : > { %3490 = vrot.lane.b32.xlu0 %v3471_v33, %s6006_s19  ;;  %3748 = vrot.lane.b32.xlu1 %v3729_v30, %s6007_s22  ;;  %v4303_v33 = vrot.slane %v4277_v3, 2  ;;  %v4415_v30 = vmul.f32 %v9423_v36, %v9667_v26  ;;  %v4191_v26 = vrot.slane %v4152_v61, 2  ;;  %v4448_v3 = vrot.slane %v4410_v58, 2 }
 0x72e   : > { %v4459_v31 = vrot.slane %v4420_v60, 2 }
 0x72f   : > { %v4304_v24 = vsel %vm4066_vm4, %v4302_v43, %v4303_v33  ;;  %v4192_v45 = vsel %vm4066_vm4, %v4181_v7, %v4191_v26  ;;  %v9903_v7 = vsel %vm2871_vm1, %v9397_v16, %v9545_v51  ;;  %v9905_v43 = vld [vmem:[#allocation2 + $0x30] sm:$0xfe]  ;;  %v4550_v26 = vmul.f32 %v9604_v39, %v4005_v54 }
 0x731   : > { %3616 = vrot.lane.b32.xlu0 %v3597_v55, %s6008_s25  ;;  %3874 = vrot.lane.b32.xlu1 %v3851_v49, %s6006_s19  ;;  %v4449_v55 = vrot.slane %v4415_v30, 2  ;;  %v4545_v49 = vmul.f32 %v9604_v39, %v9723_v1  ;;  %v4570_v30 = vrot.slane %v4540_v35, 2  ;;  %v9924_v35 = vld [vmem:[#allocation2 + $0xb8] sm:$0x1] }
 0x733   : > { %v4450_v20 = vsel %vm4066_vm4, %v4448_v3, %v4449_v55  ;;  %v4571_v53 = vrot.slane %v4545_v49, 2  ;;  %v3447_v49 = vrot.slane %v3417_v42, 1  ;;  %v3419_v3 = vmul.f32 %v9903_v7, %v9905_v43 }
 0x735   : > { %3758 = vrot.lane.b32.xlu0 %v3739_v5, %s6007_s22  ;;  %4201 = vrot.lane.b32.xlu1 %v4182_v9, %s6006_s19  ;;  %v9893_v5 = vmul.f32 %v9535_v57, %v9794_v37  ;;  %v4317_v9 = vrot.slane %v4282_v47, 2  ;;  %v4572_v58 = vsel %vm4066_vm4, %v4570_v30, %v4571_v53  ;;  %v9922_v47 = vld [vmem:[#allocation2 + $0x28] sm:$0xfe]  ;;  %v4585_v30 = vrot.slane %v4550_v26, 2 }
 0x737   : > { %v4318_v61 = vsel %vm4066_vm4, %v4303_v33, %v4317_v9  ;;  %v3409_v33 = vsel %vm2871_vm1, %v9535_v57, %v9397_v16  ;;  %v3453_v16 = vrot.slane %v3419_v3, 1 }
 0x738   : > { %v3423_v54 = vmul.f32 %v3409_v33, %v9729_v4  ;;  %v3418_v60 = vmul.f32 %v3409_v33, %v9922_v47  ;;  %v3428_v42 = vmul.f32 %v3409_v33, %v9924_v35 }
 0x739   : > { %3884 = vrot.lane.b32.xlu0 %v3865_v2, %s6006_s19  ;;  %4327 = vrot.lane.b32.xlu1 %v4304_v24, %s6008_s25  ;;  %v11368_v2 = vrot.slane %v9893_v5, 1  ;;  %v9912_v24 = vmul.f32 %v9903_v7, %v9744_v17 }
 0x73a   : > { %v3451_v3 = vrot.slane %v3423_v54, 1  ;;  %v9961_v54 = vld [vmem:[#allocation2 + $0xb0] sm:$0x1] }
 0x73b   : > { %v11367_v9 = vrot.slane %v9912_v24, 1  ;;  %v3427_v39 = vmul.f32 %v9535_v57, %v9961_v54 }
 0x73d   : > { %4211 = vrot.lane.b32.xlu0 %v4192_v45, %s6006_s19  ;;  %4469 = vrot.lane.b32.xlu1 %v4450_v20, %s6007_s22  ;;  %v4460_v45 = vsel %vm4066_vm4, %v4449_v55, %v4459_v31  ;;  %v3449_v20 = vsel %vm3345_vm3, %v3447_v49, %v11368_v2  ;;  %v3411_v55 = vsel %vm2871_vm1, %v9545_v51, %v9399_v41  ;;  %v9943_v31 = vld [vmem:[#allocation2 + $0xc8] sm:$0x1]  ;;  %v3450_v41 = vrot.slane %v3418_v60, 1 }
 0x73e   : > { %v4586_v49 = vsel %vm4066_vm4, %v4571_v53, %v4585_v30  ;;  %v3455_v26 = vsel %vm3345_vm3, %v3453_v16, %v11367_v9  ;;  %v3464_v51 = vrot.slane %v3428_v42, 1  ;;  %v9957_v53 = vsel %vm2600_vm0, %v9401_v62, %v9562_v27  ;;  %v9963_v16 = vld [vmem:[#allocation2 + $0x10] sm:$0xfe] }
 0x73f   : > { %11621 = vst [vmem:[#allocation36_spill] sm:$0xff] %v9963_v16  ;;  %v3462_v57 = vrot.slane %v3427_v39, 1 }
 0x740   : > { %v3465_v60 = vsel %vm3345_vm3, %v3451_v3, %v3464_v51 }
 0x741   : > { %4337 = vrot.lane.b32.xlu0 %v4318_v61, %s6008_s25  ;;  %4595 = vrot.lane.b32.xlu1 %v4572_v58, %s6006_s19  ;;  %v9941_v58 = vld [vmem:[#allocation2 + $0x38] sm:$0xfe] }
 0x742   : > { %v3420_v33 = vmul.f32 %v3411_v55, %v9941_v58 }
 0x744   : > { %v3456_v9 = vrot.slane %v3420_v33, 1  ;;  %v9988_v33 = vmul.f32 %v9403_v25, %v9794_v37 }
 0x745   : > { %4479 = vrot.lane.b32.xlu0 %v4460_v45, %s6007_s22  ;;  %3472 = vrot.lane.b32.xlu1 %v3449_v20, %s6006_s19  ;;  %v3425_v45 = vmul.f32 %v3411_v55, %v9747_v10  ;;  %v3430_v20 = vmul.f32 %v3411_v55, %v9943_v31 }
 0x747   : > { %v9939_v61 = vpop.permute.xlu1 %2908  ;;  %v3457_v42 = vrot.slane %v3425_v45, 1  ;;  %v3468_v2 = vrot.slane %v3430_v20, 1  ;;  %v9981_v45 = vld [vmem:[#allocation2 + $0xc0] sm:$0x1] }
 0x748   : > { %11619 = vst [vmem:[#allocation34_spill] sm:$0xff] %v9939_v61 }
 0x749   : > { %4605 = vrot.lane.b32.xlu0 %v4586_v49, %s6006_s19  ;;  %3476 = vrot.lane.b32.xlu1 %v3455_v26, %s6006_s19  ;;  %v3452_v49 = vsel %vm3345_vm3, %v3450_v41, %v3451_v3  ;;  %v9969_v26 = vmul.f32 %v9957_v53, %v9694_v48  ;;  %v3553_v41 = vmul.f32 %v9957_v53, %v9963_v16 }
 0x74a   : > { %v3458_v51 = vsel %vm3345_vm3, %v3456_v9, %v3457_v42  ;;  %v3469_v36 = vsel %vm3345_vm3, %v3457_v42, %v3468_v2  ;;  %v3555_v9 = vmul.f32 %v9403_v25, %v9887_v44  ;;  %v3543_v2 = vsel %vm2600_vm0, %v9553_v28, %v9401_v62 }
 0x74b   : > { %v9959_v30 = vpop.permute.xlu1 %2999  ;;  %v3587_v20 = vrot.slane %v3553_v41, 1  ;;  %v3557_v62 = vmul.f32 %v3543_v2, %v9670_v52  ;;  %v3545_v28 = vsel %vm2600_vm0, %v9562_v27, %v9403_v25  ;;  %v10033_v27 = vsel %vm2747_vm14, %v9405_v63, %v9582_v18  ;;  %v10068_v52 = vld [vmem:[%s11257_s6 + $0x3] ss:$8 sm:$0xf] }
 0x74c   : > { %11620 = vst [vmem:[#allocation35_spill] sm:$0xff] %v9959_v30  ;;  %v9971_v55 = vpop.permute.xlu0 %2902  ;;  %11633 = vst [vmem:[#allocation44_spill] sm:$0xff] %v10068_v52 }
 0x74d   : > { %3474 = vrot.lane.b32.xlu0 %v3452_v49, %s6006_s19  ;;  %3484 = vrot.lane.b32.xlu1 %v3465_v60, %s6006_s19  ;;  %v3429_v60 = vmul.f32 %v9903_v7, %v9981_v45  ;;  %v11627_v7 = vrot.slane %v9969_v26, 1  ;;  %v3585_v61 = vrot.slane %v3557_v62, 1 }
 0x74f   : > { %v9979_v3 = vpop.permute.xlu1 %3106  ;;  %v3589_v41 = vsel %vm3345_vm3, %v3587_v20, %v11627_v7  ;;  %v3593_v20 = vrot.slane %v3555_v9, 1 }
 0x750   : > { %11622 = vst [vmem:[#allocation37_spill] sm:$0xff] %v9979_v3  ;;  %v9999_v42 = vpop.permute.xlu0 %2906 }
 0x751   : > { %3478 = vrot.lane.b32.xlu0 %v3458_v51, %s6006_s19  ;;  %3488 = vrot.lane.b32.xlu1 %v3469_v36, %s6006_s19  ;;  %11623 = vst [vmem:[#allocation38_spill] sm:$0xff] %v9999_v42  ;;  %v10005_v51 = vld [vmem:[#allocation2 + $0x98] sm:$0x1]  ;;  %v11626_v36 = vrot.slane %v9893_v5, 1 }
 0x752   : > { %11625 = vst [vmem:[#allocation40_spill] sm:$0xff] %v10005_v51  ;;  %v2807_v5 = vld [vmem:[%s11257_s6] ss:$8 sm:$0xf]  ;;  %v3562_v7 = vmul.f32 %v3543_v2, %v10005_v51 }
 0x753   : > { %v10001_v49 = vpop.permute.xlu1 %3197  ;;  %v3463_v39 = vsel %vm3345_vm3, %v11626_v36, %v3462_v57  ;;  %v3466_v57 = vrot.slane %v3429_v60, 1  ;;  %v3552_v36 = vmul.f32 %v3543_v2, %v10003_v34  ;;  %v10048_v60 = vsel %vm2871_vm1, %v9409_v23, %v9590_v15 }
 0x754   : > { %11624 = vst [vmem:[#allocation39_spill] sm:$0xff] %v10001_v49  ;;  %v10021_v49 = vsel %vm2747_vm14, %v9573_v13, %v9405_v63  ;;  %v10054_v63 = vld [vmem:[#allocation2 + $0x18] sm:$0xfe]  ;;  %v10081_v62 = vrot.slane %v2807_v5, %v7868_v46  ;;  %v10091_v30 = vrot.slane %v2807_v5, %v7878_v8 }
 0x755   : > { %3482 = vrot.lane.b32.xlu0 %v3463_v39, %s6006_s19  ;;  %3610 = vrot.lane.b32.xlu1 %v3589_v41, %s6008_s25  ;;  %v10038_v39 = vsel %vm2747_vm14, %v9582_v18, %v9407_v0  ;;  %v10043_v41 = vsel %vm2871_vm1, %v9587_v14, %v9409_v23  ;;  %11629 = vst [vmem:[#allocation42_spill] sm:$0xff] %v10054_v63  ;;  %v11631_v0 = vrot.slane %v9912_v24, 1  ;;  %v11632_v14 = vrot.slane %v9988_v33, 1 }
 0x756   : > { %v3559_v23 = vmul.f32 %v3545_v28, %v9716_v6  ;;  %v10076_v24 = vrot.slane %v2807_v5, %v7859_v11  ;;  %11634 = vst [vmem:[#allocation46_spill] sm:$0xff] %v10081_v62  ;;  %v10088_v6 = vld [vmem:[#allocation2 + $0xa0] sm:$0x1]  ;;  %11635 = vst [vmem:[#allocation47_spill] sm:$0xff] %v10091_v30 }
 0x757   : > { %v10050_v9 = vpop.permute.xlu1 %2900  ;;  %v10052_v2 = vpop.permute.xlu0 %2918  ;;  %v3467_v18 = vsel %vm3345_vm3, %v11631_v0, %v3466_v57  ;;  %v3595_v3 = vsel %vm3345_vm3, %v3593_v20, %v11632_v14  ;;  %v4843_v57 = vld [vmem:[%s11258_s7 + $0x2] ss:$8 sm:$0xf]  ;;  %v3584_v20 = vrot.slane %v3552_v36, 1  ;;  %v3598_v0 = vrot.slane %v3562_v7, 1 }
 0x758   : > { %11628 = vst [vmem:[#allocation41_spill] sm:$0xff] %v10052_v2  ;;  %v10073_v2 = vsel %vm2871_vm1, %v9590_v15, %v9411_v29  ;;  %v3554_v14 = vmul.f32 %v3545_v28, %v10054_v63  ;;  %v3564_v15 = vmul.f32 %v3545_v28, %v10056_v21  ;;  %v10101_v1 = vrot.slane %v4843_v57, %v7859_v11 }
 0x759   : > { %3486 = vrot.lane.b32.xlu0 %v3467_v18, %s6006_s19  ;;  %3614 = vrot.lane.b32.xlu1 %v3595_v3, %s6008_s25  ;;  %v10094_v3 = vrot.slane %v2807_v5, %v7862_v59  ;;  %v10105_v36 = vrot.slane %v10068_v52, %v7859_v11  ;;  %v3586_v28 = vsel %vm3345_vm3, %v3584_v20, %v3585_v61  ;;  %v3591_v21 = vrot.slane %v3559_v23, 1 }
 0x75a   : > { %v3599_v7 = vsel %vm3345_vm3, %v3585_v61, %v3598_v0  ;;  %v10111_v5 = vmul.f32 %v9573_v13, %v9794_v37  ;;  %v10121_v11 = vrot.slane %v4843_v57, %v7878_v8  ;;  %v3590_v20 = vrot.slane %v3554_v14, 1 }
 0x75b   : > { %11636 = vst [vmem:[#allocation48_spill] sm:$0xff] %v10094_v3  ;;  %v10096_v18 = vpop.permute.xlu1 %2904  ;;  %v10098_v42 = vpop.permute.xlu0 %3001  ;;  %11639 = vst [vmem:[#allocation52_spill] sm:$0xff] %v10105_v36  ;;  %v3602_v61 = vrot.slane %v3564_v15, 1  ;;  %v3685_v23 = vmul.f32 %v9573_v13, %v9887_v44  ;;  %v10126_v0 = vrot.slane %v4843_v57, %v7862_v59  ;;  %v10142_v14 = vrot.slane %v10068_v52, %v7868_v46 }
 0x75c   : > { %11637 = vst [vmem:[#allocation49_spill] sm:$0xff] %v10096_v18  ;;  %11638 = vst [vmem:[#allocation51_spill] sm:$0xff] %v10098_v42  ;;  %v3563_v42 = vmul.f32 %v9957_v53, %v10088_v6  ;;  %v10118_v18 = vrot.slane %v4843_v57, %v7868_v46  ;;  %v10134_v53 = vmul.f32 %v10081_v62, %v9679_v40 }
 0x75d   : > { %3608 = vrot.lane.b32.xlu0 %v3586_v28, %s6008_s25  ;;  %3618 = vrot.lane.b32.xlu1 %v3599_v7, %s6008_s25  ;;  %11640 = vst [vmem:[#allocation53_spill] sm:$0xff] %v10126_v0  ;;  %v10130_v28 = vmul.f32 %v10076_v24, %v9626_v50  ;;  %11641 = vst [vmem:[#allocation54_spill] sm:$0xff] %v10142_v14  ;;  %v10146_v57 = vmul.f32 %v10105_v36, %v9829_v12 }
 0x75e   : > { %v3592_v15 = vsel %vm3345_vm3, %v3590_v20, %v3591_v21  ;;  %v3603_v50 = vsel %vm3345_vm3, %v3591_v21, %v3602_v61  ;;  %v10153_v40 = vmul.f32 %v10033_v27, %v9744_v17  ;;  %v10157_v62 = vmul.f32 %v10094_v3, %v9701_v32 }
 0x75f   : > { %v10136_v7 = vpop.permute.xlu1 %3003  ;;  %v10138_v8 = vpop.permute.xlu0 %3005  ;;  %v3600_v12 = vrot.slane %v3563_v42, 1  ;;  %v10163_v20 = vmul.f32 %v10048_v60, %v9963_v16  ;;  %v10167_v21 = vmul.f32 %v10043_v41, %v10003_v34  ;;  %v3715_v61 = vrot.slane %v3685_v23, 1 }
 0x760   : > { %v3565_v59 = vmul.f32 %v9403_v25, %v9961_v54  ;;  %v3687_v32 = vmul.f32 %v10033_v27, %v9905_v43  ;;  %v10177_v42 = vmul.f32 %v10091_v30, %v9703_v22  ;;  %v3686_v23 = vmul.f32 %v10021_v49, %v9922_v47 }
 0x761   : > { %3612 = vrot.lane.b32.xlu0 %v3592_v15, %s6008_s25  ;;  %3622 = vrot.lane.b32.xlu1 %v3603_v50, %s6008_s25  ;;  %v3691_v15 = vmul.f32 %v10021_v49, %v9729_v4  ;;  %v3693_v25 = vmul.f32 %v10038_v39, %v9747_v10  ;;  %v10189_v43 = vmul.f32 %v10073_v2, %v10054_v63  ;;  %v11642_v16 = vrot.slane %v9969_v26, 1 }
 0x762   : > { %v11643_v22 = vrot.slane %v10111_v5, 1  ;;  %v3696_v47 = vmul.f32 %v10021_v49, %v9924_v35  ;;  %v3688_v63 = vmul.f32 %v10038_v39, %v9941_v58  ;;  %v3855_v26 = vrot.slane %v10163_v20, 1 }
 0x763   : > { %v10179_v50 = vpop.permute.xlu1 %3007  ;;  %v10181_v46 = vpop.permute.xlu0 %3009  ;;  %v3601_v52 = vsel %vm3345_vm3, %v11642_v16, %v3600_v12  ;;  %v10207_v16 = vmul.f32 %v10043_v41, %v10005_v51  ;;  %v10211_v12 = vmul.f32 %v10142_v14, %v10003_v34  ;;  %v3719_v35 = vrot.slane %v3691_v15, 1  ;;  %v11644_v51 = vld [vmem:[#allocation29_spill] sm:$0xff] }
 0x764   : > { %v3717_v3 = vsel %vm3345_vm3, %v3715_v61, %v11643_v22  ;;  %v3604_v61 = vrot.slane %v3565_v59, 1  ;;  %v3721_v22 = vrot.slane %v3687_v32, 1  ;;  %v3725_v30 = vrot.slane %v3693_v25, 1 }
 0x765   : > { %3620 = vrot.lane.b32.xlu0 %v3601_v52, %s6008_s25  ;;  %3740 = vrot.lane.b32.xlu1 %v3717_v3, %s6007_s22  ;;  %v3698_v52 = vmul.f32 %v10038_v39, %v9943_v31  ;;  %v3695_v58 = vmul.f32 %v9573_v13, %v9961_v54  ;;  %v10219_v20 = vmul.f32 %v10048_v60, %v9694_v48  ;;  %v11645_v59 = vrot.slane %v9988_v33, 1 }
 0x766   : > { %v10223_v34 = vmul.f32 %v10121_v11, %v11644_v51  ;;  %v11646_v31 = vrot.slane %v10153_v40, 1  ;;  %v3718_v15 = vrot.slane %v3686_v23, 1  ;;  %v3732_v25 = vrot.slane %v3696_v47, 1 }
 0x767   : > { %v3099_v49 = vpop.permute.xlu1 %3098  ;;  %v3101_v3 = vpop.permute.xlu0 %3100  ;;  %v3605_v32 = vsel %vm3345_vm3, %v11645_v59, %v3604_v61  ;;  %v3724_v13 = vrot.slane %v3688_v63, 1  ;;  %v10235_v10 = vmul.f32 %v10101_v1, %v9640_v56  ;;  %v3697_v33 = vmul.f32 %v10033_v27, %v9981_v45 }
 0x768   : > { %v3723_v39 = vsel %vm3345_vm3, %v3721_v22, %v11646_v31  ;;  %v10241_v51 = vmul.f32 %v9411_v29, %v9887_v44  ;;  %v3720_v61 = vsel %vm3345_vm3, %v3718_v15, %v3719_v35  ;;  %v3733_v23 = vsel %vm3345_vm3, %v3719_v35, %v3732_v25  ;;  %v11647_v35 = vld [vmem:[#allocation49_spill] sm:$0xff]  ;;  %v11649_v15 = vld [vmem:[#allocation32_spill] sm:$0xff] }
 0x769   : > { %3624 = vrot.lane.b32.xlu0 %v3605_v32, %s6008_s25  ;;  %3744 = vrot.lane.b32.xlu1 %v3723_v39, %s6007_s22  ;;  %v3736_v47 = vrot.slane %v3698_v52, 1  ;;  %v10247_v22 = vmul.f32 %v10118_v18, %v9677_v38  ;;  %v3726_v56 = vsel %vm3345_vm3, %v3724_v13, %v3725_v30  ;;  %v3730_v32 = vrot.slane %v3695_v58, 1  ;;  %v11651_v13 = vld [vmem:[#allocation51_spill] sm:$0xff] }
 0x76a   : > { %v10253_v44 = vmul.f32 %v10126_v0, %v9651_v19  ;;  %v2920_v27 = vsel %vm2871_vm1, %v10050_v9, %v9971_v55  ;;  %v2921_v38 = vsel %vm2871_vm1, %v9971_v55, %v11647_v35  ;;  %v10264_v31 = vmul.f32 %v9411_v29, %v9794_v37 }
 0x76b   : > { %v3103_v63 = vpop.permute.xlu1 %3102  ;;  %v3105_v59 = vpop.permute.xlu0 %3104  ;;  %v3737_v52 = vsel %vm3345_vm3, %v3725_v30, %v3736_v47  ;;  %v11648_v19 = vrot.slane %v10111_v5, 1  ;;  %v3734_v39 = vrot.slane %v3697_v33, 1  ;;  %v3861_v9 = vrot.slane %v10241_v51, 1  ;;  %v11650_v30 = vld [vmem:[#allocation38_spill] sm:$0xff]  ;;  %v11652_v47 = vld [vmem:[#allocation35_spill] sm:$0xff] }
 0x76c   : > { %v10274_v55 = vmul.f32 %v10105_v36, %v11649_v15  ;;  %v2922_v25 = vsel %vm2871_vm1, %v11647_v35, %v11650_v30  ;;  %v3020_v5 = vsel %vm2747_vm14, %v11651_v13, %v10136_v7  ;;  %v2936_v51 = vadd.f32 %v2920_v27, %v10130_v28 }
 0x76d   : > { %3742 = vrot.lane.b32.xlu0 %v3720_v61, %s6007_s22  ;;  %3752 = vrot.lane.b32.xlu1 %v3733_v23, %s6007_s22  ;;  %v3731_v58 = vsel %vm3345_vm3, %v11648_v19, %v3730_v32  ;;  %v3019_v61 = vsel %vm2747_vm14, %v11652_v47, %v11651_v13  ;;  %v11653_v23 = vld [vmem:[#allocation30_spill] sm:$0xff]  ;;  %v2937_v32 = vadd.f32 %v2921_v38, %v10134_v53  ;;  %v11654_v35 = vrot.slane %v10219_v20, 1 }
 0x76e   : > { %v10287_v33 = vmul.f32 %v10142_v14, %v11653_v23  ;;  %v10298_v47 = vmul.f32 %v10043_v41, %v11653_v23  ;;  %v11655_v13 = vld [vmem:[#allocation34_spill] sm:$0xff]  ;;  %v3021_v28 = vsel %vm2747_vm14, %v10136_v7, %v10138_v8  ;;  %v3118_v53 = vsel %vm2600_vm0, %v3099_v49, %v3101_v3 }
 0x76f   : > { %v3202_v19 = vpop.permute.xlu1 %3201  ;;  %v10291_v45 = vpop.permute.xlu0 %3116  ;;  %v3857_v0 = vsel %vm3345_vm3, %v3855_v26, %v11654_v35  ;;  %v2923_v14 = vsel %vm2871_vm1, %v11650_v30, %v11655_v13  ;;  %v3119_v27 = vsel %vm2600_vm0, %v3101_v3, %v3103_v63  ;;  %v2938_v38 = vadd.f32 %v2922_v25, %v10157_v62  ;;  %v11657_v35 = vld [vmem:[#allocation37_spill] sm:$0xff] }
 0x770   : > { %v3035_v36 = vadd.f32 %v3019_v61, %v2936_v51  ;;  %v3036_v26 = vadd.f32 %v3020_v5, %v2937_v32  ;;  %v3862_v41 = vrot.slane %v10264_v31, 1  ;;  %v3022_v30 = vsel %vm2747_vm14, %v10138_v8, %v10179_v50  ;;  %v11658_v50 = vld [vmem:[#allocation39_spill] sm:$0xff]  ;;  %v11676_v31 = vld [vmem:[#allocation41_spill] sm:$0xff] }
 0x771   : > { %3746 = vrot.lane.b32.xlu0 %v3726_v56, %s6007_s22  ;;  %3756 = vrot.lane.b32.xlu1 %v3737_v52, %s6007_s22  ;;  %v11656_v7 = vrot.slane %v10153_v40, 1  ;;  %v11404_v3 = vrot.slane %v10274_v55, 1  ;;  %v2939_v25 = vadd.f32 %v2923_v14, %v10177_v42  ;;  %v3037_v61 = vadd.f32 %v3021_v28, %v2938_v38 }
 0x772   : > { %v3134_v56 = vadd.f32 %v3118_v53, %v3035_v36  ;;  %v3135_v5 = vadd.f32 %v3119_v27, %v3036_v26  ;;  %v3120_v32 = vsel %vm2600_vm0, %v3103_v63, %v3105_v59  ;;  %v3121_v8 = vsel %vm2600_vm0, %v3105_v59, %v11657_v35  ;;  %v11659_v63 = vld [vmem:[#allocation31_spill] sm:$0xff] }
 0x773   : > { %v3735_v49 = vsel %vm3345_vm3, %v11656_v7, %v3734_v39  ;;  %v3206_v52 = vpop.permute.xlu1 %3205  ;;  %v3200_v51 = vpop.permute.xlu0 %3199  ;;  %v3038_v13 = vadd.f32 %v3022_v30, %v2939_v25  ;;  %v3346_v36 = vrot.slane %v10146_v57, 1  ;;  %v3863_v14 = vsel %vm3345_vm3, %v3861_v9, %v3862_v41 }
 0x774   : > { %v3217_v40 = vsel %vm2871_vm1, %v11658_v50, %v3200_v51  ;;  %v3218_v39 = vsel %vm2871_vm1, %v3200_v51, %v3202_v19  ;;  %v3853_v42 = vrot.slane %v10298_v47, 1  ;;  %v3827_v59 = vmul.f32 %v10073_v2, %v11659_v63 }
 0x775   : > { %v3233_v7 = vadd.f32 %v3217_v40, %v3134_v56  ;;  %v3234_v62 = vadd.f32 %v3218_v39, %v3135_v5  ;;  %3750 = vrot.lane.b32.xlu0 %v3731_v58, %s6007_s22  ;;  %3878 = vrot.lane.b32.xlu1 %v3857_v0, %s6006_s19  ;;  %v3349_v28 = vrot.slane %v10211_v12, 1  ;;  %v3136_v53 = vadd.f32 %v3120_v32, %v3037_v61 }
 0x776   : > { %v3137_v27 = vadd.f32 %v3121_v8, %v3038_v13  ;;  %v3348_v9 = vsel %vm3345_vm3, %v3346_v36, %v11404_v3  ;;  %v11660_v47 = vrot.slane %v10287_v33, 1  ;;  %v3859_v35 = vrot.slane %v3827_v59, 1  ;;  %v10367_v8 = vld [vmem:[#allocation2 + $0x20] sm:$0xfc]  ;;  %v11687_v3 = vld [vmem:[#allocation21_spill] sm:$0xff] }
 0x777   : > { %v3272_v38 = vadd.f32 %v10235_v10, %v3233_v7  ;;  %v3273_v58 = vadd.f32 %v10247_v22, %v3234_v62  ;;  %v2913_v0 = vpop.permute.xlu1 %2912  ;;  %v3204_v26 = vpop.permute.xlu0 %3203  ;;  %v3852_v22 = vrot.slane %v10167_v21, 1  ;;  %v11661_v62 = vld [vmem:[#allocation43_spill] sm:$0xff]  ;;  %v11663_v13 = vld [vmem:[#allocation24_spill] sm:$0xff] }
 0x778   : > { %v3219_v57 = vsel %vm2871_vm1, %v3202_v19, %v3204_v26  ;;  %v3220_v30 = vsel %vm2871_vm1, %v3204_v26, %v3206_v52  ;;  %v3351_v12 = vsel %vm3345_vm3, %v3349_v28, %v11660_v47  ;;  %v3866_v19 = vrot.slane %v10207_v16, 1  ;;  %v11664_v7 = vld [vmem:[#allocation16_spill] sm:$0xff] }
 0x779   : > { %v3235_v25 = vadd.f32 %v3219_v57, %v3136_v53  ;;  %v3236_v61 = vadd.f32 %v3220_v30, %v3137_v27  ;;  %3754 = vrot.lane.b32.xlu0 %v3735_v49, %s6007_s22  ;;  %3882 = vrot.lane.b32.xlu1 %v3863_v14, %s6006_s19  ;;  %v10349_v10 = vadd.f32 %v3348_v9, %v3272_v38 }
 0x77a   : > { %v3832_v56 = vmul.f32 %v10073_v2, %v11661_v62  ;;  %v10355_v5 = vadd.f32 %v3351_v12, %v3273_v58  ;;  %v3854_v21 = vsel %vm3345_vm3, %v3852_v22, %v3853_v42  ;;  %v3867_v16 = vsel %vm3345_vm3, %v3853_v42, %v3866_v19  ;;  %v11662_v2 = vld [vmem:[#allocation23_spill] sm:$0xff]  ;;  %v10416_v22 = vld [vmem:[#allocation2 + $0x28] sm:$0xfc] }
 0x77b   : > { %v10358_v52 = vadd.f32 %v10253_v44, %v3235_v25  ;;  %v10361_v51 = vadd.f32 %v10223_v34, %v3236_v61  ;;  %v10363_v49 = vpop.permute.xlu1 %2916  ;;  %v10365_v32 = vpop.permute.xlu0 %3207  ;;  %v10373_v50 = vmul.f32 %v11662_v2, %v9794_v37  ;;  %v3858_v34 = vrot.slane %v10189_v43, 1  ;;  %11668 = vst [vmem:[#allocation56_spill] sm:$0xff] %v10416_v22 }
 0x77c   : > { %v3831_v44 = vmul.f32 %v10048_v60, %v10088_v6  ;;  %v3870_v40 = vrot.slane %v3832_v56, 1  ;;  %v4138_v39 = vmul.f32 %v11662_v2, %v10367_v8  ;;  %v10385_v36 = vsel %vm2871_vm1, %v11664_v7, %v11663_v13  ;;  %v10392_v60 = vld [vmem:[#allocation2 + $0x30] sm:$0xfc]  ;;  %v10419_v56 = vld [vmem:[#allocation2 + $0xb8] sm:$0x3] }
 0x77d   : > { %3876 = vrot.lane.b32.xlu0 %v3854_v21, %s6006_s19  ;;  %3886 = vrot.lane.b32.xlu1 %v3867_v16, %s6006_s19  ;;  %v2833_v42 = vmul.f32 %v10076_v24, %v11649_v15  ;;  %v3860_v28 = vsel %vm3345_vm3, %v3858_v34, %v3859_v35  ;;  %v3833_v43 = vmul.f32 %v9411_v29, %v9961_v54  ;;  %v4169_v38 = vrot.slane %v10373_v50, 2  ;;  %v11666_v54 = vld [vmem:[#allocation17_spill] sm:$0xff]  ;;  %v11670_v34 = vld [vmem:[#allocation47_spill] sm:$0xff] }
 0x77e   : > { %11665 = vst [vmem:[#allocation55_spill] sm:$0xff] %v10392_v60  ;;  %v3871_v27 = vsel %vm3345_vm3, %v3859_v35, %v3870_v40  ;;  %v10399_v58 = vmul.f32 %v10385_v36, %v9744_v17  ;;  %v4130_v24 = vsel %vm2871_vm1, %v11662_v2, %v11664_v7  ;;  %v3868_v29 = vrot.slane %v3831_v44, 1  ;;  %11669 = vst [vmem:[#allocation57_spill] sm:$0xff] %v10419_v56 }
 0x77f   : > { %v3012_v14 = vpop.permute.xlu1 %3011  ;;  %v2911_v59 = vpop.permute.xlu0 %2910  ;;  %v4132_v26 = vsel %vm2871_vm1, %v11663_v13, %v11666_v54  ;;  %v4168_v30 = vrot.slane %v4138_v39, 2  ;;  %v4140_v17 = vmul.f32 %v10385_v36, %v10392_v60  ;;  %v11667_v12 = vrot.slane %v10219_v20, 1  ;;  %v11672_v39 = vld [vmem:[#allocation48_spill] sm:$0xff] }
 0x780   : > { %v2924_v53 = vsel %vm2871_vm1, %v2911_v59, %v2913_v0  ;;  %v3023_v57 = vsel %vm2747_vm14, %v10181_v46, %v3012_v14  ;;  %v3872_v61 = vrot.slane %v3833_v43, 1  ;;  %v4144_v19 = vmul.f32 %v4130_v24, %v9729_v4  ;;  %v11671_v4 = vld [vmem:[#allocation46_spill] sm:$0xff] }
 0x781   : > { %v2940_v15 = vadd.f32 %v2924_v53, %v2833_v42  ;;  %3880 = vrot.lane.b32.xlu0 %v3860_v28, %s6006_s19  ;;  %3890 = vrot.lane.b32.xlu1 %v3871_v27, %s6006_s19  ;;  %v3869_v25 = vsel %vm3345_vm3, %v11667_v12, %v3868_v29  ;;  %v4170_v20 = vsel %vm4066_vm4, %v4168_v30, %v4169_v38  ;;  %v4175_v16 = vrot.slane %v10399_v58, 2  ;;  %v11674_v27 = vld [vmem:[#allocation33_spill] sm:$0xff] }
 0x782   : > { %v2836_v44 = vmul.f32 %v11670_v34, %v11659_v63  ;;  %v2834_v40 = vmul.f32 %v11671_v4, %v11653_v23  ;;  %v2835_v13 = vmul.f32 %v11672_v39, %v9694_v48  ;;  %v4174_v7 = vrot.slane %v4140_v17, 2  ;;  %v10443_v63 = vld [vmem:[#allocation2 + $0x38] sm:$0xfc]  ;;  %v10448_v29 = vld [vmem:[#allocation2 + $0xc8] sm:$0x3] }
 0x783   : > { %v3016_v9 = vpop.permute.xlu1 %3015  ;;  %v2915_v47 = vpop.permute.xlu0 %2914  ;;  %v10421_v35 = vadd.f32 %v3023_v57, %v2940_v15  ;;  %v4139_v42 = vmul.f32 %v4130_v24, %v10416_v22  ;;  %v4149_v59 = vmul.f32 %v4130_v24, %v10419_v56  ;;  %11673 = vst [vmem:[#allocation58_spill] sm:$0xff] %v10443_v63  ;;  %v4172_v53 = vrot.slane %v4144_v19, 2  ;;  %11675 = vst [vmem:[#allocation59_spill] sm:$0xff] %v10448_v29  ;;  %v11677_v12 = vld [vmem:[#allocation45_spill] sm:$0xff]  ;;  %v10471_v39 = vld [vmem:[#allocation2 + $0x58] sm:$0xff] }
 0x784   : > { %v2925_v46 = vsel %vm2871_vm1, %v2913_v0, %v2915_v47  ;;  %v2926_v21 = vsel %vm2871_vm1, %v2915_v47, %v10363_v49  ;;  %v3873_v0 = vsel %vm3345_vm3, %v3862_v41, %v3872_v61  ;;  %v4146_v15 = vmul.f32 %v4132_v26, %v11674_v27 }
 0x785   : > { %3888 = vrot.lane.b32.xlu0 %v3869_v25, %s6006_s19  ;;  %4193 = vrot.lane.b32.xlu1 %v4170_v20, %s6006_s19  ;;  %v2941_v28 = vadd.f32 %v2925_v46, %v2834_v40  ;;  %v2942_v23 = vadd.f32 %v2926_v21, %v2835_v13  ;;  %v2927_v41 = vsel %vm2871_vm1, %v10363_v49, %v11676_v31  ;;  %v11678_v25 = vld [vmem:[#allocation18_spill] sm:$0xff]  ;;  %v4185_v61 = vrot.slane %v4149_v59, 2 }
 0x786   : > { %v4176_v57 = vsel %vm4066_vm4, %v4174_v7, %v4175_v16  ;;  %v4141_v47 = vmul.f32 %v4132_v26, %v10443_v63  ;;  %v10464_v49 = vsel %vm2600_vm0, %v11678_v25, %v11677_v12  ;;  %v4151_v19 = vmul.f32 %v4132_v26, %v10448_v29  ;;  %v10467_v46 = vld [vmem:[#allocation2 + $0xb0] sm:$0x3]  ;;  %v10469_v21 = vld [vmem:[#allocation2 + $0x10] sm:$0xfc] }
 0x787   : > { %v10445_v43 = vpop.permute.xlu1 %3110  ;;  %v3014_v48 = vpop.permute.xlu0 %3013  ;;  %11679 = vst [vmem:[#allocation60_spill] sm:$0xff] %v10469_v21  ;;  %v2943_v20 = vadd.f32 %v2927_v41, %v2836_v44  ;;  %v4178_v40 = vrot.slane %v4146_v15, 2  ;;  %v10475_v13 = vmul.f32 %v10471_v39, %v10464_v49  ;;  %v4186_v26 = vsel %vm4066_vm4, %v4172_v53, %v4185_v61 }
 0x788   : > { %v3024_v54 = vsel %vm2747_vm14, %v3012_v14, %v3014_v48  ;;  %v3025_v24 = vsel %vm2747_vm14, %v3014_v48, %v3016_v9  ;;  %v4171_v14 = vrot.slane %v4139_v42, 2  ;;  %v4177_v44 = vrot.slane %v4141_v47, 2  ;;  %v10488_v48 = vld [vmem:[#allocation2 + $0xc0] sm:$0x3] }
 0x789   : > { %v3040_v30 = vadd.f32 %v3024_v54, %v2941_v28  ;;  %v3041_v17 = vadd.f32 %v3025_v24, %v2942_v23  ;;  %3892 = vrot.lane.b32.xlu0 %v3873_v0, %s6006_s19  ;;  %4197 = vrot.lane.b32.xlu1 %v4176_v57, %s6006_s19  ;;  %v4148_v59 = vmul.f32 %v11662_v2, %v10467_v46  ;;  %v4309_v31 = vrot.slane %v10475_v13, 2 }
 0x78a   : > { %v4173_v7 = vsel %vm4066_vm4, %v4171_v14, %v4172_v53  ;;  %v4274_v28 = vmul.f32 %v10464_v49, %v10469_v21  ;;  %11680 = vst [vmem:[#allocation61_spill] sm:$0xff] %v10488_v48  ;;  %v4179_v15 = vsel %vm4066_vm4, %v4177_v44, %v4178_v40 }
 0x78b   : > { %v3115_v34 = vpop.permute.xlu1 %3114  ;;  %v3018_v4 = vpop.permute.xlu0 %3017  ;;  %v4183_v14 = vrot.slane %v4148_v59, 2  ;;  %v10527_v59 = vld [vmem:[#allocation2 + $0x50] sm:$0xff] }
 0x78c   : > { %v3026_v0 = vsel %vm2747_vm14, %v3016_v9, %v3018_v4  ;;  %v3125_v23 = vsel %vm2600_vm0, %v3115_v34, %v10291_v45  ;;  %v4189_v9 = vrot.slane %v4151_v19, 2  ;;  %v11681_v45 = vld [vmem:[#allocation19_spill] sm:$0xff]  ;;  %v4308_v61 = vrot.slane %v4274_v28, 2 }
 0x78d   : > { %v3042_v42 = vadd.f32 %v3026_v0, %v2943_v20  ;;  %4195 = vrot.lane.b32.xlu0 %v4173_v7, %s6006_s19  ;;  %4205 = vrot.lane.b32.xlu1 %v4186_v26, %s6006_s19  ;;  %v10499_v57 = vmul.f32 %v11681_v45, %v9794_v37  ;;  %v4276_v19 = vmul.f32 %v11681_v45, %v10367_v8  ;;  %v11682_v20 = vld [vmem:[#allocation3_spill] sm:$0xff] }
 0x78e   : > { %v4190_v24 = vsel %vm4066_vm4, %v4178_v40, %v4189_v9  ;;  %v4264_v4 = vsel %vm2600_vm0, %v11682_v20, %v11678_v25  ;;  %v4184_v0 = vsel %vm4066_vm4, %v4169_v38, %v4183_v14  ;;  %v4310_v7 = vsel %vm4066_vm4, %v4308_v61, %v4309_v31  ;;  %v10521_v26 = vld [vmem:[#allocation2 + $0x98] sm:$0x3] }
 0x78f   : > { %v3210_v27 = vpop.permute.xlu1 %3209  ;;  %v3109_v53 = vpop.permute.xlu0 %3108  ;;  %v3141_v41 = vadd.f32 %v3125_v23, %v3042_v42  ;;  %11683 = vst [vmem:[#allocation62_spill] sm:$0xff] %v10521_v26  ;;  %v4315_v44 = vrot.slane %v10499_v57, 2  ;;  %v4278_v50 = vmul.f32 %v10527_v59, %v4264_v4  ;;  %v4266_v9 = vsel %vm2600_vm0, %v11677_v12, %v11681_v45 }
 0x790   : > { %v3221_v54 = vsel %vm2871_vm1, %v10365_v32, %v3210_v27  ;;  %v3122_v2 = vsel %vm2600_vm0, %v3109_v53, %v10445_v43  ;;  %v4150_v32 = vmul.f32 %v10385_v36, %v10488_v48  ;;  %v10519_v36 = vld [vmem:[#allocation2 + $0x8] sm:$0xfc]  ;;  %v4283_v53 = vmul.f32 %v4264_v4, %v10521_v26 }
 0x791   : > { %v3138_v47 = vadd.f32 %v3122_v2, %v10421_v35  ;;  %4199 = vrot.lane.b32.xlu0 %v4179_v15, %s6006_s19  ;;  %4209 = vrot.lane.b32.xlu1 %v4190_v24, %s6006_s19  ;;  %v10544_v2 = vld [vmem:[#allocation2 + $0x60] sm:$0xff] }
 0x792   : > { %v4187_v23 = vrot.slane %v4150_v32, 2  ;;  %v4280_v24 = vmul.f32 %v10544_v2, %v4266_v9  ;;  %v4306_v32 = vrot.slane %v4278_v50, 2  ;;  %v4319_v20 = vrot.slane %v4283_v53, 2  ;;  %v10570_v50 = vld [vmem:[#allocation2 + $0xa0] sm:$0x3] }
 0x793   : > { %v10511_v37 = vadd.f32 %v3221_v54, %v3138_v47  ;;  %v3214_v40 = vpop.permute.xlu1 %3213  ;;  %v3113_v35 = vpop.permute.xlu0 %3112  ;;  %v10547_v47 = vld [vmem:[#allocation2 + $0x18] sm:$0xfc] }
 0x794   : > { %v3123_v42 = vsel %vm2600_vm0, %v10445_v43, %v3113_v35  ;;  %v3124_v25 = vsel %vm2600_vm0, %v3113_v35, %v3115_v34  ;;  %v4314_v43 = vrot.slane %v4276_v19, 2  ;;  %v4273_v34 = vmul.f32 %v4264_v4, %v10519_v36 }
 0x795   : > { %v3139_v38 = vadd.f32 %v3123_v42, %v3040_v30  ;;  %v3140_v28 = vadd.f32 %v3124_v25, %v3041_v17  ;;  %4203 = vrot.lane.b32.xlu0 %v4184_v0, %s6006_s19  ;;  %4331 = vrot.lane.b32.xlu1 %v4310_v7, %s6008_s25  ;;  %v4188_v30 = vsel %vm4066_vm4, %v4175_v16, %v4187_v23  ;;  %v10542_v17 = vld [vmem:[#allocation2 + $0xa8] sm:$0x3]  ;;  %v11684_v42 = vld [vmem:[#allocation50_spill] sm:$0xff] }
 0x796   : > { %v4316_v61 = vsel %vm4066_vm4, %v4314_v43, %v4315_v44  ;;  %v4305_v19 = vrot.slane %v4273_v34, 2  ;;  %v4285_v4 = vmul.f32 %v4266_v9, %v10542_v17  ;;  %v10564_v7 = vld [vmem:[#allocation2 + $0x68] sm:$0xff]  ;;  %v4320_v23 = vsel %vm4066_vm4, %v4306_v32, %v4319_v20  ;;  %v10595_v20 = vld [vmem:[#allocation2 + $0x78] sm:$0xff] }
 0x797   : > { %v10537_v15 = vpop.permute.xlu1 %3480  ;;  %v3212_v54 = vpop.permute.xlu0 %3211  ;;  %v10568_v25 = vmul.f32 %v10564_v7, %v11684_v42  ;;  %v4312_v43 = vrot.slane %v4280_v24, 2 }
 0x798   : > { %v3222_v12 = vsel %vm2871_vm1, %v3210_v27, %v3212_v54  ;;  %v3223_v14 = vsel %vm2871_vm1, %v3212_v54, %v3214_v40  ;;  %v4275_v27 = vmul.f32 %v4266_v9, %v10547_v47  ;;  %v4323_v9 = vrot.slane %v4285_v4, 2 }
 0x799   : > { %v10554_v58 = vadd.f32 %v3222_v12, %v3139_v38  ;;  %v10556_v16 = vadd.f32 %v3223_v14, %v3140_v28  ;;  %4207 = vrot.lane.b32.xlu0 %v4188_v30, %s6006_s19  ;;  %4335 = vrot.lane.b32.xlu1 %v4316_v61, %s6008_s25  ;;  %v4307_v28 = vsel %vm4066_vm4, %v4305_v19, %v4306_v32  ;;  %v11686_v12 = vld [vmem:[#allocation20_spill] sm:$0xff]  ;;  %v11405_v19 = vrot.slane %v10568_v25, 2 }
 0x79a   : > { %v4311_v53 = vrot.slane %v4275_v27, 2  ;;  %v4406_v54 = vmul.f32 %v11684_v42, %v10367_v8  ;;  %v4284_v30 = vmul.f32 %v10464_v49, %v10570_v50  ;;  %v4324_v61 = vsel %vm4066_vm4, %v4312_v43, %v4323_v9 }
 0x79b   : > { %v10562_v35 = vpop.permute.xlu1 %3606  ;;  %v3216_v0 = vpop.permute.xlu0 %3215 }
 0x79c   : > { %v3224_v38 = vsel %vm2871_vm1, %v3214_v40, %v3216_v0  ;;  %v11685_v40 = vld [vmem:[#allocation25_spill] sm:$0xff]  ;;  %v4313_v32 = vsel %vm4066_vm4, %v4311_v53, %v4312_v43  ;;  %v4436_v4 = vrot.slane %v4406_v54, 2  ;;  %v4321_v27 = vrot.slane %v4284_v30, 2  ;;  %v10621_v30 = vld [vmem:[#allocation2 + $0x70] sm:$0xff] }
 0x79d   : > { %v10575_v34 = vadd.f32 %v3224_v38, %v3141_v41  ;;  %4329 = vrot.lane.b32.xlu0 %v4307_v28, %s6008_s25  ;;  %4339 = vrot.lane.b32.xlu1 %v4320_v23, %s6008_s25  ;;  %v10586_v14 = vsel %vm2747_vm14, %v11686_v12, %v11685_v40  ;;  %v4286_v38 = vmul.f32 %v11681_v45, %v10467_v46 }
 0x79e   : > { %v10599_v49 = vmul.f32 %v10595_v20, %v10586_v14  ;;  %v4408_v0 = vmul.f32 %v10586_v14, %v10392_v60  ;;  %v4398_v28 = vsel %vm2747_vm14, %v11684_v42, %v11686_v12  ;;  %v4438_v9 = vsel %vm4066_vm4, %v4436_v4, %v11405_v19 }
 0x79f   : > { %v10588_v24 = vpop.permute.xlu1 %3748  ;;  %v10590_v41 = vpop.permute.xlu0 %3490  ;;  %v4322_v53 = vsel %vm4066_vm4, %v4309_v31, %v4321_v27  ;;  %v4412_v45 = vmul.f32 %v10621_v30, %v4398_v28  ;;  %v4407_v4 = vmul.f32 %v4398_v28, %v10416_v22  ;;  %v4400_v13 = vsel %vm2747_vm14, %v11685_v40, %v11687_v3 }
 0x7a0   : > { %v11406_v54 = vrot.slane %v10599_v49, 2  ;;  %v4442_v12 = vrot.slane %v4408_v0, 2  ;;  %v4419_v19 = vmul.f32 %v4400_v13, %v10448_v29  ;;  %v4416_v29 = vmul.f32 %v11684_v42, %v10467_v46 }
 0x7a1   : > { %4343 = vrot.lane.b32.xlu1 %v4324_v61, %s6008_s25  ;;  %4333 = vrot.lane.b32.xlu0 %v4313_v32, %s6008_s25  ;;  %v4325_v61 = vrot.slane %v4286_v38, 2  ;;  %v4417_v32 = vmul.f32 %v4398_v28, %v10419_v56  ;;  %v4440_v38 = vrot.slane %v4412_v45, 2  ;;  %v4439_v40 = vrot.slane %v4407_v4, 2 }
 0x7a2   : > { %v4457_v4 = vrot.slane %v4419_v19, 2  ;;  %v11706_v22 = vrot.slane %v10599_v49, 2 }
 0x7a3   : > { %v10610_v23 = vpop.permute.xlu1 %3874  ;;  %v10612_v43 = vpop.permute.xlu0 %3616  ;;  %v4326_v0 = vsel %vm4066_vm4, %v4315_v44, %v4325_v61  ;;  %v4453_v3 = vrot.slane %v4417_v32, 2 }
 0x7a5   : > { %4461 = vrot.lane.b32.xlu1 %v4438_v9, %s6007_s22  ;;  %4341 = vrot.lane.b32.xlu0 %v4322_v53, %s6008_s25  ;;  %v4444_v9 = vsel %vm4066_vm4, %v4442_v12, %v11406_v54  ;;  %v10641_v53 = vld [vmem:[#allocation2 + $0x80] sm:$0xff]  ;;  %v11690_v54 = vld [vmem:[#allocation22_spill] sm:$0xff]  ;;  %v4454_v61 = vsel %vm4066_vm4, %v4440_v38, %v4453_v3 }
 0x7a6   : > { %v4414_v28 = vmul.f32 %v10641_v53, %v4400_v13  ;;  %v11689_v12 = vld [vmem:[#allocation28_spill] sm:$0xff] }
 0x7a7   : > { %v10631_v31 = vpop.permute.xlu1 %4201  ;;  %v10633_v27 = vpop.permute.xlu0 %3758  ;;  %v10651_v57 = vsel %vm2871_vm1, %v11690_v54, %v11689_v12 }
 0x7a8   : > { %11688 = vst [vmem:[#allocation63_spill] sm:$0xff] %v10631_v31  ;;  %v4409_v31 = vmul.f32 %v4400_v13, %v10443_v63  ;;  %v10661_v32 = vmul.f32 %v10471_v39, %v10651_v57  ;;  %v11695_v63 = vld [vmem:[#allocation27_spill] sm:$0xff] }
 0x7a9   : > { %4465 = vrot.lane.b32.xlu1 %v4444_v9, %s6007_s22  ;;  %4345 = vrot.lane.b32.xlu0 %v4326_v0, %s6008_s25  ;;  %v4441_v9 = vsel %vm4066_vm4, %v4439_v40, %v4440_v38  ;;  %v4446_v0 = vrot.slane %v4414_v28, 2  ;;  %v10678_v19 = vmul.f32 %v10564_v7, %v11695_v63  ;;  %v4534_v7 = vsel %vm2871_vm1, %v11689_v12, %v11695_v63 }
 0x7aa   : > { %v4445_v13 = vrot.slane %v4409_v31, 2  ;;  %v11696_v31 = vld [vmem:[#allocation26_spill] sm:$0xff] }
 0x7ab   : > { %v10653_v44 = vpop.permute.xlu1 %4327  ;;  %v10655_v45 = vpop.permute.xlu0 %3884  ;;  %v4458_v28 = vsel %vm4066_vm4, %v4446_v0, %v4457_v4  ;;  %v4544_v4 = vmul.f32 %v11695_v63, %v10367_v8 }
 0x7ac   : > { %11691 = vst [vmem:[#allocation64_spill] sm:$0xff] %v10653_v44  ;;  %11692 = vst [vmem:[#allocation65_spill] sm:$0xff] %v10655_v45  ;;  %v4542_v44 = vmul.f32 %v10651_v57, %v10469_v21  ;;  %v4447_v40 = vsel %vm4066_vm4, %v4445_v13, %v4446_v0  ;;  %v4418_v0 = vmul.f32 %v10586_v14, %v10488_v48 }
 0x7ad   : > { %4473 = vrot.lane.b32.xlu1 %v4454_v61, %s6007_s22  ;;  %4463 = vrot.lane.b32.xlu0 %v4441_v9, %s6007_s22  ;;  %v4532_v9 = vsel %vm2871_vm1, %v11696_v31, %v11690_v54  ;;  %v11702_v31 = vld [vmem:[#allocation44_spill] sm:$0xff] }
 0x7ae   : > { %v4576_v42 = vrot.slane %v4542_v44, 2  ;;  %v4546_v54 = vmul.f32 %v10527_v59, %v4532_v9  ;;  %v11700_v44 = vrot.slane %v10568_v25, 2  ;;  %v4551_v12 = vmul.f32 %v4532_v9, %v10521_v26  ;;  %v11707_v26 = vld [vmem:[#allocation36_spill] sm:$0xff] }
 0x7af   : > { %v10669_v3 = vpop.permute.xlu1 %4469  ;;  %v10671_v38 = vpop.permute.xlu0 %4211  ;;  %v4455_v25 = vrot.slane %v4418_v0, 2 }
 0x7b0   : > { %11693 = vst [vmem:[#allocation66_spill] sm:$0xff] %v10669_v3  ;;  %11694 = vst [vmem:[#allocation67_spill] sm:$0xff] %v10671_v38  ;;  %v4451_v3 = vrot.slane %v4416_v29, 2  ;;  %v4574_v45 = vrot.slane %v4546_v54, 2  ;;  %v4587_v0 = vrot.slane %v4551_v12, 2 }
 0x7b1   : > { %4477 = vrot.lane.b32.xlu1 %v4458_v28, %s6007_s22  ;;  %4467 = vrot.lane.b32.xlu0 %v4447_v40, %s6007_s22  ;;  %v11699_v28 = vrot.slane %v10661_v32, 2  ;;  %v11701_v40 = vld [vmem:[#allocation7_spill] sm:$0xff] }
 0x7b2   : > { %v4452_v8 = vsel %vm4066_vm4, %v11700_v44, %v4451_v3  ;;  %v3316_v38 = vrot.slane %v11702_v31, %v11701_v40  ;;  %v4541_v3 = vmul.f32 %v4532_v9, %v10519_v36 }
 0x7b3   : > { %v10692_v13 = vpop.permute.xlu1 %4595  ;;  %v10694_v61 = vpop.permute.xlu0 %4337  ;;  %v4578_v29 = vsel %vm4066_vm4, %v4576_v42, %v11699_v28  ;;  %v4582_v28 = vrot.slane %v4544_v4, 2  ;;  %v4543_v4 = vmul.f32 %v4534_v7, %v10547_v47 }
 0x7b4   : > { %11697 = vst [vmem:[#allocation68_spill] sm:$0xff] %v10692_v13  ;;  %11698 = vst [vmem:[#allocation69_spill] sm:$0xff] %v10694_v61  ;;  %v4548_v13 = vmul.f32 %v10544_v2, %v4534_v7  ;;  %v11703_v61 = vld [vmem:[#allocation5_spill] sm:$0xff]  ;;  %v3328_v44 = vmul.f32 %v10544_v2, %v3316_v38  ;;  %v3332_v9 = vmul.f32 %v3316_v38, %v11661_v62 }
 0x7b5   : > { %4599 = vrot.lane.b32.xlu1 %v4578_v29, %s6006_s19  ;;  %4471 = vrot.lane.b32.xlu0 %v4452_v8, %s6007_s22  ;;  %v3312_v42 = vrot.slane %v11702_v31, %v11703_v61  ;;  %v4553_v29 = vmul.f32 %v4534_v7, %v10542_v17  ;;  %v11705_v8 = vrot.slane %v10678_v19, 2  ;;  %v4456_v31 = vsel %vm4066_vm4, %v11706_v22, %v4455_v25  ;;  %v11709_v7 = vld [vmem:[#allocation42_spill] sm:$0xff] }
 0x7b6   : > { %v4580_v54 = vrot.slane %v4548_v13, 2  ;;  %v3356_v56 = vrot.slane %v3328_v44, 1  ;;  %v3324_v25 = vmul.f32 %v3316_v38, %v11709_v7  ;;  %v4552_v62 = vmul.f32 %v10651_v57, %v10570_v50  ;;  %v10740_v44 = vld [vmem:[#allocation2 + $0x88] sm:$0xff] }
 0x7b7   : > { %v3473_v14 = vpop.permute.xlu1 %3472  ;;  %v10714_v48 = vpop.permute.xlu0 %4479  ;;  %v4584_v60 = vsel %vm4066_vm4, %v4582_v28, %v11705_v8  ;;  %v3323_v21 = vmul.f32 %v3312_v42, %v11707_v26  ;;  %v10729_v28 = vmul.f32 %v10471_v39, %v3312_v42  ;;  %v4591_v22 = vrot.slane %v4553_v29, 2 }
 0x7b8   : > { %11704 = vst [vmem:[#allocation70_spill] sm:$0xff] %v10714_v48  ;;  %v4573_v48 = vrot.slane %v4541_v3, 2  ;;  %v4579_v12 = vrot.slane %v4543_v4, 2  ;;  %v3364_v3 = vrot.slane %v3332_v9, 1  ;;  %v3269_v26 = vmul.f32 %v10595_v20, %v10118_v18 }
 0x7b9   : > { %4603 = vrot.lane.b32.xlu1 %v4584_v60, %s6006_s19  ;;  %4475 = vrot.lane.b32.xlu0 %v4456_v31, %s6007_s22  ;;  %v4588_v60 = vsel %vm4066_vm4, %v4574_v45, %v4587_v0  ;;  %v3271_v31 = vmul.f32 %v10740_v44, %v10121_v11  ;;  %v4592_v57 = vsel %vm4066_vm4, %v4580_v54, %v4591_v22  ;;  %v3353_v29 = vrot.slane %v10729_v28, 1 }
 0x7ba   : > { %v4575_v13 = vsel %vm4066_vm4, %v4573_v48, %v4574_v45  ;;  %v4581_v38 = vsel %vm4066_vm4, %v4579_v12, %v4580_v54  ;;  %v3365_v48 = vsel %vm3345_vm3, %v3356_v56, %v3364_v3  ;;  %v3352_v45 = vrot.slane %v3323_v21, 1  ;;  %v11710_v54 = vld [vmem:[#allocation52_spill] sm:$0xff] }
 0x7bb   : > { %v3477_v49 = vpop.permute.xlu1 %3476  ;;  %v10731_v8 = vpop.permute.xlu0 %4605  ;;  %v3279_v18 = vadd.f32 %v3271_v31, %v10575_v34  ;;  %v3355_v0 = vrot.slane %v3324_v25, 1  ;;  %v4589_v7 = vrot.slane %v4552_v62, 2  ;;  %v3268_v11 = vmul.f32 %v10621_v30, %v10101_v1  ;;  %v11711_v25 = vld [vmem:[#allocation40_spill] sm:$0xff]  ;;  %v11712_v1 = vld [vmem:[#allocation54_spill] sm:$0xff] }
 0x7bc   : > { %11708 = vst [vmem:[#allocation71_spill] sm:$0xff] %v10731_v8  ;;  %v4554_v21 = vmul.f32 %v11695_v63, %v10467_v46  ;;  %v3330_v62 = vmul.f32 %v11712_v1, %v11711_v25  ;;  %v11713_v31 = vrot.slane %v10661_v32, 2  ;;  %v3331_v63 = vmul.f32 %v3312_v42, %v10088_v6  ;;  %v5994_v8 = vld [vmem:[#allocation2 + $0xc0] sm:$0x1] }
 0x7bd   : > { %4607 = vrot.lane.b32.xlu1 %v4588_v60, %s6006_s19  ;;  %4597 = vrot.lane.b32.xlu0 %v4575_v13, %s6006_s19  ;;  %v5984_v13 = vld [vmem:[#allocation2 + $0x90] sm:$0x1]  ;;  %v3357_v3 = vsel %vm3345_vm3, %v3355_v0, %v3356_v56  ;;  %v3381_v46 = vadd.f32 %v3365_v48, %v3279_v18 }
 0x7be   : > { %v3329_v12 = vmul.f32 %v5984_v13, %v11710_v54  ;;  %v4593_v18 = vrot.slane %v4554_v21, 2  ;;  %v11716_v54 = vrot.slane %v10678_v19, 2  ;;  %v3360_v25 = vrot.slane %v3330_v62, 1 }
 0x7bf   : > { %v3485_v4 = vpop.permute.xlu1 %3484  ;;  %v3475_v9 = vpop.permute.xlu0 %3474  ;;  %v3362_v1 = vrot.slane %v3331_v63, 1 }
 0x7c0   : > { %v3492_v60 = vsel %vm2871_vm1, %v3473_v14, %v3475_v9  ;;  %v3493_v22 = vsel %vm2871_vm1, %v3475_v9, %v3477_v49  ;;  %v3354_v14 = vsel %vm3345_vm3, %v3352_v45, %v3353_v29  ;;  %v4590_v9 = vsel %vm4066_vm4, %v11713_v31, %v4589_v7  ;;  %v11714_v7 = vld [vmem:[#allocation53_spill] sm:$0xff] }
 0x7c1   : > { %v3508_v28 = vadd.f32 %v3492_v60, %v10349_v10  ;;  %v3509_v34 = vadd.f32 %v3493_v22, %v10355_v5  ;;  %4611 = vrot.lane.b32.xlu1 %v4592_v57, %s6006_s19  ;;  %4601 = vrot.lane.b32.xlu0 %v4581_v38, %s6006_s19  ;;  %v3376_v5 = vadd.f32 %v3354_v14, %v10358_v52  ;;  %v3358_v0 = vrot.slane %v3329_v12, 1 }
 0x7c2   : > { %v3377_v57 = vadd.f32 %v3357_v3, %v10361_v51  ;;  %v3276_v60 = vadd.f32 %v3268_v11, %v10511_v37  ;;  %v3270_v6 = vmul.f32 %v10641_v53, %v11714_v7  ;;  %v11715_v51 = vrot.slane %v10274_v55, 1 }
 0x7c3   : > { %v3489_v10 = vpop.permute.xlu1 %3488  ;;  %v3479_v38 = vpop.permute.xlu0 %3478  ;;  %v4594_v12 = vsel %vm4066_vm4, %v11716_v54, %v4593_v18  ;;  %v11717_v55 = vrot.slane %v10287_v33, 1 }
 0x7c4   : > { %v3499_v45 = vsel %vm2871_vm1, %v3489_v10, %v10590_v41  ;;  %v3494_v56 = vsel %vm2871_vm1, %v3477_v49, %v3479_v38  ;;  %v3495_v32 = vsel %vm2871_vm1, %v3479_v38, %v10537_v15  ;;  %v3359_v37 = vsel %vm3345_vm3, %v11715_v51, %v3358_v0 }
 0x7c5   : > { %v3515_v42 = vadd.f32 %v3499_v45, %v3381_v46  ;;  %v3510_v48 = vadd.f32 %v3494_v56, %v3376_v5  ;;  %v3511_v52 = vadd.f32 %v3495_v32, %v3377_v57  ;;  %4609 = vrot.lane.b32.xlu0 %v4590_v9, %s6006_s19  ;;  %v3277_v41 = vadd.f32 %v3269_v26, %v10554_v58 }
 0x7c6   : > { %v3278_v49 = vadd.f32 %v3270_v6, %v10556_v16  ;;  %v3378_v15 = vadd.f32 %v3359_v37, %v3276_v60  ;;  %v3361_v58 = vsel %vm3345_vm3, %v11717_v55, %v3360_v25  ;;  %v3363_v16 = vsel %vm3345_vm3, %v3353_v29, %v3362_v1 }
 0x7c7   : > { %v3611_v11 = vpop.permute.xlu1 %3610  ;;  %v3483_v22 = vpop.permute.xlu0 %3482  ;;  %v3379_v21 = vadd.f32 %v3361_v58, %v3277_v41 }
 0x7c8   : > { %v3496_v13 = vsel %vm2871_vm1, %v3483_v22, %v3485_v4  ;;  %v3380_v3 = vadd.f32 %v3363_v16, %v3278_v49 }
 0x7c9   : > { %v3512_v14 = vadd.f32 %v3496_v13, %v3378_v15  ;;  %4613 = vrot.lane.b32.xlu0 %v4594_v12, %s6006_s19 }
 0x7cb   : > { %v3615_v26 = vpop.permute.xlu1 %3614  ;;  %v3487_v31 = vpop.permute.xlu0 %3486 }
 0x7cc   : > { %v3497_v9 = vsel %vm2871_vm1, %v3485_v4, %v3487_v31  ;;  %v3498_v19 = vsel %vm2871_vm1, %v3487_v31, %v3489_v10 }
 0x7cd   : > { %v3513_v46 = vadd.f32 %v3497_v9, %v3379_v21  ;;  %v3514_v62 = vadd.f32 %v3498_v19, %v3380_v3  ;;  %v10825_v21 = vld [vmem:[%s11258_s7 + $0x5] ss:$8 sm:$0xf] }
 0x7ce   : > { %v11718_v3 = vld [vmem:[#allocation4_spill] sm:$0xff] }
 0x7cf   : > { %v3619_v63 = vpop.permute.xlu1 %3618  ;;  %v3609_v5 = vpop.permute.xlu0 %3608  ;;  %v10835_v31 = vrot.slane %v10825_v21, %v11718_v3 }
 0x7d0   : > { %v3630_v57 = vsel %vm2747_vm14, %v10612_v43, %v3619_v63  ;;  %v3626_v33 = vsel %vm2747_vm14, %v10562_v35, %v3609_v5  ;;  %v3627_v29 = vsel %vm2747_vm14, %v3609_v5, %v3611_v11 }
 0x7d1   : > { %v3646_v38 = vadd.f32 %v3630_v57, %v3512_v14  ;;  %v3642_v60 = vadd.f32 %v3626_v33, %v3508_v28  ;;  %v3643_v45 = vadd.f32 %v3627_v29, %v3509_v34  ;;  %v10841_v19 = vmul.f32 %v10621_v30, %v10835_v31  ;;  %v5985_v33 = vld [vmem:[#allocation2 + $0x28] sm:$0xfe] }
 0x7d2   : > { %v3941_v29 = vmul.f32 %v5985_v33, %v10835_v31 }
 0x7d3   : > { %v3623_v56 = vpop.permute.xlu1 %3622  ;;  %v3613_v32 = vpop.permute.xlu0 %3612 }
 0x7d4   : > { %v3628_v4 = vsel %vm2747_vm14, %v3611_v11, %v3613_v32  ;;  %v3629_v10 = vsel %vm2747_vm14, %v3613_v32, %v3615_v26  ;;  %v11420_v32 = vrot.slane %v10841_v19, 1 }
 0x7d5   : > { %v3644_v0 = vadd.f32 %v3628_v4, %v3510_v48  ;;  %v3645_v7 = vadd.f32 %v3629_v10, %v3511_v52  ;;  %v5987_v4 = vld [vmem:[#allocation2] sm:$0xfc] }
 0x7d7   : > { %v3741_v6 = vpop.permute.xlu1 %3740  ;;  %v3621_v51 = vpop.permute.xlu0 %3620 }
 0x7d8   : > { %v3631_v43 = vsel %vm2747_vm14, %v3619_v63, %v3621_v51  ;;  %v3632_v37 = vsel %vm2747_vm14, %v3621_v51, %v3623_v56 }
 0x7d9   : > { %v3647_v35 = vadd.f32 %v3631_v43, %v3513_v46  ;;  %v3648_v18 = vadd.f32 %v3632_v37, %v3514_v62  ;;  %v10868_v43 = vrot.slane %v10825_v21, %v11703_v61 }
 0x7db   : > { %v3745_v41 = vpop.permute.xlu1 %3744  ;;  %v3625_v49 = vpop.permute.xlu0 %3624 }
 0x7dc   : > { %v3633_v28 = vsel %vm2747_vm14, %v3623_v56, %v3625_v49 }
 0x7dd   : > { %v3649_v34 = vadd.f32 %v3633_v28, %v3515_v42 }
 0x7df   : > { %v3753_v15 = vpop.permute.xlu1 %3752  ;;  %v3743_v22 = vpop.permute.xlu0 %3742 }
 0x7e0   : > { %v3760_v11 = vsel %vm2600_vm0, %v3741_v6, %v3743_v22  ;;  %v3761_v48 = vsel %vm2600_vm0, %v3743_v22, %v3745_v41  ;;  %v3965_v6 = vrot.slane %v3941_v29, 1 }
 0x7e1   : > { %v3776_v52 = vadd.f32 %v3760_v11, %v3642_v60  ;;  %v10809_v13 = vadd.f32 %v3761_v48, %v3643_v45  ;;  %v5988_v48 = vld [vmem:[#allocation2 + $0xc8] sm:$0x1] }
 0x7e3   : > { %v3757_v54 = vpop.permute.xlu1 %3756  ;;  %v3747_v12 = vpop.permute.xlu0 %3746 }
 0x7e4   : > { %v3767_v25 = vsel %vm2600_vm0, %v3757_v54, %v10633_v27  ;;  %v3762_v1 = vsel %vm2600_vm0, %v3745_v41, %v3747_v12  ;;  %v3763_v14 = vsel %vm2600_vm0, %v3747_v12, %v10588_v24  ;;  %v10830_v27 = vld [vmem:[%s11257_s6 + $0x6] ss:$8 sm:$0xf]  ;;  %v10876_v41 = vmul.f32 %v10641_v53, %v10868_v43 }
 0x7e5   : > { %v10816_v42 = vadd.f32 %v3767_v25, %v3649_v34  ;;  %v3778_v55 = vadd.f32 %v3762_v1, %v3644_v0  ;;  %v10818_v58 = vadd.f32 %v3763_v14, %v3645_v7  ;;  %v10845_v46 = vrot.slane %v10830_v27, %v11718_v3 }
 0x7e6   : > { %v10880_v28 = vrot.slane %v10830_v27, %v11703_v61 }
 0x7e7   : > { %v10820_v16 = vpop.permute.xlu1 %3878  ;;  %v3751_v26 = vpop.permute.xlu0 %3750  ;;  %v4042_v10 = vmul.f32 %v5987_v4, %v10845_v46 }
 0x7e8   : > { %v3764_v24 = vsel %vm2600_vm0, %v3751_v26, %v3753_v15  ;;  %v10897_v12 = vmul.f32 %v10471_v39, %v10880_v28  ;;  %v11419_v26 = vrot.slane %v10876_v41, 1 }
 0x7e9   : > { %v10837_v9 = vadd.f32 %v3764_v24, %v3646_v38  ;;  %v5986_v38 = vld [vmem:[#allocation2 + $0x48] sm:$0xff]  ;;  %v4067_v49 = vrot.slane %v4042_v10, 2  ;;  %v4037_v24 = vrot.slane %v10830_v27, %v11701_v40 }
 0x7ea   : > { %v10853_v60 = vmul.f32 %v5986_v38, %v10845_v46  ;;  %v11417_v4 = vrot.slane %v10897_v12, 2 }
 0x7eb   : > { %v10847_v62 = vpop.permute.xlu1 %3882  ;;  %v3755_v63 = vpop.permute.xlu0 %3754  ;;  %v10920_v38 = vmul.f32 %v10544_v2, %v4037_v24 }
 0x7ec   : > { %v3765_v5 = vsel %vm2600_vm0, %v3753_v15, %v3755_v63  ;;  %v3766_v57 = vsel %vm2600_vm0, %v3755_v63, %v3757_v54  ;;  %v11415_v37 = vrot.slane %v10853_v60, 2  ;;  %v10884_v15 = vrot.slane %v10825_v21, %v11701_v40 }
 0x7ed   : > { %v10855_v45 = vadd.f32 %v3765_v5, %v3647_v35  ;;  %v3782_v56 = vadd.f32 %v3766_v57, %v3648_v18  ;;  %v3967_v18 = vsel %vm3345_vm3, %v3965_v6, %v11420_v32  ;;  %v4052_v63 = vmul.f32 %v10880_v28, %v10570_v50 }
 0x7ee   : > { %v4069_v54 = vsel %vm4066_vm4, %v4067_v49, %v11415_v37  ;;  %v10905_v14 = vmul.f32 %v10740_v44, %v10884_v15 }
 0x7ef   : > { %v10859_v0 = vpop.permute.xlu1 %3886  ;;  %v10861_v7 = vpop.permute.xlu0 %3876 }
 0x7f0   : > { %v3894_v51 = vsel %vm2871_vm1, %v10610_v23, %v10861_v7  ;;  %v11418_v6 = vrot.slane %v10905_v14, 1 }
 0x7f1   : > { %v3910_v35 = vadd.f32 %v3894_v51, %v3776_v52  ;;  %v3951_v52 = vmul.f32 %v5988_v48, %v10868_v43  ;;  %v4053_v51 = vmul.f32 %v4037_v24, %v10542_v17  ;;  %v11416_v48 = vrot.slane %v10920_v38, 2 }
 0x7f3   : > { %v3993_v23 = vadd.f32 %v3967_v18, %v3910_v35  ;;  %v3891_v34 = vpop.permute.xlu1 %3890  ;;  %v10886_v22 = vpop.permute.xlu0 %3880  ;;  %v3981_v33 = vrot.slane %v3951_v52, 1  ;;  %v4083_v35 = vrot.slane %v4052_v63, 2  ;;  %v4085_v63 = vrot.slane %v4053_v51, 2 }
 0x7f4   : > { %v3896_v11 = vsel %vm2871_vm1, %v10820_v16, %v10886_v22 }
 0x7f5   : > { %v10899_v25 = vadd.f32 %v3896_v11, %v3778_v55  ;;  %v10901_v1 = vadd.f32 %v4069_v54, %v3993_v23  ;;  %v5989_v55 = vld [vmem:[#allocation2 + $0xd0] sm:$0x1]  ;;  %v3982_v50 = vsel %vm3345_vm3, %v11419_v26, %v3981_v33  ;;  %v5993_v26 = vld [vmem:[#allocation2 + $0x40] sm:$0xfe] }
 0x7f6   : > { %v3952_v57 = vmul.f32 %v5989_v55, %v10884_v15  ;;  %v3944_v32 = vmul.f32 %v5993_v26, %v10884_v15 }
 0x7f7   : > { %v10912_v5 = vpop.permute.xlu1 %4193  ;;  %v10914_v39 = vpop.permute.xlu0 %3888 }
 0x7f8   : > { %v3900_v29 = vsel %vm2871_vm1, %v10914_v39, %v3891_v34  ;;  %v3983_v11 = vrot.slane %v3952_v57, 1 }
 0x7f9   : > { %v3916_v10 = vadd.f32 %v3900_v29, %v3782_v56  ;;  %v4084_v56 = vsel %vm4066_vm4, %v11417_v4, %v4083_v35  ;;  %v5992_v4 = vld [vmem:[#allocation2 + $0x38] sm:$0xfe] }
 0x7fa   : > { %v3984_v17 = vsel %vm3345_vm3, %v11418_v6, %v3983_v11 }
 0x7fb   : > { %v3999_v18 = vadd.f32 %v3982_v50, %v3916_v10  ;;  %v10928_v49 = vpop.permute.xlu1 %4197  ;;  %v3893_v23 = vpop.permute.xlu0 %3892 }
 0x7fc   : > { %v3901_v2 = vsel %vm2871_vm1, %v3891_v34, %v3893_v23  ;;  %v4086_v34 = vsel %vm4066_vm4, %v11416_v48, %v4085_v63  ;;  %v11722_v23 = vld [vmem:[#allocation6_spill] sm:$0xff]  ;;  %v5990_v63 = vld [vmem:[#allocation2 + $0xb8] sm:$0x1] }
 0x7fd   : > { %v3917_v52 = vadd.f32 %v3901_v2, %v10816_v42  ;;  %v10936_v54 = vadd.f32 %v4084_v56, %v3999_v18  ;;  %v3928_v11 = vrot.slane %v10825_v21, %v11722_v23  ;;  %v4029_v56 = vrot.slane %v10830_v27, %v11722_v23  ;;  %v4855_v48 = vld [vmem:[%s11258_s7 + $0x20] ss:$8 sm:$0xf] }
 0x7fe   : > { %v3943_v21 = vmul.f32 %v5992_v4, %v10868_v43  ;;  %v11726_v4 = vld [vmem:[#allocation60_spill] sm:$0xff]  ;;  %v4645_v26 = vrot.slane %v4855_v48, %v11718_v3 }
 0x7ff   : > { %11719 = vst [vmem:[#allocation72_spill] sm:$0xff] %v10936_v54  ;;  %v4000_v55 = vadd.f32 %v3984_v17, %v3917_v52  ;;  %v10941_v33 = vpop.permute.xlu1 %4205  ;;  %v10943_v57 = vpop.permute.xlu0 %4195  ;;  %v3946_v2 = vmul.f32 %v10595_v20, %v3928_v11  ;;  %v10977_v6 = vmul.f32 %v10527_v59, %v4029_v56  ;;  %v3950_v54 = vmul.f32 %v5994_v8, %v3928_v11  ;;  %v5995_v8 = vld [vmem:[#allocation2 + $0x90] sm:$0x3] }
 0x800   : > { %v4044_v59 = vmul.f32 %v10880_v28, %v11726_v4  ;;  %v11728_v28 = vrot.slane %v10876_v41, 1 }
 0x801   : > { %v10948_v29 = vadd.f32 %v4086_v34, %v4000_v55  ;;  %v3949_v55 = vmul.f32 %v5990_v63, %v10835_v31  ;;  %v5991_v34 = vld [vmem:[#allocation2 + $0x30] sm:$0xfe]  ;;  %v3969_v27 = vrot.slane %v3946_v2, 1  ;;  %v4043_v31 = vmul.f32 %v4029_v56, %v10519_v36 }
 0x802   : > { %v3942_v37 = vmul.f32 %v5991_v34, %v3928_v11  ;;  %v4045_v2 = vmul.f32 %v4037_v24, %v10547_v47  ;;  %v4071_v15 = vrot.slane %v10977_v6, 2  ;;  %v4050_v36 = vmul.f32 %v5995_v8, %v10845_v46 }
 0x803   : > { %v10950_v10 = vpop.permute.xlu1 %4209  ;;  %v10952_v42 = vpop.permute.xlu0 %4199  ;;  %v11727_v11 = vrot.slane %v10841_v19, 1  ;;  %v4070_v24 = vrot.slane %v4043_v31, 2  ;;  %v4649_v8 = vrot.slane %v4855_v48, %v11722_v23  ;;  %v11730_v19 = vrot.slane %v10905_v14, 1  ;;  %v11731_v31 = vld [vmem:[#allocation57_spill] sm:$0xff] }
 0x804   : > { %v3968_v43 = vrot.slane %v3942_v37, 1  ;;  %v3974_v37 = vrot.slane %v3944_v32, 1  ;;  %v11733_v14 = vrot.slane %v10920_v38, 2  ;;  %v11736_v38 = vld [vmem:[#allocation55_spill] sm:$0xff] }
 0x805   : > { %v11012_v41 = vsel %vm4066_vm4, %v4070_v24, %v4071_v15  ;;  %v11735_v24 = vld [vmem:[#allocation56_spill] sm:$0xff] }
 0x807   : > { %v10954_v50 = vpop.permute.xlu1 %4331  ;;  %v10956_v35 = vpop.permute.xlu0 %4203 }
 0x808   : > { %11720 = vst [vmem:[#allocation73_spill] sm:$0xff] %v10954_v50  ;;  %v3977_v50 = vrot.slane %v3949_v55, 1  ;;  %v3970_v55 = vsel %vm3345_vm3, %v3968_v43, %v3969_v27  ;;  %v4076_v43 = vrot.slane %v4045_v2, 2 }
 0x80b   : > { %v10958_v51 = vpop.permute.xlu1 %4335  ;;  %v10960_v18 = vpop.permute.xlu0 %4207 }
 0x80c   : > { %11721 = vst [vmem:[#allocation74_spill] sm:$0xff] %v10958_v51  ;;  %v10986_v51 = vrot.slane %v4855_v48, %v11701_v40 }
 0x80f   : > { %v10967_v52 = vpop.permute.xlu1 %4339  ;;  %v10969_v17 = vpop.permute.xlu0 %4329 }
 0x810   : > { %11723 = vst [vmem:[#allocation75_spill] sm:$0xff] %v10969_v17  ;;  %v3971_v17 = vrot.slane %v3943_v21, 1  ;;  %v11729_v21 = vld [vmem:[#allocation62_spill] sm:$0xff] }
 0x811   : > { %v4051_v6 = vmul.f32 %v4029_v56, %v11729_v21  ;;  %v4666_v56 = vmul.f32 %v10621_v30, %v4645_v26 }
 0x812   : > { %v3973_v47 = vsel %vm3345_vm3, %v3971_v17, %v11728_v28  ;;  %v4079_v17 = vrot.slane %v4050_v36, 2  ;;  %v11732_v28 = vrot.slane %v10897_v12, 2 }
 0x813   : > { %v10981_v63 = vpop.permute.xlu1 %4343  ;;  %v10983_v34 = vpop.permute.xlu0 %4333  ;;  %v4081_v2 = vrot.slane %v4051_v6, 2  ;;  %v11048_v6 = vmul.f32 %v10740_v44, %v10986_v51 }
 0x814   : > { %11724 = vst [vmem:[#allocation76_spill] sm:$0xff] %v10981_v63  ;;  %11725 = vst [vmem:[#allocation77_spill] sm:$0xff] %v10983_v34  ;;  %v3978_v63 = vsel %vm3345_vm3, %v11727_v11, %v3977_v50  ;;  %v3979_v34 = vrot.slane %v3950_v54, 1  ;;  %v3976_v50 = vsel %vm3345_vm3, %v3974_v37, %v11730_v19  ;;  %v4073_v54 = vrot.slane %v4044_v59, 2 }
 0x815   : > { %v4670_v11 = vmul.f32 %v4645_v26, %v11731_v31  ;;  %v11022_v37 = vsel %vm4066_vm4, %v4076_v43, %v11733_v14  ;;  %v11734_v59 = vrot.slane %v10853_v60, 2  ;;  %v4662_v19 = vmul.f32 %v4645_v26, %v11735_v24  ;;  %v11737_v43 = vld [vmem:[#allocation65_spill] sm:$0xff] }
 0x816   : > { %v3980_v32 = vsel %vm3345_vm3, %v3969_v27, %v3979_v34  ;;  %v4075_v21 = vsel %vm4066_vm4, %v4073_v54, %v11732_v28  ;;  %v11025_v27 = vmul.f32 %v10595_v20, %v4649_v8  ;;  %v4653_v34 = vrot.slane %v4855_v48, %v11703_v61  ;;  %v5996_v28 = vld [vmem:[#allocation2 + $0x40] sm:$0xfc]  ;;  %v11739_v24 = vld [vmem:[#allocation61_spill] sm:$0xff] }
 0x817   : > { %v11002_v4 = vpop.permute.xlu1 %4461  ;;  %v11004_v46 = vpop.permute.xlu0 %4341  ;;  %v4080_v30 = vsel %vm4066_vm4, %v11734_v59, %v4079_v17  ;;  %v4663_v54 = vmul.f32 %v4649_v8, %v11736_v38  ;;  %v3898_v20 = vsel %vm2871_vm1, %v11737_v43, %v10859_v0  ;;  %v3895_v48 = vsel %vm2871_vm1, %v10861_v7, %v10820_v16  ;;  %v11738_v7 = vld [vmem:[#allocation58_spill] sm:$0xff] }
 0x818   : > { %v11044_v60 = vmul.f32 %v10641_v53, %v4653_v34  ;;  %v3897_v26 = vsel %vm2871_vm1, %v10886_v22, %v10847_v62  ;;  %v3899_v17 = vsel %vm2871_vm1, %v10859_v0, %v10914_v39  ;;  %v4687_v31 = vrot.slane %v4666_v56, 2 }
 0x819   : > { %v4665_v14 = vmul.f32 %v5996_v28, %v10986_v51  ;;  %v4698_v16 = vrot.slane %v4670_v11, 2  ;;  %v4690_v53 = vrot.slane %v11025_v27, 2  ;;  %v4664_v59 = vmul.f32 %v4653_v34, %v11738_v7 }
 0x81a   : > { %v11060_v44 = vmul.f32 %v4649_v8, %v11739_v24  ;;  %v3914_v38 = vadd.f32 %v3898_v20, %v10837_v9  ;;  %v3911_v62 = vadd.f32 %v3895_v48, %v10809_v13  ;;  %v4686_v0 = vrot.slane %v4662_v19, 2  ;;  %v11740_v13 = vld [vmem:[#allocation59_spill] sm:$0xff]  ;;  %v4722_v19 = vld [vmem:[%s11259_s8] sm:$0xf] }
 0x81b   : > { %v11031_v36 = vpop.permute.xlu1 %4465  ;;  %v11033_v12 = vpop.permute.xlu0 %4345  ;;  %v4689_v39 = vrot.slane %v4663_v54, 2  ;;  %v3913_v56 = vadd.f32 %v3897_v26, %v10818_v58  ;;  %v3915_v11 = vadd.f32 %v3899_v17, %v10855_v45  ;;  %v4693_v28 = vrot.slane %v11044_v60, 2 }
 0x81c   : > { %v4696_v7 = vrot.slane %v11048_v6, 2  ;;  %v4082_v8 = vsel %vm4066_vm4, %v4071_v15, %v4081_v2  ;;  %v11072_v24 = vsel %vm4066_vm4, %v4687_v31, %v4698_v16  ;;  %v4695_v9 = vrot.slane %v4665_v14, 2  ;;  %v5997_v14 = vld [vmem:[#allocation2 + $0xd0] sm:$0x3] }
 0x81d   : > { %v11075_v20 = vmul.f32 %v4653_v34, %v11740_v13  ;;  %v11081_v58 = vsel %vm4066_vm4, %v4686_v0, %v4687_v31  ;;  %v11086_v45 = vsel %vm4066_vm4, %v4689_v39, %v4690_v53  ;;  %v4692_v15 = vrot.slane %v4664_v59, 2  ;;  %v11741_v59 = vld [vmem:[#allocation67_spill] sm:$0xff] }
 0x81e   : > { %v4700_v2 = vrot.slane %v11060_v44, 2  ;;  %v3997_v54 = vadd.f32 %v3978_v63, %v3914_v38  ;;  %v3994_v48 = vadd.f32 %v3970_v55, %v3911_v62  ;;  %v3995_v34 = vadd.f32 %v3973_v47, %v10899_v25 }
 0x81f   : > { %v11064_v22 = vpop.permute.xlu1 %4473  ;;  %v4464_v43 = vpop.permute.xlu0 %4463  ;;  %v11093_v16 = vmul.f32 %v5997_v14, %v10986_v51  ;;  %v3996_v31 = vadd.f32 %v3976_v50, %v3913_v56  ;;  %v3998_v0 = vadd.f32 %v3980_v32, %v3915_v11  ;;  %v11098_v39 = vsel %vm4066_vm4, %v4692_v15, %v4693_v28 }
 0x820   : > { %v11103_v63 = vsel %vm4066_vm4, %v4695_v9, %v4696_v7  ;;  %v11106_v25 = vrot.slane %v4722_v19, %v11718_v3  ;;  %v11109_v55 = vrot.slane %v4722_v19, %v11722_v23  ;;  %v11112_v51 = vrot.slane %v4722_v19, %v11703_v61 }
 0x821   : > { %v4702_v47 = vrot.slane %v11075_v20, 2  ;;  %v4213_v50 = vsel %vm2871_vm1, %v10912_v5, %v10943_v57  ;;  %v4214_v32 = vsel %vm2871_vm1, %v10943_v57, %v10928_v49  ;;  %v4220_v3 = vsel %vm2871_vm1, %v10950_v10, %v11741_v59  ;;  %v11742_v57 = vld [vmem:[#allocation63_spill] sm:$0xff] }
 0x822   : > { %v11125_v23 = vrot.slane %v4722_v19, %v11701_v40  ;;  %v4096_v61 = vadd.f32 %v11012_v41, %v3994_v48  ;;  %v4097_v38 = vadd.f32 %v4075_v21, %v3995_v34  ;;  %v4215_v62 = vsel %vm2871_vm1, %v10928_v49, %v10952_v42  ;;  %v11745_v48 = vld [vmem:[#allocation64_spill] sm:$0xff] }
 0x823   : > { %v11090_v26 = vpop.permute.xlu1 %4477  ;;  %v4468_v17 = vpop.permute.xlu0 %4467  ;;  %v4099_v56 = vadd.f32 %v4080_v30, %v3997_v54  ;;  %v4098_v9 = vadd.f32 %v11022_v37, %v3996_v31  ;;  %v4216_v13 = vsel %vm2871_vm1, %v10952_v42, %v11742_v57  ;;  %v4217_v40 = vsel %vm2871_vm1, %v10956_v35, %v10941_v33  ;;  %v11743_v37 = vld [vmem:[#allocation69_spill] sm:$0xff]  ;;  %v11744_v42 = vld [vmem:[#allocation75_spill] sm:$0xff] }
 0x824   : > { %v4100_v19 = vadd.f32 %v4082_v8, %v3998_v0  ;;  %v4229_v41 = vadd.f32 %v4213_v50, %v10901_v1  ;;  %v4230_v21 = vadd.f32 %v4214_v32, %v4096_v61  ;;  %v4236_v15 = vadd.f32 %v4220_v3, %v10948_v29  ;;  %v11746_v35 = vld [vmem:[#allocation73_spill] sm:$0xff] }
 0x825   : > { %v4218_v49 = vsel %vm2871_vm1, %v10941_v33, %v10960_v18  ;;  %v4231_v30 = vadd.f32 %v4215_v62, %v4097_v38  ;;  %v4351_v54 = vsel %vm2747_vm14, %v11743_v37, %v10967_v52  ;;  %v4347_v34 = vsel %vm2747_vm14, %v11745_v48, %v11744_v42  ;;  %v11747_v33 = vld [vmem:[#allocation77_spill] sm:$0xff]  ;;  %v11752_v48 = vld [vmem:[#allocation68_spill] sm:$0xff] }
 0x826   : > { %v4348_v1 = vsel %vm2747_vm14, %v11744_v42, %v11746_v35  ;;  %v4232_v8 = vadd.f32 %v4216_v13, %v4098_v9  ;;  %v4233_v14 = vadd.f32 %v4217_v40, %v4099_v56  ;;  %v4219_v29 = vsel %vm2871_vm1, %v10960_v18, %v10950_v10  ;;  %v11748_v10 = vld [vmem:[#allocation74_spill] sm:$0xff]  ;;  %v11749_v9 = vld [vmem:[#allocation72_spill] sm:$0xff]  ;;  %v11751_v42 = vld [vmem:[#allocation71_spill] sm:$0xff] }
 0x827   : > { %v4600_v5 = vpop.permute.xlu1 %4599  ;;  %v4472_v11 = vpop.permute.xlu0 %4471  ;;  %v4349_v31 = vsel %vm2747_vm14, %v11746_v35, %v11747_v33  ;;  %v4234_v32 = vadd.f32 %v4218_v49, %v4100_v19  ;;  %v4481_v59 = vsel %vm2600_vm0, %v11002_v4, %v4464_v43  ;;  %v4482_v3 = vsel %vm2600_vm0, %v4464_v43, %v11031_v36  ;;  %v11750_v40 = vld [vmem:[#allocation76_spill] sm:$0xff]  ;;  %v11753_v35 = vld [vmem:[#allocation66_spill] sm:$0xff] }
 0x828   : > { %v4485_v61 = vsel %vm2600_vm0, %v4472_v11, %v11064_v22  ;;  %v4367_v38 = vadd.f32 %v4351_v54, %v4233_v14  ;;  %v4363_v62 = vadd.f32 %v4347_v34, %v4229_v41  ;;  %v4364_v56 = vadd.f32 %v4348_v1, %v4230_v21 }
 0x829   : > { %v4350_v18 = vsel %vm2747_vm14, %v11747_v33, %v11748_v10  ;;  %v4235_v57 = vadd.f32 %v4219_v29, %v11749_v9  ;;  %v4365_v13 = vadd.f32 %v4349_v31, %v4231_v30  ;;  %v4352_v4 = vsel %vm2747_vm14, %v10967_v52, %v11004_v46  ;;  %v11754_v9 = vld [vmem:[#allocation70_spill] sm:$0xff] }
 0x82a   : > { %v4353_v43 = vsel %vm2747_vm14, %v11004_v46, %v11750_v40  ;;  %v4497_v19 = vadd.f32 %v4481_v59, %v4363_v62  ;;  %v4498_v11 = vadd.f32 %v4482_v3, %v4364_v56  ;;  %v4483_v41 = vsel %vm2600_vm0, %v11031_v36, %v4468_v17 }
 0x82b   : > { %v4604_v0 = vpop.permute.xlu1 %4603  ;;  %v4476_v50 = vpop.permute.xlu0 %4475  ;;  %v4501_v21 = vadd.f32 %v4485_v61, %v4367_v38  ;;  %v4366_v54 = vadd.f32 %v4350_v18, %v4232_v8  ;;  %v4484_v46 = vsel %vm2600_vm0, %v4468_v17, %v11753_v35  ;;  %v4368_v33 = vadd.f32 %v4352_v4, %v4234_v32 }
 0x82c   : > { %v4369_v36 = vadd.f32 %v4353_v43, %v4235_v57  ;;  %v4354_v8 = vsel %vm2747_vm14, %v11750_v40, %v11033_v12  ;;  %v4499_v31 = vadd.f32 %v4483_v41, %v4365_v13  ;;  %v4486_v59 = vsel %vm2600_vm0, %v11064_v22, %v4476_v50  ;;  %v11757_v43 = vld [vmem:[#allocation9_spill] sm:$0xff] }
 0x82d   : > { %v4500_v62 = vadd.f32 %v4484_v46, %v4366_v54  ;;  %v4487_v32 = vsel %vm2600_vm0, %v4476_v50, %v11090_v26  ;;  %v4502_v57 = vadd.f32 %v4486_v59, %v4368_v33  ;;  %v11755_v50 = vld [vmem:[#allocation13_spill] sm:$0xff]  ;;  %v4703_v44 = vsel %vm4066_vm4, %v4693_v28, %v4702_v47  ;;  %v11760_v47 = vld [vmem:[#allocation12_spill] sm:$0xff]  ;;  %v11761_v59 = vld [vmem:[#allocation11_spill] sm:$0xff] }
 0x82e   : > { %v4704_v27 = vrot.slane %v11093_v16, 2 }
 0x82f   : > { %v4608_v49 = vpop.permute.xlu1 %4607  ;;  %v4598_v37 = vpop.permute.xlu0 %4597 }
 0x830   : > { %v4619_v30 = vsel %vm2871_vm1, %v11751_v42, %v4608_v49  ;;  %v4615_v34 = vsel %vm2871_vm1, %v11752_v48, %v4598_v37  ;;  %v4616_v52 = vsel %vm2871_vm1, %v4598_v37, %v4600_v5  ;;  %v4701_v48 = vsel %vm4066_vm4, %v4690_v53, %v4700_v2  ;;  %v11759_v53 = vld [vmem:[#allocation14_spill] sm:$0xff] }
 0x831   : > { %v4635_v1 = vadd.f32 %v4619_v30, %v4501_v21  ;;  %v4631_v14 = vadd.f32 %v4615_v34, %v4497_v19  ;;  %v4632_v29 = vadd.f32 %v4616_v52, %v4498_v11  ;;  %v4705_v28 = vsel %vm4066_vm4, %v4696_v7, %v4704_v27 }
 0x833   : > { %v4718_v3 = vadd.f32 %v11072_v24, %v4635_v1  ;;  %v4714_v61 = vadd.f32 %v11081_v58, %v4631_v14  ;;  %v4715_v38 = vadd.f32 %v11086_v45, %v4632_v29  ;;  %v4602_v17 = vpop.permute.xlu0 %4601  ;;  %v4370_v58 = vadd.f32 %v4354_v8, %v4236_v15  ;;  %v4612_v19 = vpop.permute.xlu1 %4611 }
 0x834   : > { %v4617_v56 = vsel %vm2871_vm1, %v4600_v5, %v4602_v17  ;;  %v4618_v12 = vsel %vm2871_vm1, %v4602_v17, %v4604_v0  ;;  %v4488_v45 = vsel %vm2600_vm0, %v11090_v26, %v11754_v9  ;;  %v11756_v5 = vld [vmem:[#allocation10_spill] sm:$0xff]  ;;  %v4503_v26 = vadd.f32 %v4487_v32, %v4369_v36 }
 0x835   : > { %v4748_v10 = vadd.f32 %v11106_v25, %v4718_v3  ;;  %v4744_v22 = vadd.f32 %v11106_v25, %v4714_v61  ;;  %v4745_v24 = vadd.f32 %v11109_v55, %v4715_v38  ;;  %v4633_v18 = vadd.f32 %v4617_v56, %v4499_v31 }
 0x836   : > { %v4634_v13 = vadd.f32 %v4618_v12, %v4500_v62  ;;  %v11762_v62 = vld [vmem:[#allocation15_spill] sm:$0xff] }
 0x837   : > { %v4756_v4 = vadd.f32 %v4748_v10, %v11755_v50  ;;  %v4752_v40 = vadd.f32 %v4744_v22, %v11756_v5  ;;  %v4753_v0 = vadd.f32 %v4745_v24, %v11757_v43  ;;  %v4716_v11 = vadd.f32 %v11098_v39, %v4633_v18  ;;  %v4610_v25 = vpop.permute.xlu0 %4609 }
 0x838   : > { %v4717_v15 = vadd.f32 %v11103_v63, %v4634_v13  ;;  %v4620_v41 = vsel %vm2871_vm1, %v4608_v49, %v4610_v25  ;;  %v4621_v21 = vsel %vm2871_vm1, %v4610_v25, %v4612_v19  ;;  %v4504_v63 = vadd.f32 %v4488_v45, %v4370_v58  ;;  %v11758_v49 = vld [vmem:[#allocation8_spill] sm:$0xff] }
 0x839   : > { %v4764_v37 = vmul.f32 2.0, %v4756_v4  ;;  %v4760_v54 = vmul.f32 2.0, %v4752_v40  ;;  %v4761_v39 = vmul.f32 2.0, %v4753_v0  ;;  %v4746_v42 = vadd.f32 %v11112_v51, %v4716_v11 }
 0x83a   : > { %v4747_v30 = vadd.f32 %v11125_v23, %v4717_v15  ;;  %v4636_v34 = vadd.f32 %v4620_v41, %v4502_v57  ;;  %v4637_v52 = vadd.f32 %v4621_v21, %v4503_v26 }
 0x83b   : > { %4772 = vst [vmem:[%s11210_s17 + $0x20] sm:$0xff] %v4764_v37  ;;  %4768 = vst [vmem:[%s11210_s17] sm:$0xff] %v4760_v54  ;;  %v4754_v35 = vadd.f32 %v4746_v42, %v11758_v49  ;;  %v4614_v46 = vpop.permute.xlu0 %4613 }
 0x83c   : > { %4769 = vst [vmem:[%s11210_s17 + $0x8] sm:$0xff] %v4761_v39  ;;  %v4755_v2 = vadd.f32 %v4747_v30, %v11759_v53  ;;  %v4719_v1 = vadd.f32 %v4701_v48, %v4636_v34  ;;  %v4720_v14 = vadd.f32 %v4703_v44, %v4637_v52  ;;  %v4622_v29 = vsel %vm2871_vm1, %v4612_v19, %v4614_v46 }
 0x83d   : > { %v4762_v33 = vmul.f32 2.0, %v4754_v35  ;;  %v4638_v36 = vadd.f32 %v4622_v29, %v4504_v63 }
 0x83e   : > { %v4763_v8 = vmul.f32 2.0, %v4755_v2  ;;  %v4749_v60 = vadd.f32 %v11109_v55, %v4719_v1  ;;  %v4750_v20 = vadd.f32 %v11112_v51, %v4720_v14 }
 0x83f   : > { %4770 = vst [vmem:[%s11210_s17 + $0x10] sm:$0xff] %v4762_v33  ;;  %v4721_v16 = vadd.f32 %v4705_v28, %v4638_v36 }
 0x840   : > { %4771 = vst [vmem:[%s11210_s17 + $0x18] sm:$0xff] %v4763_v8  ;;  %v4757_v31 = vadd.f32 %v4749_v60, %v11760_v47  ;;  %v4758_v3 = vadd.f32 %v4750_v20, %v11761_v59 }
 0x841   : > { %v4751_v61 = vadd.f32 %v11125_v23, %v4721_v16 }
 0x842   : > { %v4765_v38 = vmul.f32 2.0, %v4757_v31  ;;  %v4766_v17 = vmul.f32 2.0, %v4758_v3 }
 0x843   : > { %v4759_v32 = vadd.f32 %v4751_v61, %v11762_v62 }
 0x844   : > { %4773 = vst [vmem:[%s11210_s17 + $0x28] sm:$0xff] %v4765_v38  ;;  %4774 = vst [vmem:[%s11210_s17 + $0x30] sm:$0xff] %v4766_v17 }
 0x845   : > { %v4767_v55 = vmul.f32 2.0, %v4759_v32 }
 0x847   : > { %4775 = vst [vmem:[%s11210_s17 + $0x38] sm:$0xff] %v4767_v55 }
 0x848 PF: > { %s19_s30 = sadd.s32 1, %s6004_s30  }
 0x849   : > { %p16_p4 = scmp.ge.s32.totalorder %s19_s30, 4  }
 0x84b   :  { %18 = sbr.rel (!%p16_p4) target bundleno = 1 (0x1), region = 105 }

</bundles_post_ra>
